<compile_context>
chip_gen: v6e
topology: v6e:2x2x1
jax: 0.10.0
libtpu: 0.0.40
codegen_flags: <defaults>
</compile_context>

<pallas_src>
import functools
import math

import jax
import jax.numpy as jnp
from jax.experimental import pallas as pl
from jax.experimental.pallas import tpu as pltpu

_LANE = 128  # TPU lane width; pad node and output-channel dims to multiples of this.


def _mm(a, b):
    # Explicit full-f32 MXU precision (multi-pass bf16 emulation under the hood).
    return jnp.dot(a, b, preferred_element_type=jnp.float32,
                   precision=jax.lax.Precision.HIGHEST)


def _heat_kernel(a_ref, xw_ref, b_ref, out_ref, *, t, scale_squarings):
    A = a_ref[...]                                           # (Np, Np) f32 dense adjacency
    Np = A.shape[0]

    # ---- normalization: A_norm = D^{-1/2} A D^{-1/2} (row-degree, as reference) ----
    deg = jnp.sum(A, axis=1, keepdims=True)                  # (Np, 1)
    dinv = jnp.where(deg > 0.0, jax.lax.rsqrt(deg), 0.0)     # deg^{-0.5}, inf -> 0
    A_norm = dinv * A * dinv.reshape(1, Np)

    # ---- Laplacian L = I - A_norm, scaled Ms = (-t / 2^s) * L ----
    eye = (jax.lax.broadcasted_iota(jnp.int32, (Np, Np), 0) ==
           jax.lax.broadcasted_iota(jnp.int32, (Np, Np), 1)).astype(jnp.float32)
    Ms = (eye - A_norm) * (-t / (2.0 ** scale_squarings))

    # ---- degree-12 Taylor of exp(Ms) via Paterson-Stockmeyer: 5 matmuls ----
    c = [1.0 / math.factorial(k) for k in range(13)]
    M2 = _mm(Ms, Ms)
    M3 = _mm(M2, Ms)
    M4 = _mm(M2, M2)
    # p(Ms) = B0 + M4 @ (B1 + M4 @ B2); B2 used (and dropped) first.
    B2 = c[8] * eye + c[9] * Ms + c[10] * M2 + c[11] * M3 + c[12] * M4
    P1 = (c[4] * eye + c[5] * Ms + c[6] * M2 + c[7] * M3) + _mm(M4, B2)
    H = (eye + Ms + c[2] * M2 + c[3] * M3) + _mm(M4, P1)

    # ---- undo scaling by repeated squaring (static, tiny count) ----
    for _ in range(scale_squarings):
        H = _mm(H, H)

    # ---- diffusion on pre-projected, lane-padded features: out = H @ (x W^T) + b ----
    out_ref[...] = (_mm(H, xw_ref[...]) + b_ref[...]).astype(out_ref.dtype)


def _vmem_limit_bytes():
    """Generation-aware scoped-VMEM limit: physical per-core capacity minus headroom."""
    cap = None
    try:
        cap = int(getattr(pltpu.get_tpu_info(), "vmem_capacity_bytes", 0)) or None
    except Exception:
        cap = None
    if cap is None:
        cap = 64 << 20            # conservative fallback (v7x per-TC VMEM)
    return int(max(32 << 20, cap - (12 << 20)))   # ~12 MiB Mosaic scratch headroom


def _round_up(n, m):
    return ((n + m - 1) // m) * m


def heat_kernel_layer(x, edge_index, weight, bias, edge_weight=None, t=1.0):
    """x: (N, C_in) f32, edge_index: (2, E) int32, weight: (C_out, C_in), bias: (C_out,)."""
    N = x.shape[0]
    c_out = weight.shape[0]
    if edge_weight is None:
        edge_weight = jnp.ones((edge_index.shape[1],), dtype=jnp.float32)

    # Pad nodes to a lane multiple. Padded nodes are isolated (deg=0), so the
    # padded Laplacian is block-diagonal with an identity block and exp(-tL)
    # keeps the real-node block exact; padded xw rows are zero -> exact slice.
    Np = _round_up(max(N, _LANE), _LANE)
    c_pad = _round_up(max(c_out, _LANE), _LANE)

    # Densify sparse adjacency (duplicate edges sum, matching sparse .to_dense()).
    A = jnp.zeros((Np, Np), dtype=jnp.float32).at[edge_index[0], edge_index[1]].add(
        edge_weight.astype(jnp.float32))

    # Fold the linear layer's matmul into the wrapper (associativity):
    # (H @ x) @ W^T + b == H @ (x @ W^T) + b.  Lane-pad projected features and
    # bias to 128 so the kernel's final matmul and stores are lane-dense.
    xw = x.astype(jnp.float32) @ weight.T.astype(jnp.float32)            # (N, c_out)
    xw_pad = jnp.zeros((Np, c_pad), jnp.float32).at[:N, :c_out].set(xw)
    b_pad = jnp.zeros((1, c_pad), jnp.float32).at[0, :c_out].set(bias.astype(jnp.float32))

    t = float(t)
    # Choose s so ||(-t/2^s) L|| <= 1 for a normalized Laplacian (||L|| <= 2);
    # degree-12 Taylor truncation is then < 2e-10 (and still < ~1e-6 with a 2x
    # norm margin for skewed non-symmetric graphs), far below the 1e-3 tolerance.
    scale_squarings = max(0, int(math.ceil(math.log2(max(2.0 * t, 1.0)))))

    kernel = functools.partial(_heat_kernel, t=t, scale_squarings=scale_squarings)

    out_pad = pl.pallas_call(
        kernel,
        out_shape=jax.ShapeDtypeStruct((Np, c_pad), jnp.float32),
        in_specs=[pl.BlockSpec(memory_space=pltpu.MemorySpace.VMEM)] * 3,
        out_specs=pl.BlockSpec(memory_space=pltpu.MemorySpace.VMEM),
        compiler_params=pltpu.CompilerParams(vmem_limit_bytes=_vmem_limit_bytes()),
    )(A, xw_pad, b_pad)

    return out_pad[:N, :c_out].astype(x.dtype)


def _reference(x, edge_index, weight, bias, t=1.0):
    """Pure-JAX reference mirroring the PyTorch forward."""
    N = x.shape[0]
    ew = jnp.ones((edge_index.shape[1],), dtype=jnp.float32)
    A = jnp.zeros((N, N), dtype=jnp.float32).at[edge_index[0], edge_index[1]].add(ew)
    deg = A.sum(axis=1)
    dinv = jnp.where(deg > 0.0, deg ** -0.5, 0.0)
    A_norm = dinv[:, None] * A * dinv[None, :]
    L = jnp.eye(N, dtype=jnp.float32) - A_norm
    H = jax.scipy.linalg.expm(-t * L)
    return (H @ x) @ weight.T + bias


if __name__ == "__main__":
    key = jax.random.PRNGKey(0)
    N, E = 16, 40            # nodes, edges
    in_channels, out_channels = 8, 16
    t = 1.0

    k_x, k_src, k_dst, k_w, k_b = jax.random.split(key, 5)
    x = jax.random.normal(k_x, (N, in_channels), dtype=jnp.float32)
    edge_index = jnp.stack([
        jax.random.randint(k_src, (E,), 0, N),
        jax.random.randint(k_dst, (E,), 0, N),
    ]).astype(jnp.int32)

    # nn.Linear-style deterministic init: U(-1/sqrt(in), 1/sqrt(in))
    bound = 1.0 / (in_channels ** 0.5)
    weight = jax.random.uniform(k_w, (out_channels, in_channels),
                                minval=-bound, maxval=bound, dtype=jnp.float32)
    bias = jax.random.uniform(k_b, (out_channels,),
                              minval=-bound, maxval=bound, dtype=jnp.float32)

    out = heat_kernel_layer(x, edge_index, weight, bias, edge_weight=None, t=t)
    out = jax.block_until_ready(out)

    ref = jax.block_until_ready(_reference(x, edge_index, weight, bias, t=t))
    assert out.shape == (N, out_channels)
    assert jnp.allclose(out, ref, atol=1e-3, rtol=1e-3)

    print("KERNEL_OK")
</pallas_src>

<mosaic_0001>
module attributes {stable_mosaic.version = 11 : i64} {
  func.func @_heat_kernel(%arg0: memref<128x128xf32, #tpu.memory_space<vmem>>, %arg1: memref<128x128xf32, #tpu.memory_space<vmem>>, %arg2: memref<1x128xf32, #tpu.memory_space<vmem>>, %arg3: memref<128x128xf32, #tpu.memory_space<vmem>>) attributes {dimension_semantics = [], scalar_prefetch = 0 : i64, scratch_operands = 0 : i64, tpu.core_type = #tpu.core_type<tc>} {
    %c0 = arith.constant 0 : index
    %c0_0 = arith.constant 0 : index
    %0 = vector.load %arg0[%c0, %c0_0] : memref<128x128xf32, #tpu.memory_space<vmem>>, vector<128x128xf32>
    %cst = arith.constant dense<0.000000e+00> : vector<128xf32>
    %1 = vector.multi_reduction <add>, %0, %cst [1] : vector<128x128xf32> to vector<128xf32>
    %2 = vector.shape_cast %1 : vector<128xf32> to vector<128x1xf32>
    %cst_1 = arith.constant 0.000000e+00 : f32
    %3 = vector.broadcast %cst_1 : f32 to vector<128x1xf32>
    %4 = arith.cmpf ogt, %2, %3 : vector<128x1xf32>
    %5 = math.rsqrt %2 : vector<128x1xf32>
    %cst_2 = arith.constant 0.000000e+00 : f32
    %6 = vector.broadcast %cst_2 : f32 to vector<128x1xf32>
    %7 = arith.select %4, %5, %6 : vector<128x1xi1>, vector<128x1xf32>
    %8 = vector.broadcast %7 : vector<128x1xf32> to vector<128x128xf32>
    %9 = arith.mulf %8, %0 : vector<128x128xf32>
    %10 = vector.shape_cast %7 : vector<128x1xf32> to vector<1x128xf32>
    %11 = vector.broadcast %10 : vector<1x128xf32> to vector<128x128xf32>
    %12 = arith.mulf %9, %11 : vector<128x128xf32>
    %13 = tpu.iota {dimensions = array<i32: 0>} : vector<128x128xi32>
    %14 = tpu.iota {dimensions = array<i32: 1>} : vector<128x128xi32>
    %15 = arith.cmpi eq, %13, %14 : vector<128x128xi32>
    %16 = arith.extui %15 : vector<128x128xi1> to vector<128x128xi32>
    %17 = arith.sitofp %16 : vector<128x128xi32> to vector<128x128xf32>
    %18 = arith.subf %17, %12 : vector<128x128xf32>
    %cst_3 = arith.constant -5.000000e-01 : f32
    %19 = vector.broadcast %cst_3 : f32 to vector<128x128xf32>
    %20 = arith.mulf %18, %19 : vector<128x128xf32>
    %cst_4 = arith.constant dense<0.000000e+00> : vector<128x128xf32>
    %21 = tpu.matmul %20, %20, %cst_4 {dimension_numbers = #tpu.dot_dimension_numbers<[1], [0], [0], [1], [0, 0, 1, 1], [], []>, precision = #tpu.contract_precision<fp32>} : vector<128x128xf32>, vector<128x128xf32>, vector<128x128xf32> -> vector<128x128xf32>
    %cst_5 = arith.constant dense<0.000000e+00> : vector<128x128xf32>
    %22 = tpu.matmul %21, %20, %cst_5 {dimension_numbers = #tpu.dot_dimension_numbers<[1], [0], [0], [1], [0, 0, 1, 1], [], []>, precision = #tpu.contract_precision<fp32>} : vector<128x128xf32>, vector<128x128xf32>, vector<128x128xf32> -> vector<128x128xf32>
    %cst_6 = arith.constant dense<0.000000e+00> : vector<128x128xf32>
    %23 = tpu.matmul %21, %21, %cst_6 {dimension_numbers = #tpu.dot_dimension_numbers<[1], [0], [0], [1], [0, 0, 1, 1], [], []>, precision = #tpu.contract_precision<fp32>} : vector<128x128xf32>, vector<128x128xf32>, vector<128x128xf32> -> vector<128x128xf32>
    %cst_7 = arith.constant 2.48015876E-5 : f32
    %24 = vector.broadcast %cst_7 : f32 to vector<128x128xf32>
    %25 = arith.mulf %24, %17 : vector<128x128xf32>
    %cst_8 = arith.constant 2.75573188E-6 : f32
    %26 = vector.broadcast %cst_8 : f32 to vector<128x128xf32>
    %27 = arith.mulf %26, %20 : vector<128x128xf32>
    %28 = arith.addf %25, %27 : vector<128x128xf32>
    %cst_9 = arith.constant 2.755732E-7 : f32
    %29 = vector.broadcast %cst_9 : f32 to vector<128x128xf32>
    %30 = arith.mulf %29, %21 : vector<128x128xf32>
    %31 = arith.addf %28, %30 : vector<128x128xf32>
    %cst_10 = arith.constant 2.50521079E-8 : f32
    %32 = vector.broadcast %cst_10 : f32 to vector<128x128xf32>
    %33 = arith.mulf %32, %22 : vector<128x128xf32>
    %34 = arith.addf %31, %33 : vector<128x128xf32>
    %cst_11 = arith.constant 2.08767559E-9 : f32
    %35 = vector.broadcast %cst_11 : f32 to vector<128x128xf32>
    %36 = arith.mulf %35, %23 : vector<128x128xf32>
    %37 = arith.addf %34, %36 : vector<128x128xf32>
    %cst_12 = arith.constant 0.0416666679 : f32
    %38 = vector.broadcast %cst_12 : f32 to vector<128x128xf32>
    %39 = arith.mulf %38, %17 : vector<128x128xf32>
    %cst_13 = arith.constant 0.00833333377 : f32
    %40 = vector.broadcast %cst_13 : f32 to vector<128x128xf32>
    %41 = arith.mulf %40, %20 : vector<128x128xf32>
    %42 = arith.addf %39, %41 : vector<128x128xf32>
    %cst_14 = arith.constant 0.00138888892 : f32
    %43 = vector.broadcast %cst_14 : f32 to vector<128x128xf32>
    %44 = arith.mulf %43, %21 : vector<128x128xf32>
    %45 = arith.addf %42, %44 : vector<128x128xf32>
    %cst_15 = arith.constant 1.98412701E-4 : f32
    %46 = vector.broadcast %cst_15 : f32 to vector<128x128xf32>
    %47 = arith.mulf %46, %22 : vector<128x128xf32>
    %48 = arith.addf %45, %47 : vector<128x128xf32>
    %cst_16 = arith.constant dense<0.000000e+00> : vector<128x128xf32>
    %49 = tpu.matmul %23, %37, %cst_16 {dimension_numbers = #tpu.dot_dimension_numbers<[1], [0], [0], [1], [0, 0, 1, 1], [], []>, precision = #tpu.contract_precision<fp32>} : vector<128x128xf32>, vector<128x128xf32>, vector<128x128xf32> -> vector<128x128xf32>
    %50 = arith.addf %48, %49 : vector<128x128xf32>
    %51 = arith.addf %17, %20 : vector<128x128xf32>
    %cst_17 = arith.constant 5.000000e-01 : f32
    %52 = vector.broadcast %cst_17 : f32 to vector<128x128xf32>
    %53 = arith.mulf %52, %21 : vector<128x128xf32>
    %54 = arith.addf %51, %53 : vector<128x128xf32>
    %cst_18 = arith.constant 0.166666672 : f32
    %55 = vector.broadcast %cst_18 : f32 to vector<128x128xf32>
    %56 = arith.mulf %55, %22 : vector<128x128xf32>
    %57 = arith.addf %54, %56 : vector<128x128xf32>
    %cst_19 = arith.constant dense<0.000000e+00> : vector<128x128xf32>
    %58 = tpu.matmul %23, %50, %cst_19 {dimension_numbers = #tpu.dot_dimension_numbers<[1], [0], [0], [1], [0, 0, 1, 1], [], []>, precision = #tpu.contract_precision<fp32>} : vector<128x128xf32>, vector<128x128xf32>, vector<128x128xf32> -> vector<128x128xf32>
    %59 = arith.addf %57, %58 : vector<128x128xf32>
    %cst_20 = arith.constant dense<0.000000e+00> : vector<128x128xf32>
    %60 = tpu.matmul %59, %59, %cst_20 {dimension_numbers = #tpu.dot_dimension_numbers<[1], [0], [0], [1], [0, 0, 1, 1], [], []>, precision = #tpu.contract_precision<fp32>} : vector<128x128xf32>, vector<128x128xf32>, vector<128x128xf32> -> vector<128x128xf32>
    %c0_21 = arith.constant 0 : index
    %c0_22 = arith.constant 0 : index
    %61 = vector.load %arg1[%c0_21, %c0_22] : memref<128x128xf32, #tpu.memory_space<vmem>>, vector<128x128xf32>
    %cst_23 = arith.constant dense<0.000000e+00> : vector<128x128xf32>
    %62 = tpu.matmul %60, %61, %cst_23 {dimension_numbers = #tpu.dot_dimension_numbers<[1], [0], [0], [1], [0, 0, 1, 1], [], []>, precision = #tpu.contract_precision<fp32>} : vector<128x128xf32>, vector<128x128xf32>, vector<128x128xf32> -> vector<128x128xf32>
    %c0_24 = arith.constant 0 : index
    %c0_25 = arith.constant 0 : index
    %63 = vector.load %arg2[%c0_24, %c0_25] : memref<1x128xf32, #tpu.memory_space<vmem>>, vector<1x128xf32>
    %64 = vector.broadcast %63 : vector<1x128xf32> to vector<128x128xf32>
    %65 = arith.addf %62, %64 : vector<128x128xf32>
    %c0_26 = arith.constant 0 : index
    %c0_27 = arith.constant 0 : index
    %66 = vector.load %arg3[%c0_26, %c0_27] : memref<128x128xf32, #tpu.memory_space<vmem>>, vector<128x128xf32>
    tpu.vector_store %arg3[%c0_26, %c0_27], %65 {strides = array<i32>} : memref<128x128xf32, #tpu.memory_space<vmem>>, vector<128x128xf32>,
    return
  }
}

</mosaic_0001>

<bundles_post_ra>
// kernel: tpu_custom_call.1
= control target key start
LH: loop header
LB: loop body
LE: loop exit
PB: predicated region body
PF: predicated region fallthrough
CT: control target
= control target key end

     0   :  { %8 = vsyncpa [#allocation3], 0  ;;  %s19334_s0 = inlined_call_operand.hbm [shape: f32[128,128], index: 0, kind: input, shape index: {}]   ;;  %s19335_s1 = inlined_call_operand.hbm [shape: f32[128,128], index: 1, kind: input, shape index: {}]   ;;  %s19336_s2 = inlined_call_operand.vmem [shape: f32[1,128], index: 2, kind: input, shape index: {}]   ;;  %s19337_s3 = inlined_call_operand.hbm [shape: f32[128,128], index: 3, kind: output, shape index: {}]  }
   0x1   :  { %9 = vsyncpa [#allocation6], 0 }
   0x2   :  { %10 = vsyncpa [#allocation4], 0  ;;  %s13652_s12 = smov [#allocation2]  }
   0x3   :  { %s16_s13 = sshll.u32 %s13652_s12, 4  ;;  %s17_s13 = int_to_ptr.vmem [resolvable:$true] %s16_s13 }
   0x4   :  { %s13594_s14 = scalar_lea.vmem %s17_s13, 2048  ;;  %p13599_p1 = scmp.lt.s32.totalorder %s17_s13, %s17_s13 }
   0x5   :  { %p13595_p0 = scmp.ne.s32.totalorder %s17_s13, %s13594_s14  ;;  %p13600_p2 = scmp.lt.s32.totalorder %s13594_s14, %s13594_s14 }
   0x7   :  { %p13601_p3 = por %p13600_p2, %p13599_p1 }
   0x9   :  { %p13602_p4 = pnand %p13601_p3, %p13595_p0 }
   0xb   :  { %13605 = shalt.err (!%p13602_p4)
}
   0xc   :  { %s13653_s15 = smov 128   ;;  %s13654_s16 = smov 8  }
   0xd   :  { %22 = dma.hbm_to_vmem [thread:$0]  %s19334_s0, 2048, %s17_s13, [#allocation3], %s13653_s15, %s13653_s15, %s13654_s16  }
   0xe   :  { %s13655_s19 = smov [#allocation5]  }
   0xf   :  { %s28_s20 = sshll.u32 %s13655_s19, 4  ;;  %s29_s20 = int_to_ptr.vmem [resolvable:$true] %s28_s20 }
  0x10   :  { %s13614_s21 = scalar_lea.vmem %s29_s20, 2048  ;;  %p13619_p6 = scmp.lt.s32.totalorder %s29_s20, %s29_s20 }
  0x11   :  { %p13615_p5 = scmp.ne.s32.totalorder %s29_s20, %s13614_s21  ;;  %p13620_p7 = scmp.lt.s32.totalorder %s13614_s21, %s13614_s21 }
  0x13   :  { %p13621_p8 = por %p13620_p7, %p13619_p6 }
  0x15   :  { %p13622_p9 = pnand %p13621_p8, %p13615_p5 }
  0x17   :  { %13625 = shalt.err (!%p13622_p9)
}
  0x18   :  { %34 = dma.hbm_to_vmem [thread:$0]  %s19335_s1, 2048, %s29_s20, [#allocation6], %s13653_s15, %s13653_s15, %s13654_s16  }
  0x19   :  { %13646 = dma.done.wait [#allocation3], 2048  }
  0x1a   :  { %13647 = vsyncadd [#allocation3], 4294965248 }
  0x1b   :  { %13648 = dma.done.wait [#allocation6], 2048  }
  0x1c   :  { %13649 = vsyncadd [#allocation6], 4294965248  ;;  %v13690_v0 = vld [vmem:[#allocation2 + $0x10] sm:$0xff]  ;;  %v13692_v1 = vld [vmem:[#allocation2] sm:$0xff]  ;;  %v171_v16 = vlaneseq  ;;  %vm182_vm0 = vcmask 130112   ;;  %vm189_vm1 = vcmask 195712  }
  0x1d   :  { %63 = vadd.xlane.f32.xlu1 %v13690_v0  ;;  %59 = vadd.xlane.f32.xlu0 %v13692_v1  ;;  %v13696_v2 = vld [vmem:[#allocation2 + $0x18] sm:$0xff]  ;;  %v13698_v3 = vld [vmem:[#allocation2 + $0x8] sm:$0xff]  ;;  %v13704_v5 = vld [vmem:[#allocation2 + $0x20] sm:$0xff]  ;;  %vm196_vm2 = vcmask 261312   ;;  %vm203_vm4 = vcmask 326912   ;;  %vm210_vm8 = vcmask 392512  }
  0x1e   :  { %v13702_v4 = vld [vmem:[#allocation2 + $0x28] sm:$0xff]  ;;  %v13708_v6 = vld [vmem:[#allocation2 + $0x38] sm:$0xff]  ;;  %v13710_v7 = vld [vmem:[#allocation2 + $0x30] sm:$0xff]  ;;  %v13738_v17 = vand.u32 127, %v171_v16  ;;  %v13744_v20 = vshrl.u32 %v171_v16, 7  ;;  %vm217_vm9 = vcmask 458112  }
  0x1f   :  { %v13714_v8 = vld [vmem:[#allocation2 + $0x48] sm:$0xff]  ;;  %v13716_v9 = vld [vmem:[#allocation2 + $0x40] sm:$0xff]  ;;  %v13720_v10 = vld [vmem:[#allocation2 + $0x58] sm:$0xff] }
  0x20   :  { %19825 = vst [vmem:[#allocation11_spill] sm:$0xff] %v13720_v10  ;;  %v13722_v11 = vld [vmem:[#allocation2 + $0x50] sm:$0xff]  ;;  %v13726_v12 = vld [vmem:[#allocation2 + $0x68] sm:$0xff]  ;;  %v13728_v13 = vld [vmem:[#allocation2 + $0x60] sm:$0xff]  ;;  %v13747_v21 = vadd.s32 4294967280, %v13738_v17  ;;  %v175_v25 = vsub.s32 %v13738_v17, %v13744_v20  ;;  %v13762_v26 = vadd.s32 4294967272, %v13738_v17  ;;  %vm328_vm10 = vcmp.eq.s32.totalorder %v13744_v20, %v13738_v17 }
  0x21   :  { %65 = vadd.xlane.f32.xlu1 %v13696_v2  ;;  %61 = vadd.xlane.f32.xlu0 %v13698_v3  ;;  %19826 = vst [vmem:[#allocation12_spill] sm:$0xff] %v13722_v11  ;;  %19827 = vst [vmem:[#allocation13_spill] sm:$0xff] %v13726_v12  ;;  %v13732_v14 = vld [vmem:[#allocation2 + $0x78] sm:$0xff]  ;;  %v13734_v15 = vld [vmem:[#allocation2 + $0x70] sm:$0xff]  ;;  %v13765_v27 = vadd.s32 4294967288, %v13738_v17  ;;  %v13768_v28 = vadd.s32 4294967256, %v13738_v17 }
  0x22   :  { %19828 = vst [vmem:[#allocation14_spill] sm:$0xff] %v13728_v13  ;;  %19829 = vst [vmem:[#allocation15_spill] sm:$0xff] %v13732_v14  ;;  %v13771_v29 = vadd.s32 4294967264, %v13738_v17  ;;  %v13778_v32 = vadd.s32 4294967240, %v13738_v17  ;;  %v13781_v33 = vadd.s32 4294967248, %v13738_v17  ;;  %v13784_v34 = vadd.s32 4294967224, %v13738_v17 }
  0x23   :  { %19830 = vst [vmem:[#allocation16_spill] sm:$0xff] %v13734_v15  ;;  %v13787_v35 = vadd.s32 4294967232, %v13738_v17  ;;  %v13791_v36 = vadd.s32 4294967208, %v13738_v17  ;;  %v13794_v37 = vadd.s32 4294967216, %v13738_v17  ;;  %v13797_v38 = vadd.s32 4294967192, %v13738_v17 }
  0x24   :  { %v13801_v39 = vadd.s32 4294967200, %v13738_v17  ;;  %v13804_v40 = vadd.s32 4294967176, %v13738_v17  ;;  %v13807_v41 = vadd.s32 4294967184, %v13738_v17  ;;  %v180_v43 = vsub.s32 %v13765_v27, %v13744_v20 }
  0x25   :  { %69 = vadd.xlane.f32.xlu1 %v13702_v4  ;;  %67 = vadd.xlane.f32.xlu0 %v13704_v5  ;;  %v13844_v59 = vadd.s32 8, %v13744_v20  ;;  %v13847_v60 = vadd.s32 16, %v13744_v20  ;;  %v13850_v61 = vadd.s32 24, %v13744_v20  ;;  %v13853_v62 = vadd.s32 32, %v13744_v20 }
  0x26   :  { %v13860_v57 = vadd.s32 40, %v13744_v20  ;;  %v13863_v56 = vadd.s32 48, %v13744_v20  ;;  %v13866_v55 = vadd.s32 56, %v13744_v20  ;;  %v13869_v54 = vadd.s32 64, %v13744_v20 }
  0x27   :  { %v13874_v52 = vadd.s32 72, %v13744_v20  ;;  %v13877_v53 = vadd.s32 80, %v13744_v20  ;;  %v13884_v46 = vadd.s32 88, %v13744_v20  ;;  %v13891_v44 = vadd.s32 96, %v13744_v20 }
  0x28   :  { %v13902_v24 = vadd.s32 104, %v13744_v20  ;;  %vm329_vm11 = vcmp.eq.s32.totalorder %v13844_v59, %v13738_v17  ;;  %vm330_vm12 = vcmp.eq.s32.totalorder %v13847_v60, %v13738_v17  ;;  %vm331_vm15 = vcmp.eq.s32.totalorder %v13850_v61, %v13738_v17 }
  0x29   :  { %73 = vadd.xlane.f32.xlu1 %v13708_v6  ;;  %71 = vadd.xlane.f32.xlu0 %v13710_v7  ;;  %v19843_v61 = vsub.s32 %v13784_v34, %v13744_v20  ;;  %v19846_v34 = vsub.s32 %v13794_v37, %v13744_v20 }
  0x2d   :  { %77 = vadd.xlane.f32.xlu1 %v13714_v8  ;;  %75 = vadd.xlane.f32.xlu0 %v13716_v9 }
  0x31   :  { %81 = vadd.xlane.f32.xlu1 %v13720_v10  ;;  %79 = vadd.xlane.f32.xlu0 %v13722_v11 }
  0x35   :  { %85 = vadd.xlane.f32.xlu1 %v13726_v12  ;;  %83 = vadd.xlane.f32.xlu0 %v13728_v13 }
  0x39   :  { %89 = vadd.xlane.f32.xlu1 %v13732_v14  ;;  %87 = vadd.xlane.f32.xlu0 %v13734_v15  ;;  %v19831_v15 = vsub.s32 %v13747_v21, %v13744_v20 }
  0xa6   :  { %v13740_v18 = vpop.xlane.xlu1 %63  ;;  %v13742_v19 = vpop.xlane.xlu0 %59 }
  0xa7   :  { %13554 = vrsqrt.f32 %v13742_v19  ;;  %vm91_vm3 = vcmp.gt.f32.partialorder %v13742_v19, 0.0  ;;  %vm93_vm5 = vcmp.gt.f32.partialorder %v13740_v18, 0.0 }
  0xa8   :  { %13556 = vrsqrt.f32 %v13740_v18 }
  0xaa   :  { %v13751_v22 = vpop.xlane.xlu1 %65  ;;  %v13753_v23 = vpop.xlane.xlu0 %61 }
  0xab   :  { %13558 = vrsqrt.f32 %v13751_v22  ;;  %vm94_vm6 = vcmp.gt.f32.partialorder %v13751_v22, 0.0  ;;  %vm92_vm7 = vcmp.gt.f32.partialorder %v13753_v23, 0.0 }
  0xac   :  { %13560 = vrsqrt.f32 %v13753_v23 }
  0xae   :  { %v13773_v30 = vpop.xlane.xlu1 %69  ;;  %v13775_v31 = vpop.xlane.xlu0 %67 }
  0xaf   :  { %13562 = vrsqrt.f32 %v13773_v30  ;;  %vm96_vm13 = vcmp.gt.f32.partialorder %v13773_v30, 0.0  ;;  %vm95_vm14 = vcmp.gt.f32.partialorder %v13775_v31, 0.0 }
  0xb0   :  { %13564 = vrsqrt.f32 %v13775_v31  ;;  %v19833_v31 = vsub.s32 %v13771_v29, %v13744_v20  ;;  %v19834_v29 = vsub.s32 %v13768_v28, %v13744_v20 }
  0xb2   :  { %v13819_v47 = vpop.xlane.xlu1 %73  ;;  %v13823_v49 = vpop.xlane.xlu0 %71 }
  0xb3   :  { %13566 = vrsqrt.f32 %v13819_v47 }
  0xb4   :  { %13568 = vrsqrt.f32 %v13823_v49  ;;  %v13555_v58 = vpop.eup %13554 }
  0xb5   :  { %v13557_v63 = vpop.eup %13556  ;;  %v13880_v51 = vsel %vm91_vm3, %v13555_v58, 0.0  ;;  %vm224_vm3 = vcmask 523712  }
  0xb6   :  { %v13855_v16 = vpop.xlane.xlu1 %77  ;;  %v13857_v27 = vpop.xlane.xlu0 %75  ;;  %v13886_v48 = vsel %vm93_vm5, %v13557_v63, 0.0  ;;  %v13905_v63 = vadd.s32 112, %v13744_v20  ;;  %v176_v22 = vrot.slane %v13880_v51, %v175_v25  ;;  %vm333_vm5 = vcmp.eq.s32.totalorder %v13860_v57, %v13738_v17 }
  0xb7   :  { %13570 = vrsqrt.f32 %v13855_v16  ;;  %v188_v14 = vrot.slane %v13886_v48, %v19831_v15 }
  0xb8   :  { %v13559_v50 = vpop.eup %13558  ;;  %13572 = vrsqrt.f32 %v13857_v27 }
  0xb9   :  { %v13561_v19 = vpop.eup %13560  ;;  %v13893_v45 = vsel %vm94_vm6, %v13559_v50, 0.0  ;;  %v13914_v50 = vadd.s32 120, %v13744_v20  ;;  %vm334_vm6 = vcmp.eq.s32.totalorder %v13863_v56, %v13738_v17 }
  0xba   :  { %v13895_v18 = vsel %vm92_vm7, %v13561_v19, 0.0  ;;  %v13897_v58 = vpop.xlane.xlu1 %81  ;;  %v13899_v42 = vpop.xlane.xlu0 %79  ;;  %vm100_vm7 = vcmp.gt.f32.partialorder %v13855_v16, 0.0 }
  0xbb   :  { %v181_v23 = vrot.slane %v13895_v18, %v180_v43  ;;  %13574 = vrsqrt.f32 %v13897_v58  ;;  %v19832_v43 = vsub.s32 %v13762_v26, %v13744_v20 }
  0xbc   :  { %v13563_v19 = vpop.eup %13562  ;;  %13576 = vrsqrt.f32 %v13899_v42 }
  0xbd   :  { %v13565_v25 = vpop.eup %13564  ;;  %v195_v13 = vrot.slane %v13893_v45, %v19832_v43  ;;  %v183_v21 = vsel %vm182_vm0, %v181_v23, %v176_v22  ;;  %v13937_v12 = vsel %vm96_vm13, %v13563_v19, 0.0  ;;  %vm332_vm0 = vcmp.eq.s32.totalorder %v13853_v62, %v13738_v17 }
  0xbe   :  { %v190_v15 = vsel %vm189_vm1, %v188_v14, %v183_v21  ;;  %v13939_v11 = vsel %vm95_vm14, %v13565_v25, 0.0  ;;  %v13941_v10 = vpop.xlane.xlu1 %85  ;;  %v13943_v26 = vpop.xlane.xlu0 %83  ;;  %v209_v23 = vrot.slane %v13937_v12, %v19834_v29  ;;  %vm98_vm14 = vcmp.gt.f32.partialorder %v13819_v47, 0.0 }
  0xbf   :  { %v197_v30 = vsel %vm196_vm2, %v195_v13, %v190_v15  ;;  %v202_v22 = vrot.slane %v13939_v11, %v19833_v31  ;;  %13578 = vrsqrt.f32 %v13941_v10  ;;  %vm97_vm1 = vcmp.gt.f32.partialorder %v13823_v49, 0.0 }
  0xc0   :  { %v13567_v14 = vpop.eup %13566  ;;  %13580 = vrsqrt.f32 %v13943_v26  ;;  %vm338_vm13 = vcmp.eq.s32.totalorder %v13877_v53, %v13738_v17  ;;  %v19835_v47 = vsub.s32 %v13781_v33, %v13744_v20  ;;  %vm252_vm2 = vcmask 786112  }
  0xc1   :  { %v13569_v13 = vpop.eup %13568  ;;  %v204_v19 = vsel %vm203_vm4, %v202_v22, %v197_v30  ;;  %v13971_v25 = vsel %vm98_vm14, %v13567_v14, 0.0  ;;  %vm339_vm4 = vcmp.eq.s32.totalorder %v13884_v46, %v13738_v17  ;;  %v19836_v30 = vsub.s32 %v13778_v32, %v13744_v20 }
  0xc2   :  { %v13973_v43 = vsel %vm97_vm1, %v13569_v13, 0.0  ;;  %v13975_v21 = vpop.xlane.xlu1 %89  ;;  %v13979_v28 = vpop.xlane.xlu0 %87  ;;  %v211_v22 = vsel %vm210_vm8, %v209_v23, %v204_v19  ;;  %vm99_vm1 = vcmp.gt.f32.partialorder %v13857_v27, 0.0  ;;  %vm343_vm14 = vcmp.eq.s32.totalorder %v13914_v50, %v13738_v17 }
  0xc3   :  { %v216_v49 = vrot.slane %v13973_v43, %v19835_v47  ;;  %13582 = vrsqrt.f32 %v13975_v21  ;;  %v223_v31 = vrot.slane %v13971_v25, %v19836_v30  ;;  %v19837_v32 = vsub.s32 %v13787_v35, %v13744_v20 }
  0xc4   :  { %v13571_v15 = vpop.eup %13570  ;;  %13584 = vrsqrt.f32 %v13979_v28  ;;  %vm259_vm8 = vcmask 851712   ;;  %v13656_v23 = vmov 0.0   ;;  %v19853_v46 = vsub.s32 %v13791_v36, %v13744_v20 }
  0xc5   :  { %v13573_v33 = vpop.eup %13572  ;;  %v218_v14 = vsel %vm217_vm9, %v216_v49, %v211_v22  ;;  %v14003_v13 = vsel %vm100_vm7, %v13571_v15, 0.0  ;;  %v14016_v16 = vsel %vm328_vm10, 1.0, %v13656_v23  ;;  %v14021_v27 = vsel %vm329_vm11, 1.0, %v13656_v23 }
  0xc6   :  { %v14005_v29 = vsel %vm99_vm1, %v13573_v33, 0.0  ;;  %19838 = vst [vmem:[#allocation17_spill] sm:$0xff] %v14016_v16  ;;  %v14026_v19 = vsel %vm330_vm12, 1.0, %v13656_v23  ;;  %v14031_v49 = vsel %vm331_vm15, 1.0, %v13656_v23  ;;  %v14036_v15 = vsel %vm332_vm0, 1.0, %v13656_v23 }
  0xc7   :  { %v230_v47 = vrot.slane %v14005_v29, %v19837_v32  ;;  %19839 = vst [vmem:[#allocation18_spill] sm:$0xff] %v14026_v19  ;;  %19840 = vst [vmem:[#allocation19_spill] sm:$0xff] %v14031_v49  ;;  %v14041_v59 = vsel %vm333_vm5, 1.0, %v13656_v23  ;;  %v14046_v60 = vsel %vm334_vm6, 1.0, %v13656_v23  ;;  %v237_v30 = vrot.slane %v14003_v13, %v19843_v61 }
  0xc8   :  { %v13575_v35 = vpop.eup %13574  ;;  %19841 = vst [vmem:[#allocation20_spill] sm:$0xff] %v14036_v15  ;;  %19842 = vst [vmem:[#allocation21_spill] sm:$0xff] %v14041_v59  ;;  %v225_v62 = vsel %vm224_vm3, %v223_v31, %v218_v14  ;;  %vm102_vm9 = vcmp.gt.f32.partialorder %v13897_v58, 0.0  ;;  %vm101_vm10 = vcmp.gt.f32.partialorder %v13899_v42, 0.0  ;;  %vm266_vm11 = vcmask 917312  }
  0xc9   :  { %v13577_v33 = vpop.eup %13576  ;;  %vm19844_vm12 = vcmask 589312   ;;  %v134_v22 = vsel %vm102_vm9, %v13575_v35, 0.0  ;;  %vm273_vm15 = vcmask 982912   ;;  %vm19845_vm0 = vcmp.eq.s32.totalorder %v13866_v55, %v13738_v17 }
  0xca   :  { %v232_v57 = vsel %vm19844_vm12, %v230_v47, %v225_v62  ;;  %v133_v32 = vsel %vm101_vm10, %v13577_v33, 0.0  ;;  %v14059_v56 = vsel %vm19845_vm0, 1.0, %v13656_v23  ;;  %vm280_vm3 = vcmask 1048512  }
  0xcb   :  { %v244_v61 = vrot.slane %v133_v32, %v19846_v34  ;;  %vm19847_vm5 = vcmp.eq.s32.totalorder %v13869_v54, %v13738_v17  ;;  %vm19848_vm6 = vcmp.eq.s32.totalorder %v13874_v52, %v13738_v17  ;;  %v14077_v55 = vsel %vm338_vm13, 1.0, %v13656_v23 }
  0xcc   :  { %v14067_v42 = vsel %vm19847_vm5, 1.0, %v13656_v23  ;;  %v14072_v58 = vsel %vm19848_vm6, 1.0, %v13656_v23  ;;  %v14082_v37 = vsel %vm339_vm4, 1.0, %v13656_v23  ;;  %vm19849_vm7 = vcmp.eq.s32.totalorder %v13891_v44, %v13738_v17  ;;  %v13579_v31 = vpop.eup %13578 }
  0xcd   :  { %v14087_v54 = vsel %vm19849_vm7, 1.0, %v13656_v23  ;;  %vm19850_vm1 = vcmp.eq.s32.totalorder %v13902_v24, %v13738_v17  ;;  %vm19851_vm9 = vcmp.eq.s32.totalorder %v13905_v63, %v13738_v17  ;;  %v251_v14 = vrot.slane %v134_v22, %v19853_v46  ;;  %v13581_v44 = vpop.eup %13580  ;;  %v19863_v46 = vld [vmem:[#allocation14_spill] sm:$0xff] }
  0xce   :  { %v14092_v52 = vsel %vm19850_vm1, 1.0, %v13656_v23  ;;  %v14097_v53 = vsel %vm19851_vm9, 1.0, %v13656_v23  ;;  %vm19854_vm13 = vcmask 654912   ;;  %vm104_vm4 = vcmp.gt.f32.partialorder %v13941_v10, 0.0 }
  0xcf   :  { %19852 = vst [vmem:[#allocation22_spill] sm:$0xff] %v14097_v53  ;;  %v239_v47 = vsel %vm19854_vm13, %v237_v30, %v232_v57  ;;  %v14107_v24 = vsel %vm343_vm14, 1.0, %v13656_v23  ;;  %v141_v63 = vmul.f32 %v13886_v48, %v13690_v0  ;;  %vm19855_vm10 = vcmask 720512   ;;  %v19861_v57 = vld [vmem:[#allocation12_spill] sm:$0xff] }
  0xd0   :  { %v246_v35 = vsel %vm19855_vm10, %v244_v61, %v239_v47  ;;  %v136_v33 = vsel %vm104_vm4, %v13579_v31, 0.0  ;;  %vm103_vm12 = vcmp.gt.f32.partialorder %v13943_v26, 0.0  ;;  %v139_v36 = vmul.f32 %v13880_v51, %v13692_v1  ;;  %v13583_v23 = vpop.eup %13582 }
  0xd1   :  { %v142_v10 = vmul.f32 %v13893_v45, %v13696_v2  ;;  %v140_v17 = vmul.f32 %v13895_v18, %v13698_v3  ;;  %v135_v50 = vsel %vm103_vm12, %v13581_v44, 0.0  ;;  %v144_v30 = vmul.f32 %v13937_v12, %v13702_v4  ;;  %v13585_v1 = vpop.eup %13584 }
  0xd2   :  { %v19856_v0 = vsub.s32 %v13797_v38, %v13744_v20  ;;  %v19857_v26 = vsub.s32 %v13801_v39, %v13744_v20  ;;  %vm106_vm14 = vcmp.gt.f32.partialorder %v13975_v21, 0.0  ;;  %v143_v2 = vmul.f32 %v13939_v11, %v13704_v5 }
  0xd3   :  { %v253_v3 = vsel %vm252_vm2, %v251_v14, %v246_v35  ;;  %v138_v45 = vsel %vm106_vm14, %v13583_v23, 0.0  ;;  %vm105_vm0 = vcmp.gt.f32.partialorder %v13979_v28, 0.0  ;;  %v146_v4 = vmul.f32 %v13971_v25, %v13708_v6  ;;  %v19860_v25 = vld [vmem:[#allocation11_spill] sm:$0xff] }
  0xd4   :  { %v265_v48 = vrot.slane %v136_v33, %v19856_v0  ;;  %v258_v62 = vrot.slane %v135_v50, %v19857_v26  ;;  %v19858_v38 = vsub.s32 %v13804_v40, %v13744_v20  ;;  %v137_v51 = vsel %vm105_vm0, %v13585_v1, 0.0  ;;  %v19862_v40 = vld [vmem:[#allocation13_spill] sm:$0xff] }
  0xd5   :  { %v145_v18 = vmul.f32 %v13973_v43, %v13710_v7  ;;  %v148_v5 = vmul.f32 %v14003_v13, %v13714_v8  ;;  %v147_v11 = vmul.f32 %v14005_v29, %v13716_v9  ;;  %v19859_v21 = vsub.s32 %v13807_v41, %v13744_v20  ;;  %v19864_v43 = vld [vmem:[#allocation15_spill] sm:$0xff]  ;;  %v19865_v8 = vld [vmem:[#allocation16_spill] sm:$0xff] }
  0xd6   :  { %v260_v12 = vsel %vm259_vm8, %v258_v62, %v253_v3  ;;  %v279_v39 = vrot.slane %v138_v45, %v19858_v38  ;;  %v150_v28 = vmul.f32 %v134_v22, %v19860_v25  ;;  %v149_v34 = vmul.f32 %v133_v32, %v19861_v57 }
  0xd7   :  { %v272_v6 = vrot.slane %v137_v51, %v19859_v21  ;;  %v152_v61 = vmul.f32 %v136_v33, %v19862_v40  ;;  %v267_v31 = vsel %vm266_vm11, %v265_v48, %v260_v12  ;;  %v151_v7 = vmul.f32 %v135_v50, %v19863_v46 }
  0xd8   :  { %v154_v14 = vmul.f32 %v138_v45, %v19864_v43  ;;  %v153_v13 = vmul.f32 %v137_v51, %v19865_v8  ;;  %v14157_v20 = vmul.f32 2.4801588e-05, %v14021_v27  ;;  %v14160_v41 = vmul.f32 2.4801588e-05, %v14016_v16 }
  0xd9   :  { %v274_v9 = vsel %vm273_vm15, %v272_v6, %v267_v31  ;;  %v14163_v22 = vmul.f32 2.4801588e-05, %v14031_v49  ;;  %v14166_v47 = vmul.f32 2.4801588e-05, %v14026_v19  ;;  %v14169_v44 = vmul.f32 2.4801588e-05, %v14041_v59 }
  0xda   :  { %v281_v29 = vsel %vm280_vm3, %v279_v39, %v274_v9  ;;  %v14172_v35 = vmul.f32 2.4801588e-05, %v14036_v15 }
  0xdb   :  { %v295_v32 = vmul.f32 %v281_v29, %v139_v36  ;;  %v299_v33 = vmul.f32 %v281_v29, %v143_v2  ;;  %v300_v50 = vmul.f32 %v281_v29, %v144_v30  ;;  %v301_v23 = vmul.f32 %v281_v29, %v145_v18 }
  0xdc   :  { %v302_v0 = vmul.f32 %v281_v29, %v146_v4  ;;  %v303_v48 = vmul.f32 %v281_v29, %v147_v11  ;;  %v304_v26 = vmul.f32 %v281_v29, %v148_v5  ;;  %v305_v62 = vmul.f32 %v281_v29, %v149_v34 }
  0xdd   :  { %v306_v1 = vmul.f32 %v281_v29, %v150_v28  ;;  %v307_v3 = vmul.f32 %v281_v29, %v151_v7  ;;  %v308_v45 = vmul.f32 %v281_v29, %v152_v61  ;;  %v309_v36 = vmul.f32 %v281_v29, %v153_v13 }
  0xde   :  { %v310_v12 = vmul.f32 %v281_v29, %v154_v14  ;;  %v296_v38 = vmul.f32 %v281_v29, %v140_v17  ;;  %v297_v39 = vmul.f32 %v281_v29, %v141_v63  ;;  %v298_v51 = vmul.f32 %v281_v29, %v142_v10 }
  0xdf   :  { %v376_v21 = vsub.f32 %v14016_v16, %v295_v32  ;;  %v380_v6 = vsub.f32 %v14036_v15, %v299_v33  ;;  %v381_v2 = vsub.f32 %v14041_v59, %v300_v50  ;;  %v382_v30 = vsub.f32 %v14046_v60, %v301_v23 }
  0xe0   :  { %v383_v4 = vsub.f32 %v14059_v56, %v302_v0  ;;  %v384_v18 = vsub.f32 %v14067_v42, %v303_v48  ;;  %v385_v5 = vsub.f32 %v14072_v58, %v304_v26  ;;  %v386_v11 = vsub.f32 %v14077_v55, %v305_v62 }
  0xe1   :  { %v387_v17 = vsub.f32 %v14082_v37, %v306_v1  ;;  %v388_v63 = vsub.f32 %v14087_v54, %v307_v3  ;;  %v389_v10 = vsub.f32 %v14092_v52, %v308_v45  ;;  %v390_v25 = vsub.f32 %v14097_v53, %v309_v36 }
  0xe2   :  { %v391_v28 = vsub.f32 %v14107_v24, %v310_v12  ;;  %v377_v57 = vsub.f32 %v14021_v27, %v296_v38  ;;  %v378_v34 = vsub.f32 %v14026_v19, %v297_v39  ;;  %v379_v40 = vsub.f32 %v14031_v49, %v298_v51 }
  0xe3   :  { %v14190_v61 = vmul.f32 -0.5, %v376_v21  ;;  %v14192_v31 = vmul.f32 -0.5, %v380_v6  ;;  %v14194_v46 = vmul.f32 -0.5, %v381_v2  ;;  %v14196_v7 = vmul.f32 -0.5, %v382_v30 }
  0xe4   :  { %v14198_v43 = vmul.f32 -0.5, %v383_v4  ;;  %v14200_v14 = vmul.f32 -0.5, %v384_v18  ;;  %v14202_v8 = vmul.f32 -0.5, %v385_v5  ;;  %v14204_v13 = vmul.f32 -0.5, %v386_v11 }
  0xe5   :  { %19866 = vst [vmem:[#allocation11_spill] sm:$0xff] %v14190_v61  ;;  %v14206_v9 = vmul.f32 -0.5, %v387_v17  ;;  %v14208_v29 = vmul.f32 -0.5, %v388_v63  ;;  %v14210_v32 = vmul.f32 -0.5, %v389_v10  ;;  %v14212_v33 = vmul.f32 -0.5, %v390_v25 }
  0xe6   :  { %v14214_v50 = vmul.f32 -0.5, %v391_v28  ;;  %v14216_v23 = vmul.f32 -0.5, %v377_v57  ;;  %v14218_v0 = vmul.f32 -0.5, %v379_v40  ;;  %v14224_v26 = vand.u32 4294901760, %v14204_v13 }
  0xe7   :  { %19867 = vst [vmem:[#allocation12_spill] sm:$0xff] %v14212_v33  ;;  %v14221_v48 = vand.u32 4294901760, %v14206_v9  ;;  %v14230_v1 = vand.u32 4294901760, %v14212_v33  ;;  %v14233_v3 = vand.u32 4294901760, %v14210_v32  ;;  %v14236_v45 = vand.u32 4294901760, %v14208_v29 }
  0xe8   :  { %19868 = vst [vmem:[#allocation13_spill] sm:$0xff] %v14216_v23  ;;  %19870 = vst [vmem:[#allocation15_spill] sm:$0xff] %v14224_v26  ;;  %v14227_v62 = vand.u32 4294901760, %v14214_v50  ;;  %v14238_v36 = vmul.f32 -0.5, %v378_v34  ;;  %v14241_v12 = vand.u32 4294901760, %v14202_v8  ;;  %v14244_v38 = vand.u32 4294901760, %v14200_v14 }
  0xe9   :  { %19869 = vst [vmem:[#allocation14_spill] sm:$0xff] %v14221_v48  ;;  %19872 = vst [vmem:[#allocation23_spill] sm:$0xff] %v14230_v1  ;;  %v14247_v39 = vand.u32 4294901760, %v14198_v43  ;;  %v14250_v51 = vand.u32 4294901760, %v14196_v7  ;;  %v14253_v21 = vand.u32 4294901760, %v14194_v46  ;;  %v14256_v6 = vand.u32 4294901760, %v14192_v31 }
  0xea   :  { %19871 = vst [vmem:[#allocation16_spill] sm:$0xff] %v14227_v62  ;;  %19873 = vst [vmem:[#allocation24_spill] sm:$0xff] %v14233_v3  ;;  %v14259_v2 = vand.u32 4294901760, %v14190_v61  ;;  %11196 = vmatprep.subr.mxu0 %v14227_v62  ;;  %v14264_v30 = vsub.f32 %v14212_v33, %v14230_v1  ;;  %v14269_v4 = vsub.f32 %v14214_v50, %v14227_v62  ;;  %v14280_v11 = vand.u32 4294901760, %v14218_v0 }
  0xeb   :  { %19874 = vst [vmem:[#allocation25_spill] sm:$0xff] %v14236_v45  ;;  %19875 = vst [vmem:[#allocation26_spill] sm:$0xff] %v14241_v12  ;;  %11197 = vmatpush3.msra.mxu0 %v14227_v62  ;;  %v14273_v18 = vsub.f32 %v14210_v32, %v14233_v3  ;;  %v14277_v5 = vsub.f32 %v14208_v29, %v14236_v45  ;;  %v14290_v63 = vsub.f32 %v14206_v9, %v14221_v48 }
  0xec   :  { %19876 = vst [vmem:[#allocation27_spill] sm:$0xff] %v14244_v38  ;;  %19877 = vst [vmem:[#allocation28_spill] sm:$0xff] %v14247_v39  ;;  %11284 = vmatprep.mubr.f32.mxu1 %v14259_v2  ;;  %11198 = vmatprep.subr.mxu0 %v14230_v1  ;;  %v14286_v17 = vsub.f32 %v14190_v61, %v14259_v2  ;;  %v14294_v10 = vsub.f32 %v14204_v13, %v14224_v26  ;;  %v14298_v25 = vand.u32 4294901760, %v14269_v4 }
  0xed   :  { %19878 = vst [vmem:[#allocation29_spill] sm:$0xff] %v14250_v51  ;;  %19879 = vst [vmem:[#allocation30_spill] sm:$0xff] %v14253_v21  ;;  %11199 = vmatpush3.msra.mxu0 %v14230_v1  ;;  %v14301_v28 = vand.u32 4294901760, %v14264_v30  ;;  %v14304_v57 = vand.u32 4294901760, %v14273_v18  ;;  %v14307_v34 = vand.u32 4294901760, %v14277_v5  ;;  %v14314_v33 = vand.u32 4294901760, %v14290_v63 }
  0xee   :  { %19880 = vst [vmem:[#allocation31_spill] sm:$0xff] %v14256_v6  ;;  %19881 = vst [vmem:[#allocation32_spill] sm:$0xff] %v14259_v2  ;;  %11200 = vmatprep.subr.mxu0 %v14233_v3  ;;  %v14311_v40 = vand.u32 4294901760, %v14286_v17  ;;  %v14317_v53 = vand.u32 4294901760, %v14294_v10  ;;  %v14321_v1 = vsub.f32 %v14202_v8, %v14241_v12  ;;  %v642_v62 = vsub.f32 %v14269_v4, %v14298_v25 }
  0xef   :  { %19882 = vst [vmem:[#allocation33_spill] sm:$0xff] %v14264_v30  ;;  %19883 = vst [vmem:[#allocation34_spill] sm:$0xff] %v14269_v4  ;;  %11201 = vmatpush3.msra.mxu0 %v14233_v3  ;;  %v632_v2 = vsub.f32 %v14264_v30, %v14301_v28  ;;  %v622_v15 = vsub.f32 %v14273_v18, %v14304_v57  ;;  %v612_v59 = vsub.f32 %v14277_v5, %v14307_v34 }
  0xf0   :  { %19884 = vst [vmem:[#allocation35_spill] sm:$0xff] %v14273_v18  ;;  %19885 = vst [vmem:[#allocation36_spill] sm:$0xff] %v14277_v5  ;;  %v14333_v19 = vand.u32 4294901760, %v14238_v36  ;;  %v14336_v49 = vand.u32 4294901760, %v14216_v23  ;;  %11202 = vmatprep.subr.mxu0 %v14236_v45  ;;  %v14342_v3 = vand.u32 4294901760, %v14321_v1 }
  0xf1   :  { %19886 = vst [vmem:[#allocation37_spill] sm:$0xff] %v14280_v11  ;;  %19887 = vst [vmem:[#allocation38_spill] sm:$0xff] %v14286_v17  ;;  %11203 = vmatpush3.msra.mxu0 %v14236_v45  ;;  %v4283_v5 = vmul.f32 2.7557319e-06, %v14216_v23 }
  0xf2   :  { %19888 = vst [vmem:[#allocation39_spill] sm:$0xff] %v14290_v63  ;;  %19889 = vst [vmem:[#allocation40_spill] sm:$0xff] %v14294_v10  ;;  %11204 = vmatprep.subr.mxu0 %v14221_v48  ;;  %v14420_v4 = vsub.f32 %v14238_v36, %v14333_v19 }
  0xf3   :  { %19890 = vst [vmem:[#allocation41_spill] sm:$0xff] %v14298_v25  ;;  %19891 = vst [vmem:[#allocation42_spill] sm:$0xff] %v14301_v28  ;;  %v492_v25 = vsub.f32 %v14286_v17, %v14311_v40  ;;  %v592_v28 = vsub.f32 %v14294_v10, %v14317_v53  ;;  %v14357_v17 = vand.u32 4294901760, %v622_v15  ;;  %11205 = vmatpush3.msra.mxu0 %v14221_v48  ;;  %v4282_v48 = vmul.f32 2.7557319e-06, %v14190_v61 }
  0xf4   :  { %19892 = vst [vmem:[#allocation43_spill] sm:$0xff] %v14304_v57  ;;  %19893 = vst [vmem:[#allocation44_spill] sm:$0xff] %v14307_v34  ;;  %v14345_v57 = vand.u32 4294901760, %v642_v62  ;;  %v602_v34 = vsub.f32 %v14290_v63, %v14314_v33  ;;  %v582_v62 = vsub.f32 %v14321_v1, %v14342_v3  ;;  %v14375_v15 = vsub.f32 %v14196_v7, %v14250_v51 }
  0xf5   :  { %19894 = vst [vmem:[#allocation45_spill] sm:$0xff] %v14311_v40  ;;  %19895 = vst [vmem:[#allocation46_spill] sm:$0xff] %v14314_v33  ;;  %v14353_v18 = vand.u32 4294901760, %v492_v25  ;;  %v14355_v40 = vand.u32 4294901760, %v632_v2  ;;  %v14363_v33 = vand.u32 4294901760, %v612_v59  ;;  %v14371_v25 = vsub.f32 %v14198_v43, %v14247_v39  ;;  %11206 = vmatprep.subr.mxu0 %v14224_v26 }
  0xf6   :  { %19896 = vst [vmem:[#allocation47_spill] sm:$0xff] %v14317_v53  ;;  %19897 = vst [vmem:[#allocation48_spill] sm:$0xff] %v14321_v1  ;;  %11252 = vmatprep.subr.mxu1 %v14345_v57  ;;  %v14367_v53 = vsub.f32 %v14200_v14, %v14244_v38  ;;  %v14381_v59 = vsub.f32 %v14194_v46, %v14253_v21  ;;  %v14385_v2 = vsub.f32 %v14192_v31, %v14256_v6 }
  0xf7   :  { %19898 = vst [vmem:[#allocation49_spill] sm:$0xff] %v14333_v19  ;;  %19899 = vst [vmem:[#allocation50_spill] sm:$0xff] %v14336_v49  ;;  %11228 = vmatprep.mubr.f32.mxu0 %v14353_v18  ;;  %11253 = vmatpush3.msra.mxu1 %v14345_v57  ;;  %v14398_v45 = vand.u32 4294901760, %v14371_v25  ;;  %v14401_v1 = vand.u32 4294901760, %v14375_v15  ;;  %v14405_v10 = vsub.f32 %v14218_v0, %v14280_v11 }
  0xf8   :  { %19900 = vst [vmem:[#allocation51_spill] sm:$0xff] %v14342_v3  ;;  %19901 = vst [vmem:[#allocation52_spill] sm:$0xff] %v14345_v57  ;;  %v14389_v3 = vsub.f32 %v14216_v23, %v14336_v49  ;;  %11254 = vmatprep.subr.mxu1 %v14355_v40  ;;  %v14395_v57 = vand.u32 4294901760, %v14367_v53  ;;  %11207 = vmatpush3.msra.mxu0 %v14224_v26  ;;  %v14410_v63 = vand.u32 4294901760, %v14381_v59 }
  0xf9   :  { %19902 = vst [vmem:[#allocation53_spill] sm:$0xff] %v14353_v18  ;;  %19903 = vst [vmem:[#allocation54_spill] sm:$0xff] %v14355_v40  ;;  %11255 = vmatpush3.msra.mxu1 %v14355_v40  ;;  %v14413_v18 = vand.u32 4294901760, %v14385_v2  ;;  %11208 = vmatprep.subr.mxu0 %v14241_v12  ;;  %v562_v26 = vsub.f32 %v14371_v25, %v14398_v45  ;;  %v552_v49 = vsub.f32 %v14375_v15, %v14401_v1 }
  0xfa   :  { %19904 = vst [vmem:[#allocation55_spill] sm:$0xff] %v14357_v17  ;;  %19905 = vst [vmem:[#allocation56_spill] sm:$0xff] %v14363_v33  ;;  %v14416_v30 = vand.u32 4294901760, %v14389_v3  ;;  %11256 = vmatprep.subr.mxu1 %v14357_v17  ;;  %v572_v40 = vsub.f32 %v14367_v53, %v14395_v57  ;;  %v14431_v61 = vand.u32 4294901760, %v14405_v10  ;;  %11209 = vmatpush3.msra.mxu0 %v14241_v12  ;;  %v14448_v12 = vand.u32 4294901760, %v592_v28 }
  0xfb   :  { %19906 = vst [vmem:[#allocation57_spill] sm:$0xff] %v14367_v53  ;;  %19907 = vst [vmem:[#allocation58_spill] sm:$0xff] %v14371_v25  ;;  %11257 = vmatpush3.msra.mxu1 %v14357_v17  ;;  %v542_v16 = vsub.f32 %v14381_v59, %v14410_v63  ;;  %v532_v23 = vsub.f32 %v14385_v2, %v14413_v18  ;;  %11210 = vmatprep.subr.mxu0 %v14244_v38  ;;  %v14450_v17 = vand.u32 4294901760, %v582_v62 }
  0xfc   :  { %19908 = vst [vmem:[#allocation59_spill] sm:$0xff] %v14375_v15  ;;  %19909 = vst [vmem:[#allocation60_spill] sm:$0xff] %v14381_v59  ;;  %11258 = vmatprep.subr.mxu1 %v14363_v33  ;;  %11211 = vmatpush3.msra.mxu0 %v14244_v38  ;;  %v14472_v62 = vadd.f32 %v4282_v48, %v14160_v41  ;;  %v4286_v41 = vmul.f32 2.7557319e-06, %v14192_v31  ;;  %v4273_v48 = vmul.f32 2.4801588e-05, %v14059_v56 }
  0xfd   :  { %19910 = vst [vmem:[#allocation61_spill] sm:$0xff] %v14385_v2  ;;  %19911 = vst [vmem:[#allocation62_spill] sm:$0xff] %v14389_v3  ;;  %11259 = vmatpush3.msra.mxu1 %v14363_v33  ;;  %11212 = vmatprep.subr.mxu0 %v14247_v39  ;;  %v14466_v28 = vand.u32 4294901760, %v532_v23  ;;  %v4284_v23 = vmul.f32 2.7557319e-06, %v14238_v36  ;;  %v19945_v2 = vld [vmem:[#allocation18_spill] sm:$0xff] }
  0xfe   :  { %19912 = vst [vmem:[#allocation63_spill] sm:$0xff] %v14395_v57  ;;  %19913 = vst [vmem:[#allocation64_spill] sm:$0xff] %v14398_v45  ;;  %v502_v57 = vsub.f32 %v14389_v3, %v14416_v30  ;;  %v14442_v45 = vand.u32 4294901760, %v14420_v4  ;;  %v14460_v3 = vand.u32 4294901760, %v542_v16  ;;  %11213 = vmatpush3.msra.mxu0 %v14247_v39  ;;  %v4412_v38 = vmul.f32 0.041666668, %v19945_v2 }
  0xff   :  { %19914 = vst [vmem:[#allocation65_spill] sm:$0xff] %v14401_v1  ;;  %19915 = vst [vmem:[#allocation66_spill] sm:$0xff] %v14405_v10  ;;  %v14446_v1 = vand.u32 4294901760, %v602_v34  ;;  %v522_v34 = vsub.f32 %v14405_v10, %v14431_v61  ;;  %11214 = vmatprep.subr.mxu0 %v14250_v51  ;;  %v4429_v10 = vmul.f32 0.008333334, %v14218_v0  ;;  %v19948_v59 = vld [vmem:[#allocation20_spill] sm:$0xff] }
 0x100   :  { %19916 = vst [vmem:[#allocation67_spill] sm:$0xff] %v14410_v63  ;;  %19917 = vst [vmem:[#allocation68_spill] sm:$0xff] %v14413_v18  ;;  %v14452_v63 = vand.u32 4294901760, %v572_v40  ;;  %v14456_v18 = vand.u32 4294901760, %v562_v26  ;;  %v14469_v40 = vadd.f32 %v4283_v5, %v14157_v20  ;;  %v14477_v16 = vand.u32 4294901760, %v502_v57  ;;  %11215 = vmatpush3.msra.mxu0 %v14250_v51 }
 0x101   :  { %19918 = vst [vmem:[#allocation69_spill] sm:$0xff] %v14416_v30  ;;  %19919 = vst [vmem:[#allocation70_spill] sm:$0xff] %v14420_v4  ;;  %v14458_v30 = vand.u32 4294901760, %v552_v49  ;;  %11260 = vmatprep.subr.mxu1 %v14446_v1  ;;  %v4285_v49 = vmul.f32 2.7557319e-06, %v14218_v0  ;;  %v512_v26 = vsub.f32 %v14420_v4, %v14442_v45  ;;  %v14494_v57 = vadd.f32 %v4284_v23, %v14166_v47 }
 0x102   :  { %19920 = vst [vmem:[#allocation71_spill] sm:$0xff] %v14431_v61  ;;  %19921 = vst [vmem:[#allocation72_spill] sm:$0xff] %v14442_v45  ;;  %11261 = vmatpush3.msra.mxu1 %v14446_v1  ;;  %v4287_v61 = vmul.f32 2.7557319e-06, %v14194_v46  ;;  %v4289_v5 = vmul.f32 2.7557319e-06, %v14198_v43  ;;  %11216 = vmatprep.subr.mxu0 %v14253_v21 }
 0x103   :  { %19922 = vst [vmem:[#allocation73_spill] sm:$0xff] %v14446_v1  ;;  %19923 = vst [vmem:[#allocation74_spill] sm:$0xff] %v14469_v40  ;;  %11262 = vmatprep.subr.mxu1 %v14448_v12  ;;  %v14486_v20 = vadd.f32 %v4285_v49, %v14163_v22  ;;  %v4272_v40 = vmul.f32 2.4801588e-05, %v14046_v60  ;;  %v4288_v22 = vmul.f32 2.7557319e-06, %v14196_v7  ;;  %v14504_v49 = vadd.f32 %v4286_v41, %v14172_v35 }
 0x104   :  { %19924 = vst [vmem:[#allocation75_spill] sm:$0xff] %v14472_v62  ;;  %11263 = vmatpush3.msra.mxu1 %v14448_v12  ;;  %19926 = vst [vmem:[#allocation77_spill] sm:$0xff] %v14494_v57  ;;  %v14497_v62 = vadd.f32 %v4287_v61, %v14169_v44  ;;  %v4275_v45 = vmul.f32 2.4801588e-05, %v14072_v58  ;;  %v4291_v47 = vmul.f32 2.7557319e-06, %v14202_v8  ;;  %11217 = vmatpush3.msra.mxu0 %v14253_v21 }
 0x105   :  { %19925 = vst [vmem:[#allocation76_spill] sm:$0xff] %v14486_v20  ;;  %11264 = vmatprep.subr.mxu1 %v14450_v17  ;;  %19928 = vst [vmem:[#allocation79_spill] sm:$0xff] %v14504_v49  ;;  %v14506_v20 = vadd.f32 %v4289_v5, %v4273_v48  ;;  %v14512_v44 = vadd.f32 %v4288_v22, %v4272_v40  ;;  %v4274_v61 = vmul.f32 2.4801588e-05, %v14067_v42  ;;  %v4290_v23 = vmul.f32 2.7557319e-06, %v14200_v14 }
 0x106   :  { %19927 = vst [vmem:[#allocation78_spill] sm:$0xff] %v14497_v62  ;;  %11265 = vmatpush3.msra.mxu1 %v14450_v17  ;;  %v4277_v62 = vmul.f32 2.4801588e-05, %v14082_v37  ;;  %11218 = vmatprep.subr.mxu0 %v14256_v6  ;;  %v14519_v35 = vadd.f32 %v4291_v47, %v4275_v45  ;;  %v4293_v41 = vmul.f32 2.7557319e-06, %v14206_v9 }
 0x107   :  { %19929 = vst [vmem:[#allocation80_spill] sm:$0xff] %v14506_v20  ;;  %19930 = vst [vmem:[#allocation81_spill] sm:$0xff] %v14512_v44  ;;  %11266 = vmatprep.subr.mxu1 %v14452_v63  ;;  %v4276_v48 = vmul.f32 2.4801588e-05, %v14077_v55  ;;  %v4292_v5 = vmul.f32 2.7557319e-06, %v14204_v13  ;;  %11219 = vmatpush3.msra.mxu0 %v14256_v6  ;;  %v14526_v40 = vadd.f32 %v4290_v23, %v4274_v61 }
 0x108   :  { %19931 = vst [vmem:[#allocation82_spill] sm:$0xff] %v14519_v35  ;;  %11267 = vmatpush3.msra.mxu1 %v14452_v63  ;;  %v4279_v22 = vmul.f32 2.4801588e-05, %v14092_v52  ;;  %v4295_v44 = vmul.f32 2.7557319e-06, %v14210_v32  ;;  %11220 = vmatprep.subr.mxu0 %v14280_v11  ;;  %v14533_v45 = vadd.f32 %v4293_v41, %v4277_v62  ;;  %v14541_v61 = vand.u32 4294901760, %v522_v34 }
 0x109   :  { %19932 = vst [vmem:[#allocation83_spill] sm:$0xff] %v14526_v40  ;;  %v4278_v20 = vmul.f32 2.4801588e-05, %v14087_v54  ;;  %11268 = vmatprep.subr.mxu1 %v14456_v18  ;;  %v14535_v47 = vadd.f32 %v4292_v5, %v4276_v48  ;;  %v4294_v35 = vmul.f32 2.7557319e-06, %v14208_v29  ;;  %11221 = vmatpush3.msra.mxu0 %v14280_v11  ;;  %v19937_v41 = vld [vmem:[#allocation13_spill] sm:$0xff] }
 0x10a   :  { %19933 = vst [vmem:[#allocation84_spill] sm:$0xff] %v14533_v45  ;;  %v4281_v49 = vmul.f32 2.4801588e-05, %v14107_v24  ;;  %11269 = vmatpush3.msra.mxu1 %v14456_v18  ;;  %v14543_v23 = vadd.f32 %v4295_v44, %v4279_v22  ;;  %v4297_v40 = vmul.f32 2.7557319e-06, %v14214_v50  ;;  %11222 = vmatprep.subr.mxu0 %v14333_v19  ;;  %v19938_v5 = vld [vmem:[#allocation17_spill] sm:$0xff] }
 0x10b   :  { %19934 = vst [vmem:[#allocation85_spill] sm:$0xff] %v14535_v47  ;;  %v4411_v57 = vmul.f32 0.041666668, %v14021_v27  ;;  %11270 = vmatprep.subr.mxu1 %v14458_v30  ;;  %v14549_v62 = vadd.f32 %v4294_v35, %v4278_v20  ;;  %v4427_v48 = vmul.f32 0.008333334, %v19937_v41  ;;  %v19939_v45 = vld [vmem:[#allocation11_spill] sm:$0xff]  ;;  %11223 = vmatpush3.msra.mxu0 %v14333_v19 }
 0x10c   :  { %19935 = vst [vmem:[#allocation86_spill] sm:$0xff] %v14543_v23  ;;  %v4410_v47 = vmul.f32 0.041666668, %v19938_v5  ;;  %v4426_v4 = vmul.f32 0.008333334, %v19939_v45  ;;  %11271 = vmatpush3.msra.mxu1 %v14458_v30  ;;  %v14556_v34 = vand.u32 4294901760, %v512_v26  ;;  %v14558_v44 = vadd.f32 %v4297_v40, %v4281_v49 }
 0x10d   :  { %19936 = vst [vmem:[#allocation87_spill] sm:$0xff] %v14549_v62  ;;  %v19941_v22 = vld [vmem:[#allocation19_spill] sm:$0xff]  ;;  %v19942_v20 = vld [vmem:[#allocation50_spill] sm:$0xff]  ;;  %11272 = vmatprep.subr.mxu1 %v14460_v3  ;;  %v14564_v35 = vadd.f32 %v4427_v48, %v4411_v57  ;;  %v4428_v33 = vmul.f32 0.008333334, %v14238_v36  ;;  %v19947_v49 = vld [vmem:[#allocation21_spill] sm:$0xff] }
 0x10e   :  { %19940 = vst [vmem:[#allocation13_spill] sm:$0xff] %v14558_v44  ;;  %v4413_v23 = vmul.f32 0.041666668, %v19941_v22  ;;  %11224 = vmatprep.subr.mxu0 %v19942_v20  ;;  %v14566_v62 = vadd.f32 %v4426_v4, %v4410_v47  ;;  %11273 = vmatpush3.msra.mxu1 %v14460_v3  ;;  %v4415_v40 = vmul.f32 0.041666668, %v19947_v49  ;;  %v19949_v57 = vld [vmem:[#allocation32_spill] sm:$0xff] }
 0x10f   :  { %19943 = vst [vmem:[#allocation17_spill] sm:$0xff] %v14564_v35  ;;  %11225 = vmatpush3.msra.mxu0 %v19942_v20  ;;  %v4431_v44 = vmul.f32 0.008333334, %v14194_v46  ;;  %v4414_v39 = vmul.f32 0.041666668, %v19948_v59  ;;  %11274 = vmatprep.subr.mxu1 %v14466_v28  ;;  %v14579_v4 = vadd.f32 %v4428_v33, %v4412_v38 }
 0x110   :  { %19944 = vst [vmem:[#allocation11_spill] sm:$0xff] %v14566_v62  ;;  %v14572_v26 = vadd.f32 %v4429_v10, %v4413_v23  ;;  %11226 = vmatprep.subr.mxu0 %v19949_v57  ;;  %v4430_v47 = vmul.f32 0.008333334, %v14192_v31  ;;  %v4417_v48 = vmul.f32 0.041666668, %v14059_v56  ;;  %11275 = vmatpush3.msra.mxu1 %v14466_v28 }
 0x111   :  { %19950 = vst [vmem:[#allocation18_spill] sm:$0xff] %v14579_v4  ;;  %v4433_v62 = vmul.f32 0.008333334, %v14198_v43  ;;  %11227 = vmatpush3.msra.mxu0 %v19949_v57  ;;  %v14586_v10 = vadd.f32 %v4431_v44, %v4415_v40  ;;  %v4416_v23 = vmul.f32 0.041666668, %v14046_v60  ;;  %11276 = vmatprep.subr.mxu1 %v14541_v61  ;;  %v19954_v44 = vld [vmem:[#allocation34_spill] sm:$0xff] }
 0x112   :  { %19946 = vst [vmem:[#allocation19_spill] sm:$0xff] %v14572_v26  ;;  %v4432_v26 = vmul.f32 0.008333334, %v14196_v7  ;;  %v4419_v35 = vmul.f32 0.041666668, %v14072_v58  ;;  %11229 = vmatmul.mubr.f32.vlgmr.msra.gmra.mxu0 %v14477_v16  ;;  %v14593_v33 = vadd.f32 %v4430_v47, %v4414_v39  ;;  %11308 = vmatprep.subr.mxu0 %v19954_v44 }
 0x113   :  { %19951 = vst [vmem:[#allocation21_spill] sm:$0xff] %v14586_v10  ;;  %v14595_v38 = vadd.f32 %v4433_v62, %v4417_v48  ;;  %v4435_v4 = vmul.f32 0.008333334, %v14202_v8  ;;  %v4418_v57 = vmul.f32 0.041666668, %v14067_v42  ;;  %11231 = vmatprep.mubr.f32.mxu0 %v14556_v34  ;;  %11277 = vmatpush3.msra.mxu1 %v14541_v61 }
 0x114   :  { %19952 = vst [vmem:[#allocation20_spill] sm:$0xff] %v14593_v33  ;;  %v14601_v40 = vadd.f32 %v4432_v26, %v4416_v23  ;;  %v4434_v10 = vmul.f32 0.008333334, %v14200_v14  ;;  %v4421_v1 = vmul.f32 0.041666668, %v14082_v37  ;;  %11309 = vmatpush3.msra.mxu0 %v19954_v44  ;;  %11278 = vmatprep.subr.mxu1 %v14556_v34  ;;  %v19957_v26 = vld [vmem:[#allocation33_spill] sm:$0xff] }
 0x115   :  { %19953 = vst [vmem:[#allocation88_spill] sm:$0xff] %v14595_v38  ;;  %v4437_v15 = vmul.f32 0.008333334, %v14206_v9  ;;  %v14608_v39 = vadd.f32 %v4435_v4, %v4419_v35  ;;  %v4420_v62 = vmul.f32 0.041666668, %v14077_v55  ;;  %11310 = vmatprep.subr.mxu0 %v19957_v26  ;;  %11279 = vmatpush3.msra.mxu1 %v14556_v34 }
 0x116   :  { %19955 = vst [vmem:[#allocation89_spill] sm:$0xff] %v14601_v40  ;;  %v4436_v47 = vmul.f32 0.008333334, %v14204_v13  ;;  %v4423_v48 = vmul.f32 0.041666668, %v14092_v52  ;;  %v14615_v23 = vadd.f32 %v4434_v10, %v4418_v57  ;;  %11311 = vmatpush3.msra.mxu0 %v19957_v26  ;;  %11280 = vmatprep.subr.mxu1 %v14477_v16 }
 0x117   :  { %19956 = vst [vmem:[#allocation90_spill] sm:$0xff] %v14608_v39  ;;  %v14617_v40 = vadd.f32 %v4437_v15, %v4421_v1  ;;  %v4439_v38 = vmul.f32 0.008333334, %v14210_v32  ;;  %v4422_v33 = vmul.f32 0.041666668, %v14087_v54  ;;  %11232 = vmatmul.mubr.f32.gmra.mxu0 %v14541_v61  ;;  %v19962_v15 = vld [vmem:[#allocation35_spill] sm:$0xff]  ;;  %11281 = vmatpush3.msra.mxu1 %v14477_v16 }
 0x118   :  { %19958 = vst [vmem:[#allocation91_spill] sm:$0xff] %v14615_v23  ;;  %v14623_v35 = vadd.f32 %v4436_v47, %v4420_v62  ;;  %v4438_v4 = vmul.f32 0.008333334, %v14208_v29  ;;  %v4425_v39 = vmul.f32 0.041666668, %v14107_v24  ;;  %11312 = vmatprep.subr.mxu0 %v19962_v15  ;;  %11234 = vmatprep.mubr.f32.mxu0 %v14466_v28  ;;  %v19965_v62 = vld [vmem:[#allocation53_spill] sm:$0xff] }
 0x119   :  { %19959 = vst [vmem:[#allocation92_spill] sm:$0xff] %v14617_v40  ;;  %v4441_v44 = vmul.f32 0.008333334, %v14214_v50  ;;  %v14630_v1 = vadd.f32 %v4439_v38, %v4423_v48  ;;  %11313 = vmatpush3.msra.mxu0 %v19962_v15  ;;  %11282 = vmatprep.subr.mxu1 %v19965_v62  ;;  %v19966_v47 = vld [vmem:[#allocation36_spill] sm:$0xff]  ;;  %v14662_v48 = vadd.f32 %v19941_v22, %v14218_v0 }
 0x11a   :  { %19960 = vst [vmem:[#allocation93_spill] sm:$0xff] %v14623_v35  ;;  %v14634_v57 = vadd.f32 %v4438_v4, %v4422_v33  ;;  %11314 = vmatprep.subr.mxu0 %v19966_v47  ;;  %11283 = vmatpush3.msra.mxu1 %v19965_v62  ;;  %v19967_v33 = vld [vmem:[#allocation39_spill] sm:$0xff]  ;;  %v19968_v38 = vld [vmem:[#allocation16_spill] sm:$0xff]  ;;  %v14682_v0 = vadd.f32 %v14059_v56, %v14198_v43 }
 0x11b   :  { %19961 = vst [vmem:[#allocation94_spill] sm:$0xff] %v14630_v1  ;;  %v14636_v10 = vadd.f32 %v4441_v44, %v4425_v39  ;;  %11315 = vmatpush3.msra.mxu0 %v19966_v47  ;;  %11285 = vmatmul.mubr.f32.vlgmr.msra.gmra.mxu1 %v19942_v20  ;;  %v14654_v44 = vadd.f32 %v14021_v27, %v19937_v41  ;;  %19971 = vst [vmem:[#allocation98_spill] sm:$0xff] %v14662_v48  ;;  %v19972_v4 = vld [vmem:[#allocation40_spill] sm:$0xff]  ;;  %v20001_v41 = vld [vmem:[#allocation54_spill] sm:$0xff] }
 0x11c   :  { %19963 = vst [vmem:[#allocation95_spill] sm:$0xff] %v14634_v57  ;;  %11235 = vmatmul.mubr.f32.gmra.mxu0 %v14460_v3  ;;  %11316 = vmatprep.subr.mxu0 %v19967_v33  ;;  %v14658_v39 = vadd.f32 %v19938_v5, %v19939_v45  ;;  %v14668_v57 = vadd.f32 %v19945_v2, %v14238_v36  ;;  %19977 = vst [vmem:[#allocation102_spill] sm:$0xff] %v14682_v0  ;;  %v20000_v2 = vld [vmem:[#allocation66_spill] sm:$0xff]  ;;  %v20003_v22 = vld [vmem:[#allocation52_spill] sm:$0xff] }
 0x11d   :  { %19964 = vst [vmem:[#allocation96_spill] sm:$0xff] %v14636_v10  ;;  %11364 = vmatprep.subr.mxu1 %v19968_v38  ;;  %11237 = vmatprep.mubr.f32.mxu0 %v14458_v30  ;;  %19969 = vst [vmem:[#allocation53_spill] sm:$0xff] %v14654_v44  ;;  %v19973_v10 = vld [vmem:[#allocation23_spill] sm:$0xff]  ;;  %v14672_v27 = vadd.f32 %v19947_v49, %v14194_v46  ;;  %v14676_v45 = vadd.f32 %v19948_v59, %v14192_v31  ;;  %v20002_v5 = vld [vmem:[#allocation70_spill] sm:$0xff] }
 0x11e   :  { %11287 = vmatprep.mubr.f32.mxu1 %v14333_v19  ;;  %11317 = vmatpush3.msra.mxu0 %v19967_v33  ;;  %19970 = vst [vmem:[#allocation97_spill] sm:$0xff] %v14658_v39  ;;  %19974 = vst [vmem:[#allocation99_spill] sm:$0xff] %v14668_v57  ;;  %v14686_v36 = vadd.f32 %v14046_v60, %v14196_v7  ;;  %v14690_v46 = vadd.f32 %v14072_v58, %v14202_v8  ;;  %v19983_v7 = vld [vmem:[#allocation48_spill] sm:$0xff]  ;;  %v19999_v59 = vld [vmem:[#allocation55_spill] sm:$0xff] }
 0x11f   :  { %11365 = vmatpush3.msra.mxu1 %v19968_v38  ;;  %11318 = vmatprep.subr.mxu0 %v19972_v4  ;;  %19975 = vst [vmem:[#allocation100_spill] sm:$0xff] %v14672_v27  ;;  %19976 = vst [vmem:[#allocation101_spill] sm:$0xff] %v14676_v45  ;;  %v14696_v31 = vadd.f32 %v14067_v42, %v14200_v14  ;;  %v14700_v56 = vadd.f32 %v14082_v37, %v14206_v9  ;;  %v19984_v58 = vld [vmem:[#allocation24_spill] sm:$0xff]  ;;  %v19992_v14 = vld [vmem:[#allocation73_spill] sm:$0xff] }
 0x120   :  { %11366 = vmatprep.subr.mxu1 %v19973_v10  ;;  %11319 = vmatpush3.msra.mxu0 %v19972_v4  ;;  %19978 = vst [vmem:[#allocation103_spill] sm:$0xff] %v14686_v36  ;;  %19979 = vst [vmem:[#allocation104_spill] sm:$0xff] %v14690_v46  ;;  %v14704_v60 = vadd.f32 %v14077_v55, %v14204_v13  ;;  %v14710_v43 = vadd.f32 %v14092_v52, %v14210_v32  ;;  %v19988_v55 = vld [vmem:[#allocation25_spill] sm:$0xff]  ;;  %v19990_v52 = vld [vmem:[#allocation59_spill] sm:$0xff] }
 0x121   :  { %11367 = vmatpush3.msra.mxu1 %v19973_v10  ;;  %11238 = vmatmul.mubr.f32.gmra.mxu0 %v14456_v18  ;;  %19980 = vst [vmem:[#allocation105_spill] sm:$0xff] %v14696_v31  ;;  %19981 = vst [vmem:[#allocation106_spill] sm:$0xff] %v14700_v56  ;;  %v14714_v42 = vadd.f32 %v14087_v54, %v14208_v29  ;;  %v14718_v37 = vadd.f32 %v14107_v24, %v14214_v50  ;;  %v19989_v54 = vld [vmem:[#allocation14_spill] sm:$0xff]  ;;  %v19991_v24 = vld [vmem:[#allocation15_spill] sm:$0xff] }
 0x122   :  { %11288 = vmatmul.mubr.f32.gmra.mxu1 %v14280_v11  ;;  %19982 = vst [vmem:[#allocation107_spill] sm:$0xff] %v14704_v60  ;;  %11320 = vmatprep.subr.mxu0 %v19983_v7  ;;  %19985 = vst [vmem:[#allocation108_spill] sm:$0xff] %v14710_v43  ;;  %v19993_v8 = vld [vmem:[#allocation28_spill] sm:$0xff]  ;;  %v19995_v9 = vld [vmem:[#allocation26_spill] sm:$0xff] }
 0x123   :  { %11368 = vmatprep.subr.mxu1 %v19984_v58  ;;  %19986 = vst [vmem:[#allocation109_spill] sm:$0xff] %v14714_v42  ;;  %19987 = vst [vmem:[#allocation110_spill] sm:$0xff] %v14718_v37  ;;  %11240 = vmatprep.mubr.f32.mxu0 %v14452_v63  ;;  %v19994_v13 = vld [vmem:[#allocation60_spill] sm:$0xff]  ;;  %v19997_v32 = vld [vmem:[#allocation27_spill] sm:$0xff] }
 0x124   :  { %11290 = vmatprep.mubr.f32.mxu1 %v14256_v6  ;;  %11321 = vmatpush3.msra.mxu0 %v19983_v7  ;;  %v19996_v29 = vld [vmem:[#allocation56_spill] sm:$0xff]  ;;  %v19998_v50 = vld [vmem:[#allocation61_spill] sm:$0xff]  ;;  %v20004_v49 = vld [vmem:[#allocation62_spill] sm:$0xff] }
 0x125   :  { %11369 = vmatpush3.msra.mxu1 %v19984_v58  ;;  %11322 = vmatprep.subr.mxu0 %v14367_v53  ;;  %v20005_v37 = vld [vmem:[#allocation38_spill] sm:$0xff]  ;;  %v20006_v42 = vld [vmem:[#allocation41_spill] sm:$0xff]  ;;  %v20011_v60 = vld [vmem:[#allocation44_spill] sm:$0xff] }
 0x126   :  { %11370 = vmatprep.subr.mxu1 %v19988_v55  ;;  %11323 = vmatpush3.msra.mxu0 %v14367_v53  ;;  %v20009_v43 = vld [vmem:[#allocation45_spill] sm:$0xff]  ;;  %v20013_v31 = vld [vmem:[#allocation46_spill] sm:$0xff]  ;;  %v20014_v46 = vld [vmem:[#allocation72_spill] sm:$0xff] }
 0x127   :  { %11371 = vmatpush3.msra.mxu1 %v19988_v55  ;;  %11241 = vmatmul.mubr.f32.gmra.mxu0 %v14450_v17  ;;  %v20012_v56 = vld [vmem:[#allocation69_spill] sm:$0xff]  ;;  %v20015_v36 = vld [vmem:[#allocation47_spill] sm:$0xff]  ;;  %v20018_v45 = vld [vmem:[#allocation68_spill] sm:$0xff] }
 0x128   :  { %11291 = vmatmul.mubr.f32.gmra.mxu1 %v14253_v21  ;;  %11324 = vmatprep.subr.mxu0 %v14371_v25  ;;  %v20017_v0 = vld [vmem:[#allocation51_spill] sm:$0xff]  ;;  %v20021_v1 = vld [vmem:[#allocation64_spill] sm:$0xff] }
 0x129   :  { %11372 = vmatprep.subr.mxu1 %v19989_v54  ;;  %11243 = vmatprep.mubr.f32.mxu0 %v14448_v12 }
 0x12a   :  { %11293 = vmatprep.mubr.f32.mxu1 %v14250_v51  ;;  %11325 = vmatpush3.msra.mxu0 %v14371_v25 }
 0x12b   :  { %11373 = vmatpush3.msra.mxu1 %v19989_v54  ;;  %11326 = vmatprep.subr.mxu0 %v19990_v52 }
 0x12c   :  { %11374 = vmatprep.subr.mxu1 %v19991_v24  ;;  %11327 = vmatpush3.msra.mxu0 %v19990_v52 }
 0x12d   :  { %11375 = vmatpush3.msra.mxu1 %v19991_v24  ;;  %11244 = vmatmul.mubr.f32.gmra.mxu0 %v19992_v14 }
 0x12e   :  { %11294 = vmatmul.mubr.f32.gmra.mxu1 %v19993_v8  ;;  %11328 = vmatprep.subr.mxu0 %v19994_v13 }
 0x12f   :  { %11376 = vmatprep.subr.mxu1 %v19995_v9  ;;  %11246 = vmatprep.mubr.f32.mxu0 %v19996_v29 }
 0x130   :  { %11296 = vmatprep.mubr.f32.mxu1 %v19997_v32  ;;  %11329 = vmatpush3.msra.mxu0 %v19994_v13 }
 0x131   :  { %11377 = vmatpush3.msra.mxu1 %v19995_v9  ;;  %11330 = vmatprep.subr.mxu0 %v19998_v50 }
 0x132   :  { %11378 = vmatprep.subr.mxu1 %v19997_v32  ;;  %11331 = vmatpush3.msra.mxu0 %v19998_v50 }
 0x133   :  { %11379 = vmatpush3.msra.mxu1 %v19997_v32  ;;  %11247 = vmatmul.mubr.f32.gmra.mxu0 %v19999_v59 }
 0x134   :  { %11297 = vmatmul.mubr.f32.gmra.mxu1 %v19995_v9  ;;  %11332 = vmatprep.subr.mxu0 %v20000_v2 }
 0x135   :  { %11380 = vmatprep.subr.mxu1 %v19993_v8  ;;  %11249 = vmatprep.mubr.f32.mxu0 %v20001_v41 }
 0x136   :  { %11299 = vmatprep.mubr.f32.mxu1 %v19991_v24  ;;  %11333 = vmatpush3.msra.mxu0 %v20000_v2 }
 0x137   :  { %11381 = vmatpush3.msra.mxu1 %v19993_v8  ;;  %11334 = vmatprep.subr.mxu0 %v20002_v5 }
 0x138   :  { %11382 = vmatprep.subr.mxu1 %v14250_v51  ;;  %11335 = vmatpush3.msra.mxu0 %v20002_v5 }
 0x139   :  { %11383 = vmatpush3.msra.mxu1 %v14250_v51  ;;  %11250 = vmatmul.mubr.f32.gmra.mxu0 %v20003_v22 }
 0x13a   :  { %11300 = vmatmul.mubr.f32.gmra.mxu1 %v19989_v54  ;;  %11336 = vmatprep.subr.mxu0 %v20004_v49 }
 0x13b   :  { %11384 = vmatprep.subr.mxu1 %v14253_v21  ;;  %11302 = vmatprep.mubr.f32.mxu1 %v19988_v55 }
 0x13c   :  { %11337 = vmatpush3.msra.mxu0 %v20004_v49  ;;  %11340 = vmatprep.mubr.f32.mxu0 %v20005_v37 }
 0x13d   :  { %11385 = vmatpush3.msra.mxu1 %v14253_v21  ;;  %11338 = vmatprep.subr.mxu0 %v20005_v37 }
 0x13e   :  { %11386 = vmatprep.subr.mxu1 %v14256_v6  ;;  %11339 = vmatpush3.msra.mxu0 %v20005_v37  ;;  %v20007_v37 = vld [vmem:[#allocation42_spill] sm:$0xff] }
 0x13f   :  { %11387 = vmatpush3.msra.mxu1 %v14256_v6  ;;  %11341 = vmatmul.mubr.f32.vlgmr.msra.gmra.mxu0 %v20004_v49  ;;  %v20008_v49 = vld [vmem:[#allocation43_spill] sm:$0xff] }
 0x140   :  { %11303 = vmatmul.mubr.f32.gmra.mxu1 %v19984_v58  ;;  %11388 = vmatprep.subr.mxu1 %v14280_v11 }
 0x141   :  { %11420 = vmatprep.subr.mxu0 %v20006_v42  ;;  %11305 = vmatprep.mubr.f32.mxu1 %v19973_v10 }
 0x142   :  { %11343 = vmatprep.mubr.f32.mxu0 %v20002_v5  ;;  %11389 = vmatpush3.msra.mxu1 %v14280_v11  ;;  %v20010_v5 = vld [vmem:[#allocation32_spill] sm:$0xff] }
 0x143   :  { %11421 = vmatpush3.msra.mxu0 %v20006_v42  ;;  %11390 = vmatprep.subr.mxu1 %v14333_v19 }
 0x144   :  { %11422 = vmatprep.subr.mxu0 %v20007_v37  ;;  %11391 = vmatpush3.msra.mxu1 %v14333_v19 }
 0x145   :  { %11423 = vmatpush3.msra.mxu0 %v20007_v37  ;;  %11306 = vmatmul.mubr.f32.gmra.mxu1 %v19968_v38 }
 0x146   :  { %11344 = vmatmul.mubr.f32.gmra.mxu0 %v20000_v2  ;;  %11392 = vmatprep.subr.mxu1 %v19942_v20  ;;  %v20016_v2 = vld [vmem:[#allocation71_spill] sm:$0xff] }
 0x147   :  { %11424 = vmatprep.subr.mxu0 %v20008_v49  ;;  %11346 = vmatprep.mubr.f32.mxu0 %v19998_v50  ;;  %v20019_v50 = vld [vmem:[#allocation63_spill] sm:$0xff] }
 0x148   :  { %11393 = vmatpush3.msra.mxu1 %v19942_v20  ;;  %11396 = vmatprep.mubr.f32.mxu1 %v20009_v43 }
 0x149   :  { %11425 = vmatpush3.msra.mxu0 %v20008_v49  ;;  %11394 = vmatprep.subr.mxu1 %v20010_v5 }
 0x14a   :  { %11426 = vmatprep.subr.mxu0 %v20011_v60  ;;  %11395 = vmatpush3.msra.mxu1 %v20010_v5 }
 0x14b   :  { %11427 = vmatpush3.msra.mxu0 %v20011_v60  ;;  %11397 = vmatmul.mubr.f32.vlgmr.msra.gmra.mxu1 %v20012_v56 }
 0x14c   :  { %11347 = vmatmul.mubr.f32.gmra.mxu0 %v19994_v13  ;;  %11428 = vmatprep.subr.mxu0 %v20013_v31  ;;  %v20020_v13 = vld [vmem:[#allocation67_spill] sm:$0xff] }
 0x14d   :  { %11476 = vmatprep.subr.mxu1 %v19968_v38  ;;  %11349 = vmatprep.mubr.f32.mxu0 %v19990_v52  ;;  %v20022_v52 = vld [vmem:[#allocation65_spill] sm:$0xff] }
 0x14e   :  { %11399 = vmatprep.mubr.f32.mxu1 %v20014_v46  ;;  %11429 = vmatpush3.msra.mxu0 %v20013_v31 }
 0x14f   :  { %11477 = vmatpush3.msra.mxu1 %v19968_v38  ;;  %11430 = vmatprep.subr.mxu0 %v20015_v36 }
 0x150   :  { %11478 = vmatprep.subr.mxu1 %v19973_v10  ;;  %11431 = vmatpush3.msra.mxu0 %v20015_v36 }
 0x151   :  { %11479 = vmatpush3.msra.mxu1 %v19973_v10  ;;  %11350 = vmatmul.mubr.f32.gmra.mxu0 %v14371_v25 }
 0x152   :  { %11400 = vmatmul.mubr.f32.gmra.mxu1 %v20016_v2  ;;  %11432 = vmatprep.subr.mxu0 %v20017_v0 }
 0x153   :  { %11480 = vmatprep.subr.mxu1 %v19984_v58  ;;  %11352 = vmatprep.mubr.f32.mxu0 %v14367_v53 }
 0x154   :  { %11402 = vmatprep.mubr.f32.mxu1 %v20018_v45  ;;  %11433 = vmatpush3.msra.mxu0 %v20017_v0 }
 0x155   :  { %11481 = vmatpush3.msra.mxu1 %v19984_v58  ;;  %11434 = vmatprep.subr.mxu0 %v20019_v50 }
 0x156   :  { %11482 = vmatprep.subr.mxu1 %v19988_v55  ;;  %11435 = vmatpush3.msra.mxu0 %v20019_v50 }
 0x157   :  { %11483 = vmatpush3.msra.mxu1 %v19988_v55  ;;  %11353 = vmatmul.mubr.f32.gmra.mxu0 %v19983_v7 }
 0x158   :  { %11403 = vmatmul.mubr.f32.gmra.mxu1 %v20020_v13  ;;  %11436 = vmatprep.subr.mxu0 %v20021_v1 }
 0x159   :  { %11484 = vmatprep.subr.mxu1 %v19989_v54  ;;  %11355 = vmatprep.mubr.f32.mxu0 %v19972_v4 }
 0x15a   :  { %11405 = vmatprep.mubr.f32.mxu1 %v20022_v52  ;;  %11437 = vmatpush3.msra.mxu0 %v20021_v1 }
 0x15b   :  { %11485 = vmatpush3.msra.mxu1 %v19989_v54  ;;  %11438 = vmatprep.subr.mxu0 %v20022_v52 }
 0x15c   :  { %11486 = vmatprep.subr.mxu1 %v19991_v24  ;;  %11439 = vmatpush3.msra.mxu0 %v20022_v52 }
 0x15d   :  { %11487 = vmatpush3.msra.mxu1 %v19991_v24  ;;  %11356 = vmatmul.mubr.f32.gmra.mxu0 %v19967_v33 }
 0x15e   :  { %11406 = vmatmul.mubr.f32.gmra.mxu1 %v20021_v1  ;;  %11440 = vmatprep.subr.mxu0 %v20020_v13 }
 0x15f   :  { %11488 = vmatprep.subr.mxu1 %v19995_v9  ;;  %11358 = vmatprep.mubr.f32.mxu0 %v19966_v47 }
 0x160   :  { %11408 = vmatprep.mubr.f32.mxu1 %v20019_v50  ;;  %11441 = vmatpush3.msra.mxu0 %v20020_v13 }
 0x161   :  { %11489 = vmatpush3.msra.mxu1 %v19995_v9  ;;  %11442 = vmatprep.subr.mxu0 %v20018_v45 }
 0x162   :  { %11490 = vmatprep.subr.mxu1 %v19997_v32  ;;  %11443 = vmatpush3.msra.mxu0 %v20018_v45  ;;  %v20023_v45 = vld [vmem:[#allocation34_spill] sm:$0xff] }
 0x163   :  { %11491 = vmatpush3.msra.mxu1 %v19997_v32  ;;  %11359 = vmatmul.mubr.f32.gmra.mxu0 %v19962_v15  ;;  %v20029_v15 = vld [vmem:[#allocation22_spill] sm:$0xff] }
 0x164   :  { %11409 = vmatmul.mubr.f32.gmra.mxu1 %v20017_v0  ;;  %11444 = vmatprep.subr.mxu0 %v20016_v2 }
 0x165   :  { %11492 = vmatprep.subr.mxu1 %v19993_v8  ;;  %11361 = vmatprep.mubr.f32.mxu0 %v19957_v26 }
 0x166   :  { %11411 = vmatprep.mubr.f32.mxu1 %v20015_v36  ;;  %11445 = vmatpush3.msra.mxu0 %v20016_v2 }
 0x167   :  { %11493 = vmatpush3.msra.mxu1 %v19993_v8  ;;  %11446 = vmatprep.subr.mxu0 %v20014_v46 }
 0x168   :  { %11494 = vmatprep.subr.mxu1 %v14250_v51  ;;  %11447 = vmatpush3.msra.mxu0 %v20014_v46 }
 0x169   :  { %11495 = vmatpush3.msra.mxu1 %v14250_v51  ;;  %11362 = vmatmul.mubr.f32.gmra.mxu0 %v20023_v45 }
 0x16a   :  { %11412 = vmatmul.mubr.f32.gmra.mxu1 %v20013_v31  ;;  %11448 = vmatprep.subr.mxu0 %v20012_v56 }
 0x16b   :  { %11496 = vmatprep.subr.mxu1 %v14253_v21  ;;  %11414 = vmatprep.mubr.f32.mxu1 %v20011_v60 }
 0x16c   :  { %11449 = vmatpush3.msra.mxu0 %v20012_v56  ;;  %11452 = vmatprep.mubr.f32.mxu0 %v20010_v5 }
 0x16d   :  { %11497 = vmatpush3.msra.mxu1 %v14253_v21  ;;  %11450 = vmatprep.subr.mxu0 %v20009_v43 }
 0x16e   :  { %11498 = vmatprep.subr.mxu1 %v14256_v6  ;;  %11451 = vmatpush3.msra.mxu0 %v20009_v43 }
 0x16f   :  { %11499 = vmatpush3.msra.mxu1 %v14256_v6  ;;  %11453 = vmatmul.mubr.f32.vlgmr.msra.gmra.mxu0 %v19942_v20 }
 0x170   :  { %11415 = vmatmul.mubr.f32.gmra.mxu1 %v20008_v49  ;;  %11500 = vmatprep.subr.mxu1 %v14280_v11 }
 0x171   :  { %11532 = vmatprep.subr.mxu0 %v19968_v38  ;;  %11417 = vmatprep.mubr.f32.mxu1 %v20007_v37 }
 0x172   :  { %11455 = vmatprep.mubr.f32.mxu0 %v14333_v19  ;;  %11501 = vmatpush3.msra.mxu1 %v14280_v11 }
 0x173   :  { %11533 = vmatpush3.msra.mxu0 %v19968_v38  ;;  %11502 = vmatprep.subr.mxu1 %v14333_v19 }
 0x174   :  { %11534 = vmatprep.subr.mxu0 %v19973_v10  ;;  %11503 = vmatpush3.msra.mxu1 %v14333_v19 }
 0x175   :  { %11535 = vmatpush3.msra.mxu0 %v19973_v10  ;;  %11418 = vmatmul.mubr.f32.gmra.mxu1 %v20006_v42 }
 0x176   :  { %11456 = vmatmul.mubr.f32.gmra.mxu0 %v14280_v11  ;;  %11504 = vmatprep.subr.mxu1 %v19942_v20 }
 0x177   :  { %11536 = vmatprep.subr.mxu0 %v19984_v58  ;;  %11458 = vmatprep.mubr.f32.mxu0 %v14256_v6 }
 0x178   :  { %11505 = vmatpush3.msra.mxu1 %v19942_v20  ;;  %11508 = vmatprep.mubr.f32.mxu1 %v20010_v5 }
 0x179   :  { %11537 = vmatpush3.msra.mxu0 %v19984_v58  ;;  %11506 = vmatprep.subr.mxu1 %v20010_v5 }
 0x17a   :  { %11538 = vmatprep.subr.mxu0 %v19988_v55  ;;  %11507 = vmatpush3.msra.mxu1 %v20010_v5 }
 0x17b   :  { %11539 = vmatpush3.msra.mxu0 %v19988_v55  ;;  %11509 = vmatmul.mubr.f32.vlgmr.msra.gmra.mxu1 %v19942_v20 }
 0x17c   :  { %11459 = vmatmul.mubr.f32.gmra.mxu0 %v14253_v21  ;;  %11540 = vmatprep.subr.mxu0 %v19989_v54 }
 0x17d   :  { %11588 = vmatprep.subr.mxu1 %v20003_v22  ;;  %11461 = vmatprep.mubr.f32.mxu0 %v14250_v51 }
 0x17e   :  { %11511 = vmatprep.mubr.f32.mxu1 %v14333_v19  ;;  %11541 = vmatpush3.msra.mxu0 %v19989_v54 }
 0x17f   :  { %11589 = vmatpush3.msra.mxu1 %v20003_v22  ;;  %11542 = vmatprep.subr.mxu0 %v19991_v24 }
 0x180   :  { %11590 = vmatprep.subr.mxu1 %v20001_v41  ;;  %11543 = vmatpush3.msra.mxu0 %v19991_v24 }
 0x181   :  { %11591 = vmatpush3.msra.mxu1 %v20001_v41  ;;  %11462 = vmatmul.mubr.f32.gmra.mxu0 %v19993_v8 }
 0x182   :  { %11512 = vmatmul.mubr.f32.gmra.mxu1 %v14280_v11  ;;  %11544 = vmatprep.subr.mxu0 %v19995_v9 }
 0x183   :  { %11592 = vmatprep.subr.mxu1 %v19999_v59  ;;  %11464 = vmatprep.mubr.f32.mxu0 %v19997_v32 }
 0x184   :  { %11514 = vmatprep.mubr.f32.mxu1 %v14256_v6  ;;  %11545 = vmatpush3.msra.mxu0 %v19995_v9 }
 0x185   :  { %11593 = vmatpush3.msra.mxu1 %v19999_v59  ;;  %11546 = vmatprep.subr.mxu0 %v19997_v32 }
 0x186   :  { %11594 = vmatprep.subr.mxu1 %v19996_v29  ;;  %11547 = vmatpush3.msra.mxu0 %v19997_v32 }
 0x187   :  { %11595 = vmatpush3.msra.mxu1 %v19996_v29  ;;  %11465 = vmatmul.mubr.f32.gmra.mxu0 %v19995_v9 }
 0x188   :  { %11515 = vmatmul.mubr.f32.gmra.mxu1 %v14253_v21  ;;  %11548 = vmatprep.subr.mxu0 %v19993_v8 }
 0x189   :  { %11596 = vmatprep.subr.mxu1 %v19992_v14  ;;  %11467 = vmatprep.mubr.f32.mxu0 %v19991_v24 }
 0x18a   :  { %11517 = vmatprep.mubr.f32.mxu1 %v14250_v51  ;;  %11549 = vmatpush3.msra.mxu0 %v19993_v8 }
 0x18b   :  { %11597 = vmatpush3.msra.mxu1 %v19992_v14  ;;  %11550 = vmatprep.subr.mxu0 %v14250_v51 }
 0x18c   :  { %11598 = vmatprep.subr.mxu1 %v14448_v12  ;;  %11551 = vmatpush3.msra.mxu0 %v14250_v51 }
 0x18d   :  { %11599 = vmatpush3.msra.mxu1 %v14448_v12  ;;  %11468 = vmatmul.mubr.f32.gmra.mxu0 %v19989_v54 }
 0x18e   :  { %11518 = vmatmul.mubr.f32.gmra.mxu1 %v19993_v8  ;;  %11552 = vmatprep.subr.mxu0 %v14253_v21 }
 0x18f   :  { %11600 = vmatprep.subr.mxu1 %v14450_v17  ;;  %11470 = vmatprep.mubr.f32.mxu0 %v19988_v55 }
 0x190   :  { %11520 = vmatprep.mubr.f32.mxu1 %v19997_v32  ;;  %11553 = vmatpush3.msra.mxu0 %v14253_v21 }
 0x191   :  { %11601 = vmatpush3.msra.mxu1 %v14450_v17  ;;  %11554 = vmatprep.subr.mxu0 %v14256_v6 }
 0x192   :  { %11602 = vmatprep.subr.mxu1 %v14452_v63  ;;  %11555 = vmatpush3.msra.mxu0 %v14256_v6 }
 0x193   :  { %11603 = vmatpush3.msra.mxu1 %v14452_v63  ;;  %11471 = vmatmul.mubr.f32.gmra.mxu0 %v19984_v58 }
 0x194   :  { %11521 = vmatmul.mubr.f32.gmra.mxu1 %v19995_v9  ;;  %11556 = vmatprep.subr.mxu0 %v14280_v11 }
 0x195   :  { %11604 = vmatprep.subr.mxu1 %v14456_v18  ;;  %11473 = vmatprep.mubr.f32.mxu0 %v19973_v10 }
 0x196   :  { %11523 = vmatprep.mubr.f32.mxu1 %v19991_v24  ;;  %11557 = vmatpush3.msra.mxu0 %v14280_v11  ;;  %v4280_v24 = vmul.f32 2.4801588e-05, %v20029_v15 }
 0x197   :  { %11605 = vmatpush3.msra.mxu1 %v14456_v18  ;;  %11558 = vmatprep.subr.mxu0 %v14333_v19 }
 0x198   :  { %11606 = vmatprep.subr.mxu1 %v14458_v30  ;;  %11559 = vmatpush3.msra.mxu0 %v14333_v19 }
 0x199   :  { %11607 = vmatpush3.msra.mxu1 %v14458_v30  ;;  %11474 = vmatmul.mubr.f32.gmra.mxu0 %v19968_v38 }
 0x19a   :  { %11524 = vmatmul.mubr.f32.gmra.mxu1 %v19989_v54  ;;  %11560 = vmatprep.subr.mxu0 %v19942_v20  ;;  %v20030_v54 = vld [vmem:[#allocation12_spill] sm:$0xff] }
 0x19b   :  { %11608 = vmatprep.subr.mxu1 %v14460_v3  ;;  %11526 = vmatprep.mubr.f32.mxu1 %v19988_v55  ;;  %v4296_v55 = vmul.f32 2.7557319e-06, %v20030_v54 }
 0x19c   :  { %11561 = vmatpush3.msra.mxu0 %v19942_v20  ;;  %11609 = vmatpush3.msra.mxu1 %v14460_v3 }
 0x19d   :  { %11562 = vmatprep.subr.mxu0 %v20010_v5  ;;  %11610 = vmatprep.subr.mxu1 %v14466_v28 }
 0x19e   :  { %11563 = vmatpush3.msra.mxu0 %v20010_v5  ;;  %11611 = vmatpush3.msra.mxu1 %v14466_v28 }
 0x19f   :  { %11644 = vmatprep.subr.mxu0 %v20023_v45  ;;  %11527 = vmatmul.mubr.f32.gmra.mxu1 %v19984_v58 }
 0x1a0   :  { %11612 = vmatprep.subr.mxu1 %v14541_v61  ;;  %11529 = vmatprep.mubr.f32.mxu1 %v19973_v10 }
 0x1a1   :  { %11613 = vmatpush3.msra.mxu1 %v14541_v61 }
 0x1a2   :  { %11614 = vmatprep.subr.mxu1 %v14556_v34 }
 0x1a3   :  { %11615 = vmatpush3.msra.mxu1 %v14556_v34 }
 0x1a4   :  { %11530 = vmatmul.mubr.f32.gmra.mxu1 %v19968_v38  ;;  %11616 = vmatprep.subr.mxu1 %v14477_v16 }
 0x1a5   :  { %11617 = vmatpush3.msra.mxu1 %v14477_v16 }
 0x1a6   :  { %11618 = vmatprep.subr.mxu1 %v19965_v62 }
 0x1a7   :  { %11619 = vmatpush3.msra.mxu1 %v19965_v62 }
 0x1a8   :  { %11700 = vmatprep.subr.mxu1 %v19968_v38  ;;  %v15024_v38 = vadd.f32 %v4296_v55, %v4280_v24 }
 0x1aa   :  { %20032 = vst [vmem:[#allocation112_spill] sm:$0xff] %v15024_v38 }
 0x1d2   :  { %v14980_v3 = vpop.f32.mrf.mxu0 }
 0x1d4   :  { %v14982_v12 = vpop.f32.mrf.mxu0 }
 0x1d7   :  { %v14984_v30 = vpop.f32.mrf.mxu0 }
 0x1d9   :  { %v14986_v18 = vpop.f32.mrf.mxu0 }
 0x1db   :  { %v14990_v63 = vpop.f32.mrf.mxu1 }
 0x1dc   :  { %v14988_v17 = vpop.f32.mrf.mxu0 }
 0x1dd   :  { %v14994_v16 = vpop.f32.mrf.mxu1 }
 0x1de   :  { %v14992_v28 = vpop.f32.mrf.mxu0 }
 0x1e1   :  { %v11239_v61 = vpop.f32.mrf.mxu0 }
 0x1e2   :  { %v14996_v34 = vpop.f32.mrf.mxu1 }
 0x1e3   :  { %v14998_v62 = vpop.f32.mrf.mxu0 }
 0x1e4   :  { %v15000_v14 = vpop.f32.mrf.mxu1 }
 0x1e7   :  { %v11242_v29 = vpop.f32.mrf.mxu0 }
 0x1e8   :  { %v15002_v59 = vpop.f32.mrf.mxu1 }
 0x1e9   :  { %v15004_v41 = vpop.f32.mrf.mxu0  ;;  %v827_v55 = vadd.f32 %v15002_v59, %v14988_v17 }
 0x1ea   :  { %v15006_v22 = vpop.f32.mrf.mxu1 }
 0x1eb   :  { %v821_v24 = vadd.f32 %v15006_v22, %v14992_v28 }
 0x1ed   :  { %v11245_v43 = vpop.f32.mrf.mxu0 }
 0x1ee   :  { %v11295_v56 = vpop.f32.mrf.mxu1 }
 0x1ef   :  { %v15008_v46 = vadd.f32 %v11295_v56, %v11239_v61  ;;  %v15010_v2 = vpop.f32.mrf.mxu0 }
 0x1f0   :  { %v832_v13 = vpop.f32.mrf.mxu1 }
 0x1f1   :  { %20024 = vst [vmem:[#allocation73_spill] sm:$0xff] %v15008_v46  ;;  %v815_v46 = vadd.f32 %v14996_v34, %v14984_v30 }
 0x1f3   :  { %v11248_v52 = vpop.f32.mrf.mxu0 }
 0x1f4   :  { %v11298_v1 = vpop.f32.mrf.mxu1 }
 0x1f5   :  { %v15012_v50 = vadd.f32 %v11298_v1, %v11242_v29  ;;  %v615_v0 = vpop.f32.mrf.mxu0 }
 0x1f6   :  { %v844_v36 = vpop.f32.mrf.mxu1 }
 0x1f7   :  { %20025 = vst [vmem:[#allocation56_spill] sm:$0xff] %v15012_v50  ;;  %v797_v50 = vadd.f32 %v14994_v16, %v14982_v12 }
 0x1f9   :  { %v11251_v31 = vpop.f32.mrf.mxu0 }
 0x1fa   :  { %v11301_v60 = vpop.f32.mrf.mxu1 }
 0x1fb   :  { %v15014_v49 = vadd.f32 %v11301_v60, %v11245_v43  ;;  %v635_v37 = vpop.f32.mrf.mxu0 }
 0x1fc   :  { %v856_v42 = vpop.f32.mrf.mxu1 }
 0x1fd   :  { %20026 = vst [vmem:[#allocation55_spill] sm:$0xff] %v15014_v49  ;;  %v803_v49 = vadd.f32 %v14990_v63, %v14980_v3  ;;  %v857_v12 = vadd.f32 %v856_v42, %v15010_v2 }
 0x1fe   :  { %v20036_v42 = vld [vmem:[#allocation56_spill] sm:$0xff] }
 0x1ff   :  { %v11342_v20 = vpop.f32.mrf.mxu0 }
 0x200   :  { %v11304_v5 = vpop.f32.mrf.mxu1  ;;  %v998_v16 = vadd.f32 %v11342_v20, %v803_v49 }
 0x201   :  { %v15016_v19 = vadd.f32 %v11304_v5, %v11248_v52  ;;  %v990_v61 = vpop.f32.mrf.mxu0 }
 0x202   :  { %v868_v56 = vpop.f32.mrf.mxu1  ;;  %v991_v30 = vadd.f32 %v990_v61, %v797_v50 }
 0x203   :  { %20027 = vst [vmem:[#allocation54_spill] sm:$0xff] %v15016_v19  ;;  %v15030_v19 = vmul.f32 0.008333334, %v20030_v54  ;;  %v845_v54 = vadd.f32 %v844_v36, %v15004_v41 }
 0x205   :  { %v11307_v27 = vpop.f32.mrf.mxu1  ;;  %20034 = vst [vmem:[#allocation114_spill] sm:$0xff] %v15030_v19  ;;  %v869_v19 = vadd.f32 %v868_v56, %v615_v0 }
 0x206   :  { %v11345_v11 = vpop.f32.mrf.mxu0  ;;  %v15018_v57 = vadd.f32 %v11307_v27, %v11251_v31 }
 0x207   :  { %v880_v1 = vpop.f32.mrf.mxu1  ;;  %v1012_v34 = vadd.f32 %v11345_v11, %v815_v46  ;;  %v20037_v11 = vld [vmem:[#allocation55_spill] sm:$0xff] }
 0x208   :  { %20028 = vst [vmem:[#allocation52_spill] sm:$0xff] %v15018_v57  ;;  %v1004_v29 = vpop.f32.mrf.mxu0  ;;  %v15027_v57 = vmul.f32 0.041666668, %v20029_v15  ;;  %v833_v15 = vadd.f32 %v832_v13, %v14998_v62  ;;  %v20035_v13 = vld [vmem:[#allocation73_spill] sm:$0xff] }
 0x20a   :  { %20033 = vst [vmem:[#allocation113_spill] sm:$0xff] %v15027_v57  ;;  %v881_v57 = vadd.f32 %v880_v1, %v635_v37 }
 0x20b   :  { %v11398_v25 = vpop.f32.mrf.mxu1 }
 0x20c   :  { %v11348_v35 = vpop.f32.mrf.mxu0  ;;  %v1193_v59 = vadd.f32 %v11398_v25, %v998_v16 }
 0x20d   :  { %v1184_v6 = vpop.f32.mrf.mxu1 }
 0x20e   :  { %v1018_v40 = vpop.f32.mrf.mxu0  ;;  %v1185_v28 = vadd.f32 %v1184_v6, %v991_v30 }
 0x20f   :  { %v1019_v22 = vadd.f32 %v1018_v40, %v821_v24  ;;  %v20038_v40 = vld [vmem:[#allocation54_spill] sm:$0xff] }
 0x211   :  { %v11351_v60 = vpop.f32.mrf.mxu0 }
 0x212   :  { %v11401_v43 = vpop.f32.mrf.mxu1  ;;  %v1040_v62 = vadd.f32 %v11351_v60, %v20035_v13 }
 0x213   :  { %v1032_v53 = vpop.f32.mrf.mxu0  ;;  %v1209_v36 = vadd.f32 %v11401_v43, %v1012_v34 }
 0x214   :  { %v1200_v21 = vpop.f32.mrf.mxu1  ;;  %v1033_v41 = vadd.f32 %v1032_v53, %v833_v15 }
 0x217   :  { %v11354_v48 = vpop.f32.mrf.mxu0 }
 0x218   :  { %v11404_v23 = vpop.f32.mrf.mxu1  ;;  %v1054_v20 = vadd.f32 %v11354_v48, %v20036_v42  ;;  %v20054_v42 = vld [vmem:[#allocation23_spill] sm:$0xff] }
 0x219   :  { %v1046_v52 = vpop.f32.mrf.mxu0 }
 0x21a   :  { %v1216_v5 = vpop.f32.mrf.mxu1  ;;  %v1047_v0 = vadd.f32 %v1046_v52, %v845_v54 }
 0x21b   :  { %v1217_v56 = vadd.f32 %v1216_v5, %v1019_v22  ;;  %v20049_v22 = vld [vmem:[#allocation11_spill] sm:$0xff] }
 0x21d   :  { %v11357_v7 = vpop.f32.mrf.mxu0 }
 0x21e   :  { %v11407_v51 = vpop.f32.mrf.mxu1  ;;  %v1068_v46 = vadd.f32 %v11357_v7, %v20037_v11 }
 0x21f   :  { %v1060_v4 = vpop.f32.mrf.mxu0 }
 0x220   :  { %v1232_v8 = vpop.f32.mrf.mxu1 }
 0x221   :  { %v1233_v37 = vadd.f32 %v1232_v8, %v1033_v41  ;;  %v20052_v41 = vld [vmem:[#allocation16_spill] sm:$0xff] }
 0x223   :  { %v11360_v27 = vpop.f32.mrf.mxu0 }
 0x224   :  { %v11410_v31 = vpop.f32.mrf.mxu1  ;;  %v1082_v6 = vadd.f32 %v11360_v27, %v20038_v40  ;;  %v20057_v40 = vld [vmem:[#allocation76_spill] sm:$0xff] }
 0x225   :  { %v1074_v39 = vpop.f32.mrf.mxu0  ;;  %v15051_v1 = vadd.f32 %v11410_v31, %v1054_v20  ;;  %v20045_v31 = vld [vmem:[#allocation17_spill] sm:$0xff] }
 0x226   :  { %v1248_v33 = vpop.f32.mrf.mxu1 }
 0x227   :  { %v15055_v15 = vadd.f32 %v1248_v33, %v1047_v0 }
 0x229   :  { %v11363_v32 = vpop.f32.mrf.mxu0 }
 0x22a   :  { %v11413_v47 = vpop.f32.mrf.mxu1 }
 0x22b   :  { %v1088_v9 = vpop.f32.mrf.mxu0 }
 0x22c   :  { %v1264_v44 = vpop.f32.mrf.mxu1 }
 0x22f   :  { %v11454_v45 = vpop.f32.mrf.mxu0 }
 0x230   :  { %v11416_v26 = vpop.f32.mrf.mxu1  ;;  %v1430_v50 = vadd.f32 %v11454_v45, %v1193_v59  ;;  %v15058_v45 = vadd.f32 %v11413_v47, %v1068_v46  ;;  %v20047_v59 = vld [vmem:[#allocation75_spill] sm:$0xff] }
 0x231   :  { %v1423_v10 = vpop.f32.mrf.mxu0  ;;  %v15068_v43 = vadd.f32 %v11416_v26, %v1082_v6 }
 0x232   :  { %v15022_v58 = vpop.f32.mrf.mxu1 }
 0x233   :  { %20031 = vst [vmem:[#allocation111_spill] sm:$0xff] %v15022_v58  ;;  %v809_v58 = vadd.f32 %v15000_v14, %v14986_v18  ;;  %v1026_v14 = vadd.f32 %v11348_v35, %v827_v55  ;;  %v1061_v35 = vadd.f32 %v1060_v4, %v857_v12  ;;  %v1089_v4 = vadd.f32 %v1088_v9, %v881_v57 }
 0x235   :  { %v11419_v3 = vpop.f32.mrf.mxu1  ;;  %v1005_v18 = vadd.f32 %v1004_v29, %v809_v58  ;;  %v1225_v49 = vadd.f32 %v11404_v23, %v1026_v14  ;;  %v1241_v58 = vadd.f32 %v11407_v51, %v1040_v62  ;;  %v1424_v29 = vadd.f32 %v1423_v10, %v1185_v28  ;;  %v20039_v23 = vld [vmem:[#allocation52_spill] sm:$0xff] }
 0x236   :  { %v11457_v63 = vpop.f32.mrf.mxu0  ;;  %v1096_v48 = vadd.f32 %v11363_v32, %v20039_v23  ;;  %v15066_v10 = vadd.f32 %v1264_v44, %v1061_v35 }
 0x237   :  { %v1296_v38 = vpop.f32.mrf.mxu1  ;;  %v1201_v2 = vadd.f32 %v1200_v21, %v1005_v18  ;;  %v1075_v21 = vadd.f32 %v1074_v39, %v869_v19  ;;  %v1442_v19 = vadd.f32 %v11457_v63, %v1209_v36  ;;  %v20042_v39 = vld [vmem:[#allocation74_spill] sm:$0xff] }
 0x238   :  { %v1435_v17 = vpop.f32.mrf.mxu0  ;;  %v15085_v26 = vadd.f32 %v11419_v3, %v1096_v48  ;;  %v15101_v3 = vadd.f32 %v1296_v38, %v1089_v4 }
 0x239   :  { %v1436_v63 = vadd.f32 %v1435_v17, %v1201_v2 }
 0x23a   :  { %v20044_v52 = vld [vmem:[#allocation111_spill] sm:$0xff] }
 0x23b   :  { %v11510_v25 = vpop.f32.mrf.mxu1  ;;  %v15083_v44 = vadd.f32 %v20044_v52, %v1075_v21 }
 0x23c   :  { %v11460_v61 = vpop.f32.mrf.mxu0  ;;  %v15053_v53 = vadd.f32 %v11510_v25, %v1430_v50  ;;  %v20056_v25 = vld [vmem:[#allocation24_spill] sm:$0xff] }
 0x23d   :  { %v1600_v51 = vpop.f32.mrf.mxu1  ;;  %v1454_v34 = vadd.f32 %v11460_v61, %v1225_v49 }
 0x23e   :  { %v1447_v7 = vpop.f32.mrf.mxu0  ;;  %v15061_v54 = vand.u32 4294901760, %v15053_v53  ;;  %v15063_v8 = vadd.f32 %v1600_v51, %v1424_v29  ;;  %v4315_v60 = vmul.f32 2.755732e-07, %v15053_v53  ;;  %v4459_v33 = vmul.f32 0.0013888889, %v15053_v53  ;;  %v20059_v29 = vld [vmem:[#allocation19_spill] sm:$0xff] }
 0x23f   :  { %v1448_v13 = vadd.f32 %v1447_v7, %v1217_v56 }
 0x240   :  { %20040 = vst [vmem:[#allocation73_spill] sm:$0xff] %v15061_v54  ;;  %v15073_v47 = vsub.f32 %v15053_v53, %v15061_v54  ;;  %v15076_v57 = vand.u32 4294901760, %v15063_v8  ;;  %v15079_v9 = vadd.f32 %v4315_v60, %v20042_v39  ;;  %v4314_v32 = vmul.f32 2.755732e-07, %v15063_v8 }
 0x241   :  { %v11463_v5 = vpop.f32.mrf.mxu0  ;;  %v15088_v55 = vadd.f32 %v4459_v33, %v20045_v31  ;;  %v4458_v24 = vmul.f32 0.0013888889, %v15063_v8  ;;  %v20063_v33 = vld [vmem:[#allocation25_spill] sm:$0xff] }
 0x242   :  { %20041 = vst [vmem:[#allocation56_spill] sm:$0xff] %v15076_v57  ;;  %20043 = vst [vmem:[#allocation55_spill] sm:$0xff] %v15079_v9  ;;  %v11513_v27 = vpop.f32.mrf.mxu1  ;;  %v15093_v12 = vsub.f32 %v15063_v8, %v15076_v57  ;;  %11620 = vmatprep.mubr.f32.mxu1 %v15076_v57  ;;  %v15099_v30 = vand.u32 4294901760, %v15073_v47  ;;  %v15105_v17 = vadd.f32 %v4314_v32, %v20047_v59  ;;  %v20064_v32 = vld [vmem:[#allocation77_spill] sm:$0xff]  ;;  %v5841_v59 = vmul.f32 0.5, %v15053_v53  ;;  %v20073_v53 = vld [vmem:[#allocation15_spill] sm:$0xff] }
 0x243   :  { %20046 = vst [vmem:[#allocation54_spill] sm:$0xff] %v15088_v55  ;;  %v15095_v16 = vadd.f32 %v11513_v27, %v1442_v19  ;;  %v1459_v18 = vpop.f32.mrf.mxu0  ;;  %11621 = vmatmul.mubr.f32.vlgmr.msra.gmra.mxu1 %v15061_v54  ;;  %v15108_v28 = vadd.f32 %v4458_v24, %v20049_v22  ;;  %v1466_v2 = vadd.f32 %v11463_v5, %v1241_v58  ;;  %v20066_v5 = vld [vmem:[#allocation18_spill] sm:$0xff] }
 0x244   :  { %v1612_v14 = vpop.f32.mrf.mxu1  ;;  %20048 = vst [vmem:[#allocation52_spill] sm:$0xff] %v15105_v17  ;;  %11701 = vmatpush3.msra.mxu1 %v20052_v41  ;;  %v15117_v38 = vand.u32 4294901760, %v15093_v12  ;;  %v1788_v20 = vsub.f32 %v15073_v47, %v15099_v30  ;;  %v15135_v58 = vadd.f32 %v1459_v18, %v1233_v37  ;;  %v20081_v17 = vld [vmem:[#allocation79_spill] sm:$0xff] }
 0x245   :  { %20050 = vst [vmem:[#allocation74_spill] sm:$0xff] %v15108_v28  ;;  %v15111_v62 = vand.u32 4294901760, %v15095_v16  ;;  %v15113_v36 = vadd.f32 %v1612_v14, %v1436_v63  ;;  %11702 = vmatprep.subr.mxu1 %v20054_v42  ;;  %v4317_v49 = vmul.f32 2.755732e-07, %v15095_v16  ;;  %v4461_v0 = vmul.f32 0.0013888889, %v15095_v16 }
 0x246   :  { %20053 = vst [vmem:[#allocation17_spill] sm:$0xff] %v15117_v38  ;;  %11703 = vmatpush3.msra.mxu1 %v20054_v42  ;;  %v1778_v11 = vsub.f32 %v15093_v12, %v15117_v38  ;;  %v15155_v51 = vand.u32 4294901760, %v1788_v20  ;;  %v20071_v20 = vld [vmem:[#allocation34_spill] sm:$0xff]  ;;  %v20095_v28 = vld [vmem:[#allocation88_spill] sm:$0xff] }
 0x247   :  { %20051 = vst [vmem:[#allocation111_spill] sm:$0xff] %v15111_v62  ;;  %v15126_v56 = vsub.f32 %v15095_v16, %v15111_v62  ;;  %v15129_v50 = vand.u32 4294901760, %v15113_v36  ;;  %v4316_v46 = vmul.f32 2.755732e-07, %v15113_v36  ;;  %v11466_v35 = vpop.f32.mrf.mxu0  ;;  %11704 = vmatprep.subr.mxu1 %v20056_v25  ;;  %v15139_v6 = vadd.f32 %v4317_v49, %v20057_v40  ;;  %v20075_v40 = vld [vmem:[#allocation78_spill] sm:$0xff] }
 0x248   :  { %v11516_v61 = vpop.f32.mrf.mxu1  ;;  %v15142_v21 = vadd.f32 %v4461_v0, %v20059_v29  ;;  %v4460_v23 = vmul.f32 0.0013888889, %v15113_v36  ;;  %11705 = vmatpush3.msra.mxu1 %v20056_v25  ;;  %v15153_v37 = vand.u32 4294901760, %v1778_v11  ;;  %20062 = vst [vmem:[#allocation24_spill] sm:$0xff] %v15155_v51  ;;  %v15158_v4 = vadd.f32 %v11466_v35, %v15051_v1  ;;  %v20072_v35 = vld [vmem:[#allocation33_spill] sm:$0xff] }
 0x249   :  { %20055 = vst [vmem:[#allocation75_spill] sm:$0xff] %v15129_v50  ;;  %20058 = vst [vmem:[#allocation11_spill] sm:$0xff] %v15139_v6  ;;  %v15147_v48 = vsub.f32 %v15113_v36, %v15129_v50  ;;  %v15149_v7 = vadd.f32 %v11516_v61, %v1454_v34  ;;  %11623 = vmatprep.mubr.f32.mxu1 %v15129_v50  ;;  %v1471_v60 = vpop.f32.mrf.mxu0  ;;  %11706 = vmatprep.subr.mxu1 %v20063_v33  ;;  %v15163_v39 = vand.u32 4294901760, %v15126_v56  ;;  %v20069_v34 = vld [vmem:[#allocation14_spill] sm:$0xff] }
 0x24a   :  { %20060 = vst [vmem:[#allocation16_spill] sm:$0xff] %v15142_v21  ;;  %20061 = vst [vmem:[#allocation23_spill] sm:$0xff] %v15153_v37  ;;  %v1624_v19 = vpop.f32.mrf.mxu1  ;;  %11624 = vmatmul.mubr.f32.gmra.mxu1 %v15111_v62  ;;  %v15166_v52 = vadd.f32 %v4316_v46, %v20064_v32  ;;  %v15169_v27 = vadd.f32 %v4460_v23, %v20066_v5  ;;  %v15175_v1 = vadd.f32 %v1471_v60, %v15055_v15  ;;  %v20077_v23 = vld [vmem:[#allocation21_spill] sm:$0xff]  ;;  %v20093_v21 = vld [vmem:[#allocation80_spill] sm:$0xff] }
 0x24b   :  { %v15172_v31 = vand.u32 4294901760, %v15149_v7  ;;  %v15177_v24 = vadd.f32 %v1624_v19, %v1448_v13  ;;  %11707 = vmatpush3.msra.mxu1 %v20063_v33  ;;  %11564 = vmatprep.mubr.f32.mxu0 %v15153_v37  ;;  %v15182_v63 = vand.u32 4294901760, %v15147_v48  ;;  %v1808_v18 = vsub.f32 %v15126_v56, %v15163_v39 }
 0x24c   :  { %20065 = vst [vmem:[#allocation76_spill] sm:$0xff] %v15166_v52  ;;  %20067 = vst [vmem:[#allocation19_spill] sm:$0xff] %v15169_v27  ;;  %11708 = vmatprep.subr.mxu1 %v20069_v34  ;;  %11565 = vmatmul.mubr.f32.vlgmr.msra.gmra.mxu0 %v15155_v51  ;;  %v4319_v14 = vmul.f32 2.755732e-07, %v15149_v7  ;;  %v4463_v15 = vmul.f32 0.0013888889, %v15149_v7 }
 0x24d   :  { %20068 = vst [vmem:[#allocation25_spill] sm:$0xff] %v15172_v31  ;;  %v15193_v22 = vsub.f32 %v15149_v7, %v15172_v31  ;;  %v15196_v13 = vand.u32 4294901760, %v15177_v24  ;;  %11645 = vmatpush3.msra.mxu0 %v20071_v20  ;;  %11709 = vmatpush3.msra.mxu1 %v20069_v34  ;;  %v1798_v49 = vsub.f32 %v15147_v48, %v15182_v63  ;;  %v4318_v0 = vmul.f32 2.755732e-07, %v15177_v24  ;;  %v11469_v11 = vpop.f32.mrf.mxu0 }
 0x24e   :  { %v11519_v46 = vpop.f32.mrf.mxu1  ;;  %11646 = vmatprep.subr.mxu0 %v20072_v35  ;;  %11710 = vmatprep.subr.mxu1 %v20073_v53  ;;  %v15205_v61 = vand.u32 4294901760, %v1808_v18  ;;  %v15208_v29 = vadd.f32 %v4319_v14, %v20075_v40  ;;  %v15211_v60 = vadd.f32 %v4463_v15, %v20077_v23  ;;  %v4462_v19 = vmul.f32 0.0013888889, %v15177_v24  ;;  %v20080_v40 = vld [vmem:[#allocation35_spill] sm:$0xff] }
 0x24f   :  { %20070 = vst [vmem:[#allocation77_spill] sm:$0xff] %v15196_v13  ;;  %v15216_v32 = vsub.f32 %v15177_v24, %v15196_v13  ;;  %v15219_v5 = vadd.f32 %v11469_v11, %v15058_v45  ;;  %v15221_v20 = vadd.f32 %v11519_v46, %v1466_v2  ;;  %11626 = vmatprep.mubr.f32.mxu1 %v15196_v13  ;;  %v15225_v18 = vand.u32 4294901760, %v1798_v49  ;;  %v1483_v14 = vpop.f32.mrf.mxu0  ;;  %v20083_v2 = vld [vmem:[#allocation20_spill] sm:$0xff]  ;;  %v20085_v46 = vld [vmem:[#allocation53_spill] sm:$0xff] }
 0x250   :  { %20074 = vst [vmem:[#allocation18_spill] sm:$0xff] %v15205_v61  ;;  %20076 = vst [vmem:[#allocation14_spill] sm:$0xff] %v15208_v29  ;;  %11647 = vmatpush3.msra.mxu0 %v20072_v35  ;;  %v1636_v15 = vpop.f32.mrf.mxu1  ;;  %11627 = vmatmul.mubr.f32.gmra.mxu1 %v15172_v31  ;;  %v15230_v23 = vand.u32 4294901760, %v15193_v22  ;;  %v15233_v45 = vadd.f32 %v4318_v0, %v20081_v17  ;;  %v15236_v11 = vadd.f32 %v4462_v19, %v20083_v2  ;;  %v20088_v0 = vld [vmem:[#allocation26_spill] sm:$0xff]  ;;  %v20090_v29 = vld [vmem:[#allocation36_spill] sm:$0xff] }
 0x251   :  { %20078 = vst [vmem:[#allocation34_spill] sm:$0xff] %v15211_v60  ;;  %20079 = vst [vmem:[#allocation33_spill] sm:$0xff] %v15225_v18  ;;  %11648 = vmatprep.subr.mxu0 %v20080_v40  ;;  %v15239_v52 = vadd.f32 %v5841_v59, %v20085_v46  ;;  %v15242_v49 = vand.u32 4294901760, %v15221_v20  ;;  %v15245_v35 = vadd.f32 %v1483_v14, %v15066_v10  ;;  %11711 = vmatpush3.msra.mxu1 %v20073_v53 }
 0x252   :  { %20082 = vst [vmem:[#allocation15_spill] sm:$0xff] %v15233_v45  ;;  %20084 = vst [vmem:[#allocation78_spill] sm:$0xff] %v15236_v11  ;;  %v15248_v60 = vadd.f32 %v1636_v15, %v15135_v58  ;;  %11567 = vmatprep.mubr.f32.mxu0 %v15225_v18  ;;  %v15253_v17 = vand.u32 4294901760, %v15216_v32  ;;  %11712 = vmatprep.subr.mxu1 %v20088_v0  ;;  %v1828_v59 = vsub.f32 %v15193_v22, %v15230_v23 }
 0x253   :  { %20086 = vst [vmem:[#allocation21_spill] sm:$0xff] %v15239_v52  ;;  %20087 = vst [vmem:[#allocation35_spill] sm:$0xff] %v15242_v49  ;;  %11568 = vmatmul.mubr.f32.gmra.mxu0 %v15205_v61  ;;  %v4321_v10 = vmul.f32 2.755732e-07, %v15221_v20  ;;  %v4465_v19 = vmul.f32 0.0013888889, %v15221_v20  ;;  %v15264_v14 = vsub.f32 %v15221_v20, %v15242_v49  ;;  %11713 = vmatpush3.msra.mxu1 %v20088_v0  ;;  %v11472_v45 = vpop.f32.mrf.mxu0 }
 0x254   :  { %v5840_v58 = vmul.f32 0.5, %v15063_v8  ;;  %v15267_v15 = vand.u32 4294901760, %v15248_v60  ;;  %11649 = vmatpush3.msra.mxu0 %v20080_v40  ;;  %v1818_v2 = vsub.f32 %v15216_v32, %v15253_v17  ;;  %v4320_v46 = vmul.f32 2.755732e-07, %v15248_v60  ;;  %v11522_v11 = vpop.f32.mrf.mxu1  ;;  %v20091_v8 = vld [vmem:[#allocation27_spill] sm:$0xff]  ;;  %v20112_v61 = vld [vmem:[#allocation82_spill] sm:$0xff] }
 0x255   :  { %11650 = vmatprep.subr.mxu0 %v20090_v29  ;;  %11714 = vmatprep.subr.mxu1 %v20091_v8  ;;  %v15276_v27 = vand.u32 4294901760, %v1828_v59  ;;  %v15279_v6 = vadd.f32 %v4321_v10, %v20093_v21  ;;  %v15282_v40 = vadd.f32 %v4465_v19, %v20095_v28  ;;  %v4464_v52 = vmul.f32 0.0013888889, %v15248_v60  ;;  %v1495_v28 = vpop.f32.mrf.mxu0  ;;  %v20098_v10 = vld [vmem:[#allocation39_spill] sm:$0xff] }
 0x256   :  { %20089 = vst [vmem:[#allocation79_spill] sm:$0xff] %v15267_v15  ;;  %v15287_v55 = vsub.f32 %v15248_v60, %v15267_v15  ;;  %v15290_v9 = vadd.f32 %v11472_v45, %v15068_v43  ;;  %v15293_v37 = vadd.f32 %v11522_v11, %v15158_v4  ;;  %11629 = vmatprep.mubr.f32.mxu1 %v15267_v15  ;;  %v15297_v21 = vand.u32 4294901760, %v1818_v2  ;;  %v1648_v59 = vpop.f32.mrf.mxu1  ;;  %v20099_v43 = vld [vmem:[#allocation81_spill] sm:$0xff] }
 0x257   :  { %20092 = vst [vmem:[#allocation20_spill] sm:$0xff] %v15276_v27  ;;  %20094 = vst [vmem:[#allocation53_spill] sm:$0xff] %v15279_v6  ;;  %11651 = vmatpush3.msra.mxu0 %v20090_v29  ;;  %11630 = vmatmul.mubr.f32.gmra.mxu1 %v15242_v49  ;;  %v15302_v19 = vand.u32 4294901760, %v15264_v14  ;;  %v15305_v45 = vadd.f32 %v4320_v46, %v20099_v43  ;;  %v20101_v4 = vld [vmem:[#allocation89_spill] sm:$0xff]  ;;  %v15317_v2 = vadd.f32 %v1495_v28, %v15083_v44 }
 0x258   :  { %20096 = vst [vmem:[#allocation26_spill] sm:$0xff] %v15282_v40  ;;  %20097 = vst [vmem:[#allocation36_spill] sm:$0xff] %v15297_v21  ;;  %11652 = vmatprep.subr.mxu0 %v20098_v10  ;;  %v15308_v11 = vadd.f32 %v4464_v52, %v20101_v4  ;;  %v20103_v40 = vld [vmem:[#allocation97_spill] sm:$0xff]  ;;  %v15314_v29 = vand.u32 4294901760, %v15293_v37  ;;  %v15320_v51 = vadd.f32 %v1648_v59, %v15175_v1  ;;  %11715 = vmatpush3.msra.mxu1 %v20091_v8  ;;  %v20106_v52 = vld [vmem:[#allocation28_spill] sm:$0xff] }
 0x259   :  { %20100 = vst [vmem:[#allocation27_spill] sm:$0xff] %v15305_v45  ;;  %v15311_v6 = vadd.f32 %v5840_v58, %v20103_v40  ;;  %11570 = vmatprep.mubr.f32.mxu0 %v15297_v21  ;;  %v15325_v46 = vand.u32 4294901760, %v15287_v55  ;;  %11716 = vmatprep.subr.mxu1 %v20106_v52  ;;  %v1848_v58 = vsub.f32 %v15264_v14, %v15302_v19  ;;  %v4323_v44 = vmul.f32 2.755732e-07, %v15293_v37  ;;  %v11475_v45 = vpop.f32.mrf.mxu0 }
 0x25a   :  { %20102 = vst [vmem:[#allocation80_spill] sm:$0xff] %v15308_v11  ;;  %20105 = vst [vmem:[#allocation39_spill] sm:$0xff] %v15314_v29  ;;  %11571 = vmatmul.mubr.f32.gmra.mxu0 %v15276_v27  ;;  %v4467_v40 = vmul.f32 0.0013888889, %v15293_v37  ;;  %v5843_v1 = vmul.f32 0.5, %v15095_v16  ;;  %v15336_v28 = vsub.f32 %v15293_v37, %v15314_v29  ;;  %v15339_v59 = vand.u32 4294901760, %v15320_v51  ;;  %11717 = vmatpush3.msra.mxu1 %v20106_v52  ;;  %v11525_v11 = vpop.f32.mrf.mxu1 }
 0x25b   :  { %20104 = vst [vmem:[#allocation88_spill] sm:$0xff] %v15311_v6  ;;  %11653 = vmatpush3.msra.mxu0 %v20098_v10  ;;  %v1838_v43 = vsub.f32 %v15287_v55, %v15325_v46  ;;  %v4322_v4 = vmul.f32 2.755732e-07, %v15320_v51  ;;  %v20109_v6 = vld [vmem:[#allocation40_spill] sm:$0xff]  ;;  %v20110_v16 = vld [vmem:[#allocation29_spill] sm:$0xff]  ;;  %v15348_v18 = vand.u32 4294901760, %v1848_v58  ;;  %v15351_v21 = vadd.f32 %v4323_v44, %v20112_v61 }
 0x25c   :  { %20107 = vst [vmem:[#allocation81_spill] sm:$0xff] %v15336_v28  ;;  %20108 = vst [vmem:[#allocation89_spill] sm:$0xff] %v15339_v59  ;;  %11654 = vmatprep.subr.mxu0 %v20109_v6  ;;  %11718 = vmatprep.subr.mxu1 %v20110_v16  ;;  %v20114_v27 = vld [vmem:[#allocation90_spill] sm:$0xff]  ;;  %v4466_v49 = vmul.f32 0.0013888889, %v15320_v51  ;;  %v15359_v15 = vsub.f32 %v15320_v51, %v15339_v59  ;;  %v15362_v31 = vadd.f32 %v11475_v45, %v15085_v26  ;;  %v1660_v58 = vpop.f32.mrf.mxu1  ;;  %v20117_v44 = vld [vmem:[#allocation48_spill] sm:$0xff] }
 0x25d   :  { %20111 = vst [vmem:[#allocation97_spill] sm:$0xff] %v15348_v18  ;;  %20113 = vst [vmem:[#allocation28_spill] sm:$0xff] %v15351_v21  ;;  %v15354_v10 = vadd.f32 %v4467_v40, %v20114_v27  ;;  %v15365_v13 = vadd.f32 %v11525_v11, %v15219_v5  ;;  %11632 = vmatprep.mubr.f32.mxu1 %v15339_v59  ;;  %11655 = vmatpush3.msra.mxu0 %v20109_v6  ;;  %v15369_v61 = vand.u32 4294901760, %v1838_v43  ;;  %v1507_v27 = vpop.f32.mrf.mxu0  ;;  %v20118_v26 = vld [vmem:[#allocation83_spill] sm:$0xff]  ;;  %v20133_v59 = vld [vmem:[#allocation92_spill] sm:$0xff] }
 0x25e   :  { %11633 = vmatmul.mubr.f32.gmra.mxu1 %v15314_v29  ;;  %11656 = vmatprep.subr.mxu0 %v20117_v44  ;;  %v15374_v40 = vand.u32 4294901760, %v15336_v28  ;;  %v15377_v45 = vadd.f32 %v4322_v4, %v20118_v26  ;;  %v20120_v5 = vld [vmem:[#allocation91_spill] sm:$0xff]  ;;  %v15389_v43 = vadd.f32 %v1507_v27, %v15101_v3  ;;  %v15392_v29 = vadd.f32 %v1660_v58, %v15245_v35 }
 0x25f   :  { %20115 = vst [vmem:[#allocation40_spill] sm:$0xff] %v15354_v10  ;;  %20116 = vst [vmem:[#allocation29_spill] sm:$0xff] %v15369_v61  ;;  %v15380_v11 = vadd.f32 %v4466_v49, %v20120_v5  ;;  %v20122_v10 = vld [vmem:[#allocation98_spill] sm:$0xff]  ;;  %v15386_v6 = vand.u32 4294901760, %v15365_v13  ;;  %11719 = vmatpush3.msra.mxu1 %v20110_v16  ;;  %11573 = vmatprep.mubr.f32.mxu0 %v15369_v61  ;;  %v15397_v4 = vand.u32 4294901760, %v15359_v15  ;;  %v5842_v35 = vmul.f32 0.5, %v15113_v36 }
 0x260   :  { %20119 = vst [vmem:[#allocation82_spill] sm:$0xff] %v15377_v45  ;;  %v15383_v21 = vadd.f32 %v5843_v1, %v20122_v10  ;;  %v20125_v49 = vld [vmem:[#allocation30_spill] sm:$0xff]  ;;  %11574 = vmatmul.mubr.f32.gmra.mxu0 %v15348_v18  ;;  %v1868_v1 = vsub.f32 %v15336_v28, %v15374_v40  ;;  %v4325_v3 = vmul.f32 2.755732e-07, %v15365_v13  ;;  %v4469_v10 = vmul.f32 0.0013888889, %v15365_v13  ;;  %v11528_v45 = vpop.f32.mrf.mxu1 }
 0x261   :  { %20121 = vst [vmem:[#allocation90_spill] sm:$0xff] %v15380_v11  ;;  %20124 = vst [vmem:[#allocation83_spill] sm:$0xff] %v15386_v6  ;;  %11720 = vmatprep.subr.mxu1 %v20125_v49  ;;  %v15408_v27 = vsub.f32 %v15365_v13, %v15386_v6  ;;  %v15411_v58 = vand.u32 4294901760, %v15392_v29  ;;  %11657 = vmatpush3.msra.mxu0 %v20117_v44  ;;  %v1858_v26 = vsub.f32 %v15359_v15, %v15397_v4  ;;  %v20128_v11 = vld [vmem:[#allocation57_spill] sm:$0xff]  ;;  %v20129_v36 = vld [vmem:[#allocation31_spill] sm:$0xff] }
 0x262   :  { %20123 = vst [vmem:[#allocation48_spill] sm:$0xff] %v15383_v21  ;;  %11721 = vmatpush3.msra.mxu1 %v20125_v49  ;;  %v4324_v5 = vmul.f32 2.755732e-07, %v15392_v29  ;;  %11658 = vmatprep.subr.mxu0 %v20128_v11  ;;  %v15420_v21 = vand.u32 4294901760, %v1868_v1  ;;  %v20131_v61 = vld [vmem:[#allocation84_spill] sm:$0xff]  ;;  %v15426_v62 = vadd.f32 %v4469_v10, %v20133_v59  ;;  %v15434_v54 = vadd.f32 %v11528_v45, %v15290_v9  ;;  %v1672_v59 = vpop.f32.mrf.mxu1  ;;  %v20138_v10 = vld [vmem:[#allocation85_spill] sm:$0xff] }
 0x263   :  { %20126 = vst [vmem:[#allocation91_spill] sm:$0xff] %v15408_v27  ;;  %20127 = vst [vmem:[#allocation98_spill] sm:$0xff] %v15411_v58  ;;  %11722 = vmatprep.subr.mxu1 %v20129_v36  ;;  %v15423_v18 = vadd.f32 %v4325_v3, %v20131_v61  ;;  %v4468_v44 = vmul.f32 0.0013888889, %v15392_v29  ;;  %v15431_v50 = vsub.f32 %v15392_v29, %v15411_v58  ;;  %11635 = vmatprep.mubr.f32.mxu1 %v15411_v58  ;;  %v20137_v3 = vld [vmem:[#allocation58_spill] sm:$0xff]  ;;  %v20142_v45 = vld [vmem:[#allocation99_spill] sm:$0xff] }
 0x264   :  { %20130 = vst [vmem:[#allocation30_spill] sm:$0xff] %v15420_v21  ;;  %20134 = vst [vmem:[#allocation84_spill] sm:$0xff] %v15426_v62  ;;  %11659 = vmatpush3.msra.mxu0 %v20128_v11  ;;  %v15438_v1 = vand.u32 4294901760, %v1858_v26  ;;  %v15441_v61 = vand.u32 4294901760, %v15408_v27  ;;  %11636 = vmatmul.mubr.f32.gmra.mxu1 %v15386_v6  ;;  %v15446_v62 = vadd.f32 %v4324_v5, %v20138_v10  ;;  %v5845_v11 = vmul.f32 0.5, %v15149_v7 }
 0x265   :  { %20132 = vst [vmem:[#allocation57_spill] sm:$0xff] %v15423_v18  ;;  %20135 = vst [vmem:[#allocation92_spill] sm:$0xff] %v15431_v50  ;;  %11660 = vmatprep.subr.mxu0 %v20137_v3  ;;  %v20140_v18 = vld [vmem:[#allocation93_spill] sm:$0xff]  ;;  %v15452_v58 = vadd.f32 %v5842_v35, %v20142_v45  ;;  %v15456_v26 = vand.u32 4294901760, %v15434_v54  ;;  %v15459_v57 = vadd.f32 %v1672_v59, %v15317_v2  ;;  %11723 = vmatpush3.msra.mxu1 %v20129_v36  ;;  %v11531_v35 = vpop.f32.mrf.mxu1  ;;  %v20146_v59 = vld [vmem:[#allocation100_spill] sm:$0xff] }
 0x266   :  { %20136 = vst [vmem:[#allocation115_spill] sm:$0xff] %v15438_v1  ;;  %20139 = vst [vmem:[#allocation58_spill] sm:$0xff] %v15446_v62  ;;  %v15449_v9 = vadd.f32 %v4468_v44, %v20140_v18  ;;  %11576 = vmatprep.mubr.f32.mxu0 %v15438_v1  ;;  %v15464_v5 = vand.u32 4294901760, %v15431_v50  ;;  %v1888_v18 = vsub.f32 %v15408_v27, %v15441_v61  ;;  %v20145_v44 = vld [vmem:[#allocation37_spill] sm:$0xff]  ;;  %v4327_v7 = vmul.f32 2.755732e-07, %v15434_v54 }
 0x267   :  { %20143 = vst [vmem:[#allocation93_spill] sm:$0xff] %v15452_v58  ;;  %20144 = vst [vmem:[#allocation99_spill] sm:$0xff] %v15456_v26  ;;  %11724 = vmatprep.subr.mxu1 %v20145_v44  ;;  %11577 = vmatmul.mubr.f32.gmra.mxu0 %v15420_v21  ;;  %v4471_v2 = vmul.f32 0.0013888889, %v15434_v54  ;;  %v15473_v10 = vadd.f32 %v5845_v11, %v20146_v59  ;;  %v5844_v45 = vmul.f32 0.5, %v15177_v24  ;;  %v1684_v59 = vpop.f32.mrf.mxu1  ;;  %v20151_v24 = vld [vmem:[#allocation49_spill] sm:$0xff] }
 0x268   :  { %20141 = vst [vmem:[#allocation85_spill] sm:$0xff] %v15449_v9  ;;  %v15478_v62 = vsub.f32 %v15434_v54, %v15456_v26  ;;  %v15481_v9 = vand.u32 4294901760, %v15459_v57  ;;  %v15484_v58 = vadd.f32 %v11531_v35, %v15362_v31  ;;  %11661 = vmatpush3.msra.mxu0 %v20137_v3  ;;  %11725 = vmatpush3.msra.mxu1 %v20145_v44  ;;  %v15492_v6 = vand.u32 4294901760, %v1888_v18  ;;  %v20153_v1 = vld [vmem:[#allocation86_spill] sm:$0xff]  ;;  %v20159_v18 = vld [vmem:[#allocation60_spill] sm:$0xff]  ;;  %v20176_v36 = vld [vmem:[#allocation101_spill] sm:$0xff] }
 0x269   :  { %20147 = vst [vmem:[#allocation100_spill] sm:$0xff] %v15473_v10  ;;  %v1878_v11 = vsub.f32 %v15431_v50, %v15464_v5  ;;  %v20150_v10 = vld [vmem:[#allocation59_spill] sm:$0xff]  ;;  %11726 = vmatprep.subr.mxu1 %v20151_v24  ;;  %v15495_v21 = vadd.f32 %v4327_v7, %v20153_v1  ;;  %v4326_v31 = vmul.f32 2.755732e-07, %v15459_v57  ;;  %v20155_v35 = vld [vmem:[#allocation94_spill] sm:$0xff]  ;;  %v15509_v28 = vadd.f32 %v1684_v59, %v15389_v43 }
 0x26a   :  { %20148 = vst [vmem:[#allocation116_spill] sm:$0xff] %v15478_v62  ;;  %20149 = vst [vmem:[#allocation117_spill] sm:$0xff] %v15481_v9  ;;  %11662 = vmatprep.subr.mxu0 %v20150_v10  ;;  %v15499_v27 = vadd.f32 %v4471_v2, %v20155_v35  ;;  %v15503_v3 = vsub.f32 %v15459_v57, %v15481_v9  ;;  %v15506_v50 = vand.u32 4294901760, %v15484_v58  ;;  %11638 = vmatprep.mubr.f32.mxu1 %v15481_v9  ;;  %v20161_v2 = vld [vmem:[#allocation87_spill] sm:$0xff] }
 0x26b   :  { %20152 = vst [vmem:[#allocation59_spill] sm:$0xff] %v15492_v6  ;;  %20154 = vst [vmem:[#allocation86_spill] sm:$0xff] %v15495_v21  ;;  %11663 = vmatpush3.msra.mxu0 %v20150_v10  ;;  %v15513_v1 = vand.u32 4294901760, %v1878_v11  ;;  %11639 = vmatmul.mubr.f32.gmra.mxu1 %v15456_v26  ;;  %v15518_v7 = vand.u32 4294901760, %v15478_v62  ;;  %v15521_v35 = vadd.f32 %v4326_v31, %v20161_v2  ;;  %v4470_v43 = vmul.f32 0.0013888889, %v15459_v57 }
 0x26c   :  { %20156 = vst [vmem:[#allocation94_spill] sm:$0xff] %v15499_v27  ;;  %20157 = vst [vmem:[#allocation118_spill] sm:$0xff] %v15503_v3  ;;  %11664 = vmatprep.subr.mxu0 %v20159_v18  ;;  %v4329_v27 = vmul.f32 2.755732e-07, %v15484_v58  ;;  %v15527_v59 = vsub.f32 %v15484_v58, %v15506_v50  ;;  %v15530_v10 = vand.u32 4294901760, %v15509_v28  ;;  %11727 = vmatpush3.msra.mxu1 %v20151_v24  ;;  %v15535_v11 = vand.u32 4294901760, %v15503_v3 }
 0x26d   :  { %20158 = vst [vmem:[#allocation119_spill] sm:$0xff] %v15513_v1  ;;  %20160 = vst [vmem:[#allocation60_spill] sm:$0xff] %v15518_v7  ;;  %11579 = vmatprep.mubr.f32.mxu0 %v15513_v1  ;;  %v4328_v31 = vmul.f32 2.755732e-07, %v15509_v28  ;;  %v20164_v2 = vld [vmem:[#allocation50_spill] sm:$0xff]  ;;  %v20165_v21 = vld [vmem:[#allocation13_spill] sm:$0xff]  ;;  %11665 = vmatpush3.msra.mxu0 %v20159_v18 }
 0x26e   :  { %20162 = vst [vmem:[#allocation87_spill] sm:$0xff] %v15521_v35  ;;  %20163 = vst [vmem:[#allocation120_spill] sm:$0xff] %v15530_v10  ;;  %11728 = vmatprep.subr.mxu1 %v20164_v2  ;;  %11580 = vmatmul.mubr.f32.gmra.mxu0 %v15492_v6  ;;  %v1908_v35 = vsub.f32 %v15478_v62, %v15518_v7  ;;  %v15543_v9 = vadd.f32 %v4329_v27, %v20165_v21  ;;  %v20167_v26 = vld [vmem:[#allocation95_spill] sm:$0xff]  ;;  %v4473_v1 = vmul.f32 0.0013888889, %v15484_v58  ;;  %v20169_v21 = vld [vmem:[#allocation112_spill] sm:$0xff] }
 0x26f   :  { %v15546_v44 = vadd.f32 %v4470_v43, %v20167_v26  ;;  %v15551_v24 = vsub.f32 %v15509_v28, %v15530_v10  ;;  %11641 = vmatprep.mubr.f32.mxu1 %v15530_v10  ;;  %v1898_v6 = vsub.f32 %v15503_v3, %v15535_v11  ;;  %v15558_v62 = vand.u32 4294901760, %v15527_v59  ;;  %v20171_v26 = vld [vmem:[#allocation61_spill] sm:$0xff]  ;;  %v20172_v43 = vld [vmem:[#allocation96_spill] sm:$0xff]  ;;  %v20175_v10 = vld [vmem:[#allocation114_spill] sm:$0xff]  ;;  %11729 = vmatpush3.msra.mxu1 %v20164_v2 }
 0x270   :  { %20166 = vst [vmem:[#allocation50_spill] sm:$0xff] %v15543_v9  ;;  %v15561_v27 = vadd.f32 %v4328_v31, %v20169_v21  ;;  %11642 = vmatmul.mubr.f32.gmra.mxu1 %v15506_v50  ;;  %11666 = vmatprep.subr.mxu0 %v20171_v26  ;;  %v15566_v9 = vadd.f32 %v4473_v1, %v20172_v43  ;;  %v4472_v18 = vmul.f32 0.0013888889, %v15509_v28  ;;  %v15578_v21 = vand.u32 4294901760, %v1908_v35  ;;  %v20178_v43 = vld [vmem:[#allocation32_spill] sm:$0xff] }
 0x271   :  { %20168 = vst [vmem:[#allocation13_spill] sm:$0xff] %v15546_v44  ;;  %v20174_v44 = vld [vmem:[#allocation113_spill] sm:$0xff]  ;;  %v15572_v3 = vadd.f32 %v5844_v45, %v20176_v36  ;;  %11732 = vmatprep.mubr.f32.mxu1 %v15117_v38  ;;  %v15576_v31 = vand.u32 4294901760, %v1898_v6  ;;  %v5847_v1 = vmul.f32 0.5, %v15221_v20  ;;  %11730 = vmatprep.subr.mxu1 %v20178_v43  ;;  %v5846_v36 = vmul.f32 0.5, %v15248_v60  ;;  %v20181_v60 = vld [vmem:[#allocation66_spill] sm:$0xff] }
 0x272   :  { %20170 = vst [vmem:[#allocation95_spill] sm:$0xff] %v15561_v27  ;;  %20173 = vst [vmem:[#allocation112_spill] sm:$0xff] %v15566_v9  ;;  %v4456_v7 = vadd.f32 %v20175_v10, %v20174_v44  ;;  %v15581_v27 = vand.u32 4294901760, %v15551_v24  ;;  %11667 = vmatpush3.msra.mxu0 %v20171_v26  ;;  %v5849_v45 = vmul.f32 0.5, %v15293_v37  ;;  %v5848_v6 = vmul.f32 0.5, %v15320_v51  ;;  %11731 = vmatpush3.msra.mxu1 %v20178_v43  ;;  %v20180_v10 = vld [vmem:[#allocation102_spill] sm:$0xff] }
 0x273   :  { %20177 = vst [vmem:[#allocation61_spill] sm:$0xff] %v15572_v3  ;;  %11582 = vmatprep.mubr.f32.mxu0 %v15576_v31  ;;  %v1928_v20 = vsub.f32 %v15527_v59, %v15558_v62  ;;  %v15598_v26 = vadd.f32 %v5847_v1, %v20180_v10  ;;  %11668 = vmatprep.subr.mxu0 %v20181_v60  ;;  %v20182_v37 = vld [vmem:[#allocation103_spill] sm:$0xff]  ;;  %v20186_v9 = vld [vmem:[#allocation105_spill] sm:$0xff]  ;;  %v5850_v38 = vmul.f32 0.5, %v15392_v29  ;;  %v20188_v1 = vld [vmem:[#allocation106_spill] sm:$0xff]  ;;  %v5855_v29 = vmul.f32 0.5, %v15484_v58 }
 0x274   :  { %v15586_v44 = vadd.f32 %v4472_v18, %v4456_v7  ;;  %v1918_v35 = vsub.f32 %v15551_v24, %v15581_v27  ;;  %v5851_v7 = vmul.f32 0.5, %v15365_v13  ;;  %11812 = vmatprep.subr.mxu1 %v20052_v41  ;;  %v15604_v51 = vadd.f32 %v5846_v36, %v20182_v37  ;;  %v20184_v18 = vld [vmem:[#allocation104_spill] sm:$0xff]  ;;  %11583 = vmatmul.mubr.f32.gmra.mxu0 %v15578_v21 }
 0x275   :  { %v15610_v3 = vadd.f32 %v5848_v6, %v20186_v9  ;;  %11733 = vmatmul.mubr.f32.vlgmr.msra.gmra.mxu1 %v15099_v30  ;;  %v5853_v36 = vmul.f32 0.5, %v15434_v54  ;;  %v5852_v37 = vmul.f32 0.5, %v15459_v57  ;;  %11669 = vmatpush3.msra.mxu0 %v20181_v60  ;;  %v20190_v9 = vld [vmem:[#allocation107_spill] sm:$0xff]  ;;  %v20192_v6 = vld [vmem:[#allocation12_spill] sm:$0xff]  ;;  %v20197_v60 = vld [vmem:[#allocation109_spill] sm:$0xff] }
 0x276   :  { %20179 = vst [vmem:[#allocation96_spill] sm:$0xff] %v15586_v44  ;;  %20183 = vst [vmem:[#allocation113_spill] sm:$0xff] %v15604_v51  ;;  %v15607_v44 = vadd.f32 %v5849_v45, %v20184_v18  ;;  %v15615_v13 = vand.u32 4294901760, %v1918_v35  ;;  %v15618_v10 = vadd.f32 %v5851_v7, %v20188_v1  ;;  %11813 = vmatpush3.msra.mxu1 %v20052_v41  ;;  %v20193_v18 = vld [vmem:[#allocation22_spill] sm:$0xff]  ;;  %11735 = vmatprep.mubr.f32.mxu1 %v15182_v63  ;;  %v20195_v54 = vld [vmem:[#allocation108_spill] sm:$0xff] }
 0x277   :  { %20187 = vst [vmem:[#allocation101_spill] sm:$0xff] %v15610_v3  ;;  %v15625_v45 = vadd.f32 %v5850_v38, %v20190_v9  ;;  %v5838_v35 = vadd.f32 %v20193_v18, %v20192_v6  ;;  %v5854_v3 = vmul.f32 0.5, %v15509_v28  ;;  %v20194_v7 = vld [vmem:[#allocation70_spill] sm:$0xff]  ;;  %v15634_v57 = vadd.f32 %v5853_v36, %v20195_v54  ;;  %11814 = vmatprep.subr.mxu1 %v20054_v42  ;;  %v20215_v9 = vld [vmem:[#allocation81_spill] sm:$0xff]  ;;  %v20255_v51 = vld [vmem:[#allocation23_spill] sm:$0xff] }
 0x278   :  { %20185 = vst [vmem:[#allocation114_spill] sm:$0xff] %v15607_v44  ;;  %20189 = vst [vmem:[#allocation32_spill] sm:$0xff] %v15618_v10  ;;  %11670 = vmatprep.subr.mxu0 %v20194_v7  ;;  %v15637_v1 = vadd.f32 %v5852_v37, %v20197_v60  ;;  %v20199_v41 = vld [vmem:[#allocation110_spill] sm:$0xff]  ;;  %11815 = vmatpush3.msra.mxu1 %v20054_v42  ;;  %v15648_v28 = vand.u32 4294901760, %v1928_v20  ;;  %v20204_v42 = vld [vmem:[#allocation41_spill] sm:$0xff] }
 0x279   :  { %20191 = vst [vmem:[#allocation102_spill] sm:$0xff] %v15625_v45  ;;  %20196 = vst [vmem:[#allocation66_spill] sm:$0xff] %v15634_v57  ;;  %11671 = vmatpush3.msra.mxu0 %v20194_v7  ;;  %v15642_v38 = vadd.f32 %v5855_v29, %v20199_v41  ;;  %v15644_v58 = vadd.f32 %v5854_v3, %v5838_v35  ;;  %11585 = vmatprep.mubr.f32.mxu0 %v15615_v13  ;;  %v20202_v36 = vld [vmem:[#allocation62_spill] sm:$0xff]  ;;  %v20212_v20 = vld [vmem:[#allocation31_spill] sm:$0xff] }
 0x27a   :  { %20198 = vst [vmem:[#allocation103_spill] sm:$0xff] %v15637_v1  ;;  %11672 = vmatprep.subr.mxu0 %v20202_v36  ;;  %11816 = vmatprep.subr.mxu1 %v20056_v25  ;;  %v20203_v3 = vld [vmem:[#allocation38_spill] sm:$0xff]  ;;  %v20214_v37 = vld [vmem:[#allocation37_spill] sm:$0xff]  ;;  %v20216_v29 = vld [vmem:[#allocation60_spill] sm:$0xff] }
 0x27b   :  { %20200 = vst [vmem:[#allocation104_spill] sm:$0xff] %v15642_v38  ;;  %20201 = vst [vmem:[#allocation105_spill] sm:$0xff] %v15644_v58  ;;  %11586 = vmatmul.mubr.f32.gmra.mxu0 %v15648_v28  ;;  %11736 = vmatmul.mubr.f32.gmra.mxu1 %v15163_v39  ;;  %v20218_v6 = vld [vmem:[#allocation65_spill] sm:$0xff]  ;;  %v20220_v35 = vld [vmem:[#allocation67_spill] sm:$0xff] }
 0x27c   :  { %11673 = vmatpush3.msra.mxu0 %v20202_v36  ;;  %11817 = vmatpush3.msra.mxu1 %v20056_v25  ;;  %v20205_v25 = vld [vmem:[#allocation42_spill] sm:$0xff]  ;;  %v20219_v18 = vld [vmem:[#allocation49_spill] sm:$0xff]  ;;  %v20221_v7 = vld [vmem:[#allocation91_spill] sm:$0xff] }
 0x27d   :  { %11674 = vmatprep.subr.mxu0 %v20203_v3  ;;  %11676 = vmatprep.mubr.f32.mxu0 %v15093_v12  ;;  %v20222_v54 = vld [vmem:[#allocation118_spill] sm:$0xff]  ;;  %v20223_v60 = vld [vmem:[#allocation68_spill] sm:$0xff]  ;;  %v20225_v36 = vld [vmem:[#allocation71_spill] sm:$0xff] }
 0x27e   :  { %11738 = vmatprep.mubr.f32.mxu1 %v15253_v17  ;;  %11818 = vmatprep.subr.mxu1 %v20063_v33  ;;  %v20224_v41 = vld [vmem:[#allocation56_spill] sm:$0xff]  ;;  %v20248_v58 = vld [vmem:[#allocation98_spill] sm:$0xff]  ;;  %v20249_v38 = vld [vmem:[#allocation29_spill] sm:$0xff] }
 0x27f   :  { %11675 = vmatpush3.msra.mxu0 %v20203_v3  ;;  %11819 = vmatpush3.msra.mxu1 %v20063_v33  ;;  %v20206_v33 = vld [vmem:[#allocation43_spill] sm:$0xff]  ;;  %v20226_v3 = vld [vmem:[#allocation116_spill] sm:$0xff]  ;;  %v20252_v45 = vld [vmem:[#allocation18_spill] sm:$0xff] }
 0x280   :  { %11756 = vmatprep.subr.mxu0 %v20204_v42  ;;  %11820 = vmatprep.subr.mxu1 %v20069_v34  ;;  %v20250_v1 = vld [vmem:[#allocation20_spill] sm:$0xff]  ;;  %v20253_v10 = vld [vmem:[#allocation33_spill] sm:$0xff] }
 0x281   :  { %11677 = vmatmul.mubr.f32.vlgmr.msra.gmra.mxu0 %v15073_v47  ;;  %11739 = vmatmul.mubr.f32.gmra.mxu1 %v15230_v23  ;;  %v20251_v57 = vld [vmem:[#allocation36_spill] sm:$0xff] }
 0x282   :  { %11757 = vmatpush3.msra.mxu0 %v20204_v42  ;;  %11821 = vmatpush3.msra.mxu1 %v20069_v34  ;;  %v20207_v34 = vld [vmem:[#allocation44_spill] sm:$0xff]  ;;  %v20227_v42 = vld [vmem:[#allocation73_spill] sm:$0xff] }
 0x283   :  { %11679 = vmatprep.mubr.f32.mxu0 %v15147_v48  ;;  %11741 = vmatprep.mubr.f32.mxu1 %v15325_v46  ;;  %v20254_v44 = vld [vmem:[#allocation24_spill] sm:$0xff] }
 0x284   :  { %11758 = vmatprep.subr.mxu0 %v20205_v25  ;;  %11822 = vmatprep.subr.mxu1 %v20073_v53 }
 0x285   :  { %11759 = vmatpush3.msra.mxu0 %v20205_v25  ;;  %11823 = vmatpush3.msra.mxu1 %v20073_v53  ;;  %v20208_v53 = vld [vmem:[#allocation46_spill] sm:$0xff]  ;;  %v20229_v25 = vld [vmem:[#allocation75_spill] sm:$0xff] }
 0x286   :  { %11760 = vmatprep.subr.mxu0 %v20206_v33  ;;  %11824 = vmatprep.subr.mxu1 %v20088_v0 }
 0x287   :  { %11680 = vmatmul.mubr.f32.gmra.mxu0 %v15126_v56  ;;  %11742 = vmatmul.mubr.f32.gmra.mxu1 %v15302_v19 }
 0x288   :  { %11761 = vmatpush3.msra.mxu0 %v20206_v33  ;;  %11825 = vmatpush3.msra.mxu1 %v20088_v0  ;;  %v20209_v0 = vld [vmem:[#allocation47_spill] sm:$0xff] }
 0x289   :  { %11682 = vmatprep.mubr.f32.mxu0 %v15216_v32  ;;  %11744 = vmatprep.mubr.f32.mxu1 %v15397_v4  ;;  %v20231_v33 = vld [vmem:[#allocation111_spill] sm:$0xff] }
 0x28a   :  { %11762 = vmatprep.subr.mxu0 %v20207_v34  ;;  %11826 = vmatprep.subr.mxu1 %v20091_v8 }
 0x28b   :  { %11763 = vmatpush3.msra.mxu0 %v20207_v34  ;;  %11827 = vmatpush3.msra.mxu1 %v20091_v8  ;;  %v20210_v8 = vld [vmem:[#allocation51_spill] sm:$0xff]  ;;  %v20232_v34 = vld [vmem:[#allocation45_spill] sm:$0xff] }
 0x28c   :  { %11764 = vmatprep.subr.mxu0 %v20208_v53  ;;  %11828 = vmatprep.subr.mxu1 %v20106_v52 }
 0x28d   :  { %11683 = vmatmul.mubr.f32.gmra.mxu0 %v15193_v22  ;;  %11745 = vmatmul.mubr.f32.gmra.mxu1 %v15374_v40 }
 0x28e   :  { %11765 = vmatpush3.msra.mxu0 %v20208_v53  ;;  %11829 = vmatpush3.msra.mxu1 %v20106_v52  ;;  %v20211_v52 = vld [vmem:[#allocation63_spill] sm:$0xff]  ;;  %v20233_v53 = vld [vmem:[#allocation77_spill] sm:$0xff] }
 0x28f   :  { %11685 = vmatprep.mubr.f32.mxu0 %v15287_v55  ;;  %11747 = vmatprep.mubr.f32.mxu1 %v15464_v5 }
 0x290   :  { %11766 = vmatprep.subr.mxu0 %v20209_v0  ;;  %11830 = vmatprep.subr.mxu1 %v20110_v16 }
 0x291   :  { %11767 = vmatpush3.msra.mxu0 %v20209_v0  ;;  %11831 = vmatpush3.msra.mxu1 %v20110_v16  ;;  %v20213_v16 = vld [vmem:[#allocation64_spill] sm:$0xff]  ;;  %v20234_v0 = vld [vmem:[#allocation59_spill] sm:$0xff] }
 0x292   :  { %11768 = vmatprep.subr.mxu0 %v20210_v8  ;;  %11832 = vmatprep.subr.mxu1 %v20125_v49 }
 0x293   :  { %11686 = vmatmul.mubr.f32.gmra.mxu0 %v15264_v14  ;;  %11748 = vmatmul.mubr.f32.gmra.mxu1 %v15441_v61 }
 0x294   :  { %11769 = vmatpush3.msra.mxu0 %v20210_v8  ;;  %11833 = vmatpush3.msra.mxu1 %v20125_v49  ;;  %v20217_v49 = vld [vmem:[#allocation92_spill] sm:$0xff]  ;;  %v20235_v8 = vld [vmem:[#allocation25_spill] sm:$0xff] }
 0x295   :  { %11688 = vmatprep.mubr.f32.mxu0 %v15359_v15  ;;  %11750 = vmatprep.mubr.f32.mxu1 %v15535_v11 }
 0x296   :  { %11770 = vmatprep.subr.mxu0 %v20211_v52  ;;  %11834 = vmatprep.subr.mxu1 %v20212_v20 }
 0x297   :  { %11771 = vmatpush3.msra.mxu0 %v20211_v52  ;;  %11835 = vmatpush3.msra.mxu1 %v20212_v20  ;;  %v20236_v52 = vld [vmem:[#allocation79_spill] sm:$0xff]  ;;  %v20237_v20 = vld [vmem:[#allocation120_spill] sm:$0xff] }
 0x298   :  { %11772 = vmatprep.subr.mxu0 %v20213_v16  ;;  %11836 = vmatprep.subr.mxu1 %v20214_v37 }
 0x299   :  { %11689 = vmatmul.mubr.f32.gmra.mxu0 %v20215_v9  ;;  %11751 = vmatmul.mubr.f32.gmra.mxu1 %v20216_v29 }
 0x29a   :  { %11773 = vmatpush3.msra.mxu0 %v20213_v16  ;;  %11837 = vmatpush3.msra.mxu1 %v20214_v37  ;;  %v20238_v16 = vld [vmem:[#allocation119_spill] sm:$0xff] }
 0x29b   :  { %11691 = vmatprep.mubr.f32.mxu0 %v20217_v49  ;;  %11753 = vmatprep.mubr.f32.mxu1 %v15581_v27  ;;  %v20239_v37 = vld [vmem:[#allocation99_spill] sm:$0xff] }
 0x29c   :  { %11774 = vmatprep.subr.mxu0 %v20218_v6  ;;  %11838 = vmatprep.subr.mxu1 %v20219_v18 }
 0x29d   :  { %11775 = vmatpush3.msra.mxu0 %v20218_v6  ;;  %11839 = vmatpush3.msra.mxu1 %v20219_v18  ;;  %v20240_v6 = vld [vmem:[#allocation30_spill] sm:$0xff]  ;;  %v20241_v18 = vld [vmem:[#allocation35_spill] sm:$0xff] }
 0x29e   :  { %11776 = vmatprep.subr.mxu0 %v20220_v35  ;;  %11840 = vmatprep.subr.mxu1 %v20164_v2 }
 0x29f   :  { %11692 = vmatmul.mubr.f32.gmra.mxu0 %v20221_v7  ;;  %11754 = vmatmul.mubr.f32.gmra.mxu1 %v15558_v62 }
 0x2a0   :  { %11777 = vmatpush3.msra.mxu0 %v20220_v35  ;;  %11841 = vmatpush3.msra.mxu1 %v20164_v2  ;;  %v20228_v2 = vld [vmem:[#allocation72_spill] sm:$0xff]  ;;  %v20242_v35 = vld [vmem:[#allocation89_spill] sm:$0xff] }
 0x2a1   :  { %11694 = vmatprep.mubr.f32.mxu0 %v20222_v54  ;;  %11778 = vmatprep.subr.mxu0 %v20223_v60 }
 0x2a2   :  { %11842 = vmatprep.subr.mxu1 %v20178_v43  ;;  %11844 = vmatprep.mubr.f32.mxu1 %v20224_v41 }
 0x2a3   :  { %11779 = vmatpush3.msra.mxu0 %v20223_v60  ;;  %11843 = vmatpush3.msra.mxu1 %v20178_v43  ;;  %v20230_v43 = vld [vmem:[#allocation69_spill] sm:$0xff] }
 0x2a4   :  { %11780 = vmatprep.subr.mxu0 %v20225_v36  ;;  %11924 = vmatprep.subr.mxu1 %v15648_v28  ;;  %v20243_v60 = vld [vmem:[#allocation117_spill] sm:$0xff] }
 0x2a5   :  { %11695 = vmatmul.mubr.f32.gmra.mxu0 %v20226_v3  ;;  %11845 = vmatmul.mubr.f32.vlgmr.msra.gmra.mxu1 %v20227_v42 }
 0x2a6   :  { %11781 = vmatpush3.msra.mxu0 %v20225_v36  ;;  %11925 = vmatpush3.msra.mxu1 %v15648_v28  ;;  %v20244_v36 = vld [vmem:[#allocation115_spill] sm:$0xff] }
 0x2a7   :  { %11697 = vmatprep.mubr.f32.mxu0 %v15551_v24  ;;  %11782 = vmatprep.subr.mxu0 %v20228_v2 }
 0x2a8   :  { %11847 = vmatprep.mubr.f32.mxu1 %v20229_v25  ;;  %11926 = vmatprep.subr.mxu1 %v15615_v13 }
 0x2a9   :  { %11783 = vmatpush3.msra.mxu0 %v20228_v2  ;;  %11927 = vmatpush3.msra.mxu1 %v15615_v13  ;;  %v20245_v2 = vld [vmem:[#allocation83_spill] sm:$0xff] }
 0x2aa   :  { %11784 = vmatprep.subr.mxu0 %v20230_v43  ;;  %11928 = vmatprep.subr.mxu1 %v15578_v21 }
 0x2ab   :  { %11698 = vmatmul.mubr.f32.gmra.mxu0 %v15527_v59  ;;  %11848 = vmatmul.mubr.f32.gmra.mxu1 %v20231_v33 }
 0x2ac   :  { %11785 = vmatpush3.msra.mxu0 %v20230_v43  ;;  %11929 = vmatpush3.msra.mxu1 %v15578_v21  ;;  %v20246_v43 = vld [vmem:[#allocation97_spill] sm:$0xff] }
 0x2ad   :  { %11786 = vmatprep.subr.mxu0 %v20232_v34  ;;  %11788 = vmatprep.mubr.f32.mxu0 %v20224_v41 }
 0x2ae   :  { %11850 = vmatprep.mubr.f32.mxu1 %v20233_v53  ;;  %11930 = vmatprep.subr.mxu1 %v15576_v31 }
 0x2af   :  { %11787 = vmatpush3.msra.mxu0 %v20232_v34  ;;  %11931 = vmatpush3.msra.mxu1 %v15576_v31  ;;  %v20247_v34 = vld [vmem:[#allocation39_spill] sm:$0xff] }
 0x2b0   :  { %11868 = vmatprep.subr.mxu0 %v15506_v50  ;;  %11932 = vmatprep.subr.mxu1 %v20234_v0 }
 0x2b1   :  { %11789 = vmatmul.mubr.f32.vlgmr.msra.gmra.mxu0 %v20227_v42  ;;  %11851 = vmatmul.mubr.f32.gmra.mxu1 %v20235_v8 }
 0x2b2   :  { %11869 = vmatpush3.msra.mxu0 %v15506_v50  ;;  %11933 = vmatpush3.msra.mxu1 %v20234_v0 }
 0x2b3   :  { %11791 = vmatprep.mubr.f32.mxu0 %v20229_v25  ;;  %11853 = vmatprep.mubr.f32.mxu1 %v20236_v52 }
 0x2b4   :  { %11870 = vmatprep.subr.mxu0 %v20237_v20  ;;  %11934 = vmatprep.subr.mxu1 %v20238_v16 }
 0x2b5   :  { %11871 = vmatpush3.msra.mxu0 %v20237_v20  ;;  %11935 = vmatpush3.msra.mxu1 %v20238_v16 }
 0x2b6   :  { %11872 = vmatprep.subr.mxu0 %v20239_v37  ;;  %11936 = vmatprep.subr.mxu1 %v20240_v6 }
 0x2b7   :  { %11792 = vmatmul.mubr.f32.gmra.mxu0 %v20231_v33  ;;  %11854 = vmatmul.mubr.f32.gmra.mxu1 %v20241_v18 }
 0x2b8   :  { %11873 = vmatpush3.msra.mxu0 %v20239_v37  ;;  %11937 = vmatpush3.msra.mxu1 %v20240_v6 }
 0x2b9   :  { %11794 = vmatprep.mubr.f32.mxu0 %v20233_v53  ;;  %11856 = vmatprep.mubr.f32.mxu1 %v20242_v35 }
 0x2ba   :  { %11874 = vmatprep.subr.mxu0 %v20243_v60  ;;  %11938 = vmatprep.subr.mxu1 %v20244_v36 }
 0x2bb   :  { %11875 = vmatpush3.msra.mxu0 %v20243_v60  ;;  %11939 = vmatpush3.msra.mxu1 %v20244_v36 }
 0x2bc   :  { %11876 = vmatprep.subr.mxu0 %v20245_v2  ;;  %11940 = vmatprep.subr.mxu1 %v20246_v43 }
 0x2bd   :  { %11795 = vmatmul.mubr.f32.gmra.mxu0 %v20235_v8  ;;  %11857 = vmatmul.mubr.f32.gmra.mxu1 %v20247_v34 }
 0x2be   :  { %11877 = vmatpush3.msra.mxu0 %v20245_v2  ;;  %11941 = vmatpush3.msra.mxu1 %v20246_v43 }
 0x2bf   :  { %11797 = vmatprep.mubr.f32.mxu0 %v20236_v52  ;;  %11859 = vmatprep.mubr.f32.mxu1 %v20248_v58 }
 0x2c0   :  { %11878 = vmatprep.subr.mxu0 %v20248_v58  ;;  %11942 = vmatprep.subr.mxu1 %v20249_v38 }
 0x2c1   :  { %11879 = vmatpush3.msra.mxu0 %v20248_v58  ;;  %11943 = vmatpush3.msra.mxu1 %v20249_v38 }
 0x2c2   :  { %11880 = vmatprep.subr.mxu0 %v20247_v34  ;;  %11944 = vmatprep.subr.mxu1 %v20250_v1 }
 0x2c3   :  { %11798 = vmatmul.mubr.f32.gmra.mxu0 %v20241_v18  ;;  %11860 = vmatmul.mubr.f32.gmra.mxu1 %v20245_v2 }
 0x2c4   :  { %11881 = vmatpush3.msra.mxu0 %v20247_v34  ;;  %11945 = vmatpush3.msra.mxu1 %v20250_v1 }
 0x2c5   :  { %11800 = vmatprep.mubr.f32.mxu0 %v20242_v35  ;;  %11862 = vmatprep.mubr.f32.mxu1 %v20243_v60 }
 0x2c6   :  { %11882 = vmatprep.subr.mxu0 %v20242_v35  ;;  %11946 = vmatprep.subr.mxu1 %v20251_v57 }
 0x2c7   :  { %11883 = vmatpush3.msra.mxu0 %v20242_v35  ;;  %11947 = vmatpush3.msra.mxu1 %v20251_v57 }
 0x2c8   :  { %11884 = vmatprep.subr.mxu0 %v20241_v18  ;;  %11948 = vmatprep.subr.mxu1 %v20252_v45 }
 0x2c9   :  { %11801 = vmatmul.mubr.f32.gmra.mxu0 %v20247_v34  ;;  %11863 = vmatmul.mubr.f32.gmra.mxu1 %v20239_v37 }
 0x2ca   :  { %11885 = vmatpush3.msra.mxu0 %v20241_v18  ;;  %11949 = vmatpush3.msra.mxu1 %v20252_v45 }
 0x2cb   :  { %11803 = vmatprep.mubr.f32.mxu0 %v20248_v58  ;;  %11865 = vmatprep.mubr.f32.mxu1 %v20237_v20 }
 0x2cc   :  { %11886 = vmatprep.subr.mxu0 %v20236_v52  ;;  %11950 = vmatprep.subr.mxu1 %v20253_v10 }
 0x2cd   :  { %11887 = vmatpush3.msra.mxu0 %v20236_v52  ;;  %11951 = vmatpush3.msra.mxu1 %v20253_v10 }
 0x2ce   :  { %11888 = vmatprep.subr.mxu0 %v20235_v8  ;;  %11952 = vmatprep.subr.mxu1 %v20254_v44 }
 0x2cf   :  { %11804 = vmatmul.mubr.f32.gmra.mxu0 %v20245_v2  ;;  %11866 = vmatmul.mubr.f32.gmra.mxu1 %v15506_v50 }
 0x2d0   :  { %11889 = vmatpush3.msra.mxu0 %v20235_v8  ;;  %11953 = vmatpush3.msra.mxu1 %v20254_v44 }
 0x2d1   :  { %11806 = vmatprep.mubr.f32.mxu0 %v20243_v60  ;;  %11890 = vmatprep.subr.mxu0 %v20233_v53 }
 0x2d2   :  { %11954 = vmatprep.subr.mxu1 %v20255_v51  ;;  %11956 = vmatprep.mubr.f32.mxu1 %v20224_v41 }
 0x2d3   :  { %11891 = vmatpush3.msra.mxu0 %v20233_v53  ;;  %11955 = vmatpush3.msra.mxu1 %v20255_v51 }
 0x2d4   :  { %11892 = vmatprep.subr.mxu0 %v20231_v33  ;;  %12036 = vmatprep.subr.mxu1 %v15506_v50 }
 0x2d5   :  { %11807 = vmatmul.mubr.f32.gmra.mxu0 %v20239_v37  ;;  %11957 = vmatmul.mubr.f32.vlgmr.msra.gmra.mxu1 %v20227_v42 }
 0x2d6   :  { %11893 = vmatpush3.msra.mxu0 %v20231_v33  ;;  %12037 = vmatpush3.msra.mxu1 %v15506_v50 }
 0x2d7   :  { %11809 = vmatprep.mubr.f32.mxu0 %v20237_v20  ;;  %11894 = vmatprep.subr.mxu0 %v20229_v25 }
 0x2d8   :  { %11959 = vmatprep.mubr.f32.mxu1 %v20229_v25  ;;  %12038 = vmatprep.subr.mxu1 %v20237_v20 }
 0x2d9   :  { %11895 = vmatpush3.msra.mxu0 %v20229_v25  ;;  %12039 = vmatpush3.msra.mxu1 %v20237_v20 }
 0x2da   :  { %11896 = vmatprep.subr.mxu0 %v20227_v42  ;;  %12040 = vmatprep.subr.mxu1 %v20239_v37 }
 0x2db   :  { %11810 = vmatmul.mubr.f32.gmra.mxu0 %v15506_v50  ;;  %11960 = vmatmul.mubr.f32.gmra.mxu1 %v20231_v33 }
 0x2dc   :  { %11897 = vmatpush3.msra.mxu0 %v20227_v42  ;;  %12041 = vmatpush3.msra.mxu1 %v20239_v37 }
 0x2dd   :  { %11898 = vmatprep.subr.mxu0 %v20224_v41  ;;  %11900 = vmatprep.mubr.f32.mxu0 %v20255_v51 }
 0x2de   :  { %11962 = vmatprep.mubr.f32.mxu1 %v20233_v53  ;;  %12042 = vmatprep.subr.mxu1 %v20243_v60 }
 0x2df   :  { %11899 = vmatpush3.msra.mxu0 %v20224_v41  ;;  %12043 = vmatpush3.msra.mxu1 %v20243_v60 }
 0x2e0   :  { %11980 = vmatprep.subr.mxu0 %v15527_v59  ;;  %12044 = vmatprep.subr.mxu1 %v20245_v2 }
 0x2e1   :  { %11901 = vmatmul.mubr.f32.vlgmr.msra.gmra.mxu0 %v20254_v44  ;;  %11963 = vmatmul.mubr.f32.gmra.mxu1 %v20235_v8  ;;  %v20256_v44 = vld [vmem:[#allocation17_spill] sm:$0xff] }
 0x2e2   :  { %11981 = vmatpush3.msra.mxu0 %v15527_v59  ;;  %12045 = vmatpush3.msra.mxu1 %v20245_v2 }
 0x2e3   :  { %11903 = vmatprep.mubr.f32.mxu0 %v20253_v10  ;;  %11965 = vmatprep.mubr.f32.mxu1 %v20236_v52 }
 0x2e4   :  { %11982 = vmatprep.subr.mxu0 %v15551_v24  ;;  %12046 = vmatprep.subr.mxu1 %v20248_v58 }
 0x2e5   :  { %11983 = vmatpush3.msra.mxu0 %v15551_v24  ;;  %12047 = vmatpush3.msra.mxu1 %v20248_v58 }
 0x2e6   :  { %11984 = vmatprep.subr.mxu0 %v20226_v3  ;;  %12048 = vmatprep.subr.mxu1 %v20247_v34 }
 0x2e7   :  { %11904 = vmatmul.mubr.f32.gmra.mxu0 %v20252_v45  ;;  %11966 = vmatmul.mubr.f32.gmra.mxu1 %v20241_v18 }
 0x2e8   :  { %11985 = vmatpush3.msra.mxu0 %v20226_v3  ;;  %12049 = vmatpush3.msra.mxu1 %v20247_v34 }
 0x2e9   :  { %11906 = vmatprep.mubr.f32.mxu0 %v20251_v57  ;;  %11968 = vmatprep.mubr.f32.mxu1 %v20242_v35 }
 0x2ea   :  { %11986 = vmatprep.subr.mxu0 %v20222_v54  ;;  %12050 = vmatprep.subr.mxu1 %v20242_v35 }
 0x2eb   :  { %11987 = vmatpush3.msra.mxu0 %v20222_v54  ;;  %12051 = vmatpush3.msra.mxu1 %v20242_v35 }
 0x2ec   :  { %11988 = vmatprep.subr.mxu0 %v20221_v7  ;;  %12052 = vmatprep.subr.mxu1 %v20241_v18 }
 0x2ed   :  { %11907 = vmatmul.mubr.f32.gmra.mxu0 %v20250_v1  ;;  %11969 = vmatmul.mubr.f32.gmra.mxu1 %v20247_v34 }
 0x2ee   :  { %11989 = vmatpush3.msra.mxu0 %v20221_v7  ;;  %12053 = vmatpush3.msra.mxu1 %v20241_v18 }
 0x2ef   :  { %11909 = vmatprep.mubr.f32.mxu0 %v20249_v38  ;;  %11971 = vmatprep.mubr.f32.mxu1 %v20248_v58 }
 0x2f0   :  { %11990 = vmatprep.subr.mxu0 %v20217_v49  ;;  %12054 = vmatprep.subr.mxu1 %v20236_v52 }
 0x2f1   :  { %11991 = vmatpush3.msra.mxu0 %v20217_v49  ;;  %12055 = vmatpush3.msra.mxu1 %v20236_v52 }
 0x2f2   :  { %11992 = vmatprep.subr.mxu0 %v20215_v9  ;;  %12056 = vmatprep.subr.mxu1 %v20235_v8 }
 0x2f3   :  { %11910 = vmatmul.mubr.f32.gmra.mxu0 %v20246_v43  ;;  %11972 = vmatmul.mubr.f32.gmra.mxu1 %v20245_v2 }
 0x2f4   :  { %11993 = vmatpush3.msra.mxu0 %v20215_v9  ;;  %12057 = vmatpush3.msra.mxu1 %v20235_v8 }
 0x2f5   :  { %11912 = vmatprep.mubr.f32.mxu0 %v20244_v36  ;;  %11974 = vmatprep.mubr.f32.mxu1 %v20243_v60 }
 0x2f6   :  { %11994 = vmatprep.subr.mxu0 %v15359_v15  ;;  %12058 = vmatprep.subr.mxu1 %v20233_v53 }
 0x2f7   :  { %11995 = vmatpush3.msra.mxu0 %v15359_v15  ;;  %12059 = vmatpush3.msra.mxu1 %v20233_v53 }
 0x2f8   :  { %11996 = vmatprep.subr.mxu0 %v15264_v14  ;;  %12060 = vmatprep.subr.mxu1 %v20231_v33 }
 0x2f9   :  { %11913 = vmatmul.mubr.f32.gmra.mxu0 %v20240_v6  ;;  %11975 = vmatmul.mubr.f32.gmra.mxu1 %v20239_v37 }
 0x2fa   :  { %11997 = vmatpush3.msra.mxu0 %v15264_v14  ;;  %12061 = vmatpush3.msra.mxu1 %v20231_v33 }
 0x2fb   :  { %11915 = vmatprep.mubr.f32.mxu0 %v20238_v16  ;;  %11977 = vmatprep.mubr.f32.mxu1 %v20237_v20 }
 0x2fc   :  { %11998 = vmatprep.subr.mxu0 %v15287_v55  ;;  %12062 = vmatprep.subr.mxu1 %v20229_v25 }
 0x2fd   :  { %11999 = vmatpush3.msra.mxu0 %v15287_v55  ;;  %12063 = vmatpush3.msra.mxu1 %v20229_v25 }
 0x2fe   :  { %12000 = vmatprep.subr.mxu0 %v15193_v22  ;;  %12064 = vmatprep.subr.mxu1 %v20227_v42 }
 0x2ff   :  { %11916 = vmatmul.mubr.f32.gmra.mxu0 %v20234_v0  ;;  %11978 = vmatmul.mubr.f32.gmra.mxu1 %v15506_v50 }
 0x300   :  { %12001 = vmatpush3.msra.mxu0 %v15193_v22  ;;  %12065 = vmatpush3.msra.mxu1 %v20227_v42 }
 0x301   :  { %11918 = vmatprep.mubr.f32.mxu0 %v15576_v31  ;;  %12002 = vmatprep.subr.mxu0 %v15216_v32 }
 0x302   :  { %12066 = vmatprep.subr.mxu1 %v20224_v41  ;;  %12068 = vmatprep.mubr.f32.mxu1 %v20256_v44 }
 0x303   :  { %12003 = vmatpush3.msra.mxu0 %v15216_v32  ;;  %12067 = vmatpush3.msra.mxu1 %v20224_v41  ;;  %v11622_v31 = vpop.f32.mrf.mxu1 }
 0x304   :  { %12004 = vmatprep.subr.mxu0 %v15126_v56  ;;  %12148 = vmatprep.subr.mxu1 %v15506_v50 }
 0x305   :  { %11919 = vmatmul.mubr.f32.gmra.mxu0 %v15578_v21  ;;  %12069 = vmatmul.mubr.f32.vlgmr.msra.gmra.mxu1 %v15099_v30  ;;  %v15940_v21 = vpop.f32.mrf.mxu1 }
 0x306   :  { %12005 = vmatpush3.msra.mxu0 %v15126_v56  ;;  %12149 = vmatpush3.msra.mxu1 %v15506_v50 }
 0x307   :  { %11921 = vmatprep.mubr.f32.mxu0 %v15615_v13  ;;  %12006 = vmatprep.subr.mxu0 %v15147_v48 }
 0x308   :  { %12071 = vmatprep.mubr.f32.mxu1 %v15182_v63  ;;  %12150 = vmatprep.subr.mxu1 %v20237_v20 }
 0x309   :  { %12007 = vmatpush3.msra.mxu0 %v15147_v48  ;;  %12151 = vmatpush3.msra.mxu1 %v20237_v20 }
 0x30a   :  { %12008 = vmatprep.subr.mxu0 %v15073_v47  ;;  %12152 = vmatprep.subr.mxu1 %v20239_v37  ;;  %v11625_v51 = vpop.f32.mrf.mxu1 }
 0x30b   :  { %11922 = vmatmul.mubr.f32.gmra.mxu0 %v15648_v28  ;;  %12072 = vmatmul.mubr.f32.gmra.mxu1 %v15163_v39 }
 0x30c   :  { %12009 = vmatpush3.msra.mxu0 %v15073_v47  ;;  %12153 = vmatpush3.msra.mxu1 %v20239_v37  ;;  %v15954_v13 = vpop.f32.mrf.mxu1  ;;  %v11566_v10 = vpop.f32.mrf.mxu0 }
 0x30d   :  { %12010 = vmatprep.subr.mxu0 %v15093_v12  ;;  %12012 = vmatprep.mubr.f32.mxu0 %v15093_v12  ;;  %v15958_v45 = vadd.f32 %v11622_v31, %v11566_v10 }
 0x30e   :  { %12074 = vmatprep.mubr.f32.mxu1 %v15253_v17  ;;  %12154 = vmatprep.subr.mxu1 %v20243_v60 }
 0x30f   :  { %12011 = vmatpush3.msra.mxu0 %v15093_v12  ;;  %12155 = vmatpush3.msra.mxu1 %v20243_v60  ;;  %v15962_v12 = vpop.f32.mrf.mxu0 }
 0x310   :  { %12092 = vmatprep.subr.mxu0 %v15558_v62  ;;  %12156 = vmatprep.subr.mxu1 %v20245_v2  ;;  %v11628_v57 = vpop.f32.mrf.mxu1 }
 0x311   :  { %12013 = vmatmul.mubr.f32.vlgmr.msra.gmra.mxu0 %v15073_v47  ;;  %12075 = vmatmul.mubr.f32.gmra.mxu1 %v15230_v23 }
 0x312   :  { %12093 = vmatpush3.msra.mxu0 %v15558_v62  ;;  %12157 = vmatpush3.msra.mxu1 %v20245_v2  ;;  %v15972_v47 = vpop.f32.mrf.mxu1 }
 0x313   :  { %12015 = vmatprep.mubr.f32.mxu0 %v15147_v48  ;;  %12077 = vmatprep.mubr.f32.mxu1 %v15325_v46  ;;  %v11569_v1 = vpop.f32.mrf.mxu0 }
 0x314   :  { %12094 = vmatprep.subr.mxu0 %v15581_v27  ;;  %12158 = vmatprep.subr.mxu1 %v20248_v58  ;;  %v15976_v48 = vadd.f32 %v11625_v51, %v11569_v1 }
 0x315   :  { %12095 = vmatpush3.msra.mxu0 %v15581_v27  ;;  %12159 = vmatpush3.msra.mxu1 %v20248_v58  ;;  %v15980_v38 = vpop.f32.mrf.mxu0 }
 0x316   :  { %12096 = vmatprep.subr.mxu0 %v20216_v29  ;;  %12160 = vmatprep.subr.mxu1 %v20247_v34 }
 0x317   :  { %12016 = vmatmul.mubr.f32.gmra.mxu0 %v15126_v56  ;;  %12078 = vmatmul.mubr.f32.gmra.mxu1 %v15302_v19  ;;  %v11631_v28 = vpop.f32.mrf.mxu1 }
 0x318   :  { %12097 = vmatpush3.msra.mxu0 %v20216_v29  ;;  %12161 = vmatpush3.msra.mxu1 %v20247_v34 }
 0x319   :  { %12018 = vmatprep.mubr.f32.mxu0 %v15216_v32  ;;  %12080 = vmatprep.mubr.f32.mxu1 %v15397_v4  ;;  %v15990_v56 = vpop.f32.mrf.mxu1 }
 0x31a   :  { %12098 = vmatprep.subr.mxu0 %v15535_v11  ;;  %12162 = vmatprep.subr.mxu1 %v20242_v35  ;;  %v11572_v0 = vpop.f32.mrf.mxu0 }
 0x31b   :  { %12099 = vmatpush3.msra.mxu0 %v15535_v11  ;;  %12163 = vmatpush3.msra.mxu1 %v20242_v35  ;;  %v15994_v32 = vadd.f32 %v11628_v57, %v11572_v0 }
 0x31c   :  { %12100 = vmatprep.subr.mxu0 %v15441_v61  ;;  %12164 = vmatprep.subr.mxu1 %v20241_v18  ;;  %v15998_v16 = vpop.f32.mrf.mxu0 }
 0x31d   :  { %12019 = vmatmul.mubr.f32.gmra.mxu0 %v15193_v22  ;;  %12081 = vmatmul.mubr.f32.gmra.mxu1 %v15374_v40 }
 0x31e   :  { %12101 = vmatpush3.msra.mxu0 %v15441_v61  ;;  %12165 = vmatpush3.msra.mxu1 %v20241_v18  ;;  %v11634_v6 = vpop.f32.mrf.mxu1 }
 0x31f   :  { %12021 = vmatprep.mubr.f32.mxu0 %v15287_v55  ;;  %12083 = vmatprep.mubr.f32.mxu1 %v15464_v5 }
 0x320   :  { %12102 = vmatprep.subr.mxu0 %v15464_v5  ;;  %12166 = vmatprep.subr.mxu1 %v20236_v52  ;;  %v16008_v22 = vpop.f32.mrf.mxu1  ;;  %v11575_v36 = vpop.f32.mrf.mxu0 }
 0x321   :  { %12103 = vmatpush3.msra.mxu0 %v15464_v5  ;;  %12167 = vmatpush3.msra.mxu1 %v20236_v52  ;;  %v16012_v55 = vadd.f32 %v11631_v28, %v11575_v36 }
 0x322   :  { %12104 = vmatprep.subr.mxu0 %v15374_v40  ;;  %12168 = vmatprep.subr.mxu1 %v20235_v8  ;;  %v16016_v5 = vpop.f32.mrf.mxu0 }
 0x323   :  { %12022 = vmatmul.mubr.f32.gmra.mxu0 %v15264_v14  ;;  %12084 = vmatmul.mubr.f32.gmra.mxu1 %v15441_v61 }
 0x324   :  { %12105 = vmatpush3.msra.mxu0 %v15374_v40  ;;  %12169 = vmatpush3.msra.mxu1 %v20235_v8  ;;  %v11637_v43 = vpop.f32.mrf.mxu1 }
 0x325   :  { %12024 = vmatprep.mubr.f32.mxu0 %v15359_v15  ;;  %12086 = vmatprep.mubr.f32.mxu1 %v15535_v11 }
 0x326   :  { %12106 = vmatprep.subr.mxu0 %v15397_v4  ;;  %12170 = vmatprep.subr.mxu1 %v20233_v53  ;;  %v16026_v14 = vpop.f32.mrf.mxu1 }
 0x327   :  { %12107 = vmatpush3.msra.mxu0 %v15397_v4  ;;  %12171 = vmatpush3.msra.mxu1 %v20233_v53  ;;  %v11578_v40 = vpop.f32.mrf.mxu0 }
 0x328   :  { %12108 = vmatprep.subr.mxu0 %v15302_v19  ;;  %12172 = vmatprep.subr.mxu1 %v20231_v33  ;;  %v16030_v15 = vadd.f32 %v11634_v6, %v11578_v40 }
 0x329   :  { %12025 = vmatmul.mubr.f32.gmra.mxu0 %v20215_v9  ;;  %12087 = vmatmul.mubr.f32.gmra.mxu1 %v20216_v29  ;;  %v16034_v4 = vpop.f32.mrf.mxu0 }
 0x32a   :  { %12109 = vmatpush3.msra.mxu0 %v15302_v19  ;;  %12173 = vmatpush3.msra.mxu1 %v20231_v33 }
 0x32b   :  { %12027 = vmatprep.mubr.f32.mxu0 %v20217_v49  ;;  %12089 = vmatprep.mubr.f32.mxu1 %v15581_v27  ;;  %v11640_v61 = vpop.f32.mrf.mxu1 }
 0x32c   :  { %12110 = vmatprep.subr.mxu0 %v15325_v46  ;;  %12174 = vmatprep.subr.mxu1 %v20229_v25 }
 0x32d   :  { %12111 = vmatpush3.msra.mxu0 %v15325_v46  ;;  %12175 = vmatpush3.msra.mxu1 %v20229_v25  ;;  %v16044_v19 = vpop.f32.mrf.mxu1 }
 0x32e   :  { %12112 = vmatprep.subr.mxu0 %v15230_v23  ;;  %12176 = vmatprep.subr.mxu1 %v20227_v42  ;;  %v11581_v11 = vpop.f32.mrf.mxu0 }
 0x32f   :  { %12028 = vmatmul.mubr.f32.gmra.mxu0 %v20221_v7  ;;  %12090 = vmatmul.mubr.f32.gmra.mxu1 %v15558_v62  ;;  %v16048_v27 = vadd.f32 %v11637_v43, %v11581_v11 }
 0x330   :  { %12113 = vmatpush3.msra.mxu0 %v15230_v23  ;;  %12177 = vmatpush3.msra.mxu1 %v20227_v42  ;;  %v11643_v46 = vpop.f32.mrf.mxu1  ;;  %v16054_v9 = vpop.f32.mrf.mxu0 }
 0x331   :  { %12030 = vmatprep.mubr.f32.mxu0 %v20222_v54  ;;  %12114 = vmatprep.subr.mxu0 %v15253_v17 }
 0x332   :  { %12178 = vmatprep.subr.mxu1 %v20224_v41  ;;  %12180 = vmatprep.mubr.f32.mxu1 %v20224_v41  ;;  %v16058_v29 = vpop.f32.mrf.mxu1 }
 0x333   :  { %12115 = vmatpush3.msra.mxu0 %v15253_v17  ;;  %12179 = vmatpush3.msra.mxu1 %v20224_v41 }
 0x334   :  { %12116 = vmatprep.subr.mxu0 %v15163_v39  ;;  %12031 = vmatmul.mubr.f32.gmra.mxu0 %v20226_v3  ;;  %v11584_v62 = vpop.f32.mrf.mxu0 }
 0x335   :  { %12117 = vmatpush3.msra.mxu0 %v15163_v39  ;;  %12181 = vmatmul.mubr.f32.vlgmr.msra.gmra.mxu1 %v20227_v42  ;;  %v11734_v23 = vpop.f32.mrf.mxu1  ;;  %v16068_v49 = vadd.f32 %v11640_v61, %v11584_v62 }
 0x336   :  { %12033 = vmatprep.mubr.f32.mxu0 %v15551_v24  ;;  %12118 = vmatprep.subr.mxu0 %v15182_v63  ;;  %v16072_v17 = vpop.f32.mrf.mxu0 }
 0x337   :  { %12183 = vmatprep.mubr.f32.mxu1 %v20229_v25  ;;  %12119 = vmatpush3.msra.mxu0 %v15182_v63  ;;  %v16074_v7 = vpop.f32.mrf.mxu1 }
 0x338   :  { %12120 = vmatprep.subr.mxu0 %v15099_v30  ;;  %12034 = vmatmul.mubr.f32.gmra.mxu0 %v15527_v59 }
 0x339   :  { %12121 = vmatpush3.msra.mxu0 %v15099_v30  ;;  %12184 = vmatmul.mubr.f32.gmra.mxu1 %v20231_v33 }
 0x33a   :  { %12122 = vmatprep.subr.mxu0 %v20256_v44  ;;  %12124 = vmatprep.mubr.f32.mxu0 %v20224_v41 }
 0x33b   :  { %12186 = vmatprep.mubr.f32.mxu1 %v20233_v53  ;;  %12123 = vmatpush3.msra.mxu0 %v20256_v44  ;;  %v11587_v39 = vpop.f32.mrf.mxu0  ;;  %v11737_v63 = vpop.f32.mrf.mxu1 }
 0x33c   :  { %12125 = vmatmul.mubr.f32.vlgmr.msra.gmra.mxu0 %v20227_v42  ;;  %v16085_v24 = vadd.f32 %v11643_v46, %v11587_v39 }
 0x33d   :  { %12187 = vmatmul.mubr.f32.gmra.mxu1 %v20235_v8  ;;  %12127 = vmatprep.mubr.f32.mxu0 %v20229_v25  ;;  %v16089_v30 = vpop.f32.mrf.mxu0  ;;  %v16091_v59 = vpop.f32.mrf.mxu1 }
 0x33e   :  { %12189 = vmatprep.mubr.f32.mxu1 %v20236_v52 }
 0x340   :  { %12128 = vmatmul.mubr.f32.gmra.mxu0 %v20231_v33 }
 0x341   :  { %12190 = vmatmul.mubr.f32.gmra.mxu1 %v20241_v18  ;;  %12130 = vmatprep.mubr.f32.mxu0 %v20233_v53  ;;  %v11678_v54 = vpop.f32.mrf.mxu0  ;;  %v11740_v41 = vpop.f32.mrf.mxu1 }
 0x342   :  { %12192 = vmatprep.mubr.f32.mxu1 %v20242_v35  ;;  %v2284_v3 = vadd.f32 %v11678_v54, %v15958_v45 }
 0x343   :  { %v16099_v42 = vpop.f32.mrf.mxu0  ;;  %v16101_v25 = vpop.f32.mrf.mxu1 }
 0x344   :  { %12131 = vmatmul.mubr.f32.gmra.mxu0 %v20235_v8  ;;  %v16104_v44 = vadd.f32 %v11734_v23, %v2284_v3 }
 0x345   :  { %12193 = vmatmul.mubr.f32.gmra.mxu1 %v20247_v34  ;;  %12133 = vmatprep.mubr.f32.mxu0 %v20236_v52 }
 0x346   :  { %12195 = vmatprep.mubr.f32.mxu1 %v20248_v58 }
 0x347   :  { %v11681_v33 = vpop.f32.mrf.mxu0  ;;  %v11743_v53 = vpop.f32.mrf.mxu1 }
 0x348   :  { %12134 = vmatmul.mubr.f32.gmra.mxu0 %v20241_v18  ;;  %v2298_v31 = vadd.f32 %v11681_v33, %v15976_v48 }
 0x349   :  { %12196 = vmatmul.mubr.f32.gmra.mxu1 %v20245_v2  ;;  %12136 = vmatprep.mubr.f32.mxu0 %v20242_v35  ;;  %v2290_v51 = vpop.f32.mrf.mxu0  ;;  %v16113_v8 = vpop.f32.mrf.mxu1 }
 0x34a   :  { %12198 = vmatprep.mubr.f32.mxu1 %v20243_v60  ;;  %v16116_v10 = vadd.f32 %v11737_v63, %v2298_v31 }
 0x34c   :  { %12137 = vmatmul.mubr.f32.gmra.mxu0 %v20247_v34 }
 0x34d   :  { %12199 = vmatmul.mubr.f32.gmra.mxu1 %v20239_v37  ;;  %12139 = vmatprep.mubr.f32.mxu0 %v20248_v58  ;;  %v11684_v52 = vpop.f32.mrf.mxu0  ;;  %v11746_v18 = vpop.f32.mrf.mxu1 }
 0x34e   :  { %12201 = vmatprep.mubr.f32.mxu1 %v20237_v20  ;;  %v2312_v45 = vadd.f32 %v11684_v52, %v15994_v32 }
 0x34f   :  { %v16123_v35 = vpop.f32.mrf.mxu0  ;;  %v16125_v57 = vpop.f32.mrf.mxu1 }
 0x350   :  { %12140 = vmatmul.mubr.f32.gmra.mxu0 %v20245_v2  ;;  %v16128_v1 = vadd.f32 %v11740_v41, %v2312_v45  ;;  %v2095_v45 = vadd.f32 %v15954_v13, %v15980_v38  ;;  %v20258_v13 = vld [vmem:[#allocation55_spill] sm:$0xff] }
 0x351   :  { %12202 = vmatmul.mubr.f32.gmra.mxu1 %v15506_v50  ;;  %12142 = vmatprep.mubr.f32.mxu0 %v20243_v60 }
 0x353   :  { %v11687_v34 = vpop.f32.mrf.mxu0  ;;  %v11749_v58 = vpop.f32.mrf.mxu1 }
 0x354   :  { %12143 = vmatmul.mubr.f32.gmra.mxu0 %v20239_v37  ;;  %v2326_v48 = vadd.f32 %v11687_v34, %v16012_v55 }
 0x355   :  { %12145 = vmatprep.mubr.f32.mxu0 %v20237_v20  ;;  %v16135_v28 = vpop.f32.mrf.mxu0  ;;  %v16137_v0 = vpop.f32.mrf.mxu1 }
 0x356   :  { %v16139_v32 = vadd.f32 %v11743_v53, %v2326_v48 }
 0x358   :  { %12146 = vmatmul.mubr.f32.gmra.mxu0 %v15506_v50 }
 0x359   :  { %v11690_v2 = vpop.f32.mrf.mxu0  ;;  %v11752_v6 = vpop.f32.mrf.mxu1 }
 0x35a   :  { %v2340_v60 = vadd.f32 %v11690_v2, %v16030_v15 }
 0x35b   :  { %v16143_v36 = vpop.f32.mrf.mxu0  ;;  %v16145_v43 = vpop.f32.mrf.mxu1 }
 0x35c   :  { %v16147_v37 = vadd.f32 %v11746_v18, %v2340_v60 }
 0x35f   :  { %v11693_v55 = vpop.f32.mrf.mxu0  ;;  %v11755_v20 = vpop.f32.mrf.mxu1 }
 0x360   :  { %v2354_v40 = vadd.f32 %v11693_v55, %v16048_v27  ;;  %v2083_v27 = vadd.f32 %v15940_v21, %v15962_v12  ;;  %v2291_v12 = vadd.f32 %v2290_v51, %v2095_v45  ;;  %v20259_v51 = vld [vmem:[#allocation54_spill] sm:$0xff] }
 0x361   :  { %v16150_v61 = vpop.f32.mrf.mxu0  ;;  %v16152_v11 = vpop.f32.mrf.mxu1  ;;  %v20263_v45 = vld [vmem:[#allocation74_spill] sm:$0xff] }
 0x362   :  { %v16154_v46 = vadd.f32 %v11749_v58, %v2354_v40  ;;  %v2277_v31 = vadd.f32 %v16099_v42, %v2083_v27  ;;  %v20261_v27 = vld [vmem:[#allocation21_spill] sm:$0xff] }
 0x364   :  { %v2471_v58 = vadd.f32 %v16074_v7, %v2277_v31 }
 0x365   :  { %v11696_v50 = vpop.f32.mrf.mxu0  ;;  %v11846_v62 = vpop.f32.mrf.mxu1 }
 0x366   :  { %v2368_v15 = vadd.f32 %v11696_v50, %v16068_v49 }
 0x367   :  { %v16157_v23 = vpop.f32.mrf.mxu0  ;;  %v2886_v39 = vpop.f32.mrf.mxu1 }
 0x368   :  { %v16159_v63 = vadd.f32 %v11752_v6, %v2368_v15 }
 0x36b   :  { %v11699_v54 = vpop.f32.mrf.mxu0  ;;  %v11849_v41 = vpop.f32.mrf.mxu1 }
 0x36c   :  { %v2382_v3 = vadd.f32 %v11699_v54, %v16085_v24 }
 0x36d   :  { %v16164_v33 = vpop.f32.mrf.mxu0  ;;  %v2898_v53 = vpop.f32.mrf.mxu1 }
 0x36e   :  { %v16167_v52 = vadd.f32 %v11755_v20, %v2382_v3  ;;  %v2107_v20 = vadd.f32 %v15972_v47, %v15998_v16 }
 0x370   :  { %v2305_v16 = vadd.f32 %v16123_v35, %v2107_v20 }
 0x371   :  { %v11790_v49 = vpop.f32.mrf.mxu0  ;;  %v11852_v18 = vpop.f32.mrf.mxu1 }
 0x372   :  { %v2716_v34 = vadd.f32 %v11790_v49, %v16104_v44  ;;  %v2487_v44 = vadd.f32 %v16091_v59, %v2291_v12  ;;  %v20265_v59 = vld [vmem:[#allocation88_spill] sm:$0xff]  ;;  %v2503_v20 = vadd.f32 %v16101_v25, %v2305_v16  ;;  %v20275_v25 = vld [vmem:[#allocation93_spill] sm:$0xff] }
 0x373   :  { %v2709_v48 = vpop.f32.mrf.mxu0  ;;  %v2910_v21 = vpop.f32.mrf.mxu1 }
 0x374   :  { %v2893_v24 = vadd.f32 %v11846_v62, %v2716_v34  ;;  %v2710_v2 = vadd.f32 %v2709_v48, %v2471_v58 }
 0x376   :  { %v4347_v6 = vmul.f32 2.5052108e-08, %v2893_v24  ;;  %v16173_v60 = vadd.f32 %v2886_v39, %v2710_v2  ;;  %v4491_v42 = vmul.f32 0.0001984127, %v2893_v24  ;;  %v5873_v55 = vmul.f32 0.16666667, %v2893_v24 }
 0x377   :  { %v11793_v40 = vpop.f32.mrf.mxu0  ;;  %v11855_v50 = vpop.f32.mrf.mxu1  ;;  %v2119_v2 = vadd.f32 %v15990_v56, %v16016_v5 }
 0x378   :  { %20257 = vst [vmem:[#allocation106_spill] sm:$0xff] %v16173_v60  ;;  %v16178_v38 = vadd.f32 %v4347_v6, %v20258_v13  ;;  %v2728_v7 = vadd.f32 %v11793_v40, %v16116_v10  ;;  %v16183_v62 = vadd.f32 %v4491_v42, %v20259_v51  ;;  %v4490_v54 = vmul.f32 0.0001984127, %v16173_v60  ;;  %v20269_v40 = vld [vmem:[#allocation16_spill] sm:$0xff] }
 0x379   :  { %v2721_v15 = vpop.f32.mrf.mxu0  ;;  %v2922_v39 = vpop.f32.mrf.mxu1  ;;  %v16187_v3 = vadd.f32 %v5873_v55, %v20261_v27  ;;  %v5872_v47 = vmul.f32 0.16666667, %v16173_v60  ;;  %v20268_v55 = vld [vmem:[#allocation11_spill] sm:$0xff]  ;;  %v20271_v51 = vld [vmem:[#allocation48_spill] sm:$0xff]  ;;  %v2319_v5 = vadd.f32 %v16135_v28, %v2119_v2 }
 0x37a   :  { %20260 = vst [vmem:[#allocation107_spill] sm:$0xff] %v16183_v62  ;;  %v2905_v31 = vadd.f32 %v11849_v41, %v2728_v7  ;;  %v2722_v49 = vadd.f32 %v2721_v15, %v2487_v44  ;;  %v16192_v10 = vadd.f32 %v4490_v54, %v20263_v45 }
 0x37b   :  { %20262 = vst [vmem:[#allocation12_spill] sm:$0xff] %v16187_v3  ;;  %v16195_v34 = vadd.f32 %v5872_v47, %v20265_v59  ;;  %v20273_v47 = vld [vmem:[#allocation19_spill] sm:$0xff]  ;;  %v2519_v2 = vadd.f32 %v16113_v8, %v2319_v5  ;;  %v20285_v8 = vld [vmem:[#allocation61_spill] sm:$0xff] }
 0x37c   :  { %20264 = vst [vmem:[#allocation22_spill] sm:$0xff] %v16192_v10  ;;  %v4349_v58 = vmul.f32 2.5052108e-08, %v2905_v31  ;;  %v16197_v48 = vadd.f32 %v2898_v53, %v2722_v49  ;;  %v4493_v12 = vmul.f32 0.0001984127, %v2905_v31 }
 0x37d   :  { %20266 = vst [vmem:[#allocation70_spill] sm:$0xff] %v16195_v34  ;;  %v5875_v24 = vmul.f32 0.16666667, %v2905_v31  ;;  %v11796_v6 = vpop.f32.mrf.mxu0  ;;  %v11858_v42 = vpop.f32.mrf.mxu1 }
 0x37e   :  { %20267 = vst [vmem:[#allocation108_spill] sm:$0xff] %v16197_v48  ;;  %v16202_v35 = vadd.f32 %v4349_v58, %v20268_v55  ;;  %v2740_v41 = vadd.f32 %v11796_v6, %v16128_v1  ;;  %v16207_v13 = vadd.f32 %v4493_v12, %v20269_v40  ;;  %v4492_v44 = vmul.f32 0.0001984127, %v16197_v48  ;;  %v20278_v6 = vld [vmem:[#allocation14_spill] sm:$0xff] }
 0x37f   :  { %v2733_v7 = vpop.f32.mrf.mxu0  ;;  %v2934_v53 = vpop.f32.mrf.mxu1  ;;  %v16211_v15 = vadd.f32 %v5875_v24, %v20271_v51  ;;  %v5874_v56 = vmul.f32 0.16666667, %v16197_v48  ;;  %v2131_v58 = vadd.f32 %v16008_v22, %v16034_v4  ;;  %v20279_v55 = vld [vmem:[#allocation34_spill] sm:$0xff] }
 0x380   :  { %20270 = vst [vmem:[#allocation109_spill] sm:$0xff] %v16207_v13  ;;  %v2917_v54 = vadd.f32 %v11852_v18, %v2740_v41  ;;  %v2734_v27 = vadd.f32 %v2733_v7, %v2503_v20  ;;  %v16216_v1 = vadd.f32 %v4492_v44, %v20273_v47  ;;  %v20281_v7 = vld [vmem:[#allocation100_spill] sm:$0xff] }
 0x381   :  { %20272 = vst [vmem:[#allocation110_spill] sm:$0xff] %v16211_v15  ;;  %v16219_v16 = vadd.f32 %v5874_v56, %v20275_v25  ;;  %v2333_v4 = vadd.f32 %v16143_v36, %v2131_v58 }
 0x382   :  { %20274 = vst [vmem:[#allocation62_spill] sm:$0xff] %v16216_v1  ;;  %v4351_v31 = vmul.f32 2.5052108e-08, %v2917_v54  ;;  %v16221_v49 = vadd.f32 %v2910_v21, %v2734_v27  ;;  %v4495_v45 = vmul.f32 0.0001984127, %v2917_v54 }
 0x383   :  { %20276 = vst [vmem:[#allocation38_spill] sm:$0xff] %v16219_v16  ;;  %v5877_v59 = vmul.f32 0.16666667, %v2917_v54  ;;  %v11799_v12 = vpop.f32.mrf.mxu0  ;;  %v11861_v24 = vpop.f32.mrf.mxu1  ;;  %v20283_v54 = vld [vmem:[#allocation78_spill] sm:$0xff]  ;;  %v2535_v58 = vadd.f32 %v16125_v57, %v2333_v4  ;;  %v20294_v57 = vld [vmem:[#allocation113_spill] sm:$0xff] }
 0x384   :  { %20277 = vst [vmem:[#allocation41_spill] sm:$0xff] %v16221_v49  ;;  %v16226_v28 = vadd.f32 %v4351_v31, %v20278_v6  ;;  %v2752_v18 = vadd.f32 %v11799_v12, %v16139_v32  ;;  %v16231_v41 = vadd.f32 %v4495_v45, %v20279_v55  ;;  %v4494_v40 = vmul.f32 0.0001984127, %v16221_v49  ;;  %v20288_v6 = vld [vmem:[#allocation53_spill] sm:$0xff] }
 0x385   :  { %v2745_v20 = vpop.f32.mrf.mxu0  ;;  %v2946_v21 = vpop.f32.mrf.mxu1  ;;  %v16235_v44 = vadd.f32 %v5877_v59, %v20281_v7  ;;  %v5876_v22 = vmul.f32 0.16666667, %v16221_v49  ;;  %v2143_v45 = vadd.f32 %v16026_v14, %v16054_v9 }
 0x386   :  { %20280 = vst [vmem:[#allocation42_spill] sm:$0xff] %v16231_v41  ;;  %v2929_v51 = vadd.f32 %v11855_v50, %v2752_v18  ;;  %v2746_v56 = vadd.f32 %v2745_v20, %v2519_v2  ;;  %v16240_v32 = vadd.f32 %v4494_v40, %v20283_v54  ;;  %v20289_v18 = vld [vmem:[#allocation26_spill] sm:$0xff] }
 0x387   :  { %20282 = vst [vmem:[#allocation43_spill] sm:$0xff] %v16235_v44  ;;  %v16243_v5 = vadd.f32 %v5876_v22, %v20285_v8  ;;  %v2347_v9 = vadd.f32 %v16150_v61, %v2143_v45 }
 0x388   :  { %20284 = vst [vmem:[#allocation44_spill] sm:$0xff] %v16240_v32  ;;  %v4353_v27 = vmul.f32 2.5052108e-08, %v2929_v51  ;;  %v16245_v47 = vadd.f32 %v2922_v39, %v2746_v56  ;;  %v4497_v25 = vmul.f32 0.0001984127, %v2929_v51 }
 0x389   :  { %20286 = vst [vmem:[#allocation46_spill] sm:$0xff] %v16243_v5  ;;  %v5879_v31 = vmul.f32 0.16666667, %v2929_v51  ;;  %v11802_v59 = vpop.f32.mrf.mxu0  ;;  %v11864_v12 = vpop.f32.mrf.mxu1  ;;  %v20292_v51 = vld [vmem:[#allocation80_spill] sm:$0xff]  ;;  %v2551_v45 = vadd.f32 %v16137_v0, %v2347_v9  ;;  %v20304_v0 = vld [vmem:[#allocation101_spill] sm:$0xff]  ;;  %v20329_v5 = vld [vmem:[#allocation50_spill] sm:$0xff] }
 0x38a   :  { %20287 = vst [vmem:[#allocation47_spill] sm:$0xff] %v16245_v47  ;;  %v16250_v36 = vadd.f32 %v4353_v27, %v20288_v6  ;;  %v2764_v50 = vadd.f32 %v11802_v59, %v16147_v37  ;;  %v16255_v2 = vadd.f32 %v4497_v25, %v20289_v18  ;;  %v4496_v20 = vmul.f32 0.0001984127, %v16245_v47  ;;  %v20297_v59 = vld [vmem:[#allocation28_spill] sm:$0xff] }
 0x38b   :  { %v2757_v55 = vpop.f32.mrf.mxu0  ;;  %v2958_v39 = vpop.f32.mrf.mxu1  ;;  %v16259_v40 = vadd.f32 %v5879_v31, %v15598_v26  ;;  %v5878_v14 = vmul.f32 0.16666667, %v16245_v47  ;;  %v2155_v26 = vadd.f32 %v16044_v19, %v16072_v17  ;;  %v20298_v6 = vld [vmem:[#allocation40_spill] sm:$0xff] }
 0x38c   :  { %20290 = vst [vmem:[#allocation51_spill] sm:$0xff] %v16255_v2  ;;  %v2941_v7 = vadd.f32 %v11858_v42, %v2764_v50  ;;  %v2758_v22 = vadd.f32 %v2757_v55, %v2535_v58  ;;  %v16264_v37 = vadd.f32 %v4496_v20, %v20292_v51  ;;  %v20300_v55 = vld [vmem:[#allocation114_spill] sm:$0xff] }
 0x38d   :  { %20291 = vst [vmem:[#allocation63_spill] sm:$0xff] %v16259_v40  ;;  %v16267_v4 = vadd.f32 %v5878_v14, %v20294_v57  ;;  %v2361_v17 = vadd.f32 %v16157_v23, %v2155_v26 }
 0x38e   :  { %20293 = vst [vmem:[#allocation31_spill] sm:$0xff] %v16264_v37  ;;  %v4355_v56 = vmul.f32 2.5052108e-08, %v2941_v7  ;;  %v16269_v54 = vadd.f32 %v2934_v53, %v2758_v22  ;;  %v4499_v8 = vmul.f32 0.0001984127, %v2941_v7  ;;  %v20302_v22 = vld [vmem:[#allocation90_spill] sm:$0xff] }
 0x38f   :  { %20295 = vst [vmem:[#allocation64_spill] sm:$0xff] %v16267_v4  ;;  %v5881_v27 = vmul.f32 0.16666667, %v2941_v7  ;;  %v11805_v25 = vpop.f32.mrf.mxu0  ;;  %v11867_v31 = vpop.f32.mrf.mxu1  ;;  %v2567_v26 = vadd.f32 %v16145_v43, %v2361_v17  ;;  %v20314_v43 = vld [vmem:[#allocation102_spill] sm:$0xff]  ;;  %v20331_v4 = vld [vmem:[#allocation112_spill] sm:$0xff] }
 0x390   :  { %20296 = vst [vmem:[#allocation37_spill] sm:$0xff] %v16269_v54  ;;  %v16274_v61 = vadd.f32 %v4355_v56, %v20297_v59  ;;  %v2776_v42 = vadd.f32 %v11805_v25, %v16154_v46  ;;  %v16279_v50 = vadd.f32 %v4499_v8, %v20298_v6  ;;  %v4498_v18 = vmul.f32 0.0001984127, %v16269_v54  ;;  %v20306_v6 = vld [vmem:[#allocation57_spill] sm:$0xff] }
 0x391   :  { %v2769_v58 = vpop.f32.mrf.mxu0  ;;  %v2970_v53 = vpop.f32.mrf.mxu1  ;;  %v16283_v20 = vadd.f32 %v5881_v27, %v20300_v55  ;;  %v5880_v19 = vmul.f32 0.16666667, %v16269_v54  ;;  %v2167_v27 = vadd.f32 %v16058_v29, %v16089_v30  ;;  %v20310_v55 = vld [vmem:[#allocation32_spill] sm:$0xff] }
 0x392   :  { %20299 = vst [vmem:[#allocation81_spill] sm:$0xff] %v16279_v50  ;;  %v2953_v14 = vadd.f32 %v11861_v24, %v2776_v42  ;;  %v2770_v7 = vadd.f32 %v2769_v58, %v2551_v45  ;;  %v16288_v46 = vadd.f32 %v4498_v18, %v20302_v22  ;;  %v20308_v42 = vld [vmem:[#allocation84_spill] sm:$0xff] }
 0x393   :  { %20301 = vst [vmem:[#allocation60_spill] sm:$0xff] %v16283_v20  ;;  %v16291_v9 = vadd.f32 %v5880_v19, %v20304_v0  ;;  %v2375_v30 = vadd.f32 %v16164_v33, %v2167_v27  ;;  %v20319_v27 = vld [vmem:[#allocation94_spill] sm:$0xff] }
 0x394   :  { %20303 = vst [vmem:[#allocation92_spill] sm:$0xff] %v16288_v46  ;;  %v4357_v51 = vmul.f32 2.5052108e-08, %v2953_v14  ;;  %v16293_v57 = vadd.f32 %v2946_v21, %v2770_v7  ;;  %v4501_v56 = vmul.f32 0.0001984127, %v2953_v14 }
 0x395   :  { %20305 = vst [vmem:[#allocation65_spill] sm:$0xff] %v16291_v9  ;;  %v5883_v8 = vmul.f32 0.16666667, %v2953_v14  ;;  %v11808_v25 = vpop.f32.mrf.mxu0  ;;  %v11958_v59 = vpop.f32.mrf.mxu1 }
 0x396   :  { %v16298_v23 = vadd.f32 %v4357_v51, %v20306_v6  ;;  %v2788_v24 = vadd.f32 %v11808_v25, %v16159_v63  ;;  %v16303_v45 = vadd.f32 %v4501_v56, %v20308_v42  ;;  %v4500_v18 = vmul.f32 0.0001984127, %v16293_v57  ;;  %v20312_v63 = vld [vmem:[#allocation85_spill] sm:$0xff]  ;;  %v20317_v42 = vld [vmem:[#allocation86_spill] sm:$0xff] }
 0x397   :  { %v2781_v58 = vpop.f32.mrf.mxu0  ;;  %v16305_v21 = vpop.f32.mrf.mxu1  ;;  %v16309_v19 = vadd.f32 %v5883_v8, %v20310_v55  ;;  %v5882_v29 = vmul.f32 0.16666667, %v16293_v57 }
 0x398   :  { %20307 = vst [vmem:[#allocation49_spill] sm:$0xff] %v16298_v23  ;;  %20309 = vst [vmem:[#allocation67_spill] sm:$0xff] %v16303_v45  ;;  %v2965_v14 = vadd.f32 %v11864_v12, %v2788_v24  ;;  %v2782_v7 = vadd.f32 %v2781_v58, %v2567_v26  ;;  %v16314_v22 = vadd.f32 %v4500_v18, %v20312_v63  ;;  %v20322_v18 = vld [vmem:[#allocation66_spill] sm:$0xff] }
 0x399   :  { %20311 = vst [vmem:[#allocation91_spill] sm:$0xff] %v16309_v19  ;;  %v16317_v17 = vadd.f32 %v5882_v29, %v20314_v43  ;;  %v2583_v12 = vadd.f32 %v16152_v11, %v2375_v30  ;;  %v20324_v43 = vld [vmem:[#allocation13_spill] sm:$0xff] }
 0x39a   :  { %20313 = vst [vmem:[#allocation118_spill] sm:$0xff] %v16314_v22  ;;  %v4359_v0 = vmul.f32 2.5052108e-08, %v2965_v14  ;;  %v16319_v51 = vadd.f32 %v2958_v39, %v2782_v7  ;;  %v4503_v56 = vmul.f32 0.0001984127, %v2965_v14 }
 0x39b   :  { %20315 = vst [vmem:[#allocation68_spill] sm:$0xff] %v16317_v17  ;;  %v5885_v25 = vmul.f32 0.16666667, %v2965_v14  ;;  %v11811_v6 = vpop.f32.mrf.mxu0  ;;  %v11961_v8 = vpop.f32.mrf.mxu1 }
 0x39c   :  { %20316 = vst [vmem:[#allocation56_spill] sm:$0xff] %v16319_v51  ;;  %v16322_v55 = vadd.f32 %v4359_v0, %v20317_v42  ;;  %v2800_v33 = vadd.f32 %v11811_v6, %v16167_v52  ;;  %v16327_v24 = vadd.f32 %v4503_v56, %v20319_v27  ;;  %v4502_v39 = vmul.f32 0.0001984127, %v16319_v51  ;;  %v20326_v52 = vld [vmem:[#allocation103_spill] sm:$0xff] }
 0x39d   :  { %v2793_v26 = vpop.f32.mrf.mxu0  ;;  %v16329_v58 = vpop.f32.mrf.mxu1  ;;  %v16333_v29 = vadd.f32 %v5885_v25, %v20322_v18  ;;  %v5884_v14 = vmul.f32 0.16666667, %v16319_v51 }
 0x39e   :  { %20318 = vst [vmem:[#allocation71_spill] sm:$0xff] %v16322_v55  ;;  %20320 = vst [vmem:[#allocation116_spill] sm:$0xff] %v16327_v24  ;;  %v2977_v7 = vadd.f32 %v11867_v31, %v2800_v33  ;;  %v2794_v63 = vadd.f32 %v2793_v26, %v2583_v12  ;;  %v16337_v0 = vadd.f32 %v4502_v39, %v20324_v43  ;;  %v20333_v39 = vld [vmem:[#allocation104_spill] sm:$0xff] }
 0x39f   :  { %20321 = vst [vmem:[#allocation73_spill] sm:$0xff] %v16329_v58  ;;  %20323 = vst [vmem:[#allocation72_spill] sm:$0xff] %v16333_v29  ;;  %v16340_v11 = vadd.f32 %v5884_v14, %v20326_v52 }
 0x3a0   :  { %20325 = vst [vmem:[#allocation75_spill] sm:$0xff] %v16337_v0  ;;  %v4361_v30 = vmul.f32 2.5052108e-08, %v2977_v7  ;;  %v16342_v56 = vadd.f32 %v2970_v53, %v2794_v63  ;;  %v4505_v6 = vmul.f32 0.0001984127, %v2977_v7 }
 0x3a1   :  { %20327 = vst [vmem:[#allocation69_spill] sm:$0xff] %v16340_v11  ;;  %v5887_v42 = vmul.f32 0.16666667, %v2977_v7  ;;  %v11902_v27 = vpop.f32.mrf.mxu0  ;;  %v11964_v16 = vpop.f32.mrf.mxu1  ;;  %v20335_v7 = vld [vmem:[#allocation96_spill] sm:$0xff] }
 0x3a2   :  { %20328 = vst [vmem:[#allocation111_spill] sm:$0xff] %v16342_v56  ;;  %v16345_v25 = vadd.f32 %v4361_v30, %v20329_v5  ;;  %v3375_v18 = vadd.f32 %v11958_v59, %v11902_v27  ;;  %v16348_v31 = vadd.f32 %v4505_v6, %v20331_v4  ;;  %v4504_v26 = vmul.f32 0.0001984127, %v16342_v56  ;;  %v20337_v5 = vld [vmem:[#allocation105_spill] sm:$0xff] }
 0x3a3   :  { %v16350_v33 = vpop.f32.mrf.mxu0  ;;  %v16352_v12 = vpop.f32.mrf.mxu1  ;;  %v16356_v53 = vadd.f32 %v5887_v42, %v20333_v39  ;;  %v5886_v14 = vmul.f32 0.16666667, %v16342_v56 }
 0x3a4   :  { %20330 = vst [vmem:[#allocation45_spill] sm:$0xff] %v16345_v25  ;;  %20332 = vst [vmem:[#allocation77_spill] sm:$0xff] %v16348_v31  ;;  %v16360_v63 = vadd.f32 %v4504_v26, %v20335_v7  ;;  %v3369_v49 = vadd.f32 %v16305_v21, %v16350_v33 }
 0x3a5   :  { %20334 = vst [vmem:[#allocation59_spill] sm:$0xff] %v16356_v53  ;;  %v16363_v43 = vadd.f32 %v5886_v14, %v20337_v5 }
 0x3a6   :  { %20336 = vst [vmem:[#allocation25_spill] sm:$0xff] %v16360_v63 }
 0x3a7   :  { %20338 = vst [vmem:[#allocation79_spill] sm:$0xff] %v16363_v43  ;;  %v11905_v59 = vpop.f32.mrf.mxu0  ;;  %v11967_v4 = vpop.f32.mrf.mxu1 }
 0x3a8   :  { %v3387_v52 = vadd.f32 %v11961_v8, %v11905_v59 }
 0x3a9   :  { %v16365_v30 = vpop.f32.mrf.mxu0  ;;  %v16367_v6 = vpop.f32.mrf.mxu1 }
 0x3aa   :  { %20339 = vst [vmem:[#allocation120_spill] sm:$0xff] %v16365_v30 }
 0x3ad   :  { %v11908_v27 = vpop.f32.mrf.mxu0  ;;  %v11970_v9 = vpop.f32.mrf.mxu1 }
 0x3ae   :  { %v3399_v17 = vadd.f32 %v11964_v16, %v11908_v27 }
 0x3af   :  { %v16369_v42 = vpop.f32.mrf.mxu0  ;;  %v16371_v39 = vpop.f32.mrf.mxu1 }
 0x3b3   :  { %v11911_v53 = vpop.f32.mrf.mxu0  ;;  %v11973_v26 = vpop.f32.mrf.mxu1 }
 0x3b4   :  { %v16373_v7 = vadd.f32 %v11967_v4, %v11911_v53 }
 0x3b5   :  { %v16375_v14 = vpop.f32.mrf.mxu0  ;;  %v16377_v5 = vpop.f32.mrf.mxu1 }
 0x3b9   :  { %v11914_v8 = vpop.f32.mrf.mxu0  ;;  %v11976_v59 = vpop.f32.mrf.mxu1 }
 0x3ba   :  { %v16379_v43 = vadd.f32 %v11970_v9, %v11914_v8 }
 0x3bb   :  { %v16381_v11 = vpop.f32.mrf.mxu0  ;;  %v16383_v29 = vpop.f32.mrf.mxu1 }
 0x3bf   :  { %v11917_v16 = vpop.f32.mrf.mxu0  ;;  %v16385_v27 = vpop.f32.mrf.mxu1 }
 0x3c0   :  { %v16387_v19 = vadd.f32 %v11973_v26, %v11917_v16 }
 0x3c1   :  { %v16389_v20 = vpop.f32.mrf.mxu0  ;;  %v16391_v53 = vpop.f32.mrf.mxu1 }
 0x3c5   :  { %v11920_v4 = vpop.f32.mrf.mxu0  ;;  %v12070_v40 = vpop.f32.mrf.mxu1 }
 0x3c6   :  { %v16393_v44 = vadd.f32 %v11976_v59, %v11920_v4 }
 0x3c7   :  { %v16395_v15 = vpop.f32.mrf.mxu0  ;;  %v3756_v9 = vpop.f32.mrf.mxu1 }
 0x3cb   :  { %v16397_v8 = vpop.f32.mrf.mxu0  ;;  %v12073_v34 = vpop.f32.mrf.mxu1 }
 0x3cd   :  { %v16399_v3 = vpop.f32.mrf.mxu0  ;;  %v16401_v10 = vpop.f32.mrf.mxu1 }
 0x3ce   :  { %20340 = vst [vmem:[#allocation119_spill] sm:$0xff] %v16401_v10 }
 0x3d1   :  { %v12014_v26 = vpop.f32.mrf.mxu0  ;;  %v12076_v16 = vpop.f32.mrf.mxu1 }
 0x3d2   :  { %v3570_v1 = vadd.f32 %v12014_v26, %v3375_v18 }
 0x3d3   :  { %v3562_v32 = vpop.f32.mrf.mxu0  ;;  %v16403_v37 = vpop.f32.mrf.mxu1 }
 0x3d4   :  { %20341 = vst [vmem:[#allocation99_spill] sm:$0xff] %v16403_v37  ;;  %v3765_v46 = vadd.f32 %v12070_v40, %v3570_v1  ;;  %v3563_v25 = vadd.f32 %v3562_v32, %v3369_v49 }
 0x3d6   :  { %v3757_v56 = vadd.f32 %v3756_v9, %v3563_v25 }
 0x3d7   :  { %v12017_v63 = vpop.f32.mrf.mxu0  ;;  %v12079_v59 = vpop.f32.mrf.mxu1 }
 0x3d8   :  { %v3584_v4 = vadd.f32 %v12017_v63, %v3387_v52 }
 0x3d9   :  { %v16405_v31 = vpop.f32.mrf.mxu0  ;;  %v16407_v22 = vpop.f32.mrf.mxu1 }
 0x3da   :  { %20342 = vst [vmem:[#allocation30_spill] sm:$0xff] %v16405_v31  ;;  %20343 = vst [vmem:[#allocation35_spill] sm:$0xff] %v16407_v22  ;;  %v3781_v0 = vadd.f32 %v12073_v34, %v3584_v4 }
 0x3dd   :  { %v12020_v24 = vpop.f32.mrf.mxu0  ;;  %v16409_v45 = vpop.f32.mrf.mxu1 }
 0x3de   :  { %v3598_v50 = vadd.f32 %v12020_v24, %v3399_v17 }
 0x3df   :  { %v16411_v2 = vpop.f32.mrf.mxu0  ;;  %v16413_v41 = vpop.f32.mrf.mxu1 }
 0x3e0   :  { %20344 = vst [vmem:[#allocation89_spill] sm:$0xff] %v16411_v2  ;;  %v3797_v18 = vadd.f32 %v12076_v16, %v3598_v50 }
 0x3e3   :  { %v12023_v26 = vpop.f32.mrf.mxu0  ;;  %v16415_v13 = vpop.f32.mrf.mxu1 }
 0x3e5   :  { %v16417_v1 = vpop.f32.mrf.mxu0  ;;  %v16419_v40 = vpop.f32.mrf.mxu1 }
 0x3e9   :  { %v12026_v63 = vpop.f32.mrf.mxu0  ;;  %v16421_v52 = vpop.f32.mrf.mxu1 }
 0x3eb   :  { %v16423_v34 = vpop.f32.mrf.mxu0  ;;  %v16425_v4 = vpop.f32.mrf.mxu1 }
 0x3ef   :  { %v12029_v17 = vpop.f32.mrf.mxu0  ;;  %v16427_v24 = vpop.f32.mrf.mxu1 }
 0x3f0   :  { %20345 = vst [vmem:[#allocation117_spill] sm:$0xff] %v16427_v24 }
 0x3f1   :  { %v3632_v62 = vpop.f32.mrf.mxu0  ;;  %v16429_v60 = vpop.f32.mrf.mxu1 }
 0x3f2   :  { %20346 = vst [vmem:[#allocation115_spill] sm:$0xff] %v16429_v60 }
 0x3f4   :  { %v12032_v50 = vpop.f32.mrf.mxu0 }
 0x3f5   :  { %v12182_v16 = vpop.f32.mrf.mxu1 }
 0x3f6   :  { %v16431_v48 = vpop.f32.mrf.mxu0 }
 0x3f7   :  { %v4172_v10 = vpop.f32.mrf.mxu1 }
 0x3f8   :  { %v16435_v47 = vpop.f32.mrf.mxu0 }
 0x3f9   :  { %v12185_v31 = vpop.f32.mrf.mxu1 }
 0x3fa   :  { %v16437_v37 = vpop.f32.mrf.mxu0 }
 0x3fb   :  { %v16439_v58 = vpop.f32.mrf.mxu1 }
 0x3fc   :  { %20347 = vst [vmem:[#allocation83_spill] sm:$0xff] %v16439_v58  ;;  %v12126_v30 = vpop.f32.mrf.mxu0 }
 0x3fd   :  { %v4002_v54 = vadd.f32 %v12126_v30, %v3765_v46  ;;  %v12188_v55 = vpop.f32.mrf.mxu1 }
 0x3fe   :  { %v3995_v60 = vpop.f32.mrf.mxu0 }
 0x3ff   :  { %v16441_v22 = vadd.f32 %v12182_v16, %v4002_v54  ;;  %v3996_v2 = vadd.f32 %v3995_v60, %v3757_v56  ;;  %v16443_v51 = vpop.f32.mrf.mxu1  ;;  %v3612_v60 = vadd.f32 %v12023_v26, %v16373_v7  ;;  %v3626_v7 = vadd.f32 %v12026_v63, %v16379_v43 }
 0x400   :  { %v12129_v21 = vpop.f32.mrf.mxu0  ;;  %v3640_v43 = vadd.f32 %v12029_v17, %v16387_v19 }
 0x401   :  { %v4379_v33 = vmul.f32 2.0876756e-09, %v16441_v22  ;;  %v16446_v23 = vadd.f32 %v4172_v10, %v3996_v2  ;;  %v4014_v49 = vadd.f32 %v12129_v21, %v3781_v0  ;;  %v12191_v32 = vpop.f32.mrf.mxu1  ;;  %v3813_v16 = vadd.f32 %v12079_v59, %v3612_v60 }
 0x402   :  { %v16448_v24 = vpop.f32.mrf.mxu0  ;;  %v3829_v60 = vadd.f32 %v16409_v45, %v3626_v7 }
 0x403   :  { %v16451_v58 = vadd.f32 %v4379_v33, %v16178_v38  ;;  %v16454_v46 = vand.u32 4294901760, %v16446_v23  ;;  %v16456_v54 = vpop.f32.mrf.mxu1  ;;  %v16459_v56 = vadd.f32 %v12185_v31, %v4014_v49 }
 0x404   :  { %v12132_v25 = vpop.f32.mrf.mxu0 }
 0x405   :  { %20348 = vst [vmem:[#allocation97_spill] sm:$0xff] %v16454_v46  ;;  %v12194_v30 = vpop.f32.mrf.mxu1  ;;  %12292 = vmatprep.mubr.f32.mxu1 %v16454_v46  ;;  %v4381_v10 = vmul.f32 2.0876756e-09, %v16459_v56  ;;  %v4026_v2 = vadd.f32 %v12132_v25, %v3797_v18  ;;  %v16477_v18 = vsub.f32 %v16446_v23, %v16454_v46  ;;  %v3654_v46 = vadd.f32 %v12032_v50, %v16393_v44 }
 0x406   :  { %v16463_v0 = vpop.f32.mrf.mxu0  ;;  %v3441_v44 = vadd.f32 %v16383_v29, %v16395_v15  ;;  %v3459_v50 = vadd.f32 %v16385_v27, %v16397_v8  ;;  %v3453_v15 = vadd.f32 %v16391_v53, %v16399_v3 }
 0x407   :  { %v16465_v38 = vpop.f32.mrf.mxu1  ;;  %v16468_v9 = vadd.f32 %v4381_v10, %v16202_v35  ;;  %v16471_v31 = vadd.f32 %v12188_v55, %v4026_v2  ;;  %20350 = vst [vmem:[#allocation98_spill] sm:$0xff] %v16477_v18  ;;  %v3429_v35 = vadd.f32 %v16377_v5, %v16389_v20  ;;  %v16492_v20 = vand.u32 4294901760, %v16477_v18 }
 0x408   :  { %v12135_v21 = vpop.f32.mrf.mxu0  ;;  %v3417_v5 = vadd.f32 %v16371_v39, %v16381_v11  ;;  %v3647_v29 = vadd.f32 %v16431_v48, %v3441_v44  ;;  %v3668_v27 = vadd.f32 %v16435_v47, %v3459_v50  ;;  %v20359_v50 = vld [vmem:[#allocation111_spill] sm:$0xff] }
 0x409   :  { %20349 = vst [vmem:[#allocation39_spill] sm:$0xff] %v16471_v31  ;;  %v12197_v26 = vpop.f32.mrf.mxu1  ;;  %v4038_v33 = vadd.f32 %v12135_v21, %v3813_v16  ;;  %v4383_v25 = vmul.f32 2.0876756e-09, %v16471_v31  ;;  %v3633_v2 = vadd.f32 %v3632_v62, %v3429_v35  ;;  %20351 = vst [vmem:[#allocation29_spill] sm:$0xff] %v16492_v20  ;;  %v4606_v62 = vsub.f32 %v16477_v18, %v16492_v20 }
 0x40a   :  { %v16473_v49 = vpop.f32.mrf.mxu0  ;;  %v3619_v11 = vadd.f32 %v16423_v34, %v3417_v5  ;;  %v3393_v35 = vadd.f32 %v16352_v12, %v16369_v42  ;;  %v20358_v12 = vld [vmem:[#allocation115_spill] sm:$0xff] }
 0x40b   :  { %v16482_v10 = vadd.f32 %v12191_v32, %v4038_v33  ;;  %v16486_v55 = vadd.f32 %v4383_v25, %v16226_v28  ;;  %v4232_v63 = vpop.f32.mrf.mxu1  ;;  %v3845_v32 = vadd.f32 %v16415_v13, %v3640_v43  ;;  %v16511_v7 = vand.u32 4294901760, %v4606_v62  ;;  %v20356_v62 = vld [vmem:[#allocation89_spill] sm:$0xff] }
 0x40c   :  { %v12138_v59 = vpop.f32.mrf.mxu0  ;;  %v3861_v33 = vadd.f32 %v16421_v52, %v3654_v46  ;;  %v3405_v13 = vadd.f32 %v16367_v6, %v16375_v14  ;;  %v3661_v14 = vadd.f32 %v16437_v37, %v3453_v15  ;;  %v3821_v48 = vadd.f32 %v16413_v41, %v3619_v11 }
 0x40d   :  { %v4385_v16 = vmul.f32 2.0876756e-09, %v16482_v10  ;;  %v4050_v31 = vadd.f32 %v12138_v59, %v3829_v60  ;;  %v12200_v45 = vpop.f32.mrf.mxu1  ;;  %20352 = vst [vmem:[#allocation20_spill] sm:$0xff] %v16511_v7  ;;  %12236 = vmatprep.mubr.f32.mxu0 %v16511_v7  ;;  %v20353_v59 = vld [vmem:[#allocation117_spill] sm:$0xff]  ;;  %v4360_v11 = vmul.f32 2.5052108e-08, %v20359_v50 }
 0x40e   :  { %v4043_v21 = vpop.f32.mrf.mxu0  ;;  %v3605_v6 = vadd.f32 %v16417_v1, %v3405_v13  ;;  %v3877_v43 = vadd.f32 %v20353_v59, %v3668_v27  ;;  %v3869_v42 = vadd.f32 %v20358_v12, %v3661_v14  ;;  %v20363_v14 = vld [vmem:[#allocation87_spill] sm:$0xff] }
 0x40f   :  { %v16497_v19 = vadd.f32 %v4385_v16, %v16250_v36  ;;  %v16499_v17 = vadd.f32 %v12194_v30, %v4050_v31  ;;  %v3837_v36 = vadd.f32 %v16419_v40, %v3633_v2  ;;  %v4244_v34 = vpop.f32.mrf.mxu1  ;;  %v4044_v1 = vadd.f32 %v4043_v21, %v3821_v48  ;;  %v20354_v2 = vld [vmem:[#allocation49_spill] sm:$0xff]  ;;  %v20364_v48 = vld [vmem:[#allocation120_spill] sm:$0xff]  ;;  %v20370_v12 = vld [vmem:[#allocation47_spill] sm:$0xff] }
 0x410   :  { %v12141_v28 = vpop.f32.mrf.mxu0 }
 0x411   :  { %v4387_v30 = vmul.f32 2.0876756e-09, %v16499_v17  ;;  %v4062_v31 = vadd.f32 %v12141_v28, %v3845_v32  ;;  %v12203_v16 = vpop.f32.mrf.mxu1  ;;  %v20355_v28 = vld [vmem:[#allocation56_spill] sm:$0xff]  ;;  %v20357_v32 = vld [vmem:[#allocation35_spill] sm:$0xff]  ;;  %v16551_v27 = vadd.f32 %v16465_v38, %v4044_v1  ;;  %v20368_v1 = vld [vmem:[#allocation30_spill] sm:$0xff] }
 0x412   :  { %v4055_v39 = vpop.f32.mrf.mxu0  ;;  %v3805_v44 = vadd.f32 %v20357_v32, %v3605_v6  ;;  %v20369_v32 = vld [vmem:[#allocation45_spill] sm:$0xff] }
 0x413   :  { %v16521_v40 = vadd.f32 %v4387_v30, %v16274_v61  ;;  %v16524_v25 = vadd.f32 %v12197_v26, %v4062_v31  ;;  %v4056_v52 = vadd.f32 %v4055_v39, %v3837_v36  ;;  %v4356_v61 = vmul.f32 2.5052108e-08, %v16293_v57  ;;  %v20360_v36 = vld [vmem:[#allocation71_spill] sm:$0xff]  ;;  %v20361_v31 = vld [vmem:[#allocation37_spill] sm:$0xff] }
 0x414   :  { %v12144_v8 = vpop.f32.mrf.mxu0  ;;  %v3853_v26 = vadd.f32 %v16425_v4, %v3647_v29  ;;  %v3591_v57 = vadd.f32 %v20356_v62, %v3393_v35  ;;  %v4032_v15 = vadd.f32 %v16473_v49, %v3805_v44  ;;  %v20367_v49 = vld [vmem:[#allocation95_spill] sm:$0xff] }
 0x415   :  { %v4074_v46 = vadd.f32 %v12144_v8, %v3861_v33  ;;  %v4389_v47 = vmul.f32 2.0876756e-09, %v16524_v25  ;;  %v16538_v5 = vadd.f32 %v4232_v63, %v4056_v52  ;;  %v4354_v63 = vmul.f32 2.5052108e-08, %v20361_v31  ;;  %v20362_v33 = vld [vmem:[#allocation58_spill] sm:$0xff]  ;;  %v4256_v52 = vpop.f32.mrf.mxu1 }
 0x416   :  { %v4067_v3 = vpop.f32.mrf.mxu0  ;;  %v4372_v13 = vadd.f32 %v4356_v61, %v20362_v33 }
 0x417   :  { %v16530_v53 = vadd.f32 %v12200_v45, %v4074_v46  ;;  %v4405_v37 = vadd.f32 %v4389_v47, %v20354_v2  ;;  %v4358_v45 = vmul.f32 2.5052108e-08, %v20355_v28  ;;  %v4068_v39 = vadd.f32 %v4067_v3, %v3853_v26  ;;  %v20365_v47 = vld [vmem:[#allocation73_spill] sm:$0xff]  ;;  %v20366_v26 = vld [vmem:[#allocation99_spill] sm:$0xff] }
 0x418   :  { %v12147_v60 = vpop.f32.mrf.mxu0  ;;  %v4388_v8 = vmul.f32 2.0876756e-09, %v16538_v5  ;;  %v3381_v35 = vadd.f32 %v20365_v47, %v20364_v48  ;;  %v3789_v61 = vadd.f32 %v20366_v26, %v3591_v57 }
 0x419   :  { %v4391_v41 = vmul.f32 2.0876756e-09, %v16530_v53  ;;  %v4086_v30 = vadd.f32 %v12147_v60, %v3877_v43  ;;  %v16554_v46 = vadd.f32 %v4244_v34, %v4068_v39  ;;  %v4374_v3 = vadd.f32 %v4358_v45, %v20363_v14 }
 0x41a   :  { %v4079_v4 = vpop.f32.mrf.mxu0  ;;  %v4376_v43 = vadd.f32 %v4360_v11, %v20367_v49  ;;  %v3577_v2 = vadd.f32 %v20368_v1, %v3381_v35  ;;  %v4386_v45 = vmul.f32 2.0876756e-09, %v16551_v27  ;;  %v4404_v62 = vadd.f32 %v4388_v8, %v4372_v13 }
 0x41b   :  { %v4407_v21 = vadd.f32 %v4391_v41, %v20360_v36  ;;  %v4080_v29 = vadd.f32 %v4079_v4, %v3869_v42  ;;  %v16556_v6 = vadd.f32 %v12203_v16, %v4086_v30  ;;  %v4390_v60 = vmul.f32 2.0876756e-09, %v16554_v46  ;;  %v20371_v4 = vld [vmem:[#allocation82_spill] sm:$0xff]  ;;  %v20372_v30 = vld [vmem:[#allocation119_spill] sm:$0xff] }
 0x41c   :  { %v4020_v16 = vadd.f32 %v16463_v0, %v3789_v61  ;;  %v16572_v41 = vadd.f32 %v16456_v54, %v4032_v15  ;;  %v4352_v42 = vmul.f32 2.5052108e-08, %v20370_v12  ;;  %v4370_v50 = vadd.f32 %v4354_v63, %v20371_v4 }
 0x41d   :  { %v16562_v59 = vadd.f32 %v4256_v52, %v4080_v29  ;;  %v16565_v38 = vand.u32 4294901760, %v4407_v21  ;;  %v4393_v34 = vmul.f32 2.0876756e-09, %v16556_v6  ;;  %v4406_v57 = vadd.f32 %v4390_v60, %v4374_v3  ;;  %v20373_v52 = vld [vmem:[#allocation41_spill] sm:$0xff]  ;;  %v20374_v3 = vld [vmem:[#allocation27_spill] sm:$0xff] }
 0x41e   :  { %v16579_v36 = vand.u32 4294901760, %v4405_v37  ;;  %v3773_v31 = vadd.f32 %v20372_v30, %v3577_v2  ;;  %v16590_v33 = vadd.f32 %v16443_v51, %v4020_v16  ;;  %v4384_v13 = vmul.f32 2.0876756e-09, %v16572_v41  ;;  %v20379_v16 = vld [vmem:[#allocation15_spill] sm:$0xff] }
 0x41f   :  { %v4392_v28 = vmul.f32 2.0876756e-09, %v16562_v59  ;;  %v4409_v44 = vadd.f32 %v4393_v34, %v20369_v32  ;;  %v16582_v0 = vsub.f32 %v4407_v21, %v16565_v38  ;;  %v16584_v54 = vand.u32 4294901760, %v4406_v57 }
 0x420   :  { %v4402_v63 = vadd.f32 %v4386_v45, %v4370_v50  ;;  %v16595_v29 = vand.u32 4294901760, %v4404_v62  ;;  %v4350_v14 = vmul.f32 2.5052108e-08, %v20373_v52  ;;  %v4368_v51 = vadd.f32 %v4352_v42, %v20374_v3  ;;  %v20380_v45 = vld [vmem:[#allocation83_spill] sm:$0xff]  ;;  %v20382_v50 = vld [vmem:[#allocation108_spill] sm:$0xff] }
 0x421   :  { %v4408_v11 = vadd.f32 %v4392_v28, %v4376_v43  ;;  %v16586_v39 = vand.u32 4294901760, %v4409_v44  ;;  %v16598_v8 = vsub.f32 %v4406_v57, %v16584_v54  ;;  %v4008_v48 = vadd.f32 %v16448_v24, %v3773_v31 }
 0x422   :  { %v16612_v35 = vand.u32 4294901760, %v16521_v40  ;;  %v16615_v26 = vsub.f32 %v4405_v37, %v16579_v36  ;;  %v16622_v49 = vand.u32 4294901760, %v16582_v0  ;;  %v4382_v24 = vmul.f32 2.0876756e-09, %v16590_v33 }
 0x423   :  { %v16593_v15 = vand.u32 4294901760, %v4408_v11  ;;  %v16601_v21 = vsub.f32 %v4409_v44, %v16586_v39  ;;  %12204 = vmatprep.subr.mxu0 %v16586_v39  ;;  %v4400_v43 = vadd.f32 %v4384_v13, %v4368_v51  ;;  %v16629_v34 = vand.u32 4294901760, %v4402_v63 }
 0x424   :  { %12205 = vmatpush3.msra.mxu0 %v16586_v39  ;;  %20376 = vst [vmem:[#allocation18_spill] sm:$0xff] %v16622_v49  ;;  %v16632_v37 = vsub.f32 %v4404_v62, %v16595_v29  ;;  %v16638_v2 = vand.u32 4294901760, %v16598_v8  ;;  %v4366_v28 = vadd.f32 %v4350_v14, %v20379_v16  ;;  %v16642_v57 = vadd.f32 %v20380_v45, %v4008_v48  ;;  %v20385_v16 = vld [vmem:[#allocation106_spill] sm:$0xff]  ;;  %v20386_v45 = vld [vmem:[#allocation76_spill] sm:$0xff] }
 0x425   :  { %v16608_v47 = vsub.f32 %v4408_v11, %v16593_v15  ;;  %12206 = vmatprep.subr.mxu0 %v16593_v15  ;;  %v16619_v61 = vand.u32 4294901760, %v16601_v21  ;;  %v16645_v32 = vand.u32 4294901760, %v16497_v19  ;;  %v16652_v44 = vsub.f32 %v16521_v40, %v16612_v35 }
 0x426   :  { %12207 = vmatpush3.msra.mxu0 %v16593_v15  ;;  %20378 = vst [vmem:[#allocation24_spill] sm:$0xff] %v16638_v2  ;;  %v4781_v42 = vsub.f32 %v16582_v0, %v16622_v49  ;;  %v16658_v4 = vand.u32 4294901760, %v16615_v26  ;;  %v4348_v11 = vmul.f32 2.5052108e-08, %v20382_v50  ;;  %v4398_v30 = vadd.f32 %v4382_v24, %v4366_v28 }
 0x427   :  { %20375 = vst [vmem:[#allocation36_spill] sm:$0xff] %v16619_v61  ;;  %v16627_v60 = vand.u32 4294901760, %v16608_v47  ;;  %12208 = vmatprep.subr.mxu0 %v16565_v38  ;;  %v4767_v1 = vsub.f32 %v16601_v21, %v16619_v61  ;;  %v16662_v13 = vand.u32 4294901760, %v4400_v43  ;;  %v16665_v40 = vsub.f32 %v4402_v63, %v16629_v34 }
 0x428   :  { %12209 = vmatpush3.msra.mxu0 %v16565_v38  ;;  %20381 = vst [vmem:[#allocation23_spill] sm:$0xff] %v16658_v4  ;;  %v4788_v52 = vsub.f32 %v16598_v8, %v16638_v2  ;;  %v16671_v14 = vand.u32 4294901760, %v16632_v37  ;;  %v4380_v3 = vmul.f32 2.0876756e-09, %v16642_v57  ;;  %v16675_v51 = vand.u32 4294901760, %v16486_v55 }
 0x429   :  { %20377 = vst [vmem:[#allocation33_spill] sm:$0xff] %v16627_v60  ;;  %v4774_v62 = vsub.f32 %v16608_v47, %v16627_v60  ;;  %12210 = vmatprep.subr.mxu0 %v16584_v54  ;;  %v4768_v12 = vand.u32 4294901760, %v4767_v1  ;;  %v16680_v63 = vsub.f32 %v16497_v19, %v16645_v32  ;;  %v4782_v48 = vand.u32 4294901760, %v4781_v42 }
 0x42a   :  { %12211 = vmatpush3.msra.mxu0 %v16584_v54  ;;  %20383 = vst [vmem:[#allocation17_spill] sm:$0xff] %v16671_v14  ;;  %v4795_v24 = vsub.f32 %v16615_v26, %v16658_v4  ;;  %v16686_v1 = vand.u32 4294901760, %v16652_v44  ;;  %v4346_v28 = vmul.f32 2.5052108e-08, %v20385_v16  ;;  %v16690_v50 = vand.u32 4294901760, %v4398_v30  ;;  %v20392_v4 = vld [vmem:[#allocation52_spill] sm:$0xff] }
 0x42b   :  { %v4775_v31 = vand.u32 4294901760, %v4774_v62  ;;  %12212 = vmatprep.subr.mxu0 %v16579_v36  ;;  %12260 = vmatprep.subr.mxu1 %v4768_v12  ;;  %v4364_v62 = vadd.f32 %v4348_v11, %v20386_v45  ;;  %v16694_v19 = vsub.f32 %v4400_v43, %v16662_v13  ;;  %v4802_v42 = vsub.f32 %v16632_v37, %v16671_v14 }
 0x42c   :  { %12213 = vmatpush3.msra.mxu0 %v16579_v36  ;;  %12261 = vmatpush3.msra.mxu1 %v4768_v12  ;;  %20384 = vst [vmem:[#allocation55_spill] sm:$0xff] %v16686_v1  ;;  %20387 = vst [vmem:[#allocation54_spill] sm:$0xff] %v16690_v50  ;;  %v4789_v12 = vand.u32 4294901760, %v4788_v52  ;;  %v16700_v7 = vand.u32 4294901760, %v16665_v40  ;;  %v16703_v11 = vand.u32 4294901760, %v16441_v22  ;;  %v16712_v52 = vsub.f32 %v16486_v55, %v16675_v51 }
 0x42d   :  { %12214 = vmatprep.subr.mxu0 %v16595_v29  ;;  %12262 = vmatprep.subr.mxu1 %v4775_v31  ;;  %v4378_v16 = vmul.f32 2.0876756e-09, %v16446_v23  ;;  %v4396_v43 = vadd.f32 %v4380_v3, %v4364_v62  ;;  %v4796_v45 = vand.u32 4294901760, %v4795_v24  ;;  %v4809_v14 = vsub.f32 %v16652_v44, %v16686_v1 }
 0x42e   :  { %12215 = vmatpush3.msra.mxu0 %v16595_v29  ;;  %12263 = vmatpush3.msra.mxu1 %v4775_v31  ;;  %20388 = vst [vmem:[#allocation21_spill] sm:$0xff] %v16700_v7  ;;  %20389 = vst [vmem:[#allocation74_spill] sm:$0xff] %v16703_v11  ;;  %v16707_v31 = vand.u32 4294901760, %v16468_v9  ;;  %v16718_v23 = vand.u32 4294901760, %v16680_v63  ;;  %v4362_v2 = vadd.f32 %v4346_v28, %v20392_v4  ;;  %v16722_v3 = vand.u32 4294901760, %v16642_v57 }
 0x42f   :  { %12216 = vmatprep.subr.mxu0 %v16612_v35  ;;  %12264 = vmatprep.subr.mxu1 %v4782_v48  ;;  %v16726_v55 = vsub.f32 %v4398_v30, %v16690_v50  ;;  %v4816_v24 = vsub.f32 %v16665_v40, %v16700_v7  ;;  %v16732_v62 = vand.u32 4294901760, %v16694_v19  ;;  %v16736_v4 = vsub.f32 %v16441_v22, %v16703_v11 }
 0x430   :  { %20390 = vst [vmem:[#allocation88_spill] sm:$0xff] %v16707_v31  ;;  %12217 = vmatpush3.msra.mxu0 %v16612_v35  ;;  %12265 = vmatpush3.msra.mxu1 %v4782_v48  ;;  %20391 = vst [vmem:[#allocation11_spill] sm:$0xff] %v16718_v23  ;;  %v4803_v48 = vand.u32 4294901760, %v4802_v42  ;;  %v4394_v28 = vadd.f32 %v4378_v16, %v4362_v2  ;;  %v16738_v1 = vand.u32 4294901760, %v4396_v43  ;;  %v16749_v22 = vand.u32 4294901760, %v16712_v52 }
 0x431   :  { %12218 = vmatprep.subr.mxu0 %v16629_v34  ;;  %12266 = vmatprep.subr.mxu1 %v4789_v12  ;;  %20393 = vst [vmem:[#allocation16_spill] sm:$0xff] %v16722_v3  ;;  %20394 = vst [vmem:[#allocation48_spill] sm:$0xff] %v16732_v62  ;;  %v16743_v30 = vsub.f32 %v16468_v9, %v16707_v31  ;;  %v4823_v42 = vsub.f32 %v16680_v63, %v16718_v23  ;;  %v16752_v2 = vand.u32 4294901760, %v16451_v58 }
 0x432   :  { %12219 = vmatpush3.msra.mxu0 %v16629_v34  ;;  %12267 = vmatpush3.msra.mxu1 %v4789_v12  ;;  %20395 = vst [vmem:[#allocation19_spill] sm:$0xff] %v16736_v4  ;;  %20396 = vst [vmem:[#allocation93_spill] sm:$0xff] %v16738_v1  ;;  %v4810_v12 = vand.u32 4294901760, %v4809_v14  ;;  %v16755_v16 = vand.u32 4294901760, %v16459_v56  ;;  %v16759_v9 = vsub.f32 %v16642_v57, %v16722_v3  ;;  %v16763_v14 = vand.u32 4294901760, %v16590_v33 }
 0x433   :  { %12220 = vmatprep.subr.mxu0 %v16645_v32  ;;  %12268 = vmatprep.subr.mxu1 %v4796_v45  ;;  %20397 = vst [vmem:[#allocation14_spill] sm:$0xff] %v16749_v22  ;;  %20398 = vst [vmem:[#allocation34_spill] sm:$0xff] %v16752_v2  ;;  %v4830_v23 = vsub.f32 %v16694_v19, %v16732_v62  ;;  %v16769_v7 = vand.u32 4294901760, %v16726_v55  ;;  %v16772_v20 = vand.u32 4294901760, %v16736_v4  ;;  %v16784_v49 = vand.u32 4294901760, %v16743_v30 }
 0x434   :  { %12221 = vmatpush3.msra.mxu0 %v16645_v32  ;;  %12269 = vmatpush3.msra.mxu1 %v4796_v45  ;;  %20399 = vst [vmem:[#allocation100_spill] sm:$0xff] %v16755_v16  ;;  %20400 = vst [vmem:[#allocation78_spill] sm:$0xff] %v16759_v9  ;;  %v4817_v45 = vand.u32 4294901760, %v4816_v24  ;;  %v16775_v57 = vsub.f32 %v4396_v43, %v16738_v1  ;;  %v4824_v24 = vand.u32 4294901760, %v4823_v42  ;;  %v20408_v42 = vld [vmem:[#allocation39_spill] sm:$0xff] }
 0x435   :  { %12222 = vmatprep.subr.mxu0 %v16662_v13  ;;  %12270 = vmatprep.subr.mxu1 %v4803_v48  ;;  %20401 = vst [vmem:[#allocation61_spill] sm:$0xff] %v16763_v14  ;;  %20402 = vst [vmem:[#allocation53_spill] sm:$0xff] %v16769_v7  ;;  %v4837_v62 = vsub.f32 %v16712_v52, %v16749_v22  ;;  %v16788_v60 = vsub.f32 %v16451_v58, %v16752_v2  ;;  %v16799_v61 = vand.u32 4294901760, %v20408_v42 }
 0x436   :  { %12223 = vmatpush3.msra.mxu0 %v16662_v13  ;;  %12271 = vmatpush3.msra.mxu1 %v4803_v48  ;;  %20403 = vst [vmem:[#allocation26_spill] sm:$0xff] %v16772_v20  ;;  %v16778_v48 = vand.u32 4294901760, %v4394_v28  ;;  %20405 = vst [vmem:[#allocation113_spill] sm:$0xff] %v16784_v49  ;;  %v16792_v43 = vsub.f32 %v16459_v56, %v16755_v16  ;;  %v16803_v22 = vsub.f32 %v16590_v33, %v16763_v14 }
 0x437   :  { %12224 = vmatprep.subr.mxu0 %v16675_v51  ;;  %12272 = vmatprep.subr.mxu1 %v4810_v12  ;;  %20409 = vst [vmem:[#allocation114_spill] sm:$0xff] %v16799_v61  ;;  %v4831_v58 = vand.u32 4294901760, %v4830_v23  ;;  %v4844_v56 = vsub.f32 %v16726_v55, %v16769_v7  ;;  %v16818_v33 = vand.u32 4294901760, %v16572_v41  ;;  %v4838_v23 = vand.u32 4294901760, %v4837_v62 }
 0x438   :  { %12225 = vmatpush3.msra.mxu0 %v16675_v51  ;;  %12273 = vmatpush3.msra.mxu1 %v4810_v12  ;;  %20404 = vst [vmem:[#allocation80_spill] sm:$0xff] %v16778_v48  ;;  %20406 = vst [vmem:[#allocation28_spill] sm:$0xff] %v16792_v43  ;;  %v16796_v12 = vand.u32 4294901760, %v16759_v9  ;;  %v16815_v18 = vsub.f32 %v4394_v28, %v16778_v48  ;;  %v4851_v7 = vsub.f32 %v16743_v30, %v16784_v49 }
 0x439   :  { %12226 = vmatprep.subr.mxu0 %v16690_v50  ;;  %12274 = vmatprep.subr.mxu1 %v4817_v45  ;;  %20410 = vst [vmem:[#allocation90_spill] sm:$0xff] %v16803_v22  ;;  %20412 = vst [vmem:[#allocation57_spill] sm:$0xff] %v16818_v33  ;;  %v16830_v28 = vand.u32 4294901760, %v16788_v60  ;;  %v4845_v62 = vand.u32 4294901760, %v4844_v56  ;;  %v16838_v49 = vand.u32 4294901760, %v16803_v22 }
 0x43a   :  { %12227 = vmatpush3.msra.mxu0 %v16690_v50  ;;  %12275 = vmatpush3.msra.mxu1 %v4817_v45  ;;  %20407 = vst [vmem:[#allocation40_spill] sm:$0xff] %v16796_v12  ;;  %v4616_v45 = vsub.f32 %v16736_v4, %v16772_v20  ;;  %v16812_v50 = vand.u32 4294901760, %v16775_v57  ;;  %v16827_v20 = vand.u32 4294901760, %v16792_v43  ;;  %v4852_v56 = vand.u32 4294901760, %v4851_v7 }
 0x43b   :  { %12228 = vmatprep.subr.mxu0 %v16707_v31  ;;  %12276 = vmatprep.subr.mxu1 %v4824_v24  ;;  %20414 = vst [vmem:[#allocation32_spill] sm:$0xff] %v16830_v28  ;;  %20416 = vst [vmem:[#allocation102_spill] sm:$0xff] %v16838_v49  ;;  %v4646_v7 = vsub.f32 %v16803_v22, %v16838_v49 }
 0x43c   :  { %12229 = vmatpush3.msra.mxu0 %v16707_v31  ;;  %12277 = vmatpush3.msra.mxu1 %v4824_v24  ;;  %20411 = vst [vmem:[#allocation101_spill] sm:$0xff] %v16812_v50  ;;  %v4626_v24 = vsub.f32 %v16759_v9, %v16796_v12  ;;  %20413 = vst [vmem:[#allocation84_spill] sm:$0xff] %v16827_v20  ;;  %v16834_v31 = vsub.f32 %v20408_v42, %v16799_v61 }
 0x43d   :  { %12230 = vmatprep.subr.mxu0 %v16738_v1  ;;  %12278 = vmatprep.subr.mxu1 %v4831_v58  ;;  %v4858_v12 = vsub.f32 %v16775_v57, %v16812_v50  ;;  %v16850_v42 = vsub.f32 %v16572_v41, %v16818_v33  ;;  %v4636_v50 = vsub.f32 %v16792_v43, %v16827_v20  ;;  %v16864_v41 = vand.u32 4294901760, %v16551_v27 }
 0x43e   :  { %12231 = vmatpush3.msra.mxu0 %v16738_v1  ;;  %12279 = vmatpush3.msra.mxu1 %v4831_v58  ;;  %20415 = vst [vmem:[#allocation85_spill] sm:$0xff] %v16834_v31  ;;  %v16840_v58 = vand.u32 4294901760, %v4616_v45  ;;  %v16846_v1 = vand.u32 4294901760, %v16482_v10  ;;  %v16854_v45 = vand.u32 4294901760, %v16815_v18 }
 0x43f   :  { %12232 = vmatprep.subr.mxu0 %v16752_v2  ;;  %12280 = vmatprep.subr.mxu1 %v4838_v23  ;;  %20419 = vst [vmem:[#allocation66_spill] sm:$0xff] %v16850_v42  ;;  %20421 = vst [vmem:[#allocation103_spill] sm:$0xff] %v16864_v41  ;;  %v16885_v49 = vand.u32 4294901760, %v4636_v50  ;;  %v16901_v50 = vand.u32 4294901760, %v16538_v5 }
 0x440   :  { %20417 = vst [vmem:[#allocation86_spill] sm:$0xff] %v16840_v58  ;;  %12233 = vmatpush3.msra.mxu0 %v16752_v2  ;;  %12281 = vmatpush3.msra.mxu1 %v4838_v23  ;;  %20418 = vst [vmem:[#allocation94_spill] sm:$0xff] %v16846_v1  ;;  %v16857_v23 = vand.u32 4294901760, %v4626_v24  ;;  %v4865_v2 = vsub.f32 %v16788_v60, %v16830_v28  ;;  %v4859_v24 = vand.u32 4294901760, %v4858_v12  ;;  %v16882_v28 = vand.u32 4294901760, %v16850_v42 }
 0x441   :  { %12234 = vmatprep.subr.mxu0 %v16778_v48  ;;  %12282 = vmatprep.subr.mxu1 %v4845_v62  ;;  %20425 = vst [vmem:[#allocation96_spill] sm:$0xff] %v16885_v49  ;;  %v16888_v12 = vand.u32 4294901760, %v16499_v17  ;;  %20429 = vst [vmem:[#allocation56_spill] sm:$0xff] %v16901_v50 }
 0x442   :  { %12235 = vmatpush3.msra.mxu0 %v16778_v48  ;;  %12283 = vmatpush3.msra.mxu1 %v4845_v62  ;;  %20420 = vst [vmem:[#allocation13_spill] sm:$0xff] %v16857_v23  ;;  %v16870_v48 = vand.u32 4294901760, %v16834_v31  ;;  %v16876_v62 = vsub.f32 %v16482_v10, %v16846_v1  ;;  %20424 = vst [vmem:[#allocation104_spill] sm:$0xff] %v16882_v28  ;;  %v16892_v10 = vsub.f32 %v16551_v27, %v16864_v41 }
 0x443   :  { %12237 = vmatmul.mubr.f32.vlgmr.msra.gmra.mxu0 %v16840_v58  ;;  %12284 = vmatprep.subr.mxu1 %v4852_v56  ;;  %v4872_v58 = vsub.f32 %v16815_v18, %v16854_v45  ;;  %20426 = vst [vmem:[#allocation105_spill] sm:$0xff] %v16888_v12 }
 0x444   :  { %20422 = vst [vmem:[#allocation50_spill] sm:$0xff] %v16870_v48  ;;  %12316 = vmatprep.subr.mxu0 %v16601_v21  ;;  %12239 = vmatprep.mubr.f32.mxu0 %v16857_v23  ;;  %20423 = vst [vmem:[#allocation112_spill] sm:$0xff] %v16876_v62  ;;  %v4866_v23 = vand.u32 4294901760, %v4865_v2  ;;  %v4666_v2 = vsub.f32 %v16850_v42, %v16882_v28 }
 0x445   :  { %12285 = vmatpush3.msra.mxu1 %v4852_v56  ;;  %12317 = vmatpush3.msra.mxu0 %v16601_v21  ;;  %20427 = vst [vmem:[#allocation117_spill] sm:$0xff] %v16892_v10  ;;  %v16895_v21 = vand.u32 4294901760, %v4646_v7  ;;  %v4656_v56 = vsub.f32 %v16834_v31, %v16870_v48  ;;  %v4873_v27 = vand.u32 4294901760, %v4872_v58  ;;  %v16913_v7 = vsub.f32 %v16499_v17, %v16888_v12 }
 0x446   :  { %12286 = vmatprep.subr.mxu1 %v4859_v24  ;;  %12318 = vmatprep.subr.mxu0 %v16608_v47  ;;  %v16919_v58 = vand.u32 4294901760, %v16892_v10  ;;  %v16931_v17 = vand.u32 4294901760, %v4666_v2 }
 0x447   :  { %12287 = vmatpush3.msra.mxu1 %v4859_v24  ;;  %12319 = vmatpush3.msra.mxu0 %v16608_v47  ;;  %20428 = vst [vmem:[#allocation49_spill] sm:$0xff] %v16895_v21  ;;  %v16908_v47 = vand.u32 4294901760, %v16876_v62  ;;  %20431 = vst [vmem:[#allocation35_spill] sm:$0xff] %v16913_v7  ;;  %v16916_v24 = vand.u32 4294901760, %v4656_v56  ;;  %v16945_v56 = vand.u32 4294901760, %v16913_v7 }
 0x448   :  { %12240 = vmatmul.mubr.f32.gmra.mxu0 %v16885_v49  ;;  %12288 = vmatprep.subr.mxu1 %v4866_v23  ;;  %20433 = vst [vmem:[#allocation111_spill] sm:$0xff] %v16919_v58  ;;  %20436 = vst [vmem:[#allocation58_spill] sm:$0xff] %v16931_v17 }
 0x449   :  { %12320 = vmatprep.subr.mxu0 %v16582_v0  ;;  %12242 = vmatprep.mubr.f32.mxu0 %v16895_v21  ;;  %20430 = vst [vmem:[#allocation89_spill] sm:$0xff] %v16908_v47  ;;  %20432 = vst [vmem:[#allocation115_spill] sm:$0xff] %v16916_v24  ;;  %v16923_v21 = vand.u32 4294901760, %v16524_v25 }
 0x44a   :  { %12289 = vmatpush3.msra.mxu1 %v4866_v23  ;;  %12321 = vmatpush3.msra.mxu0 %v16582_v0  ;;  %v16927_v0 = vsub.f32 %v16538_v5, %v16901_v50  ;;  %v4676_v23 = vsub.f32 %v16876_v62, %v16908_v47  ;;  %v4686_v5 = vsub.f32 %v16892_v10, %v16919_v58 }
 0x44b   :  { %12290 = vmatprep.subr.mxu1 %v4873_v27  ;;  %12322 = vmatprep.subr.mxu0 %v16598_v8  ;;  %20434 = vst [vmem:[#allocation71_spill] sm:$0xff] %v16923_v21  ;;  %20438 = vst [vmem:[#allocation120_spill] sm:$0xff] %v16945_v56 }
 0x44c   :  { %12291 = vmatpush3.msra.mxu1 %v4873_v27  ;;  %12323 = vmatpush3.msra.mxu0 %v16598_v8  ;;  %20435 = vst [vmem:[#allocation37_spill] sm:$0xff] %v16927_v0  ;;  %v16938_v8 = vand.u32 4294901760, %v16554_v46  ;;  %v16951_v27 = vsub.f32 %v16524_v25, %v16923_v21  ;;  %v16955_v2 = vand.u32 4294901760, %v4676_v23  ;;  %v16971_v23 = vand.u32 4294901760, %v4686_v5 }
 0x44d   :  { %12243 = vmatmul.mubr.f32.gmra.mxu0 %v16916_v24  ;;  %12293 = vmatmul.mubr.f32.vlgmr.msra.gmra.mxu1 %v16703_v11  ;;  %v4696_v24 = vsub.f32 %v16913_v7, %v16945_v56 }
 0x44e   :  { %12324 = vmatprep.subr.mxu0 %v16615_v26  ;;  %12372 = vmatprep.subr.mxu1 %v16586_v39  ;;  %20437 = vst [vmem:[#allocation87_spill] sm:$0xff] %v16938_v8  ;;  %20439 = vst [vmem:[#allocation73_spill] sm:$0xff] %v16951_v27  ;;  %v16967_v25 = vsub.f32 %v16554_v46, %v16938_v8  ;;  %v16985_v5 = vand.u32 4294901760, %v16951_v27 }
 0x44f   :  { %12245 = vmatprep.mubr.f32.mxu0 %v16931_v17  ;;  %12295 = vmatprep.mubr.f32.mxu1 %v16722_v3  ;;  %20440 = vst [vmem:[#allocation99_spill] sm:$0xff] %v16955_v2  ;;  %v16958_v17 = vand.u32 4294901760, %v16927_v0  ;;  %20444 = vst [vmem:[#allocation47_spill] sm:$0xff] %v16971_v23 }
 0x450   :  { %12325 = vmatpush3.msra.mxu0 %v16615_v26  ;;  %12373 = vmatpush3.msra.mxu1 %v16586_v39  ;;  %v16963_v26 = vand.u32 4294901760, %v16530_v53  ;;  %20443 = vst [vmem:[#allocation45_spill] sm:$0xff] %v16967_v25  ;;  %20446 = vst [vmem:[#allocation119_spill] sm:$0xff] %v16985_v5  ;;  %v16998_v49 = vand.u32 4294901760, %v16967_v25 }
 0x451   :  { %12326 = vmatprep.subr.mxu0 %v16632_v37  ;;  %12374 = vmatprep.subr.mxu1 %v16593_v15  ;;  %20441 = vst [vmem:[#allocation95_spill] sm:$0xff] %v16958_v17  ;;  %v4706_v46 = vsub.f32 %v16927_v0, %v16958_v17 }
 0x452   :  { %12327 = vmatpush3.msra.mxu0 %v16632_v37  ;;  %12375 = vmatpush3.msra.mxu1 %v16593_v15  ;;  %20442 = vst [vmem:[#allocation30_spill] sm:$0xff] %v16963_v26  ;;  %v16978_v37 = vand.u32 4294901760, %v16562_v59  ;;  %20449 = vst [vmem:[#allocation15_spill] sm:$0xff] %v16998_v49 }
 0x453   :  { %12246 = vmatmul.mubr.f32.gmra.mxu0 %v16955_v2  ;;  %12296 = vmatmul.mubr.f32.gmra.mxu1 %v16755_v16  ;;  %v16991_v2 = vsub.f32 %v16530_v53, %v16963_v26 }
 0x454   :  { %12328 = vmatprep.subr.mxu0 %v16652_v44  ;;  %12376 = vmatprep.subr.mxu1 %v16565_v38  ;;  %20445 = vst [vmem:[#allocation82_spill] sm:$0xff] %v16978_v37  ;;  %v17007_v53 = vsub.f32 %v16562_v59, %v16978_v37  ;;  %v4726_v59 = vsub.f32 %v16967_v25, %v16998_v49 }
 0x455   :  { %12248 = vmatprep.mubr.f32.mxu0 %v16971_v23  ;;  %12298 = vmatprep.mubr.f32.mxu1 %v16763_v14  ;;  %20447 = vst [vmem:[#allocation41_spill] sm:$0xff] %v16991_v2  ;;  %v16995_v23 = vand.u32 4294901760, %v4696_v24  ;;  %v17011_v24 = vand.u32 4294901760, %v4706_v46  ;;  %v4716_v14 = vsub.f32 %v16951_v27, %v16985_v5 }
 0x456   :  { %12329 = vmatpush3.msra.mxu0 %v16652_v44  ;;  %12377 = vmatpush3.msra.mxu1 %v16565_v38  ;;  %v17003_v44 = vand.u32 4294901760, %v16556_v6  ;;  %20451 = vst [vmem:[#allocation108_spill] sm:$0xff] %v17007_v53 }
 0x457   :  { %12330 = vmatprep.subr.mxu0 %v16665_v40  ;;  %12378 = vmatprep.subr.mxu1 %v16584_v54  ;;  %20448 = vst [vmem:[#allocation27_spill] sm:$0xff] %v16995_v23  ;;  %20452 = vst [vmem:[#allocation106_spill] sm:$0xff] %v17011_v24 }
 0x458   :  { %12331 = vmatpush3.msra.mxu0 %v16665_v40  ;;  %12379 = vmatpush3.msra.mxu1 %v16584_v54  ;;  %20450 = vst [vmem:[#allocation83_spill] sm:$0xff] %v17003_v44  ;;  %v17022_v40 = vand.u32 4294901760, %v16991_v2  ;;  %v17028_v46 = vsub.f32 %v16556_v6, %v17003_v44 }
 0x459   :  { %12249 = vmatmul.mubr.f32.gmra.mxu0 %v16995_v23  ;;  %12299 = vmatmul.mubr.f32.gmra.mxu1 %v16799_v61  ;;  %v17035_v23 = vand.u32 4294901760, %v17007_v53 }
 0x45a   :  { %12332 = vmatprep.subr.mxu0 %v16680_v63  ;;  %12380 = vmatprep.subr.mxu1 %v16579_v36  ;;  %20453 = vst [vmem:[#allocation76_spill] sm:$0xff] %v17022_v40  ;;  %20454 = vst [vmem:[#allocation52_spill] sm:$0xff] %v17028_v46  ;;  %v4736_v6 = vsub.f32 %v16991_v2, %v17022_v40 }
 0x45b   :  { %12251 = vmatprep.mubr.f32.mxu0 %v17011_v24  ;;  %12301 = vmatprep.mubr.f32.mxu1 %v16818_v33  ;;  %v17032_v24 = vand.u32 4294901760, %v4716_v14  ;;  %20456 = vst [vmem:[#allocation121_spill] sm:$0xff] %v17035_v23  ;;  %v17052_v14 = vand.u32 4294901760, %v17028_v46 }
 0x45c   :  { %12333 = vmatpush3.msra.mxu0 %v16680_v63  ;;  %12381 = vmatpush3.msra.mxu1 %v16579_v36  ;;  %v17041_v63 = vand.u32 4294901760, %v4726_v59  ;;  %v17058_v59 = vand.u32 4294901760, %v4736_v6  ;;  %v20464_v6 = vld [vmem:[#allocation88_spill] sm:$0xff] }
 0x45d   :  { %12334 = vmatprep.subr.mxu0 %v16694_v19  ;;  %12382 = vmatprep.subr.mxu1 %v16595_v29  ;;  %20455 = vst [vmem:[#allocation39_spill] sm:$0xff] %v17032_v24  ;;  %20458 = vst [vmem:[#allocation123_spill] sm:$0xff] %v17052_v14 }
 0x45e   :  { %12335 = vmatpush3.msra.mxu0 %v16694_v19  ;;  %12383 = vmatpush3.msra.mxu1 %v16595_v29  ;;  %20457 = vst [vmem:[#allocation122_spill] sm:$0xff] %v17041_v63  ;;  %v4746_v19 = vsub.f32 %v17007_v53, %v17035_v23  ;;  %20459 = vst [vmem:[#allocation124_spill] sm:$0xff] %v17058_v59 }
 0x45f   :  { %12252 = vmatmul.mubr.f32.gmra.mxu0 %v17032_v24  ;;  %12302 = vmatmul.mubr.f32.gmra.mxu1 %v16846_v1 }
 0x460   :  { %12336 = vmatprep.subr.mxu0 %v16712_v52  ;;  %12384 = vmatprep.subr.mxu1 %v16612_v35 }
 0x461   :  { %12254 = vmatprep.mubr.f32.mxu0 %v17041_v63  ;;  %12304 = vmatprep.mubr.f32.mxu1 %v16864_v41  ;;  %v17064_v63 = vand.u32 4294901760, %v4746_v19  ;;  %v20465_v19 = vld [vmem:[#allocation36_spill] sm:$0xff] }
 0x462   :  { %12337 = vmatpush3.msra.mxu0 %v16712_v52  ;;  %12385 = vmatpush3.msra.mxu1 %v16612_v35  ;;  %v4756_v52 = vsub.f32 %v17028_v46, %v17052_v14 }
 0x463   :  { %12338 = vmatprep.subr.mxu0 %v16726_v55  ;;  %12386 = vmatprep.subr.mxu1 %v16629_v34  ;;  %20460 = vst [vmem:[#allocation125_spill] sm:$0xff] %v17064_v63 }
 0x464   :  { %12339 = vmatpush3.msra.mxu0 %v16726_v55  ;;  %12387 = vmatpush3.msra.mxu1 %v16629_v34  ;;  %v17076_v55 = vand.u32 4294901760, %v4756_v52  ;;  %v20468_v52 = vld [vmem:[#allocation34_spill] sm:$0xff] }
 0x465   :  { %12255 = vmatmul.mubr.f32.gmra.mxu0 %v17058_v59  ;;  %12305 = vmatmul.mubr.f32.gmra.mxu1 %v16888_v12 }
 0x466   :  { %12340 = vmatprep.subr.mxu0 %v16743_v30  ;;  %12388 = vmatprep.subr.mxu1 %v16645_v32  ;;  %20461 = vst [vmem:[#allocation126_spill] sm:$0xff] %v17076_v55 }
 0x467   :  { %12257 = vmatprep.mubr.f32.mxu0 %v17064_v63  ;;  %12307 = vmatprep.mubr.f32.mxu1 %v16901_v50 }
 0x468   :  { %12341 = vmatpush3.msra.mxu0 %v16743_v30  ;;  %12389 = vmatpush3.msra.mxu1 %v16645_v32  ;;  %v20462_v30 = vld [vmem:[#allocation98_spill] sm:$0xff] }
 0x469   :  { %12342 = vmatprep.subr.mxu0 %v16775_v57  ;;  %12390 = vmatprep.subr.mxu1 %v16662_v13 }
 0x46a   :  { %12343 = vmatpush3.msra.mxu0 %v16775_v57  ;;  %12391 = vmatpush3.msra.mxu1 %v16662_v13  ;;  %v20463_v57 = vld [vmem:[#allocation54_spill] sm:$0xff] }
 0x46b   :  { %12258 = vmatmul.mubr.f32.gmra.mxu0 %v17076_v55  ;;  %12308 = vmatmul.mubr.f32.gmra.mxu1 %v16923_v21 }
 0x46c   :  { %12344 = vmatprep.subr.mxu0 %v16788_v60  ;;  %12392 = vmatprep.subr.mxu1 %v16675_v51 }
 0x46d   :  { %12310 = vmatprep.mubr.f32.mxu1 %v16938_v8  ;;  %12345 = vmatpush3.msra.mxu0 %v16788_v60  ;;  %v20466_v60 = vld [vmem:[#allocation93_spill] sm:$0xff] }
 0x46e   :  { %12348 = vmatprep.mubr.f32.mxu0 %v20462_v30  ;;  %12393 = vmatpush3.msra.mxu1 %v16675_v51  ;;  %v20472_v30 = vld [vmem:[#allocation24_spill] sm:$0xff] }
 0x46f   :  { %12346 = vmatprep.subr.mxu0 %v16815_v18  ;;  %12394 = vmatprep.subr.mxu1 %v20463_v57 }
 0x470   :  { %12347 = vmatpush3.msra.mxu0 %v16815_v18  ;;  %12395 = vmatpush3.msra.mxu1 %v20463_v57  ;;  %v20467_v18 = vld [vmem:[#allocation33_spill] sm:$0xff] }
 0x471   :  { %12311 = vmatmul.mubr.f32.gmra.mxu1 %v16963_v26  ;;  %12349 = vmatmul.mubr.f32.vlgmr.msra.gmra.mxu0 %v16736_v4  ;;  %v20469_v4 = vld [vmem:[#allocation18_spill] sm:$0xff] }
 0x472   :  { %12396 = vmatprep.subr.mxu1 %v20464_v6  ;;  %12428 = vmatprep.subr.mxu0 %v20465_v19 }
 0x473   :  { %12313 = vmatprep.mubr.f32.mxu1 %v16978_v37  ;;  %12351 = vmatprep.mubr.f32.mxu0 %v16759_v9  ;;  %v20471_v9 = vld [vmem:[#allocation80_spill] sm:$0xff] }
 0x474   :  { %12397 = vmatpush3.msra.mxu1 %v20464_v6  ;;  %12429 = vmatpush3.msra.mxu0 %v20465_v19  ;;  %v20470_v19 = vld [vmem:[#allocation29_spill] sm:$0xff] }
 0x475   :  { %12398 = vmatprep.subr.mxu1 %v20466_v60  ;;  %12430 = vmatprep.subr.mxu0 %v20467_v18 }
 0x476   :  { %12399 = vmatpush3.msra.mxu1 %v20466_v60  ;;  %12431 = vmatpush3.msra.mxu0 %v20467_v18  ;;  %v20473_v18 = vld [vmem:[#allocation26_spill] sm:$0xff] }
 0x477   :  { %12314 = vmatmul.mubr.f32.gmra.mxu1 %v17003_v44  ;;  %12352 = vmatmul.mubr.f32.gmra.mxu0 %v16792_v43  ;;  %v20474_v43 = vld [vmem:[#allocation23_spill] sm:$0xff] }
 0x478   :  { %12400 = vmatprep.subr.mxu1 %v20468_v52  ;;  %12432 = vmatprep.subr.mxu0 %v20469_v4 }
 0x479   :  { %12354 = vmatprep.mubr.f32.mxu0 %v16803_v22  ;;  %12401 = vmatpush3.msra.mxu1 %v20468_v52 }
 0x47a   :  { %12404 = vmatprep.mubr.f32.mxu1 %v20470_v19  ;;  %12433 = vmatpush3.msra.mxu0 %v20469_v4  ;;  %v20475_v19 = vld [vmem:[#allocation40_spill] sm:$0xff]  ;;  %v20476_v4 = vld [vmem:[#allocation17_spill] sm:$0xff] }
 0x47b   :  { %12402 = vmatprep.subr.mxu1 %v20471_v9  ;;  %12434 = vmatprep.subr.mxu0 %v20472_v30 }
 0x47c   :  { %12403 = vmatpush3.msra.mxu1 %v20471_v9  ;;  %12435 = vmatpush3.msra.mxu0 %v20472_v30  ;;  %v20477_v30 = vld [vmem:[#allocation55_spill] sm:$0xff] }
 0x47d   :  { %12355 = vmatmul.mubr.f32.gmra.mxu0 %v16834_v31  ;;  %12405 = vmatmul.mubr.f32.vlgmr.msra.gmra.mxu1 %v20473_v18 }
 0x47e   :  { %12436 = vmatprep.subr.mxu0 %v20474_v43  ;;  %12484 = vmatprep.subr.mxu1 %v16586_v39 }
 0x47f   :  { %12357 = vmatprep.mubr.f32.mxu0 %v16850_v42  ;;  %12407 = vmatprep.mubr.f32.mxu1 %v20475_v19 }
 0x480   :  { %12437 = vmatpush3.msra.mxu0 %v20474_v43  ;;  %12485 = vmatpush3.msra.mxu1 %v16586_v39  ;;  %v20478_v43 = vld [vmem:[#allocation102_spill] sm:$0xff]  ;;  %v20479_v39 = vld [vmem:[#allocation21_spill] sm:$0xff] }
 0x481   :  { %12438 = vmatprep.subr.mxu0 %v20476_v4  ;;  %12486 = vmatprep.subr.mxu1 %v16593_v15 }
 0x482   :  { %12439 = vmatpush3.msra.mxu0 %v20476_v4  ;;  %12487 = vmatpush3.msra.mxu1 %v16593_v15  ;;  %v20480_v15 = vld [vmem:[#allocation11_spill] sm:$0xff] }
 0x483   :  { %12358 = vmatmul.mubr.f32.gmra.mxu0 %v16876_v62  ;;  %12408 = vmatmul.mubr.f32.gmra.mxu1 %v16827_v20 }
 0x484   :  { %12440 = vmatprep.subr.mxu0 %v20477_v30  ;;  %12488 = vmatprep.subr.mxu1 %v16565_v38 }
 0x485   :  { %12360 = vmatprep.mubr.f32.mxu0 %v16892_v10  ;;  %12410 = vmatprep.mubr.f32.mxu1 %v20478_v43 }
 0x486   :  { %12441 = vmatpush3.msra.mxu0 %v20477_v30  ;;  %12489 = vmatpush3.msra.mxu1 %v16565_v38  ;;  %v20481_v38 = vld [vmem:[#allocation48_spill] sm:$0xff] }
 0x487   :  { %12442 = vmatprep.subr.mxu0 %v20479_v39  ;;  %12490 = vmatprep.subr.mxu1 %v16584_v54 }
 0x488   :  { %12443 = vmatpush3.msra.mxu0 %v20479_v39  ;;  %12491 = vmatpush3.msra.mxu1 %v16584_v54  ;;  %v20482_v54 = vld [vmem:[#allocation14_spill] sm:$0xff] }
 0x489   :  { %12361 = vmatmul.mubr.f32.gmra.mxu0 %v16913_v7  ;;  %12411 = vmatmul.mubr.f32.gmra.mxu1 %v16870_v48 }
 0x48a   :  { %12444 = vmatprep.subr.mxu0 %v20480_v15  ;;  %12492 = vmatprep.subr.mxu1 %v16579_v36 }
 0x48b   :  { %12363 = vmatprep.mubr.f32.mxu0 %v16927_v0  ;;  %12413 = vmatprep.mubr.f32.mxu1 %v16882_v28 }
 0x48c   :  { %12445 = vmatpush3.msra.mxu0 %v20480_v15  ;;  %12493 = vmatpush3.msra.mxu1 %v16579_v36  ;;  %v20483_v36 = vld [vmem:[#allocation53_spill] sm:$0xff] }
 0x48d   :  { %12446 = vmatprep.subr.mxu0 %v20481_v38  ;;  %12494 = vmatprep.subr.mxu1 %v16595_v29 }
 0x48e   :  { %12447 = vmatpush3.msra.mxu0 %v20481_v38  ;;  %12495 = vmatpush3.msra.mxu1 %v16595_v29  ;;  %v20484_v29 = vld [vmem:[#allocation113_spill] sm:$0xff] }
 0x48f   :  { %12364 = vmatmul.mubr.f32.gmra.mxu0 %v16951_v27  ;;  %12414 = vmatmul.mubr.f32.gmra.mxu1 %v16908_v47 }
 0x490   :  { %12448 = vmatprep.subr.mxu0 %v20482_v54  ;;  %12496 = vmatprep.subr.mxu1 %v16612_v35 }
 0x491   :  { %12366 = vmatprep.mubr.f32.mxu0 %v16967_v25  ;;  %12416 = vmatprep.mubr.f32.mxu1 %v16919_v58 }
 0x492   :  { %12449 = vmatpush3.msra.mxu0 %v20482_v54  ;;  %12497 = vmatpush3.msra.mxu1 %v16612_v35  ;;  %v20485_v35 = vld [vmem:[#allocation101_spill] sm:$0xff] }
 0x493   :  { %12450 = vmatprep.subr.mxu0 %v20483_v36  ;;  %12498 = vmatprep.subr.mxu1 %v16629_v34 }
 0x494   :  { %12451 = vmatpush3.msra.mxu0 %v20483_v36  ;;  %12499 = vmatpush3.msra.mxu1 %v16629_v34  ;;  %v20486_v34 = vld [vmem:[#allocation32_spill] sm:$0xff] }
 0x495   :  { %12367 = vmatmul.mubr.f32.gmra.mxu0 %v16991_v2  ;;  %12417 = vmatmul.mubr.f32.gmra.mxu1 %v16945_v56 }
 0x496   :  { %12452 = vmatprep.subr.mxu0 %v20484_v29  ;;  %12500 = vmatprep.subr.mxu1 %v16645_v32 }
 0x497   :  { %12369 = vmatprep.mubr.f32.mxu0 %v17007_v53  ;;  %12419 = vmatprep.mubr.f32.mxu1 %v16958_v17 }
 0x498   :  { %12453 = vmatpush3.msra.mxu0 %v20484_v29  ;;  %12501 = vmatpush3.msra.mxu1 %v16645_v32  ;;  %v20487_v32 = vld [vmem:[#allocation97_spill] sm:$0xff] }
 0x499   :  { %12454 = vmatprep.subr.mxu0 %v20485_v35  ;;  %12502 = vmatprep.subr.mxu1 %v16662_v13 }
 0x49a   :  { %12455 = vmatpush3.msra.mxu0 %v20485_v35  ;;  %12503 = vmatpush3.msra.mxu1 %v16662_v13  ;;  %v20488_v13 = vld [vmem:[#allocation61_spill] sm:$0xff] }
 0x49b   :  { %12370 = vmatmul.mubr.f32.gmra.mxu0 %v17028_v46  ;;  %12420 = vmatmul.mubr.f32.gmra.mxu1 %v16985_v5 }
 0x49c   :  { %12456 = vmatprep.subr.mxu0 %v20486_v34  ;;  %12504 = vmatprep.subr.mxu1 %v16675_v51 }
 0x49d   :  { %12422 = vmatprep.mubr.f32.mxu1 %v16998_v49  ;;  %12457 = vmatpush3.msra.mxu0 %v20486_v34 }
 0x49e   :  { %12460 = vmatprep.mubr.f32.mxu0 %v20487_v32  ;;  %12505 = vmatpush3.msra.mxu1 %v16675_v51  ;;  %v20489_v51 = vld [vmem:[#allocation20_spill] sm:$0xff] }
 0x49f   :  { %12458 = vmatprep.subr.mxu0 %v16854_v45  ;;  %12506 = vmatprep.subr.mxu1 %v20463_v57 }
 0x4a0   :  { %12459 = vmatpush3.msra.mxu0 %v16854_v45  ;;  %12507 = vmatpush3.msra.mxu1 %v20463_v57 }
 0x4a1   :  { %12423 = vmatmul.mubr.f32.gmra.mxu1 %v17022_v40  ;;  %12461 = vmatmul.mubr.f32.vlgmr.msra.gmra.mxu0 %v16703_v11 }
 0x4a2   :  { %12508 = vmatprep.subr.mxu1 %v20464_v6  ;;  %12425 = vmatprep.mubr.f32.mxu1 %v17035_v23 }
 0x4a3   :  { %12463 = vmatprep.mubr.f32.mxu0 %v16722_v3  ;;  %12509 = vmatpush3.msra.mxu1 %v20464_v6 }
 0x4a4   :  { %12510 = vmatprep.subr.mxu1 %v20466_v60 }
 0x4a5   :  { %12511 = vmatpush3.msra.mxu1 %v20466_v60  ;;  %12464 = vmatmul.mubr.f32.gmra.mxu0 %v16755_v16 }
 0x4a6   :  { %12426 = vmatmul.mubr.f32.gmra.mxu1 %v17052_v14  ;;  %12512 = vmatprep.subr.mxu1 %v20468_v52 }
 0x4a7   :  { %12466 = vmatprep.mubr.f32.mxu0 %v20488_v13  ;;  %12513 = vmatpush3.msra.mxu1 %v20468_v52 }
 0x4a8   :  { %12516 = vmatprep.mubr.f32.mxu1 %v20487_v32  ;;  %12514 = vmatprep.subr.mxu1 %v20471_v9 }
 0x4a9   :  { %12515 = vmatpush3.msra.mxu1 %v20471_v9  ;;  %12467 = vmatmul.mubr.f32.gmra.mxu0 %v16799_v61 }
 0x4aa   :  { %12517 = vmatmul.mubr.f32.vlgmr.msra.gmra.mxu1 %v16703_v11  ;;  %12469 = vmatprep.mubr.f32.mxu0 %v16818_v33 }
 0x4ab   :  { %12519 = vmatprep.mubr.f32.mxu1 %v16722_v3  ;;  %v20499_v3 = vld [vmem:[#allocation107_spill] sm:$0xff] }
 0x4ad   :  { %12470 = vmatmul.mubr.f32.gmra.mxu0 %v16846_v1 }
 0x4ae   :  { %12520 = vmatmul.mubr.f32.gmra.mxu1 %v16755_v16  ;;  %12472 = vmatprep.mubr.f32.mxu0 %v16864_v41 }
 0x4af   :  { %12522 = vmatprep.mubr.f32.mxu1 %v20488_v13 }
 0x4b1   :  { %12473 = vmatmul.mubr.f32.gmra.mxu0 %v16888_v12 }
 0x4b2   :  { %12523 = vmatmul.mubr.f32.gmra.mxu1 %v16799_v61  ;;  %12475 = vmatprep.mubr.f32.mxu0 %v16901_v50 }
 0x4b3   :  { %12525 = vmatprep.mubr.f32.mxu1 %v16818_v33 }
 0x4b5   :  { %12476 = vmatmul.mubr.f32.gmra.mxu0 %v16923_v21 }
 0x4b6   :  { %12526 = vmatmul.mubr.f32.gmra.mxu1 %v16846_v1  ;;  %12478 = vmatprep.mubr.f32.mxu0 %v16938_v8 }
 0x4b7   :  { %12528 = vmatprep.mubr.f32.mxu1 %v16864_v41 }
 0x4b9   :  { %12479 = vmatmul.mubr.f32.gmra.mxu0 %v16963_v26 }
 0x4ba   :  { %12529 = vmatmul.mubr.f32.gmra.mxu1 %v16888_v12  ;;  %12481 = vmatprep.mubr.f32.mxu0 %v16978_v37 }
 0x4bb   :  { %12531 = vmatprep.mubr.f32.mxu1 %v16901_v50 }
 0x4bd   :  { %12482 = vmatmul.mubr.f32.gmra.mxu0 %v17003_v44 }
 0x4be   :  { %12532 = vmatmul.mubr.f32.gmra.mxu1 %v16923_v21  ;;  %12572 = vmatprep.mubr.f32.mxu0 %v20489_v51 }
 0x4bf   :  { %12534 = vmatprep.mubr.f32.mxu1 %v16938_v8 }
 0x4c2   :  { %12535 = vmatmul.mubr.f32.gmra.mxu1 %v16963_v26 }
 0x4c3   :  { %12537 = vmatprep.mubr.f32.mxu1 %v16978_v37 }
 0x4c6   :  { %12538 = vmatmul.mubr.f32.gmra.mxu1 %v17003_v44 }
 0x4c7   :  { %12628 = vmatprep.mubr.f32.mxu1 %v20487_v32 }
 0x503   :  { %v12238_v9 = vpop.f32.mrf.mxu0 }
 0x505   :  { %v17232_v45 = vpop.f32.mrf.mxu0 }
 0x506   :  { %20490 = vst [vmem:[#allocation54_spill] sm:$0xff] %v17232_v45 }
 0x508   :  { %v12241_v57 = vpop.f32.mrf.mxu0 }
 0x50a   :  { %v17234_v6 = vpop.f32.mrf.mxu0 }
 0x50d   :  { %v12244_v60 = vpop.f32.mrf.mxu0  ;;  %v12294_v52 = vpop.f32.mrf.mxu1 }
 0x50e   :  { %v4917_v4 = vadd.f32 %v12294_v52, %v12238_v9 }
 0x50f   :  { %v17236_v30 = vpop.f32.mrf.mxu0  ;;  %v17238_v39 = vpop.f32.mrf.mxu1 }
 0x510   :  { %20491 = vst [vmem:[#allocation88_spill] sm:$0xff] %v17238_v39  ;;  %v20502_v39 = vld [vmem:[#allocation109_spill] sm:$0xff] }
 0x513   :  { %v12247_v15 = vpop.f32.mrf.mxu0  ;;  %v12297_v38 = vpop.f32.mrf.mxu1 }
 0x514   :  { %v4929_v54 = vadd.f32 %v12297_v38, %v12241_v57 }
 0x515   :  { %v17240_v36 = vpop.f32.mrf.mxu0  ;;  %v17242_v29 = vpop.f32.mrf.mxu1 }
 0x519   :  { %v12250_v35 = vpop.f32.mrf.mxu0  ;;  %v12300_v34 = vpop.f32.mrf.mxu1 }
 0x51a   :  { %v4941_v51 = vadd.f32 %v12300_v34, %v12244_v60 }
 0x51b   :  { %v17244_v14 = vpop.f32.mrf.mxu0  ;;  %v17246_v23 = vpop.f32.mrf.mxu1 }
 0x51f   :  { %v12253_v40 = vpop.f32.mrf.mxu0  ;;  %v12303_v9 = vpop.f32.mrf.mxu1 }
 0x520   :  { %v17248_v52 = vadd.f32 %v12303_v9, %v12247_v15 }
 0x521   :  { %v17250_v32 = vpop.f32.mrf.mxu0  ;;  %v17252_v49 = vpop.f32.mrf.mxu1 }
 0x525   :  { %v12256_v57 = vpop.f32.mrf.mxu0  ;;  %v12306_v38 = vpop.f32.mrf.mxu1 }
 0x526   :  { %v17254_v5 = vadd.f32 %v12306_v38, %v12250_v35 }
 0x527   :  { %v17256_v46 = vpop.f32.mrf.mxu0  ;;  %v17258_v17 = vpop.f32.mrf.mxu1 }
 0x52b   :  { %v17260_v60 = vpop.f32.mrf.mxu0  ;;  %v12309_v34 = vpop.f32.mrf.mxu1 }
 0x52c   :  { %v17262_v53 = vadd.f32 %v12309_v34, %v12253_v40 }
 0x52d   :  { %v17264_v56 = vpop.f32.mrf.mxu0  ;;  %v17266_v15 = vpop.f32.mrf.mxu1 }
 0x531   :  { %v12312_v9 = vpop.f32.mrf.mxu1  ;;  %v12350_v2 = vpop.f32.mrf.mxu0 }
 0x532   :  { %v17268_v58 = vadd.f32 %v12312_v9, %v12256_v57  ;;  %v5112_v25 = vadd.f32 %v12350_v2, %v4917_v4 }
 0x533   :  { %v17270_v35 = vpop.f32.mrf.mxu1  ;;  %v17272_v38 = vpop.f32.mrf.mxu0 }
 0x534   :  { %20492 = vst [vmem:[#allocation36_spill] sm:$0xff] %v17272_v38 }
 0x537   :  { %v17274_v47 = vpop.f32.mrf.mxu1  ;;  %v12353_v27 = vpop.f32.mrf.mxu0 }
 0x538   :  { %v5126_v28 = vadd.f32 %v12353_v27, %v4929_v54 }
 0x539   :  { %v17276_v0 = vpop.f32.mrf.mxu1  ;;  %v17278_v40 = vpop.f32.mrf.mxu0 }
 0x53a   :  { %20493 = vst [vmem:[#allocation93_spill] sm:$0xff] %v17278_v40 }
 0x53d   :  { %v12356_v34 = vpop.f32.mrf.mxu0  ;;  %v12406_v48 = vpop.f32.mrf.mxu1 }
 0x53e   :  { %v5140_v7 = vadd.f32 %v12356_v34, %v4941_v51  ;;  %v5307_v43 = vadd.f32 %v12406_v48, %v5112_v25 }
 0x53f   :  { %v17280_v10 = vpop.f32.mrf.mxu0  ;;  %v17282_v57 = vpop.f32.mrf.mxu1 }
 0x540   :  { %20494 = vst [vmem:[#allocation33_spill] sm:$0xff] %v17282_v57 }
 0x543   :  { %v12359_v2 = vpop.f32.mrf.mxu0  ;;  %v12409_v4 = vpop.f32.mrf.mxu1 }
 0x544   :  { %v5323_v9 = vadd.f32 %v12409_v4, %v5126_v28 }
 0x545   :  { %v17284_v20 = vpop.f32.mrf.mxu0  ;;  %v17286_v62 = vpop.f32.mrf.mxu1 }
 0x546   :  { %20495 = vst [vmem:[#allocation34_spill] sm:$0xff] %v17286_v62 }
 0x549   :  { %v12362_v27 = vpop.f32.mrf.mxu0  ;;  %v12412_v54 = vpop.f32.mrf.mxu1 }
 0x54a   :  { %v5339_v19 = vadd.f32 %v12412_v54, %v5140_v7 }
 0x54b   :  { %v17288_v42 = vpop.f32.mrf.mxu0  ;;  %v17290_v18 = vpop.f32.mrf.mxu1 }
 0x54f   :  { %v12365_v51 = vpop.f32.mrf.mxu0  ;;  %v12415_v48 = vpop.f32.mrf.mxu1 }
 0x551   :  { %v17292_v25 = vpop.f32.mrf.mxu0  ;;  %v17294_v34 = vpop.f32.mrf.mxu1 }
 0x555   :  { %v12368_v31 = vpop.f32.mrf.mxu0  ;;  %v12418_v22 = vpop.f32.mrf.mxu1 }
 0x557   :  { %v5188_v28 = vpop.f32.mrf.mxu0  ;;  %v17296_v4 = vpop.f32.mrf.mxu1 }
 0x55b   :  { %v17298_v44 = vpop.f32.mrf.mxu0  ;;  %v12421_v37 = vpop.f32.mrf.mxu1 }
 0x55d   :  { %v17300_v26 = vpop.f32.mrf.mxu0  ;;  %v17302_v7 = vpop.f32.mrf.mxu1 }
 0x561   :  { %v12424_v54 = vpop.f32.mrf.mxu1  ;;  %v12462_v8 = vpop.f32.mrf.mxu0 }
 0x562   :  { %v5544_v41 = vadd.f32 %v12462_v8, %v5307_v43  ;;  %v5154_v8 = vadd.f32 %v12359_v2, %v17248_v52 }
 0x563   :  { %v17304_v21 = vpop.f32.mrf.mxu1  ;;  %v17306_v55 = vpop.f32.mrf.mxu0 }
 0x564   :  { %20496 = vst [vmem:[#allocation18_spill] sm:$0xff] %v17306_v55 }
 0x565   :  { %v12465_v50 = vpop.f32.mrf.mxu0 }
 0x566   :  { %v17308_v63 = vpop.f32.mrf.mxu1  ;;  %v5556_v16 = vadd.f32 %v12465_v50, %v5323_v9 }
 0x567   :  { %v17310_v12 = vpop.f32.mrf.mxu0 }
 0x568   :  { %20497 = vst [vmem:[#allocation80_spill] sm:$0xff] %v17310_v12  ;;  %v17312_v59 = vpop.f32.mrf.mxu1 }
 0x569   :  { %v12468_v1 = vpop.f32.mrf.mxu0 }
 0x56a   :  { %v12518_v24 = vpop.f32.mrf.mxu1  ;;  %v5568_v43 = vadd.f32 %v12468_v1, %v5339_v19 }
 0x56b   :  { %v5721_v33 = vadd.f32 %v12518_v24, %v5544_v41  ;;  %v17314_v61 = vpop.f32.mrf.mxu0 }
 0x56c   :  { %v17316_v13 = vpop.f32.mrf.mxu1 }
 0x56d   :  { %20498 = vst [vmem:[#allocation24_spill] sm:$0xff] %v17316_v13  ;;  %v17319_v11 = vadd.f32 %v5721_v33, %v20499_v3  ;;  %v12471_v55 = vpop.f32.mrf.mxu0  ;;  %v5355_v13 = vadd.f32 %v12415_v48, %v5154_v8  ;;  %v5168_v33 = vadd.f32 %v12362_v27, %v17254_v5 }
 0x56e   :  { %v12521_v57 = vpop.f32.mrf.mxu1 }
 0x56f   :  { %20500 = vst [vmem:[#allocation23_spill] sm:$0xff] %v17319_v11  ;;  %v5733_v38 = vadd.f32 %v12521_v57, %v5556_v16  ;;  %v17321_v62 = vpop.f32.mrf.mxu0  ;;  %v5580_v16 = vadd.f32 %v12471_v55, %v5355_v13  ;;  %v20503_v57 = vld [vmem:[#allocation42_spill] sm:$0xff]  ;;  %v5371_v52 = vadd.f32 %v12418_v22, %v5168_v33  ;;  %v4971_v13 = vadd.f32 %v17266_v15, %v17250_v32 }
 0x570   :  { %v17323_v12 = vpop.f32.mrf.mxu1  ;;  %v4983_v22 = vadd.f32 %v17270_v35, %v17256_v46  ;;  %v4959_v15 = vadd.f32 %v17258_v17, %v17244_v14  ;;  %v4995_v46 = vadd.f32 %v17276_v0, %v17264_v56 }
 0x571   :  { %20501 = vst [vmem:[#allocation17_spill] sm:$0xff] %v17323_v12  ;;  %v17327_v41 = vadd.f32 %v5733_v38, %v20502_v39  ;;  %v12474_v24 = vpop.f32.mrf.mxu0  ;;  %v5182_v38 = vadd.f32 %v12365_v51, %v17262_v53  ;;  %v20505_v53 = vld [vmem:[#allocation81_spill] sm:$0xff] }
 0x572   :  { %v12524_v45 = vpop.f32.mrf.mxu1  ;;  %v5592_v2 = vadd.f32 %v12474_v24, %v5371_v52  ;;  %v5001_v24 = vadd.f32 %v17274_v47, %v17260_v60 }
 0x573   :  { %v5745_v50 = vadd.f32 %v12524_v45, %v5568_v43  ;;  %v5585_v9 = vpop.f32.mrf.mxu0  ;;  %v20504_v45 = vld [vmem:[#allocation51_spill] sm:$0xff]  ;;  %v5387_v5 = vadd.f32 %v12421_v37, %v5182_v38  ;;  %v5175_v37 = vadd.f32 %v17292_v25, %v4971_v13 }
 0x574   :  { %v17329_v3 = vpop.f32.mrf.mxu1 }
 0x575   :  { %v17333_v11 = vadd.f32 %v5745_v50, %v20503_v57  ;;  %v12477_v12 = vpop.f32.mrf.mxu0  ;;  %v5189_v57 = vadd.f32 %v5188_v28, %v4983_v22  ;;  %v5379_v35 = vadd.f32 %v17302_v7, %v5175_v37  ;;  %v5161_v28 = vadd.f32 %v17288_v42, %v4959_v15  ;;  %v20507_v42 = vld [vmem:[#allocation116_spill] sm:$0xff]  ;;  %v20508_v22 = vld [vmem:[#allocation75_spill] sm:$0xff] }
 0x576   :  { %v12527_v40 = vpop.f32.mrf.mxu1  ;;  %v5604_v33 = vadd.f32 %v12477_v12, %v5387_v5 }
 0x577   :  { %v5757_v1 = vadd.f32 %v12527_v40, %v5580_v16  ;;  %v5597_v19 = vpop.f32.mrf.mxu0  ;;  %v5196_v40 = vadd.f32 %v12368_v31, %v17268_v58  ;;  %v5210_v31 = vadd.f32 %v17298_v44, %v5001_v24  ;;  %v5395_v47 = vadd.f32 %v17304_v21, %v5189_v57 }
 0x578   :  { %v17335_v39 = vpop.f32.mrf.mxu1  ;;  %v5598_v14 = vadd.f32 %v5597_v19, %v5379_v35  ;;  %v4947_v44 = vadd.f32 %v17252_v49, %v17240_v36  ;;  %v5363_v7 = vadd.f32 %v17296_v4, %v5161_v28 }
 0x579   :  { %v17339_v48 = vadd.f32 %v5757_v1, %v20504_v45  ;;  %v12480_v8 = vpop.f32.mrf.mxu0  ;;  %v5403_v52 = vadd.f32 %v12424_v54, %v5196_v40  ;;  %v20506_v1 = vld [vmem:[#allocation67_spill] sm:$0xff]  ;;  %v5203_v54 = vadd.f32 %v17300_v26, %v4995_v46  ;;  %v5419_v17 = vadd.f32 %v17308_v63, %v5210_v31  ;;  %v20512_v31 = vld [vmem:[#allocation92_spill] sm:$0xff] }
 0x57a   :  { %v12530_v43 = vpop.f32.mrf.mxu1  ;;  %v5586_v63 = vadd.f32 %v5585_v9, %v5363_v7  ;;  %v20516_v7 = vld [vmem:[#allocation88_spill] sm:$0xff] }
 0x57b   :  { %v5769_v55 = vadd.f32 %v12530_v43, %v5592_v2  ;;  %v5609_v27 = vpop.f32.mrf.mxu0  ;;  %v5616_v60 = vadd.f32 %v12480_v8, %v5403_v52  ;;  %v5411_v21 = vadd.f32 %v17312_v59, %v5203_v54  ;;  %v4935_v59 = vadd.f32 %v17246_v23, %v17236_v30  ;;  %v20511_v30 = vld [vmem:[#allocation25_spill] sm:$0xff] }
 0x57c   :  { %v5762_v50 = vpop.f32.mrf.mxu1  ;;  %v5610_v0 = vadd.f32 %v5609_v27, %v5395_v47  ;;  %v4923_v47 = vadd.f32 %v17242_v29, %v17234_v6 }
 0x57d   :  { %v17347_v51 = vadd.f32 %v5769_v55, %v20505_v53  ;;  %v12483_v12 = vpop.f32.mrf.mxu0  ;;  %v5147_v55 = vadd.f32 %v17284_v20, %v4947_v44  ;;  %v5763_v40 = vadd.f32 %v5762_v50, %v5586_v63  ;;  %v20509_v53 = vld [vmem:[#allocation118_spill] sm:$0xff]  ;;  %v20510_v20 = vld [vmem:[#allocation77_spill] sm:$0xff]  ;;  %v5133_v57 = vadd.f32 %v17280_v10, %v4935_v59  ;;  %v20518_v63 = vld [vmem:[#allocation36_spill] sm:$0xff] }
 0x57e   :  { %v12533_v16 = vpop.f32.mrf.mxu1  ;;  %v5628_v8 = vadd.f32 %v12483_v12, %v5419_v17 }
 0x57f   :  { %v5781_v32 = vadd.f32 %v12533_v16, %v5604_v33  ;;  %v5621_v2 = vpop.f32.mrf.mxu0  ;;  %v5347_v4 = vadd.f32 %v17294_v34, %v5147_v55  ;;  %v5331_v50 = vadd.f32 %v17290_v18, %v5133_v57  ;;  %v5816_v12 = vadd.f32 %v5763_v40, %v20512_v31 }
 0x580   :  { %v5774_v58 = vpop.f32.mrf.mxu1  ;;  %v5622_v13 = vadd.f32 %v5621_v2, %v5411_v21  ;;  %v20517_v2 = vld [vmem:[#allocation34_spill] sm:$0xff] }
 0x581   :  { %v5819_v25 = vadd.f32 %v5781_v32, %v20506_v1  ;;  %v5775_v43 = vadd.f32 %v5774_v58, %v5598_v14  ;;  %v5574_v52 = vadd.f32 %v17321_v62, %v5347_v4  ;;  %v5562_v18 = vadd.f32 %v17314_v61, %v5331_v50  ;;  %v20513_v61 = vld [vmem:[#allocation93_spill] sm:$0xff]  ;;  %v20523_v50 = vld [vmem:[#allocation18_spill] sm:$0xff] }
 0x582   :  { %v12536_v38 = vpop.f32.mrf.mxu1  ;;  %v5119_v29 = vadd.f32 %v20513_v61, %v4923_v47  ;;  %v17426_v14 = vand.u32 4294901760, %v5816_v12  ;;  %v20524_v61 = vld [vmem:[#allocation24_spill] sm:$0xff] }
 0x583   :  { %v5793_v56 = vadd.f32 %v12536_v38, %v5616_v60  ;;  %v5818_v24 = vadd.f32 %v5775_v43, %v20509_v53  ;;  %v17381_v32 = vand.u32 4294901760, %v5819_v25  ;;  %v5751_v46 = vadd.f32 %v17335_v39, %v5574_v52  ;;  %v20514_v38 = vld [vmem:[#allocation31_spill] sm:$0xff]  ;;  %v20521_v53 = vld [vmem:[#allocation33_spill] sm:$0xff] }
 0x584   :  { %v5786_v45 = vpop.f32.mrf.mxu1  ;;  %v17407_v39 = vand.u32 4294901760, %v17347_v51  ;;  %v5739_v54 = vadd.f32 %v17329_v3, %v5562_v18  ;;  %v20515_v3 = vld [vmem:[#allocation54_spill] sm:$0xff]  ;;  %v17467_v59 = vsub.f32 %v5816_v12, %v17426_v14 }
 0x585   :  { %v5821_v5 = vadd.f32 %v5793_v56, %v20507_v42  ;;  %v5787_v26 = vadd.f32 %v5786_v45, %v5610_v0  ;;  %v17392_v58 = vand.u32 4294901760, %v5818_v24  ;;  %v17411_v60 = vsub.f32 %v5819_v25, %v17381_v32 }
 0x586   :  { %v12539_v19 = vpop.f32.mrf.mxu1  ;;  %v5814_v17 = vadd.f32 %v5751_v46, %v20514_v38  ;;  %v4911_v21 = vadd.f32 %v20516_v7, %v20515_v3  ;;  %v5315_v45 = vadd.f32 %v20517_v2, %v5119_v29  ;;  %v17449_v43 = vsub.f32 %v17347_v51, %v17407_v39  ;;  %v20520_v51 = vld [vmem:[#allocation44_spill] sm:$0xff]  ;;  %v20525_v38 = vld [vmem:[#allocation62_spill] sm:$0xff] }
 0x587   :  { %v17369_v27 = vand.u32 4294901760, %v5821_v5  ;;  %v5820_v49 = vadd.f32 %v5787_v26, %v20508_v22  ;;  %v5805_v36 = vadd.f32 %v12539_v19, %v5628_v8  ;;  %v17430_v25 = vsub.f32 %v5818_v24, %v17392_v58 }
 0x588   :  { %v5798_v33 = vpop.f32.mrf.mxu1  ;;  %v17445_v8 = vand.u32 4294901760, %v17339_v48  ;;  %v17458_v55 = vand.u32 4294901760, %v17411_v60  ;;  %v5105_v19 = vadd.f32 %v20518_v63, %v4911_v21  ;;  %v17502_v18 = vand.u32 4294901760, %v17467_v59 }
 0x589   :  { %v17376_v16 = vand.u32 4294901760, %v5820_v49  ;;  %v5823_v9 = vadd.f32 %v5805_v36, %v20510_v20  ;;  %v5799_v37 = vadd.f32 %v5798_v33, %v5622_v13  ;;  %v17384_v15 = vsub.f32 %v5821_v5, %v17369_v27  ;;  %v20519_v13 = vld [vmem:[#allocation80_spill] sm:$0xff]  ;;  %v20522_v20 = vld [vmem:[#allocation17_spill] sm:$0xff] }
 0x58a   :  { %v5550_v22 = vadd.f32 %v20519_v13, %v5315_v45  ;;  %v17463_v36 = vand.u32 4294901760, %v5814_v17  ;;  %v17473_v33 = vand.u32 4294901760, %v17430_v25  ;;  %v5299_v24 = vadd.f32 %v20521_v53, %v5105_v19 }
 0x58b   :  { %v17386_v23 = vand.u32 4294901760, %v5823_v9  ;;  %v5822_v34 = vadd.f32 %v5799_v37, %v20511_v30  ;;  %v17395_v10 = vsub.f32 %v5820_v49, %v17376_v16  ;;  %v17421_v6 = vand.u32 4294901760, %v17384_v15 }
 0x58c   :  { %v5812_v49 = vadd.f32 %v5739_v54, %v20520_v51  ;;  %v17478_v37 = vand.u32 4294901760, %v17333_v11  ;;  %v17483_v57 = vsub.f32 %v17339_v48, %v17445_v8  ;;  %v6177_v30 = vsub.f32 %v17411_v60, %v17458_v55 }
 0x58d   :  { %v17398_v62 = vsub.f32 %v5823_v9, %v17386_v23  ;;  %v17400_v35 = vand.u32 4294901760, %v5822_v34  ;;  %12540 = vmatprep.subr.mxu0 %v17386_v23  ;;  %v17439_v44 = vand.u32 4294901760, %v17395_v10  ;;  %v6163_v26 = vsub.f32 %v17384_v15, %v17421_v6 }
 0x58e   :  { %12541 = vmatpush3.msra.mxu0 %v17386_v23  ;;  %v5727_v9 = vadd.f32 %v20522_v20, %v5550_v22  ;;  %v5538_v46 = vadd.f32 %v20523_v50, %v5299_v24  ;;  %v17492_v31 = vand.u32 4294901760, %v5812_v49  ;;  %v17496_v48 = vsub.f32 %v5814_v17, %v17463_v36 }
 0x58f   :  { %v17414_v1 = vsub.f32 %v5822_v34, %v17400_v35  ;;  %12542 = vmatprep.subr.mxu0 %v17400_v35  ;;  %v17418_v28 = vand.u32 4294901760, %v17398_v62  ;;  %v6170_v40 = vsub.f32 %v17395_v10, %v17439_v44  ;;  %v6164_v52 = vand.u32 4294901760, %v6163_v26 }
 0x590   :  { %12543 = vmatpush3.msra.mxu0 %v17400_v35  ;;  %v17489_v34 = vand.u32 4294901760, %v17449_v43  ;;  %v6184_v47 = vsub.f32 %v17430_v25, %v17473_v33  ;;  %v5715_v29 = vadd.f32 %v20524_v61, %v5538_v46  ;;  %v17506_v54 = vand.u32 4294901760, %v17327_v41 }
 0x591   :  { %12544 = vmatprep.subr.mxu0 %v17369_v27  ;;  %v6149_v0 = vsub.f32 %v17398_v62, %v17418_v28  ;;  %v17436_v56 = vand.u32 4294901760, %v17414_v1  ;;  %v6171_v12 = vand.u32 4294901760, %v6170_v40  ;;  %v17512_v17 = vsub.f32 %v17333_v11, %v17478_v37 }
 0x592   :  { %12545 = vmatpush3.msra.mxu0 %v17369_v27  ;;  %v6178_v3 = vand.u32 4294901760, %v6177_v30  ;;  %v6191_v7 = vsub.f32 %v17449_v43, %v17489_v34  ;;  %v17518_v21 = vand.u32 4294901760, %v17483_v57  ;;  %v17522_v2 = vsub.f32 %v5812_v49, %v17492_v31  ;;  %v20527_v49 = vld [vmem:[#allocation23_spill] sm:$0xff] }
 0x593   :  { %12546 = vmatprep.subr.mxu0 %v17376_v16  ;;  %v6150_v42 = vand.u32 4294901760, %v6149_v0  ;;  %v6156_v5 = vsub.f32 %v17414_v1, %v17436_v56  ;;  %v5810_v0 = vadd.f32 %v5727_v9, %v20525_v38  ;;  %v6185_v11 = vand.u32 4294901760, %v6184_v47 }
 0x594   :  { %12547 = vmatpush3.msra.mxu0 %v17376_v16  ;;  %v6198_v45 = vsub.f32 %v17467_v59, %v17502_v18  ;;  %v17536_v19 = vsub.f32 %v17327_v41, %v17506_v54  ;;  %v6192_v13 = vand.u32 4294901760, %v6191_v7  ;;  %v6205_v22 = vsub.f32 %v17483_v57, %v17518_v21 }
 0x595   :  { %12548 = vmatprep.subr.mxu0 %v17381_v32  ;;  %12596 = vmatprep.subr.mxu1 %v6150_v42  ;;  %v6157_v4 = vand.u32 4294901760, %v6156_v5  ;;  %v20526_v5 = vld [vmem:[#allocation22_spill] sm:$0xff]  ;;  %v17531_v63 = vand.u32 4294901760, %v5810_v0  ;;  %v17542_v51 = vand.u32 4294901760, %v17512_v17  ;;  %v17552_v53 = vand.u32 4294901760, %v17522_v2 }
 0x596   :  { %12549 = vmatpush3.msra.mxu0 %v17381_v32  ;;  %12597 = vmatpush3.msra.mxu1 %v6150_v42  ;;  %v17528_v42 = vand.u32 4294901760, %v17496_v48  ;;  %v5808_v26 = vadd.f32 %v5715_v29, %v20526_v5  ;;  %v6199_v41 = vand.u32 4294901760, %v6198_v45  ;;  %v6206_v9 = vand.u32 4294901760, %v6205_v22 }
 0x597   :  { %12550 = vmatprep.subr.mxu0 %v17392_v58  ;;  %12598 = vmatprep.subr.mxu1 %v6157_v4  ;;  %v17555_v24 = vsub.f32 %v5810_v0, %v17531_v63  ;;  %v17564_v30 = vand.u32 4294901760, %v17536_v19 }
 0x598   :  { %12551 = vmatpush3.msra.mxu0 %v17392_v58  ;;  %12599 = vmatpush3.msra.mxu1 %v6157_v4  ;;  %v17545_v4 = vand.u32 4294901760, %v20527_v49  ;;  %v6212_v40 = vsub.f32 %v17496_v48, %v17528_v42  ;;  %v17558_v20 = vand.u32 4294901760, %v5808_v26 }
 0x599   :  { %12552 = vmatprep.subr.mxu0 %v17407_v39  ;;  %12600 = vmatprep.subr.mxu1 %v6164_v52  ;;  %v17576_v47 = vand.u32 4294901760, %v17555_v24  ;;  %v6233_v38 = vsub.f32 %v17536_v19, %v17564_v30 }
 0x59a   :  { %12553 = vmatpush3.msra.mxu0 %v17407_v39  ;;  %12601 = vmatpush3.msra.mxu1 %v6164_v52  ;;  %v6219_v52 = vsub.f32 %v17512_v17, %v17542_v51  ;;  %v17568_v50 = vsub.f32 %v20527_v49, %v17545_v4  ;;  %v6213_v46 = vand.u32 4294901760, %v6212_v40  ;;  %v17579_v61 = vsub.f32 %v5808_v26, %v17558_v20  ;;  %v20528_v26 = vld [vmem:[#allocation86_spill] sm:$0xff]  ;;  %v20530_v40 = vld [vmem:[#allocation96_spill] sm:$0xff] }
 0x59b   :  { %12554 = vmatprep.subr.mxu0 %v17426_v14  ;;  %12602 = vmatprep.subr.mxu1 %v6171_v12  ;;  %v6240_v7 = vsub.f32 %v17555_v24, %v17576_v47 }
 0x59c   :  { %12555 = vmatpush3.msra.mxu0 %v17426_v14  ;;  %12603 = vmatpush3.msra.mxu1 %v6171_v12  ;;  %v6226_v12 = vsub.f32 %v17522_v2, %v17552_v53  ;;  %v6220_v29 = vand.u32 4294901760, %v6219_v52  ;;  %v17586_v0 = vand.u32 4294901760, %v17568_v50  ;;  %v17594_v45 = vand.u32 4294901760, %v17579_v61 }
 0x59d   :  { %12556 = vmatprep.subr.mxu0 %v17445_v8  ;;  %12604 = vmatprep.subr.mxu1 %v6178_v3  ;;  %v6241_v22 = vand.u32 4294901760, %v6240_v7  ;;  %v20545_v7 = vld [vmem:[#allocation94_spill] sm:$0xff] }
 0x59e   :  { %12557 = vmatpush3.msra.mxu0 %v17445_v8  ;;  %12605 = vmatpush3.msra.mxu1 %v6178_v3  ;;  %v6227_v3 = vand.u32 4294901760, %v6226_v12  ;;  %v6247_v5 = vsub.f32 %v17568_v50, %v17586_v0  ;;  %v6254_v49 = vsub.f32 %v17579_v61, %v17594_v45  ;;  %v20535_v12 = vld [vmem:[#allocation16_spill] sm:$0xff] }
 0x59f   :  { %12558 = vmatprep.subr.mxu0 %v17463_v36  ;;  %12606 = vmatprep.subr.mxu1 %v6185_v11 }
 0x5a0   :  { %12559 = vmatpush3.msra.mxu0 %v17463_v36  ;;  %12607 = vmatpush3.msra.mxu1 %v6185_v11  ;;  %v6234_v11 = vand.u32 4294901760, %v6233_v38  ;;  %v6255_v52 = vand.u32 4294901760, %v6254_v49  ;;  %v20541_v38 = vld [vmem:[#allocation114_spill] sm:$0xff]  ;;  %v20557_v49 = vld [vmem:[#allocation19_spill] sm:$0xff] }
 0x5a1   :  { %12560 = vmatprep.subr.mxu0 %v17478_v37  ;;  %12608 = vmatprep.subr.mxu1 %v6192_v13 }
 0x5a2   :  { %12561 = vmatpush3.msra.mxu0 %v17478_v37  ;;  %12609 = vmatpush3.msra.mxu1 %v6192_v13  ;;  %v20529_v13 = vld [vmem:[#allocation13_spill] sm:$0xff] }
 0x5a3   :  { %12562 = vmatprep.subr.mxu0 %v17492_v31  ;;  %12610 = vmatprep.subr.mxu1 %v6199_v41 }
 0x5a4   :  { %12563 = vmatpush3.msra.mxu0 %v17492_v31  ;;  %12611 = vmatpush3.msra.mxu1 %v6199_v41  ;;  %v6248_v41 = vand.u32 4294901760, %v6247_v5  ;;  %v20549_v5 = vld [vmem:[#allocation105_spill] sm:$0xff] }
 0x5a5   :  { %12564 = vmatprep.subr.mxu0 %v17506_v54  ;;  %12612 = vmatprep.subr.mxu1 %v6206_v9 }
 0x5a6   :  { %12565 = vmatpush3.msra.mxu0 %v17506_v54  ;;  %12613 = vmatpush3.msra.mxu1 %v6206_v9  ;;  %v20531_v9 = vld [vmem:[#allocation49_spill] sm:$0xff] }
 0x5a7   :  { %12566 = vmatprep.subr.mxu0 %v17531_v63  ;;  %12614 = vmatprep.subr.mxu1 %v6213_v46 }
 0x5a8   :  { %12567 = vmatpush3.msra.mxu0 %v17531_v63  ;;  %12615 = vmatpush3.msra.mxu1 %v6213_v46  ;;  %v20534_v46 = vld [vmem:[#allocation58_spill] sm:$0xff] }
 0x5a9   :  { %12568 = vmatprep.subr.mxu0 %v17545_v4  ;;  %12616 = vmatprep.subr.mxu1 %v6220_v29 }
 0x5aa   :  { %12569 = vmatpush3.msra.mxu0 %v17545_v4  ;;  %12617 = vmatpush3.msra.mxu1 %v6220_v29  ;;  %v20538_v29 = vld [vmem:[#allocation47_spill] sm:$0xff] }
 0x5ab   :  { %12570 = vmatprep.subr.mxu0 %v17558_v20  ;;  %12618 = vmatprep.subr.mxu1 %v6227_v3 }
 0x5ac   :  { %12571 = vmatpush3.msra.mxu0 %v17558_v20  ;;  %12619 = vmatpush3.msra.mxu1 %v6227_v3  ;;  %v20542_v3 = vld [vmem:[#allocation106_spill] sm:$0xff] }
 0x5ad   :  { %12573 = vmatmul.mubr.f32.vlgmr.msra.gmra.mxu0 %v20528_v26  ;;  %12620 = vmatprep.subr.mxu1 %v6234_v11  ;;  %v20550_v26 = vld [vmem:[#allocation125_spill] sm:$0xff] }
 0x5ae   :  { %12652 = vmatprep.subr.mxu0 %v17398_v62  ;;  %12575 = vmatprep.mubr.f32.mxu0 %v20529_v13  ;;  %v20553_v13 = vld [vmem:[#allocation71_spill] sm:$0xff] }
 0x5af   :  { %12621 = vmatpush3.msra.mxu1 %v6234_v11  ;;  %12653 = vmatpush3.msra.mxu0 %v17398_v62  ;;  %v20532_v62 = vld [vmem:[#allocation115_spill] sm:$0xff]  ;;  %v20546_v11 = vld [vmem:[#allocation122_spill] sm:$0xff] }
 0x5b0   :  { %12622 = vmatprep.subr.mxu1 %v6241_v22  ;;  %12654 = vmatprep.subr.mxu0 %v17414_v1 }
 0x5b1   :  { %12623 = vmatpush3.msra.mxu1 %v6241_v22  ;;  %12655 = vmatpush3.msra.mxu0 %v17414_v1  ;;  %v20533_v1 = vld [vmem:[#allocation74_spill] sm:$0xff]  ;;  %v20554_v22 = vld [vmem:[#allocation87_spill] sm:$0xff] }
 0x5b2   :  { %12576 = vmatmul.mubr.f32.gmra.mxu0 %v20530_v40  ;;  %12624 = vmatprep.subr.mxu1 %v6248_v41  ;;  %v20561_v40 = vld [vmem:[#allocation28_spill] sm:$0xff] }
 0x5b3   :  { %12656 = vmatprep.subr.mxu0 %v17384_v15  ;;  %12578 = vmatprep.mubr.f32.mxu0 %v20531_v9  ;;  %v20562_v9 = vld [vmem:[#allocation90_spill] sm:$0xff] }
 0x5b4   :  { %12625 = vmatpush3.msra.mxu1 %v6248_v41  ;;  %12657 = vmatpush3.msra.mxu0 %v17384_v15  ;;  %v20536_v15 = vld [vmem:[#allocation99_spill] sm:$0xff]  ;;  %v20559_v41 = vld [vmem:[#allocation78_spill] sm:$0xff] }
 0x5b5   :  { %12626 = vmatprep.subr.mxu1 %v6255_v52  ;;  %12658 = vmatprep.subr.mxu0 %v17395_v10 }
 0x5b6   :  { %12627 = vmatpush3.msra.mxu1 %v6255_v52  ;;  %12659 = vmatpush3.msra.mxu0 %v17395_v10  ;;  %v20537_v10 = vld [vmem:[#allocation100_spill] sm:$0xff]  ;;  %v20565_v52 = vld [vmem:[#allocation26_spill] sm:$0xff] }
 0x5b7   :  { %12579 = vmatmul.mubr.f32.gmra.mxu0 %v20532_v62  ;;  %12629 = vmatmul.mubr.f32.vlgmr.msra.gmra.mxu1 %v20533_v1  ;;  %v20566_v62 = vld [vmem:[#allocation66_spill] sm:$0xff] }
 0x5b8   :  { %12660 = vmatprep.subr.mxu0 %v17411_v60  ;;  %12708 = vmatprep.subr.mxu1 %v17386_v23 }
 0x5b9   :  { %12581 = vmatprep.mubr.f32.mxu0 %v20534_v46  ;;  %12631 = vmatprep.mubr.f32.mxu1 %v20535_v12  ;;  %v20567_v46 = vld [vmem:[#allocation40_spill] sm:$0xff] }
 0x5ba   :  { %12661 = vmatpush3.msra.mxu0 %v17411_v60  ;;  %12709 = vmatpush3.msra.mxu1 %v17386_v23  ;;  %v20539_v60 = vld [vmem:[#allocation61_spill] sm:$0xff] }
 0x5bb   :  { %12662 = vmatprep.subr.mxu0 %v17430_v25  ;;  %12710 = vmatprep.subr.mxu1 %v17400_v35 }
 0x5bc   :  { %12663 = vmatpush3.msra.mxu0 %v17430_v25  ;;  %12711 = vmatpush3.msra.mxu1 %v17400_v35  ;;  %v20540_v25 = vld [vmem:[#allocation27_spill] sm:$0xff] }
 0x5bd   :  { %12582 = vmatmul.mubr.f32.gmra.mxu0 %v20536_v15  ;;  %12632 = vmatmul.mubr.f32.gmra.mxu1 %v20537_v10  ;;  %v20570_v15 = vld [vmem:[#allocation117_spill] sm:$0xff] }
 0x5be   :  { %12664 = vmatprep.subr.mxu0 %v17449_v43  ;;  %12712 = vmatprep.subr.mxu1 %v17369_v27 }
 0x5bf   :  { %12584 = vmatprep.mubr.f32.mxu0 %v20538_v29  ;;  %12634 = vmatprep.mubr.f32.mxu1 %v20539_v60 }
 0x5c0   :  { %12665 = vmatpush3.msra.mxu0 %v17449_v43  ;;  %12713 = vmatpush3.msra.mxu1 %v17369_v27  ;;  %v20543_v43 = vld [vmem:[#allocation57_spill] sm:$0xff] }
 0x5c1   :  { %12666 = vmatprep.subr.mxu0 %v17467_v59  ;;  %12714 = vmatprep.subr.mxu1 %v17376_v16 }
 0x5c2   :  { %12667 = vmatpush3.msra.mxu0 %v17467_v59  ;;  %12715 = vmatpush3.msra.mxu1 %v17376_v16  ;;  %v20544_v59 = vld [vmem:[#allocation39_spill] sm:$0xff] }
 0x5c3   :  { %12585 = vmatmul.mubr.f32.gmra.mxu0 %v20540_v25  ;;  %12635 = vmatmul.mubr.f32.gmra.mxu1 %v20541_v38 }
 0x5c4   :  { %12668 = vmatprep.subr.mxu0 %v17483_v57  ;;  %12716 = vmatprep.subr.mxu1 %v17381_v32 }
 0x5c5   :  { %12587 = vmatprep.mubr.f32.mxu0 %v20542_v3  ;;  %12637 = vmatprep.mubr.f32.mxu1 %v20543_v43 }
 0x5c6   :  { %12669 = vmatpush3.msra.mxu0 %v17483_v57  ;;  %12717 = vmatpush3.msra.mxu1 %v17381_v32  ;;  %v20547_v57 = vld [vmem:[#allocation103_spill] sm:$0xff] }
 0x5c7   :  { %12670 = vmatprep.subr.mxu0 %v17496_v48  ;;  %12718 = vmatprep.subr.mxu1 %v17392_v58 }
 0x5c8   :  { %12671 = vmatpush3.msra.mxu0 %v17496_v48  ;;  %12719 = vmatpush3.msra.mxu1 %v17392_v58  ;;  %v20548_v48 = vld [vmem:[#allocation124_spill] sm:$0xff] }
 0x5c9   :  { %12588 = vmatmul.mubr.f32.gmra.mxu0 %v20544_v59  ;;  %12638 = vmatmul.mubr.f32.gmra.mxu1 %v20545_v7 }
 0x5ca   :  { %12672 = vmatprep.subr.mxu0 %v17512_v17  ;;  %12720 = vmatprep.subr.mxu1 %v17407_v39 }
 0x5cb   :  { %12590 = vmatprep.mubr.f32.mxu0 %v20546_v11  ;;  %12640 = vmatprep.mubr.f32.mxu1 %v20547_v57 }
 0x5cc   :  { %12673 = vmatpush3.msra.mxu0 %v17512_v17  ;;  %12721 = vmatpush3.msra.mxu1 %v17407_v39  ;;  %v20551_v17 = vld [vmem:[#allocation56_spill] sm:$0xff] }
 0x5cd   :  { %12674 = vmatprep.subr.mxu0 %v17522_v2  ;;  %12722 = vmatprep.subr.mxu1 %v17426_v14 }
 0x5ce   :  { %12675 = vmatpush3.msra.mxu0 %v17522_v2  ;;  %12723 = vmatpush3.msra.mxu1 %v17426_v14  ;;  %v20552_v2 = vld [vmem:[#allocation126_spill] sm:$0xff] }
 0x5cf   :  { %12591 = vmatmul.mubr.f32.gmra.mxu0 %v20548_v48  ;;  %12641 = vmatmul.mubr.f32.gmra.mxu1 %v20549_v5 }
 0x5d0   :  { %12676 = vmatprep.subr.mxu0 %v17536_v19  ;;  %12724 = vmatprep.subr.mxu1 %v17445_v8 }
 0x5d1   :  { %12593 = vmatprep.mubr.f32.mxu0 %v20550_v26  ;;  %12643 = vmatprep.mubr.f32.mxu1 %v20551_v17 }
 0x5d2   :  { %12677 = vmatpush3.msra.mxu0 %v17536_v19  ;;  %12725 = vmatpush3.msra.mxu1 %v17445_v8  ;;  %v20555_v19 = vld [vmem:[#allocation98_spill] sm:$0xff] }
 0x5d3   :  { %12678 = vmatprep.subr.mxu0 %v17555_v24  ;;  %12726 = vmatprep.subr.mxu1 %v17463_v36 }
 0x5d4   :  { %12679 = vmatpush3.msra.mxu0 %v17555_v24  ;;  %12727 = vmatpush3.msra.mxu1 %v17463_v36  ;;  %v20556_v24 = vld [vmem:[#allocation30_spill] sm:$0xff] }
 0x5d5   :  { %12594 = vmatmul.mubr.f32.gmra.mxu0 %v20552_v2  ;;  %12644 = vmatmul.mubr.f32.gmra.mxu1 %v20553_v13 }
 0x5d6   :  { %12680 = vmatprep.subr.mxu0 %v17568_v50  ;;  %12728 = vmatprep.subr.mxu1 %v17478_v37 }
 0x5d7   :  { %12646 = vmatprep.mubr.f32.mxu1 %v20554_v22  ;;  %12681 = vmatpush3.msra.mxu0 %v17568_v50  ;;  %v20558_v50 = vld [vmem:[#allocation82_spill] sm:$0xff] }
 0x5d8   :  { %12684 = vmatprep.mubr.f32.mxu0 %v20555_v19  ;;  %12729 = vmatpush3.msra.mxu1 %v17478_v37 }
 0x5d9   :  { %12682 = vmatprep.subr.mxu0 %v17579_v61  ;;  %12730 = vmatprep.subr.mxu1 %v17492_v31 }
 0x5da   :  { %12683 = vmatpush3.msra.mxu0 %v17579_v61  ;;  %12731 = vmatpush3.msra.mxu1 %v17492_v31  ;;  %v20560_v61 = vld [vmem:[#allocation83_spill] sm:$0xff] }
 0x5db   :  { %12647 = vmatmul.mubr.f32.gmra.mxu1 %v20556_v24  ;;  %12685 = vmatmul.mubr.f32.vlgmr.msra.gmra.mxu0 %v20557_v49 }
 0x5dc   :  { %12732 = vmatprep.subr.mxu1 %v17506_v54  ;;  %12764 = vmatprep.subr.mxu0 %v17418_v28 }
 0x5dd   :  { %12649 = vmatprep.mubr.f32.mxu1 %v20558_v50  ;;  %12687 = vmatprep.mubr.f32.mxu0 %v20559_v41 }
 0x5de   :  { %12733 = vmatpush3.msra.mxu1 %v17506_v54  ;;  %12765 = vmatpush3.msra.mxu0 %v17418_v28  ;;  %v20563_v28 = vld [vmem:[#allocation29_spill] sm:$0xff] }
 0x5df   :  { %12734 = vmatprep.subr.mxu1 %v17531_v63  ;;  %12766 = vmatprep.subr.mxu0 %v17436_v56 }
 0x5e0   :  { %12735 = vmatpush3.msra.mxu1 %v17531_v63  ;;  %12767 = vmatpush3.msra.mxu0 %v17436_v56  ;;  %v20564_v56 = vld [vmem:[#allocation85_spill] sm:$0xff] }
 0x5e1   :  { %12650 = vmatmul.mubr.f32.gmra.mxu1 %v20560_v61  ;;  %12688 = vmatmul.mubr.f32.gmra.mxu0 %v20561_v40 }
 0x5e2   :  { %12736 = vmatprep.subr.mxu1 %v17545_v4  ;;  %12768 = vmatprep.subr.mxu0 %v17421_v6 }
 0x5e3   :  { %12690 = vmatprep.mubr.f32.mxu0 %v20562_v9  ;;  %12737 = vmatpush3.msra.mxu1 %v17545_v4 }
 0x5e4   :  { %12740 = vmatprep.mubr.f32.mxu1 %v20563_v28  ;;  %12769 = vmatpush3.msra.mxu0 %v17421_v6  ;;  %v20568_v6 = vld [vmem:[#allocation112_spill] sm:$0xff] }
 0x5e5   :  { %12738 = vmatprep.subr.mxu1 %v17558_v20  ;;  %12770 = vmatprep.subr.mxu0 %v17439_v44 }
 0x5e6   :  { %12739 = vmatpush3.msra.mxu1 %v17558_v20  ;;  %12771 = vmatpush3.msra.mxu0 %v17439_v44  ;;  %v20569_v44 = vld [vmem:[#allocation84_spill] sm:$0xff] }
 0x5e7   :  { %12691 = vmatmul.mubr.f32.gmra.mxu0 %v20564_v56  ;;  %12741 = vmatmul.mubr.f32.vlgmr.msra.gmra.mxu1 %v20565_v52 }
 0x5e8   :  { %12772 = vmatprep.subr.mxu0 %v17458_v55  ;;  %12820 = vmatprep.subr.mxu1 %v17386_v23 }
 0x5e9   :  { %12693 = vmatprep.mubr.f32.mxu0 %v20566_v62  ;;  %12743 = vmatprep.mubr.f32.mxu1 %v20567_v46 }
 0x5ea   :  { %12773 = vmatpush3.msra.mxu0 %v17458_v55  ;;  %12821 = vmatpush3.msra.mxu1 %v17386_v23  ;;  %v20571_v55 = vld [vmem:[#allocation102_spill] sm:$0xff]  ;;  %v20572_v23 = vld [vmem:[#allocation35_spill] sm:$0xff] }
 0x5eb   :  { %12774 = vmatprep.subr.mxu0 %v17473_v33  ;;  %12822 = vmatprep.subr.mxu1 %v17400_v35 }
 0x5ec   :  { %12775 = vmatpush3.msra.mxu0 %v17473_v33  ;;  %12823 = vmatpush3.msra.mxu1 %v17400_v35  ;;  %v20573_v35 = vld [vmem:[#allocation50_spill] sm:$0xff]  ;;  %v20574_v33 = vld [vmem:[#allocation37_spill] sm:$0xff] }
 0x5ed   :  { %12694 = vmatmul.mubr.f32.gmra.mxu0 %v20568_v6  ;;  %12744 = vmatmul.mubr.f32.gmra.mxu1 %v20569_v44 }
 0x5ee   :  { %12776 = vmatprep.subr.mxu0 %v17489_v34  ;;  %12824 = vmatprep.subr.mxu1 %v17369_v27 }
 0x5ef   :  { %12696 = vmatprep.mubr.f32.mxu0 %v20570_v15  ;;  %12746 = vmatprep.mubr.f32.mxu1 %v20571_v55 }
 0x5f0   :  { %12777 = vmatpush3.msra.mxu0 %v17489_v34  ;;  %12825 = vmatpush3.msra.mxu1 %v17369_v27  ;;  %v20575_v34 = vld [vmem:[#allocation104_spill] sm:$0xff]  ;;  %v20576_v27 = vld [vmem:[#allocation73_spill] sm:$0xff] }
 0x5f1   :  { %12778 = vmatprep.subr.mxu0 %v17502_v18  ;;  %12826 = vmatprep.subr.mxu1 %v17376_v16 }
 0x5f2   :  { %12779 = vmatpush3.msra.mxu0 %v17502_v18  ;;  %12827 = vmatpush3.msra.mxu1 %v17376_v16  ;;  %v20577_v16 = vld [vmem:[#allocation89_spill] sm:$0xff] }
 0x5f3   :  { %12697 = vmatmul.mubr.f32.gmra.mxu0 %v20572_v23  ;;  %12747 = vmatmul.mubr.f32.gmra.mxu1 %v20573_v35  ;;  %v20578_v18 = vld [vmem:[#allocation45_spill] sm:$0xff] }
 0x5f4   :  { %12780 = vmatprep.subr.mxu0 %v17518_v21  ;;  %12828 = vmatprep.subr.mxu1 %v17381_v32 }
 0x5f5   :  { %12699 = vmatprep.mubr.f32.mxu0 %v20574_v33  ;;  %12749 = vmatprep.mubr.f32.mxu1 %v20575_v34 }
 0x5f6   :  { %12781 = vmatpush3.msra.mxu0 %v17518_v21  ;;  %12829 = vmatpush3.msra.mxu1 %v17381_v32  ;;  %v20579_v21 = vld [vmem:[#allocation111_spill] sm:$0xff]  ;;  %v20580_v32 = vld [vmem:[#allocation41_spill] sm:$0xff] }
 0x5f7   :  { %12782 = vmatprep.subr.mxu0 %v17528_v42  ;;  %12830 = vmatprep.subr.mxu1 %v17392_v58 }
 0x5f8   :  { %12783 = vmatpush3.msra.mxu0 %v17528_v42  ;;  %12831 = vmatpush3.msra.mxu1 %v17392_v58  ;;  %v20581_v58 = vld [vmem:[#allocation120_spill] sm:$0xff] }
 0x5f9   :  { %12700 = vmatmul.mubr.f32.gmra.mxu0 %v20576_v27  ;;  %12750 = vmatmul.mubr.f32.gmra.mxu1 %v20577_v16  ;;  %v20582_v42 = vld [vmem:[#allocation108_spill] sm:$0xff] }
 0x5fa   :  { %12784 = vmatprep.subr.mxu0 %v17542_v51  ;;  %12832 = vmatprep.subr.mxu1 %v17407_v39 }
 0x5fb   :  { %12702 = vmatprep.mubr.f32.mxu0 %v20578_v18  ;;  %12752 = vmatprep.mubr.f32.mxu1 %v20579_v21 }
 0x5fc   :  { %12785 = vmatpush3.msra.mxu0 %v17542_v51  ;;  %12833 = vmatpush3.msra.mxu1 %v17407_v39  ;;  %v20583_v51 = vld [vmem:[#allocation95_spill] sm:$0xff]  ;;  %v20584_v39 = vld [vmem:[#allocation52_spill] sm:$0xff] }
 0x5fd   :  { %12786 = vmatprep.subr.mxu0 %v17552_v53  ;;  %12834 = vmatprep.subr.mxu1 %v17426_v14 }
 0x5fe   :  { %12787 = vmatpush3.msra.mxu0 %v17552_v53  ;;  %12835 = vmatpush3.msra.mxu1 %v17426_v14  ;;  %v20585_v14 = vld [vmem:[#allocation119_spill] sm:$0xff] }
 0x5ff   :  { %12703 = vmatmul.mubr.f32.gmra.mxu0 %v20580_v32  ;;  %12753 = vmatmul.mubr.f32.gmra.mxu1 %v20581_v58  ;;  %v20586_v53 = vld [vmem:[#allocation15_spill] sm:$0xff] }
 0x600   :  { %12788 = vmatprep.subr.mxu0 %v17564_v30  ;;  %12836 = vmatprep.subr.mxu1 %v17445_v8 }
 0x601   :  { %12705 = vmatprep.mubr.f32.mxu0 %v20582_v42  ;;  %12755 = vmatprep.mubr.f32.mxu1 %v20583_v51 }
 0x602   :  { %12789 = vmatpush3.msra.mxu0 %v17564_v30  ;;  %12837 = vmatpush3.msra.mxu1 %v17445_v8  ;;  %v20587_v8 = vld [vmem:[#allocation97_spill] sm:$0xff] }
 0x603   :  { %12790 = vmatprep.subr.mxu0 %v17576_v47  ;;  %12838 = vmatprep.subr.mxu1 %v17463_v36  ;;  %v20589_v30 = vld [vmem:[#allocation121_spill] sm:$0xff] }
 0x604   :  { %12791 = vmatpush3.msra.mxu0 %v17576_v47  ;;  %12839 = vmatpush3.msra.mxu1 %v17463_v36  ;;  %v20588_v36 = vld [vmem:[#allocation76_spill] sm:$0xff] }
 0x605   :  { %12706 = vmatmul.mubr.f32.gmra.mxu0 %v20584_v39  ;;  %12756 = vmatmul.mubr.f32.gmra.mxu1 %v20585_v14 }
 0x606   :  { %12792 = vmatprep.subr.mxu0 %v17586_v0  ;;  %12840 = vmatprep.subr.mxu1 %v17478_v37 }
 0x607   :  { %12758 = vmatprep.mubr.f32.mxu1 %v20586_v53  ;;  %12793 = vmatpush3.msra.mxu0 %v17586_v0 }
 0x608   :  { %12796 = vmatprep.mubr.f32.mxu0 %v20587_v8  ;;  %12841 = vmatpush3.msra.mxu1 %v17478_v37  ;;  %v20590_v37 = vld [vmem:[#allocation123_spill] sm:$0xff] }
 0x609   :  { %12794 = vmatprep.subr.mxu0 %v17594_v45  ;;  %12842 = vmatprep.subr.mxu1 %v17492_v31 }
 0x60a   :  { %12795 = vmatpush3.msra.mxu0 %v17594_v45  ;;  %12843 = vmatpush3.msra.mxu1 %v17492_v31 }
 0x60b   :  { %12759 = vmatmul.mubr.f32.gmra.mxu1 %v20588_v36  ;;  %12797 = vmatmul.mubr.f32.vlgmr.msra.gmra.mxu0 %v20533_v1 }
 0x60c   :  { %12844 = vmatprep.subr.mxu1 %v17506_v54  ;;  %12761 = vmatprep.mubr.f32.mxu1 %v20589_v30 }
 0x60d   :  { %12799 = vmatprep.mubr.f32.mxu0 %v20535_v12  ;;  %12845 = vmatpush3.msra.mxu1 %v17506_v54 }
 0x60e   :  { %12846 = vmatprep.subr.mxu1 %v17531_v63 }
 0x60f   :  { %12847 = vmatpush3.msra.mxu1 %v17531_v63  ;;  %12800 = vmatmul.mubr.f32.gmra.mxu0 %v20537_v10 }
 0x610   :  { %12762 = vmatmul.mubr.f32.gmra.mxu1 %v20590_v37  ;;  %12848 = vmatprep.subr.mxu1 %v17545_v4 }
 0x611   :  { %12802 = vmatprep.mubr.f32.mxu0 %v20539_v60  ;;  %12849 = vmatpush3.msra.mxu1 %v17545_v4 }
 0x612   :  { %12852 = vmatprep.mubr.f32.mxu1 %v20587_v8  ;;  %12850 = vmatprep.subr.mxu1 %v17558_v20 }
 0x613   :  { %12851 = vmatpush3.msra.mxu1 %v17558_v20  ;;  %12803 = vmatmul.mubr.f32.gmra.mxu0 %v20541_v38 }
 0x614   :  { %12853 = vmatmul.mubr.f32.vlgmr.msra.gmra.mxu1 %v20533_v1  ;;  %12805 = vmatprep.mubr.f32.mxu0 %v20543_v43 }
 0x615   :  { %12855 = vmatprep.mubr.f32.mxu1 %v20535_v12 }
 0x617   :  { %12806 = vmatmul.mubr.f32.gmra.mxu0 %v20545_v7 }
 0x618   :  { %12856 = vmatmul.mubr.f32.gmra.mxu1 %v20537_v10  ;;  %12808 = vmatprep.mubr.f32.mxu0 %v20547_v57 }
 0x619   :  { %12858 = vmatprep.mubr.f32.mxu1 %v20539_v60 }
 0x61b   :  { %12809 = vmatmul.mubr.f32.gmra.mxu0 %v20549_v5 }
 0x61c   :  { %12859 = vmatmul.mubr.f32.gmra.mxu1 %v20541_v38  ;;  %12811 = vmatprep.mubr.f32.mxu0 %v20551_v17 }
 0x61d   :  { %12861 = vmatprep.mubr.f32.mxu1 %v20543_v43 }
 0x61f   :  { %12812 = vmatmul.mubr.f32.gmra.mxu0 %v20553_v13 }
 0x620   :  { %12862 = vmatmul.mubr.f32.gmra.mxu1 %v20545_v7  ;;  %12814 = vmatprep.mubr.f32.mxu0 %v20554_v22 }
 0x621   :  { %12864 = vmatprep.mubr.f32.mxu1 %v20547_v57 }
 0x623   :  { %12815 = vmatmul.mubr.f32.gmra.mxu0 %v20556_v24 }
 0x624   :  { %12865 = vmatmul.mubr.f32.gmra.mxu1 %v20549_v5  ;;  %12817 = vmatprep.mubr.f32.mxu0 %v20558_v50 }
 0x625   :  { %12867 = vmatprep.mubr.f32.mxu1 %v20551_v17 }
 0x627   :  { %12818 = vmatmul.mubr.f32.gmra.mxu0 %v20560_v61 }
 0x628   :  { %12868 = vmatmul.mubr.f32.gmra.mxu1 %v20553_v13 }
 0x629   :  { %12870 = vmatprep.mubr.f32.mxu1 %v20554_v22 }
 0x62c   :  { %12871 = vmatmul.mubr.f32.gmra.mxu1 %v20556_v24 }
 0x62d   :  { %12873 = vmatprep.mubr.f32.mxu1 %v20558_v50 }
 0x630   :  { %12874 = vmatmul.mubr.f32.gmra.mxu1 %v20560_v61 }
 0x66d   :  { %v12574_v31 = vpop.f32.mrf.mxu0 }
 0x66f   :  { %v17823_v54 = vpop.f32.mrf.mxu0 }
 0x672   :  { %v12577_v63 = vpop.f32.mrf.mxu0 }
 0x674   :  { %v17825_v4 = vpop.f32.mrf.mxu0 }
 0x675   :  { %20591 = vst [vmem:[#allocation55_spill] sm:$0xff] %v17825_v4 }
 0x677   :  { %v12580_v20 = vpop.f32.mrf.mxu0  ;;  %v12630_v47 = vpop.f32.mrf.mxu1 }
 0x678   :  { %v6299_v0 = vadd.f32 %v12630_v47, %v12574_v31 }
 0x679   :  { %v17827_v45 = vpop.f32.mrf.mxu0  ;;  %v17829_v1 = vpop.f32.mrf.mxu1 }
 0x67d   :  { %v12583_v12 = vpop.f32.mrf.mxu0  ;;  %v12633_v10 = vpop.f32.mrf.mxu1 }
 0x67e   :  { %v6311_v29 = vadd.f32 %v12633_v10, %v12577_v63 }
 0x67f   :  { %v17831_v60 = vpop.f32.mrf.mxu0  ;;  %v17833_v25 = vpop.f32.mrf.mxu1 }
 0x680   :  { %20592 = vst [vmem:[#allocation21_spill] sm:$0xff] %v17833_v25 }
 0x683   :  { %v12586_v38 = vpop.f32.mrf.mxu0  ;;  %v12636_v3 = vpop.f32.mrf.mxu1 }
 0x684   :  { %v6323_v43 = vadd.f32 %v12636_v3, %v12580_v20 }
 0x685   :  { %v17835_v59 = vpop.f32.mrf.mxu0  ;;  %v17837_v7 = vpop.f32.mrf.mxu1 }
 0x689   :  { %v12589_v11 = vpop.f32.mrf.mxu0  ;;  %v12639_v57 = vpop.f32.mrf.mxu1 }
 0x68a   :  { %v17839_v48 = vadd.f32 %v12639_v57, %v12583_v12 }
 0x68b   :  { %v17841_v5 = vpop.f32.mrf.mxu0  ;;  %v17843_v26 = vpop.f32.mrf.mxu1 }
 0x68f   :  { %v12592_v17 = vpop.f32.mrf.mxu0  ;;  %v12642_v2 = vpop.f32.mrf.mxu1 }
 0x690   :  { %v17845_v13 = vadd.f32 %v12642_v2, %v12586_v38 }
 0x691   :  { %v17847_v22 = vpop.f32.mrf.mxu0  ;;  %v17849_v19 = vpop.f32.mrf.mxu1 }
 0x695   :  { %v17851_v24 = vpop.f32.mrf.mxu0  ;;  %v12645_v49 = vpop.f32.mrf.mxu1 }
 0x696   :  { %v17853_v50 = vadd.f32 %v12645_v49, %v12589_v11 }
 0x697   :  { %v17855_v41 = vpop.f32.mrf.mxu0  ;;  %v17857_v61 = vpop.f32.mrf.mxu1 }
 0x69b   :  { %v12648_v40 = vpop.f32.mrf.mxu1  ;;  %v12686_v9 = vpop.f32.mrf.mxu0 }
 0x69c   :  { %v17859_v28 = vadd.f32 %v12648_v40, %v12592_v17  ;;  %v6494_v56 = vadd.f32 %v12686_v9, %v6299_v0  ;;  %v6293_v17 = vadd.f32 %v17829_v1, %v17823_v54 }
 0x69d   :  { %v17861_v52 = vpop.f32.mrf.mxu1  ;;  %v6486_v62 = vpop.f32.mrf.mxu0 }
 0x69e   :  { %v6487_v40 = vadd.f32 %v6486_v62, %v6293_v17  ;;  %v20599_v17 = vld [vmem:[#allocation70_spill] sm:$0xff] }
 0x6a1   :  { %v17863_v46 = vpop.f32.mrf.mxu1  ;;  %v12689_v6 = vpop.f32.mrf.mxu0 }
 0x6a2   :  { %v6508_v44 = vadd.f32 %v12689_v6, %v6311_v29 }
 0x6a3   :  { %v17865_v15 = vpop.f32.mrf.mxu1  ;;  %v17867_v55 = vpop.f32.mrf.mxu0 }
 0x6a4   :  { %20593 = vst [vmem:[#allocation11_spill] sm:$0xff] %v17867_v55 }
 0x6a7   :  { %v12692_v23 = vpop.f32.mrf.mxu0  ;;  %v12742_v35 = vpop.f32.mrf.mxu1 }
 0x6a8   :  { %v6522_v33 = vadd.f32 %v12692_v23, %v6323_v43  ;;  %v6689_v34 = vadd.f32 %v12742_v35, %v6494_v56 }
 0x6a9   :  { %v17869_v27 = vpop.f32.mrf.mxu0  ;;  %v6680_v16 = vpop.f32.mrf.mxu1 }
 0x6aa   :  { %20594 = vst [vmem:[#allocation48_spill] sm:$0xff] %v17869_v27  ;;  %v6681_v6 = vadd.f32 %v6680_v16, %v6487_v40 }
 0x6ad   :  { %v12695_v18 = vpop.f32.mrf.mxu0  ;;  %v12745_v21 = vpop.f32.mrf.mxu1 }
 0x6ae   :  { %v6705_v32 = vadd.f32 %v12745_v21, %v6508_v44  ;;  %v6536_v16 = vadd.f32 %v12695_v18, %v17839_v48 }
 0x6af   :  { %v17871_v58 = vpop.f32.mrf.mxu0  ;;  %v17873_v42 = vpop.f32.mrf.mxu1 }
 0x6b0   :  { %20595 = vst [vmem:[#allocation14_spill] sm:$0xff] %v17873_v42 }
 0x6b3   :  { %v12698_v51 = vpop.f32.mrf.mxu0  ;;  %v12748_v39 = vpop.f32.mrf.mxu1 }
 0x6b4   :  { %v6721_v14 = vadd.f32 %v12748_v39, %v6522_v33  ;;  %v6550_v48 = vadd.f32 %v12698_v51, %v17845_v13 }
 0x6b5   :  { %v17875_v53 = vpop.f32.mrf.mxu0  ;;  %v17877_v8 = vpop.f32.mrf.mxu1 }
 0x6b6   :  { %20596 = vst [vmem:[#allocation53_spill] sm:$0xff] %v17877_v8  ;;  %v20598_v8 = vld [vmem:[#allocation12_spill] sm:$0xff] }
 0x6b9   :  { %v12701_v36 = vpop.f32.mrf.mxu0  ;;  %v12751_v30 = vpop.f32.mrf.mxu1 }
 0x6bb   :  { %v17879_v37 = vpop.f32.mrf.mxu0  ;;  %v17881_v31 = vpop.f32.mrf.mxu1 }
 0x6bf   :  { %v17883_v63 = vpop.f32.mrf.mxu0  ;;  %v12754_v20 = vpop.f32.mrf.mxu1 }
 0x6c1   :  { %v17885_v47 = vpop.f32.mrf.mxu0  ;;  %v17887_v0 = vpop.f32.mrf.mxu1 }
 0x6c5   :  { %v17889_v12 = vpop.f32.mrf.mxu0  ;;  %v12757_v10 = vpop.f32.mrf.mxu1 }
 0x6c7   :  { %v17891_v29 = vpop.f32.mrf.mxu0  ;;  %v17893_v38 = vpop.f32.mrf.mxu1 }
 0x6cb   :  { %v17895_v3 = vpop.f32.mrf.mxu1  ;;  %v12798_v43 = vpop.f32.mrf.mxu0 }
 0x6cc   :  { %v6926_v44 = vadd.f32 %v12798_v43, %v6689_v34 }
 0x6cd   :  { %v17897_v11 = vpop.f32.mrf.mxu1  ;;  %v6919_v57 = vpop.f32.mrf.mxu0 }
 0x6ce   :  { %v6920_v33 = vadd.f32 %v6919_v57, %v6681_v6  ;;  %v20600_v57 = vld [vmem:[#allocation110_spill] sm:$0xff] }
 0x6cf   :  { %v12801_v2 = vpop.f32.mrf.mxu0 }
 0x6d0   :  { %v17901_v49 = vpop.f32.mrf.mxu1  ;;  %v6938_v55 = vadd.f32 %v12801_v2, %v6705_v32 }
 0x6d1   :  { %v17903_v9 = vpop.f32.mrf.mxu0 }
 0x6d2   :  { %20597 = vst [vmem:[#allocation113_spill] sm:$0xff] %v17903_v9  ;;  %v17905_v56 = vpop.f32.mrf.mxu1 }
 0x6d3   :  { %v12804_v23 = vpop.f32.mrf.mxu0 }
 0x6d4   :  { %v12854_v35 = vpop.f32.mrf.mxu1 }
 0x6d5   :  { %v7103_v21 = vadd.f32 %v12854_v35, %v6926_v44  ;;  %v17907_v39 = vpop.f32.mrf.mxu0 }
 0x6d6   :  { %v7096_v42 = vpop.f32.mrf.mxu1 }
 0x6d7   :  { %v17910_v54 = vadd.f32 %v7103_v21, %v20598_v8  ;;  %v7097_v1 = vadd.f32 %v7096_v42, %v6920_v33  ;;  %v12807_v25 = vpop.f32.mrf.mxu0  ;;  %v6950_v8 = vadd.f32 %v12804_v23, %v6721_v14  ;;  %v6737_v42 = vadd.f32 %v12751_v30, %v6536_v16  ;;  %v20601_v21 = vld [vmem:[#allocation43_spill] sm:$0xff] }
 0x6d8   :  { %v12857_v62 = vpop.f32.mrf.mxu1  ;;  %v6753_v30 = vadd.f32 %v12754_v20, %v6550_v48  ;;  %v6564_v16 = vadd.f32 %v12701_v36, %v17853_v50  ;;  %v6353_v20 = vadd.f32 %v17857_v61, %v17841_v5  ;;  %v6365_v50 = vadd.f32 %v17861_v52, %v17847_v22 }
 0x6d9   :  { %v7190_v9 = vadd.f32 %v7097_v1, %v20599_v17  ;;  %v7115_v4 = vadd.f32 %v12857_v62, %v6938_v55  ;;  %v17913_v27 = vpop.f32.mrf.mxu0  ;;  %v6962_v18 = vadd.f32 %v12807_v25, %v6737_v42  ;;  %v20602_v25 = vld [vmem:[#allocation63_spill] sm:$0xff]  ;;  %v6578_v36 = vadd.f32 %v17883_v63, %v17859_v28 }
 0x6da   :  { %v17915_v34 = vpop.f32.mrf.mxu1  ;;  %v6769_v42 = vadd.f32 %v12757_v10, %v6564_v16  ;;  %v6383_v10 = vadd.f32 %v17863_v46, %v17851_v24  ;;  %v6557_v5 = vadd.f32 %v17879_v37, %v6353_v20  ;;  %v6571_v61 = vadd.f32 %v17885_v47, %v6365_v50  ;;  %v20604_v16 = vld [vmem:[#allocation91_spill] sm:$0xff] }
 0x6db   :  { %v17918_v43 = vand.u32 4294901760, %v7190_v9  ;;  %v17921_v40 = vadd.f32 %v7115_v4, %v20600_v57  ;;  %v12810_v32 = vpop.f32.mrf.mxu0  ;;  %v6341_v22 = vadd.f32 %v17849_v19, %v17835_v59  ;;  %v6377_v28 = vadd.f32 %v17865_v15, %v17855_v41 }
 0x6dc   :  { %v12860_v2 = vpop.f32.mrf.mxu1  ;;  %v6974_v13 = vadd.f32 %v12810_v32, %v6753_v30  ;;  %v6592_v52 = vadd.f32 %v17889_v12, %v6383_v10  ;;  %v6761_v24 = vadd.f32 %v17893_v38, %v6557_v5  ;;  %v6777_v46 = vadd.f32 %v17897_v11, %v6571_v61 }
 0x6dd   :  { %v17924_v6 = vsub.f32 %v7190_v9, %v17918_v43  ;;  %12964 = vmatprep.mubr.f32.mxu1 %v17918_v43  ;;  %v6967_v55 = vpop.f32.mrf.mxu0  ;;  %v7127_v44 = vadd.f32 %v12860_v2, %v6950_v8  ;;  %v6329_v12 = vadd.f32 %v17843_v26, %v17831_v60 }
 0x6de   :  { %v17927_v35 = vpop.f32.mrf.mxu1  ;;  %v6801_v59 = vadd.f32 %v17901_v49, %v6592_v52 }
 0x6df   :  { %v12813_v33 = vpop.f32.mrf.mxu0  ;;  %v17931_v4 = vadd.f32 %v7127_v44, %v20601_v21  ;;  %v17934_v14 = vand.u32 4294901760, %v17924_v6  ;;  %v20603_v21 = vld [vmem:[#allocation60_spill] sm:$0xff]  ;;  %v6529_v50 = vadd.f32 %v17871_v58, %v6329_v12  ;;  %v20608_v58 = vld [vmem:[#allocation59_spill] sm:$0xff] }
 0x6e0   :  { %v12863_v1 = vpop.f32.mrf.mxu1  ;;  %v6986_v32 = vadd.f32 %v12813_v33, %v6769_v42 }
 0x6e1   :  { %v7139_v9 = vadd.f32 %v12863_v1, %v6962_v18  ;;  %v6979_v23 = vpop.f32.mrf.mxu0  ;;  %v7290_v17 = vsub.f32 %v17924_v6, %v17934_v14 }
 0x6e2   :  { %v17936_v62 = vpop.f32.mrf.mxu1  ;;  %v6980_v19 = vadd.f32 %v6979_v23, %v6761_v24 }
 0x6e3   :  { %v17942_v51 = vadd.f32 %v7139_v9, %v20602_v25  ;;  %v12816_v57 = vpop.f32.mrf.mxu0  ;;  %v17944_v2 = vand.u32 4294901760, %v7290_v17  ;;  %v6785_v9 = vadd.f32 %v17895_v3, %v6578_v36  ;;  %v6543_v3 = vadd.f32 %v17875_v53, %v6341_v22  ;;  %v20605_v53 = vld [vmem:[#allocation72_spill] sm:$0xff] }
 0x6e4   :  { %v12866_v8 = vpop.f32.mrf.mxu1 }
 0x6e5   :  { %v7151_v44 = vadd.f32 %v12866_v8, %v6974_v13  ;;  %12908 = vmatprep.mubr.f32.mxu0 %v17944_v2  ;;  %v6991_v48 = vpop.f32.mrf.mxu0  ;;  %v6998_v37 = vadd.f32 %v12816_v57, %v6785_v9  ;;  %v6585_v13 = vadd.f32 %v17891_v29, %v6377_v28  ;;  %v6745_v38 = vadd.f32 %v17887_v0, %v6543_v3  ;;  %v20614_v3 = vld [vmem:[#allocation65_spill] sm:$0xff] }
 0x6e6   :  { %v7144_v18 = vpop.f32.mrf.mxu1  ;;  %v6992_v41 = vadd.f32 %v6991_v48, %v6777_v46  ;;  %v6317_v0 = vadd.f32 %v17837_v7, %v17827_v45  ;;  %v20610_v7 = vld [vmem:[#allocation79_spill] sm:$0xff]  ;;  %v20613_v46 = vld [vmem:[#allocation53_spill] sm:$0xff] }
 0x6e7   :  { %v17954_v1 = vadd.f32 %v7151_v44, %v20603_v21  ;;  %v12819_v63 = vpop.f32.mrf.mxu0  ;;  %v6793_v11 = vadd.f32 %v17905_v56, %v6585_v13  ;;  %v6968_v49 = vadd.f32 %v6967_v55, %v6745_v38  ;;  %v6729_v56 = vadd.f32 %v17881_v31, %v6529_v50 }
 0x6e8   :  { %v12869_v30 = vpop.f32.mrf.mxu1  ;;  %v7010_v42 = vadd.f32 %v12819_v63, %v6801_v59 }
 0x6e9   :  { %v7163_v17 = vadd.f32 %v12869_v30, %v6986_v32  ;;  %v7003_v57 = vpop.f32.mrf.mxu0  ;;  %v20606_v32 = vld [vmem:[#allocation69_spill] sm:$0xff]  ;;  %v7145_v21 = vadd.f32 %v7144_v18, %v6968_v49  ;;  %v20607_v30 = vld [vmem:[#allocation68_spill] sm:$0xff]  ;;  %v6956_v28 = vadd.f32 %v17913_v27, %v6729_v56  ;;  %v20611_v18 = vld [vmem:[#allocation55_spill] sm:$0xff] }
 0x6ea   :  { %v7156_v33 = vpop.f32.mrf.mxu1  ;;  %v7004_v48 = vadd.f32 %v7003_v57, %v6793_v11 }
 0x6eb   :  { %v7201_v47 = vadd.f32 %v7163_v17, %v20604_v16  ;;  %v7157_v44 = vadd.f32 %v7156_v33, %v6980_v19  ;;  %v20609_v17 = vld [vmem:[#allocation48_spill] sm:$0xff]  ;;  %v20612_v33 = vld [vmem:[#allocation21_spill] sm:$0xff]  ;;  %v7133_v16 = vadd.f32 %v17936_v62, %v6956_v28  ;;  %v7198_v13 = vadd.f32 %v7145_v21, %v20614_v3 }
 0x6ec   :  { %v12872_v25 = vpop.f32.mrf.mxu1  ;;  %v6515_v22 = vadd.f32 %v20609_v17, %v6317_v0  ;;  %v6305_v24 = vadd.f32 %v20612_v33, %v20611_v18  ;;  %v18017_v62 = vand.u32 4294901760, %v17954_v1  ;;  %v18088_v17 = vand.u32 4294901760, %v17931_v4  ;;  %v20620_v18 = vld [vmem:[#allocation38_spill] sm:$0xff] }
 0x6ed   :  { %v7175_v15 = vadd.f32 %v12872_v25, %v6998_v37  ;;  %v7200_v5 = vadd.f32 %v7157_v44, %v20607_v30  ;;  %v17990_v52 = vand.u32 4294901760, %v7201_v47  ;;  %v20619_v30 = vld [vmem:[#allocation46_spill] sm:$0xff]  ;;  %v18123_v3 = vand.u32 4294901760, %v17910_v54 }
 0x6ee   :  { %v7168_v8 = vpop.f32.mrf.mxu1  ;;  %v6713_v37 = vadd.f32 %v20613_v46, %v6515_v22 }
 0x6ef   :  { %v7203_v20 = vadd.f32 %v7175_v15, %v20605_v53  ;;  %v7169_v29 = vadd.f32 %v7168_v8, %v6992_v41  ;;  %v18003_v25 = vand.u32 4294901760, %v7200_v5  ;;  %v20615_v41 = vld [vmem:[#allocation11_spill] sm:$0xff]  ;;  %v18021_v38 = vsub.f32 %v7201_v47, %v17990_v52  ;;  %v20617_v53 = vld [vmem:[#allocation64_spill] sm:$0xff] }
 0x6f0   :  { %v12875_v23 = vpop.f32.mrf.mxu1  ;;  %v6501_v15 = vadd.f32 %v20615_v41, %v6305_v24  ;;  %v6944_v12 = vadd.f32 %v17907_v39, %v6713_v37  ;;  %v20616_v39 = vld [vmem:[#allocation14_spill] sm:$0xff]  ;;  %v18132_v41 = vsub.f32 %v17931_v4, %v18088_v17 }
 0x6f1   :  { %v17978_v36 = vand.u32 4294901760, %v7203_v20  ;;  %v7202_v60 = vadd.f32 %v7169_v29, %v20606_v32  ;;  %v7187_v26 = vadd.f32 %v12875_v23, %v7010_v42  ;;  %v18036_v29 = vand.u32 4294901760, %v7198_v13 }
 0x6f2   :  { %v7180_v10 = vpop.f32.mrf.mxu1  ;;  %v6697_v42 = vadd.f32 %v20616_v39, %v6501_v15  ;;  %v7121_v44 = vadd.f32 %v17927_v35, %v6944_v12  ;;  %v18040_v47 = vsub.f32 %v7200_v5, %v18003_v25  ;;  %v20618_v35 = vld [vmem:[#allocation113_spill] sm:$0xff]  ;;  %v18053_v32 = vand.u32 4294901760, %v17942_v51 }
 0x6f3   :  { %v17985_v61 = vand.u32 4294901760, %v7202_v60  ;;  %v7205_v55 = vadd.f32 %v7187_v26, %v20608_v58  ;;  %v7181_v9 = vadd.f32 %v7180_v10, %v7004_v48  ;;  %v17993_v63 = vsub.f32 %v7203_v20, %v17978_v36 }
 0x6f4   :  { %v7196_v20 = vadd.f32 %v7133_v16, %v20617_v53  ;;  %v6932_v48 = vadd.f32 %v20618_v35, %v6697_v42  ;;  %v18068_v21 = vand.u32 4294901760, %v18021_v38  ;;  %v18076_v58 = vsub.f32 %v7198_v13, %v18036_v29 }
 0x6f5   :  { %v17995_v45 = vand.u32 4294901760, %v7205_v55  ;;  %v7204_v31 = vadd.f32 %v7181_v9, %v20610_v7  ;;  %v18006_v27 = vsub.f32 %v7202_v60, %v17985_v61  ;;  %v18031_v8 = vand.u32 4294901760, %v17993_v63 }
 0x6f6   :  { %v18057_v60 = vsub.f32 %v17954_v1, %v18017_v62  ;;  %v7109_v10 = vadd.f32 %v17915_v34, %v6932_v48  ;;  %v7194_v1 = vadd.f32 %v7121_v44, %v20619_v30  ;;  %v18072_v5 = vand.u32 4294901760, %v7196_v20 }
 0x6f7   :  { %v18009_v59 = vsub.f32 %v7205_v55, %v17995_v45  ;;  %v18011_v19 = vand.u32 4294901760, %v7204_v31  ;;  %12876 = vmatprep.subr.mxu0 %v17995_v45  ;;  %v18049_v23 = vand.u32 4294901760, %v18006_v27  ;;  %v7420_v56 = vsub.f32 %v17993_v63, %v18031_v8 }
 0x6f8   :  { %12877 = vmatpush3.msra.mxu0 %v17995_v45  ;;  %v18085_v34 = vand.u32 4294901760, %v18040_v47  ;;  %v18094_v22 = vsub.f32 %v17942_v51, %v18053_v32  ;;  %v7400_v7 = vsub.f32 %v18021_v38, %v18068_v21  ;;  %v7192_v33 = vadd.f32 %v7109_v10, %v20620_v18 }
 0x6f9   :  { %v18024_v11 = vsub.f32 %v7204_v31, %v18011_v19  ;;  %12878 = vmatprep.subr.mxu0 %v18011_v19  ;;  %v18028_v57 = vand.u32 4294901760, %v18009_v59  ;;  %v7410_v9 = vsub.f32 %v18006_v27, %v18049_v23  ;;  %v18098_v28 = vand.u32 4294901760, %v7420_v56 }
 0x6fa   :  { %12879 = vmatpush3.msra.mxu0 %v18011_v19  ;;  %v18103_v31 = vand.u32 4294901760, %v18057_v60  ;;  %v18106_v24 = vand.u32 4294901760, %v7194_v1  ;;  %v18111_v51 = vsub.f32 %v7196_v20, %v18072_v5  ;;  %v7390_v37 = vsub.f32 %v18040_v47, %v18085_v34 }
 0x6fb   :  { %12880 = vmatprep.subr.mxu0 %v17978_v36  ;;  %v7440_v50 = vsub.f32 %v18009_v59, %v18028_v57  ;;  %v18046_v49 = vand.u32 4294901760, %v18024_v11  ;;  %v18115_v46 = vand.u32 4294901760, %v7410_v9  ;;  %v18120_v16 = vand.u32 4294901760, %v18076_v58 }
 0x6fc   :  { %12881 = vmatpush3.msra.mxu0 %v17978_v36  ;;  %v18126_v13 = vand.u32 4294901760, %v17921_v40  ;;  %v18136_v15 = vand.u32 4294901760, %v7400_v7  ;;  %v7380_v12 = vsub.f32 %v18057_v60, %v18103_v31  ;;  %v18141_v39 = vand.u32 4294901760, %v18094_v22 }
 0x6fd   :  { %12882 = vmatprep.subr.mxu0 %v17985_v61  ;;  %v18061_v26 = vand.u32 4294901760, %v7440_v50  ;;  %v7430_v0 = vsub.f32 %v18024_v11, %v18046_v49  ;;  %20621 = vst [vmem:[#allocation101_spill] sm:$0xff] %v18120_v16  ;;  %v18143_v42 = vand.u32 4294901760, %v7192_v33  ;;  %v18148_v4 = vsub.f32 %v7194_v1, %v18106_v24 }
 0x6fe   :  { %12883 = vmatpush3.msra.mxu0 %v17985_v61  ;;  %20622 = vst [vmem:[#allocation32_spill] sm:$0xff] %v18141_v39  ;;  %v18152_v44 = vand.u32 4294901760, %v7390_v37  ;;  %v7370_v53 = vsub.f32 %v18076_v58, %v18120_v16  ;;  %v18157_v20 = vand.u32 4294901760, %v18111_v51  ;;  %v18161_v50 = vsub.f32 %v17910_v54, %v18123_v3 }
 0x6ff   :  { %12884 = vmatprep.subr.mxu0 %v17990_v52  ;;  %12932 = vmatprep.subr.mxu1 %v18061_v26  ;;  %v18080_v55 = vand.u32 4294901760, %v7430_v0  ;;  %v18167_v35 = vsub.f32 %v17921_v40, %v18126_v13  ;;  %v18171_v48 = vand.u32 4294901760, %v7380_v12  ;;  %v7360_v0 = vsub.f32 %v18094_v22, %v18141_v39 }
 0x700   :  { %12885 = vmatpush3.msra.mxu0 %v17990_v52  ;;  %12933 = vmatpush3.msra.mxu1 %v18061_v26  ;;  %20623 = vst [vmem:[#allocation20_spill] sm:$0xff] %v18157_v20  ;;  %v18176_v54 = vand.u32 4294901760, %v18132_v41  ;;  %v18179_v56 = vsub.f32 %v7192_v33, %v18143_v42  ;;  %v18185_v40 = vand.u32 4294901760, %v7370_v53  ;;  %v7350_v10 = vsub.f32 %v18111_v51, %v18157_v20 }
 0x701   :  { %12886 = vmatprep.subr.mxu0 %v18003_v25  ;;  %12934 = vmatprep.subr.mxu1 %v18080_v55  ;;  %v18190_v30 = vand.u32 4294901760, %v18148_v4  ;;  %v18195_v1 = vand.u32 4294901760, %v18161_v50  ;;  %v18199_v9 = vand.u32 4294901760, %v7360_v0  ;;  %v18204_v18 = vand.u32 4294901760, %v18167_v35 }
 0x702   :  { %12887 = vmatpush3.msra.mxu0 %v18003_v25  ;;  %12935 = vmatpush3.msra.mxu1 %v18080_v55  ;;  %20624 = vst [vmem:[#allocation107_spill] sm:$0xff] %v18176_v54  ;;  %v7340_v7 = vsub.f32 %v18132_v41, %v18176_v54  ;;  %v18209_v33 = vand.u32 4294901760, %v18179_v56  ;;  %v7351_v37 = vand.u32 4294901760, %v7350_v10 }
 0x703   :  { %12888 = vmatprep.subr.mxu0 %v18017_v62  ;;  %12936 = vmatprep.subr.mxu1 %v18098_v28  ;;  %v7330_v12 = vsub.f32 %v18148_v4, %v18190_v30  ;;  %v7300_v53 = vsub.f32 %v18161_v50, %v18195_v1  ;;  %v7320_v20 = vsub.f32 %v18167_v35, %v18204_v18 }
 0x704   :  { %12889 = vmatpush3.msra.mxu0 %v18017_v62  ;;  %12937 = vmatpush3.msra.mxu1 %v18098_v28  ;;  %v7341_v0 = vand.u32 4294901760, %v7340_v7  ;;  %v7310_v10 = vsub.f32 %v18179_v56, %v18209_v33 }
 0x705   :  { %12890 = vmatprep.subr.mxu0 %v18036_v29  ;;  %12938 = vmatprep.subr.mxu1 %v18115_v46  ;;  %v7331_v39 = vand.u32 4294901760, %v7330_v12  ;;  %v7301_v7 = vand.u32 4294901760, %v7300_v53  ;;  %v7321_v54 = vand.u32 4294901760, %v7320_v20  ;;  %v8496_v53 = vld [vmem:[#allocation5 + $0x20] sm:$0xff] }
 0x706   :  { %12891 = vmatpush3.msra.mxu0 %v18036_v29  ;;  %12939 = vmatpush3.msra.mxu1 %v18115_v46  ;;  %v7311_v16 = vand.u32 4294901760, %v7310_v10 }
 0x707   :  { %12892 = vmatprep.subr.mxu0 %v18053_v32  ;;  %12940 = vmatprep.subr.mxu1 %v18136_v15 }
 0x708   :  { %12893 = vmatpush3.msra.mxu0 %v18053_v32  ;;  %12941 = vmatpush3.msra.mxu1 %v18136_v15 }
 0x709   :  { %12894 = vmatprep.subr.mxu0 %v18072_v5  ;;  %12942 = vmatprep.subr.mxu1 %v18152_v44 }
 0x70a   :  { %12895 = vmatpush3.msra.mxu0 %v18072_v5  ;;  %12943 = vmatpush3.msra.mxu1 %v18152_v44 }
 0x70b   :  { %12896 = vmatprep.subr.mxu0 %v18088_v17  ;;  %12944 = vmatprep.subr.mxu1 %v18171_v48 }
 0x70c   :  { %12897 = vmatpush3.msra.mxu0 %v18088_v17  ;;  %12945 = vmatpush3.msra.mxu1 %v18171_v48 }
 0x70d   :  { %12898 = vmatprep.subr.mxu0 %v18106_v24  ;;  %12946 = vmatprep.subr.mxu1 %v18185_v40 }
 0x70e   :  { %12899 = vmatpush3.msra.mxu0 %v18106_v24  ;;  %12947 = vmatpush3.msra.mxu1 %v18185_v40 }
 0x70f   :  { %12900 = vmatprep.subr.mxu0 %v18126_v13  ;;  %12948 = vmatprep.subr.mxu1 %v18199_v9 }
 0x710   :  { %12901 = vmatpush3.msra.mxu0 %v18126_v13  ;;  %12949 = vmatpush3.msra.mxu1 %v18199_v9 }
 0x711   :  { %12902 = vmatprep.subr.mxu0 %v18143_v42  ;;  %12950 = vmatprep.subr.mxu1 %v7351_v37 }
 0x712   :  { %12903 = vmatpush3.msra.mxu0 %v18143_v42  ;;  %12951 = vmatpush3.msra.mxu1 %v7351_v37 }
 0x713   :  { %12904 = vmatprep.subr.mxu0 %v18123_v3  ;;  %12952 = vmatprep.subr.mxu1 %v7341_v0 }
 0x714   :  { %12905 = vmatpush3.msra.mxu0 %v18123_v3  ;;  %12953 = vmatpush3.msra.mxu1 %v7341_v0 }
 0x715   :  { %12906 = vmatprep.subr.mxu0 %v17918_v43  ;;  %12954 = vmatprep.subr.mxu1 %v7331_v39 }
 0x716   :  { %12907 = vmatpush3.msra.mxu0 %v17918_v43  ;;  %12955 = vmatpush3.msra.mxu1 %v7331_v39 }
 0x717   :  { %12909 = vmatmul.mubr.f32.vlgmr.msra.gmra.mxu0 %v7301_v7  ;;  %12956 = vmatprep.subr.mxu1 %v7321_v54 }
 0x718   :  { %12988 = vmatprep.subr.mxu0 %v18009_v59  ;;  %12911 = vmatprep.mubr.f32.mxu0 %v7311_v16 }
 0x719   :  { %12957 = vmatpush3.msra.mxu1 %v7321_v54  ;;  %12989 = vmatpush3.msra.mxu0 %v18009_v59 }
 0x71a   :  { %12958 = vmatprep.subr.mxu1 %v7311_v16  ;;  %12990 = vmatprep.subr.mxu0 %v18024_v11 }
 0x71b   :  { %12959 = vmatpush3.msra.mxu1 %v7311_v16  ;;  %12991 = vmatpush3.msra.mxu0 %v18024_v11 }
 0x71c   :  { %12912 = vmatmul.mubr.f32.gmra.mxu0 %v7321_v54  ;;  %12960 = vmatprep.subr.mxu1 %v7301_v7 }
 0x71d   :  { %12992 = vmatprep.subr.mxu0 %v17993_v63  ;;  %12914 = vmatprep.mubr.f32.mxu0 %v7331_v39  ;;  %v8499_v39 = vld [vmem:[#allocation5 + $0x38] sm:$0xff] }
 0x71e   :  { %12961 = vmatpush3.msra.mxu1 %v7301_v7  ;;  %12993 = vmatpush3.msra.mxu0 %v17993_v63  ;;  %v18533_v20 = vand.u32 4294901760, %v8499_v39 }
 0x71f   :  { %12962 = vmatprep.subr.mxu1 %v17944_v2  ;;  %12994 = vmatprep.subr.mxu0 %v18006_v27 }
 0x720   :  { %12963 = vmatpush3.msra.mxu1 %v17944_v2  ;;  %12995 = vmatpush3.msra.mxu0 %v18006_v27  ;;  %v20626_v2 = vld [vmem:[#allocation107_spill] sm:$0xff]  ;;  %20648 = vst [vmem:[#allocation33_spill] sm:$0xff] %v18533_v20 }
 0x721   :  { %12915 = vmatmul.mubr.f32.gmra.mxu0 %v7341_v0  ;;  %12965 = vmatmul.mubr.f32.vlgmr.msra.gmra.mxu1 %v18123_v3 }
 0x722   :  { %12996 = vmatprep.subr.mxu0 %v18021_v38  ;;  %13044 = vmatprep.subr.mxu1 %v17995_v45 }
 0x723   :  { %12917 = vmatprep.mubr.f32.mxu0 %v7351_v37  ;;  %12967 = vmatprep.mubr.f32.mxu1 %v18143_v42 }
 0x724   :  { %12997 = vmatpush3.msra.mxu0 %v18021_v38  ;;  %13045 = vmatpush3.msra.mxu1 %v17995_v45 }
 0x725   :  { %12998 = vmatprep.subr.mxu0 %v18040_v47  ;;  %13046 = vmatprep.subr.mxu1 %v18011_v19 }
 0x726   :  { %12999 = vmatpush3.msra.mxu0 %v18040_v47  ;;  %13047 = vmatpush3.msra.mxu1 %v18011_v19 }
 0x727   :  { %12918 = vmatmul.mubr.f32.gmra.mxu0 %v18199_v9  ;;  %12968 = vmatmul.mubr.f32.gmra.mxu1 %v18126_v13 }
 0x728   :  { %13000 = vmatprep.subr.mxu0 %v18057_v60  ;;  %13048 = vmatprep.subr.mxu1 %v17978_v36 }
 0x729   :  { %12920 = vmatprep.mubr.f32.mxu0 %v18185_v40  ;;  %12970 = vmatprep.mubr.f32.mxu1 %v18106_v24  ;;  %v18543_v40 = vsub.f32 %v8499_v39, %v18533_v20 }
 0x72a   :  { %13001 = vmatpush3.msra.mxu0 %v18057_v60  ;;  %13049 = vmatpush3.msra.mxu1 %v17978_v36 }
 0x72b   :  { %13002 = vmatprep.subr.mxu0 %v18076_v58  ;;  %13050 = vmatprep.subr.mxu1 %v17985_v61  ;;  %20650 = vst [vmem:[#allocation18_spill] sm:$0xff] %v18543_v40 }
 0x72c   :  { %13003 = vmatpush3.msra.mxu0 %v18076_v58  ;;  %13051 = vmatpush3.msra.mxu1 %v17985_v61 }
 0x72d   :  { %12921 = vmatmul.mubr.f32.gmra.mxu0 %v18171_v48  ;;  %12971 = vmatmul.mubr.f32.gmra.mxu1 %v18088_v17 }
 0x72e   :  { %13004 = vmatprep.subr.mxu0 %v18094_v22  ;;  %13052 = vmatprep.subr.mxu1 %v17990_v52 }
 0x72f   :  { %12923 = vmatprep.mubr.f32.mxu0 %v18152_v44  ;;  %12973 = vmatprep.mubr.f32.mxu1 %v18072_v5 }
 0x730   :  { %13005 = vmatpush3.msra.mxu0 %v18094_v22  ;;  %13053 = vmatpush3.msra.mxu1 %v17990_v52 }
 0x731   :  { %13006 = vmatprep.subr.mxu0 %v18111_v51  ;;  %13054 = vmatprep.subr.mxu1 %v18003_v25 }
 0x732   :  { %13007 = vmatpush3.msra.mxu0 %v18111_v51  ;;  %13055 = vmatpush3.msra.mxu1 %v18003_v25 }
 0x733   :  { %12924 = vmatmul.mubr.f32.gmra.mxu0 %v18136_v15  ;;  %12974 = vmatmul.mubr.f32.gmra.mxu1 %v18053_v32 }
 0x734   :  { %13008 = vmatprep.subr.mxu0 %v18132_v41  ;;  %13056 = vmatprep.subr.mxu1 %v18017_v62 }
 0x735   :  { %12926 = vmatprep.mubr.f32.mxu0 %v18115_v46  ;;  %12976 = vmatprep.mubr.f32.mxu1 %v18036_v29  ;;  %v8500_v46 = vld [vmem:[#allocation5 + $0x40] sm:$0xff] }
 0x736   :  { %13009 = vmatpush3.msra.mxu0 %v18132_v41  ;;  %13057 = vmatpush3.msra.mxu1 %v18017_v62 }
 0x737   :  { %13010 = vmatprep.subr.mxu0 %v18148_v4  ;;  %13058 = vmatprep.subr.mxu1 %v18036_v29 }
 0x738   :  { %13011 = vmatpush3.msra.mxu0 %v18148_v4  ;;  %13059 = vmatpush3.msra.mxu1 %v18036_v29 }
 0x739   :  { %12927 = vmatmul.mubr.f32.gmra.mxu0 %v18098_v28  ;;  %12977 = vmatmul.mubr.f32.gmra.mxu1 %v18017_v62 }
 0x73a   :  { %13012 = vmatprep.subr.mxu0 %v18167_v35  ;;  %13060 = vmatprep.subr.mxu1 %v18053_v32 }
 0x73b   :  { %12929 = vmatprep.mubr.f32.mxu0 %v18080_v55  ;;  %12979 = vmatprep.mubr.f32.mxu1 %v18003_v25 }
 0x73c   :  { %13013 = vmatpush3.msra.mxu0 %v18167_v35  ;;  %13061 = vmatpush3.msra.mxu1 %v18053_v32 }
 0x73d   :  { %13014 = vmatprep.subr.mxu0 %v18179_v56  ;;  %13062 = vmatprep.subr.mxu1 %v18072_v5 }
 0x73e   :  { %13015 = vmatpush3.msra.mxu0 %v18179_v56  ;;  %13063 = vmatpush3.msra.mxu1 %v18072_v5 }
 0x73f   :  { %12930 = vmatmul.mubr.f32.gmra.mxu0 %v18061_v26  ;;  %12980 = vmatmul.mubr.f32.gmra.mxu1 %v17990_v52  ;;  %v20627_v26 = vld [vmem:[#allocation32_spill] sm:$0xff] }
 0x740   :  { %13016 = vmatprep.subr.mxu0 %v18161_v50  ;;  %13064 = vmatprep.subr.mxu1 %v18088_v17 }
 0x741   :  { %12982 = vmatprep.mubr.f32.mxu1 %v17985_v61  ;;  %13017 = vmatpush3.msra.mxu0 %v18161_v50 }
 0x742   :  { %13020 = vmatprep.mubr.f32.mxu0 %v17924_v6  ;;  %13065 = vmatpush3.msra.mxu1 %v18088_v17 }
 0x743   :  { %13018 = vmatprep.subr.mxu0 %v17924_v6  ;;  %13066 = vmatprep.subr.mxu1 %v18106_v24 }
 0x744   :  { %13019 = vmatpush3.msra.mxu0 %v17924_v6  ;;  %13067 = vmatpush3.msra.mxu1 %v18106_v24  ;;  %v20625_v6 = vld [vmem:[#allocation101_spill] sm:$0xff] }
 0x745   :  { %12983 = vmatmul.mubr.f32.gmra.mxu1 %v17978_v36  ;;  %13021 = vmatmul.mubr.f32.vlgmr.msra.gmra.mxu0 %v18161_v50 }
 0x746   :  { %13068 = vmatprep.subr.mxu1 %v18126_v13  ;;  %13100 = vmatprep.subr.mxu0 %v18028_v57 }
 0x747   :  { %12985 = vmatprep.mubr.f32.mxu1 %v18011_v19  ;;  %13023 = vmatprep.mubr.f32.mxu0 %v18179_v56 }
 0x748   :  { %13069 = vmatpush3.msra.mxu1 %v18126_v13  ;;  %13101 = vmatpush3.msra.mxu0 %v18028_v57 }
 0x749   :  { %13070 = vmatprep.subr.mxu1 %v18143_v42  ;;  %13102 = vmatprep.subr.mxu0 %v18046_v49 }
 0x74a   :  { %13071 = vmatpush3.msra.mxu1 %v18143_v42  ;;  %13103 = vmatpush3.msra.mxu0 %v18046_v49 }
 0x74b   :  { %12986 = vmatmul.mubr.f32.gmra.mxu1 %v17995_v45  ;;  %13024 = vmatmul.mubr.f32.gmra.mxu0 %v18167_v35  ;;  %v8498_v35 = vld [vmem:[#allocation5 + $0x30] sm:$0xff] }
 0x74c   :  { %13072 = vmatprep.subr.mxu1 %v18123_v3  ;;  %13104 = vmatprep.subr.mxu0 %v18031_v8 }
 0x74d   :  { %13026 = vmatprep.mubr.f32.mxu0 %v18148_v4  ;;  %13073 = vmatpush3.msra.mxu1 %v18123_v3 }
 0x74e   :  { %13076 = vmatprep.mubr.f32.mxu1 %v17934_v14  ;;  %13105 = vmatpush3.msra.mxu0 %v18031_v8 }
 0x74f   :  { %13074 = vmatprep.subr.mxu1 %v17918_v43  ;;  %13106 = vmatprep.subr.mxu0 %v18049_v23 }
 0x750   :  { %13075 = vmatpush3.msra.mxu1 %v17918_v43  ;;  %13107 = vmatpush3.msra.mxu0 %v18049_v23 }
 0x751   :  { %13027 = vmatmul.mubr.f32.gmra.mxu0 %v18132_v41  ;;  %13077 = vmatmul.mubr.f32.vlgmr.msra.gmra.mxu1 %v18195_v1  ;;  %v18519_v41 = vand.u32 4294901760, %v8500_v46 }
 0x752   :  { %13108 = vmatprep.subr.mxu0 %v18068_v21  ;;  %13156 = vmatprep.subr.mxu1 %v17995_v45 }
 0x753   :  { %13029 = vmatprep.mubr.f32.mxu0 %v18111_v51  ;;  %13079 = vmatprep.mubr.f32.mxu1 %v18209_v33  ;;  %20645 = vst [vmem:[#allocation36_spill] sm:$0xff] %v18519_v41  ;;  %v18531_v44 = vsub.f32 %v8500_v46, %v18519_v41 }
 0x754   :  { %13109 = vmatpush3.msra.mxu0 %v18068_v21  ;;  %13157 = vmatpush3.msra.mxu1 %v17995_v45 }
 0x755   :  { %13110 = vmatprep.subr.mxu0 %v18085_v34  ;;  %13158 = vmatprep.subr.mxu1 %v18011_v19  ;;  %20647 = vst [vmem:[#allocation44_spill] sm:$0xff] %v18531_v44  ;;  %v18540_v56 = vand.u32 4294901760, %v18531_v44 }
 0x756   :  { %13111 = vmatpush3.msra.mxu0 %v18085_v34  ;;  %13159 = vmatpush3.msra.mxu1 %v18011_v19 }
 0x757   :  { %13030 = vmatmul.mubr.f32.gmra.mxu0 %v18094_v22  ;;  %13080 = vmatmul.mubr.f32.gmra.mxu1 %v18204_v18  ;;  %20649 = vst [vmem:[#allocation17_spill] sm:$0xff] %v18540_v56 }
 0x758   :  { %13112 = vmatprep.subr.mxu0 %v18103_v31  ;;  %13160 = vmatprep.subr.mxu1 %v17978_v36 }
 0x759   :  { %13032 = vmatprep.mubr.f32.mxu0 %v18076_v58  ;;  %13082 = vmatprep.mubr.f32.mxu1 %v18190_v30  ;;  %v20628_v58 = vld [vmem:[#allocation20_spill] sm:$0xff] }
 0x75a   :  { %13113 = vmatpush3.msra.mxu0 %v18103_v31  ;;  %13161 = vmatpush3.msra.mxu1 %v17978_v36 }
 0x75b   :  { %13114 = vmatprep.subr.mxu0 %v20625_v6  ;;  %13162 = vmatprep.subr.mxu1 %v17985_v61 }
 0x75c   :  { %13115 = vmatpush3.msra.mxu0 %v20625_v6  ;;  %13163 = vmatpush3.msra.mxu1 %v17985_v61 }
 0x75d   :  { %13033 = vmatmul.mubr.f32.gmra.mxu0 %v18057_v60  ;;  %13083 = vmatmul.mubr.f32.gmra.mxu1 %v20626_v2 }
 0x75e   :  { %13116 = vmatprep.subr.mxu0 %v20627_v26  ;;  %13164 = vmatprep.subr.mxu1 %v17990_v52 }
 0x75f   :  { %13035 = vmatprep.mubr.f32.mxu0 %v18040_v47  ;;  %13085 = vmatprep.mubr.f32.mxu1 %v20628_v58 }
 0x760   :  { %13117 = vmatpush3.msra.mxu0 %v20627_v26  ;;  %13165 = vmatpush3.msra.mxu1 %v17990_v52 }
 0x761   :  { %13118 = vmatprep.subr.mxu0 %v20628_v58  ;;  %13166 = vmatprep.subr.mxu1 %v18003_v25 }
 0x762   :  { %13119 = vmatpush3.msra.mxu0 %v20628_v58  ;;  %13167 = vmatpush3.msra.mxu1 %v18003_v25 }
 0x763   :  { %13036 = vmatmul.mubr.f32.gmra.mxu0 %v18021_v38  ;;  %13086 = vmatmul.mubr.f32.gmra.mxu1 %v20627_v26  ;;  %v8495_v26 = vld [vmem:[#allocation5 + $0x18] sm:$0xff] }
 0x764   :  { %13120 = vmatprep.subr.mxu0 %v20626_v2  ;;  %13168 = vmatprep.subr.mxu1 %v18017_v62 }
 0x765   :  { %13038 = vmatprep.mubr.f32.mxu0 %v18006_v27  ;;  %13088 = vmatprep.mubr.f32.mxu1 %v20625_v6  ;;  %v18566_v6 = vand.u32 4294901760, %v8496_v53 }
 0x766   :  { %13121 = vmatpush3.msra.mxu0 %v20626_v2  ;;  %13169 = vmatpush3.msra.mxu1 %v18017_v62 }
 0x767   :  { %13122 = vmatprep.subr.mxu0 %v18190_v30  ;;  %13170 = vmatprep.subr.mxu1 %v18036_v29  ;;  %20656 = vst [vmem:[#allocation13_spill] sm:$0xff] %v18566_v6 }
 0x768   :  { %13123 = vmatpush3.msra.mxu0 %v18190_v30  ;;  %13171 = vmatpush3.msra.mxu1 %v18036_v29  ;;  %v18546_v30 = vand.u32 4294901760, %v8498_v35 }
 0x769   :  { %13039 = vmatmul.mubr.f32.gmra.mxu0 %v17993_v63  ;;  %13089 = vmatmul.mubr.f32.gmra.mxu1 %v18103_v31  ;;  %v8506_v63 = vld [vmem:[#allocation5 + $0x70] sm:$0xff] }
 0x76a   :  { %13124 = vmatprep.subr.mxu0 %v18204_v18  ;;  %13172 = vmatprep.subr.mxu1 %v18053_v32  ;;  %20651 = vst [vmem:[#allocation24_spill] sm:$0xff] %v18546_v30  ;;  %v18558_v12 = vsub.f32 %v8498_v35, %v18546_v30 }
 0x76b   :  { %13041 = vmatprep.mubr.f32.mxu0 %v18024_v11  ;;  %13091 = vmatprep.mubr.f32.mxu1 %v18085_v34 }
 0x76c   :  { %13125 = vmatpush3.msra.mxu0 %v18204_v18  ;;  %13173 = vmatpush3.msra.mxu1 %v18053_v32  ;;  %v8809_v18 = vsub.f32 %v18531_v44, %v18540_v56  ;;  %20654 = vst [vmem:[#allocation23_spill] sm:$0xff] %v18558_v12  ;;  %v18570_v2 = vand.u32 4294901760, %v18558_v12 }
 0x76d   :  { %13126 = vmatprep.subr.mxu0 %v18209_v33  ;;  %13174 = vmatprep.subr.mxu1 %v18072_v5 }
 0x76e   :  { %13127 = vmatpush3.msra.mxu0 %v18209_v33  ;;  %13175 = vmatpush3.msra.mxu1 %v18072_v5  ;;  %v18552_v33 = vand.u32 4294901760, %v18543_v40  ;;  %v8810_v0 = vand.u32 4294901760, %v8809_v18  ;;  %20657 = vst [vmem:[#allocation96_spill] sm:$0xff] %v18570_v2 }
 0x76f   :  { %13042 = vmatmul.mubr.f32.gmra.mxu0 %v18009_v59  ;;  %13092 = vmatmul.mubr.f32.gmra.mxu1 %v18068_v21  ;;  %v8504_v59 = vld [vmem:[#allocation5 + $0x60] sm:$0xff] }
 0x770   :  { %13128 = vmatprep.subr.mxu0 %v18195_v1  ;;  %13176 = vmatprep.subr.mxu1 %v18088_v17  ;;  %v18474_v11 = vand.u32 4294901760, %v8504_v59  ;;  %20652 = vst [vmem:[#allocation62_spill] sm:$0xff] %v18552_v33  ;;  %v8816_v10 = vsub.f32 %v18543_v40, %v18552_v33 }
 0x771   :  { %13094 = vmatprep.mubr.f32.mxu1 %v18049_v23  ;;  %13129 = vmatpush3.msra.mxu0 %v18195_v1  ;;  %v8497_v1 = vld [vmem:[#allocation5 + $0x28] sm:$0xff] }
 0x772   :  { %13132 = vmatprep.mubr.f32.mxu0 %v17918_v43  ;;  %13177 = vmatpush3.msra.mxu1 %v18088_v17  ;;  %v18554_v37 = vand.u32 4294901760, %v8497_v1  ;;  %v8817_v58 = vand.u32 4294901760, %v8816_v10 }
 0x773   :  { %13130 = vmatprep.subr.mxu0 %v17934_v14  ;;  %13178 = vmatprep.subr.mxu1 %v18106_v24 }
 0x774   :  { %13131 = vmatpush3.msra.mxu0 %v17934_v14  ;;  %13179 = vmatpush3.msra.mxu1 %v18106_v24  ;;  %20653 = vst [vmem:[#allocation22_spill] sm:$0xff] %v18554_v37  ;;  %v18564_v7 = vsub.f32 %v8497_v1, %v18554_v37 }
 0x775   :  { %13095 = vmatmul.mubr.f32.gmra.mxu1 %v18031_v8  ;;  %13133 = vmatmul.mubr.f32.vlgmr.msra.gmra.mxu0 %v18123_v3 }
 0x776   :  { %13180 = vmatprep.subr.mxu1 %v18126_v13  ;;  %13097 = vmatprep.mubr.f32.mxu1 %v18046_v49  ;;  %v18484_v49 = vsub.f32 %v8504_v59, %v18474_v11  ;;  %20655 = vst [vmem:[#allocation86_spill] sm:$0xff] %v18564_v7  ;;  %v8823_v59 = vsub.f32 %v18558_v12, %v18570_v2 }
 0x777   :  { %13135 = vmatprep.mubr.f32.mxu0 %v18143_v42  ;;  %13181 = vmatpush3.msra.mxu1 %v18126_v13 }
 0x778   :  { %13182 = vmatprep.subr.mxu1 %v18143_v42  ;;  %20635 = vst [vmem:[#allocation75_spill] sm:$0xff] %v18484_v49 }
 0x779   :  { %13183 = vmatpush3.msra.mxu1 %v18143_v42  ;;  %13136 = vmatmul.mubr.f32.gmra.mxu0 %v18126_v13 }
 0x77a   :  { %13098 = vmatmul.mubr.f32.gmra.mxu1 %v18028_v57  ;;  %13184 = vmatprep.subr.mxu1 %v18123_v3  ;;  %v8503_v57 = vld [vmem:[#allocation5 + $0x58] sm:$0xff] }
 0x77b   :  { %13138 = vmatprep.mubr.f32.mxu0 %v18106_v24  ;;  %13185 = vmatpush3.msra.mxu1 %v18123_v3  ;;  %v18487_v23 = vand.u32 4294901760, %v8503_v57 }
 0x77c   :  { %13188 = vmatprep.mubr.f32.mxu1 %v17918_v43  ;;  %13186 = vmatprep.subr.mxu1 %v17918_v43 }
 0x77d   :  { %13187 = vmatpush3.msra.mxu1 %v17918_v43  ;;  %13139 = vmatmul.mubr.f32.gmra.mxu0 %v18088_v17  ;;  %v8507_v43 = vld [vmem:[#allocation5 + $0x78] sm:$0xff]  ;;  %20636 = vst [vmem:[#allocation118_spill] sm:$0xff] %v18487_v23  ;;  %v18498_v34 = vsub.f32 %v8503_v57, %v18487_v23 }
 0x77e   :  { %13189 = vmatmul.mubr.f32.vlgmr.msra.gmra.mxu1 %v18123_v3  ;;  %13141 = vmatprep.mubr.f32.mxu0 %v18072_v5  ;;  %v18447_v14 = vand.u32 4294901760, %v8507_v43 }
 0x77f   :  { %13191 = vmatprep.mubr.f32.mxu1 %v18143_v42  ;;  %20639 = vst [vmem:[#allocation92_spill] sm:$0xff] %v18498_v34  ;;  %v18510_v51 = vand.u32 4294901760, %v18498_v34 }
 0x780   :  { %v18450_v27 = vsub.f32 %v8507_v43, %v18447_v14  ;;  %13212 = vmatprep.subr.mxu0 %v18447_v14  ;;  %v18574_v43 = vand.u32 4294901760, %v18564_v7 }
 0x781   :  { %13142 = vmatmul.mubr.f32.gmra.mxu0 %v18053_v32  ;;  %20642 = vst [vmem:[#allocation54_spill] sm:$0xff] %v18510_v51  ;;  %v8788_v15 = vsub.f32 %v18498_v34, %v18510_v51 }
 0x782   :  { %13192 = vmatmul.mubr.f32.gmra.mxu1 %v18126_v13  ;;  %13144 = vmatprep.mubr.f32.mxu0 %v18036_v29  ;;  %20629 = vst [vmem:[#allocation109_spill] sm:$0xff] %v18450_v27  ;;  %20658 = vst [vmem:[#allocation49_spill] sm:$0xff] %v18574_v43  ;;  %v8830_v57 = vsub.f32 %v18564_v7, %v18574_v43 }
 0x783   :  { %13194 = vmatprep.mubr.f32.mxu1 %v18106_v24  ;;  %13213 = vmatpush3.msra.mxu0 %v18447_v14  ;;  %v8789_v50 = vand.u32 4294901760, %v8788_v15  ;;  %v8492_v15 = vld [vmem:[#allocation5] sm:$0xff] }
 0x784   :  { %v18614_v35 = vand.u32 4294901760, %v8492_v15 }
 0x785   :  { %13145 = vmatmul.mubr.f32.gmra.mxu0 %v18017_v62 }
 0x786   :  { %13195 = vmatmul.mubr.f32.gmra.mxu1 %v18088_v17  ;;  %13147 = vmatprep.mubr.f32.mxu0 %v18003_v25  ;;  %v8501_v17 = vld [vmem:[#allocation5 + $0x48] sm:$0xff]  ;;  %20668 = vst [vmem:[#allocation114_spill] sm:$0xff] %v18614_v35 }
 0x787   :  { %13197 = vmatprep.mubr.f32.mxu1 %v18072_v5  ;;  %v18493_v5 = vand.u32 4294901760, %v18484_v49  ;;  %v18506_v24 = vand.u32 4294901760, %v8501_v17 }
 0x789   :  { %13148 = vmatmul.mubr.f32.gmra.mxu0 %v17990_v52  ;;  %20637 = vst [vmem:[#allocation77_spill] sm:$0xff] %v18493_v5  ;;  %v8781_v28 = vsub.f32 %v18484_v49, %v18493_v5  ;;  %20641 = vst [vmem:[#allocation31_spill] sm:$0xff] %v18506_v24  ;;  %v18517_v13 = vsub.f32 %v8501_v17, %v18506_v24  ;;  %v8831_v17 = vand.u32 4294901760, %v8830_v57 }
 0x78a   :  { %13198 = vmatmul.mubr.f32.gmra.mxu1 %v18053_v32  ;;  %13150 = vmatprep.mubr.f32.mxu0 %v17985_v61  ;;  %v8502_v32 = vld [vmem:[#allocation5 + $0x50] sm:$0xff] }
 0x78b   :  { %13200 = vmatprep.mubr.f32.mxu1 %v18036_v29  ;;  %v18495_v55 = vand.u32 4294901760, %v8502_v32  ;;  %v8782_v16 = vand.u32 4294901760, %v8781_v28  ;;  %20644 = vst [vmem:[#allocation34_spill] sm:$0xff] %v18517_v13  ;;  %v18528_v4 = vand.u32 4294901760, %v18517_v13 }
 0x78d   :  { %13151 = vmatmul.mubr.f32.gmra.mxu0 %v17978_v36  ;;  %20638 = vst [vmem:[#allocation25_spill] sm:$0xff] %v18495_v55  ;;  %v18504_v31 = vsub.f32 %v8502_v32, %v18495_v55  ;;  %20646 = vst [vmem:[#allocation80_spill] sm:$0xff] %v18528_v4  ;;  %v8802_v54 = vsub.f32 %v18517_v13, %v18528_v4 }
 0x78e   :  { %13201 = vmatmul.mubr.f32.gmra.mxu1 %v18017_v62  ;;  %13153 = vmatprep.mubr.f32.mxu0 %v18011_v19 }
 0x78f   :  { %13203 = vmatprep.mubr.f32.mxu1 %v18003_v25  ;;  %v18452_v25 = vand.u32 4294901760, %v8506_v63  ;;  %20640 = vst [vmem:[#allocation93_spill] sm:$0xff] %v18504_v31  ;;  %v18514_v3 = vand.u32 4294901760, %v18504_v31  ;;  %v8803_v9 = vand.u32 4294901760, %v8802_v54 }
 0x791   :  { %13154 = vmatmul.mubr.f32.gmra.mxu0 %v17995_v45  ;;  %13214 = vmatprep.subr.mxu0 %v18452_v25  ;;  %20643 = vst [vmem:[#allocation88_spill] sm:$0xff] %v18514_v3  ;;  %v8795_v42 = vsub.f32 %v18504_v31, %v18514_v3 }
 0x792   :  { %13204 = vmatmul.mubr.f32.gmra.mxu1 %v17990_v52  ;;  %v8505_v52 = vld [vmem:[#allocation5 + $0x68] sm:$0xff]  ;;  %13215 = vmatpush3.msra.mxu0 %v18452_v25 }
 0x793   :  { %13206 = vmatprep.mubr.f32.mxu1 %v17985_v61  ;;  %v18460_v61 = vsub.f32 %v8506_v63, %v18452_v25  ;;  %v8796_v48 = vand.u32 4294901760, %v8795_v42  ;;  %v18577_v63 = vsub.f32 %v8496_v53, %v18566_v6 }
 0x795   :  { %20631 = vst [vmem:[#allocation51_spill] sm:$0xff] %v18460_v61  ;;  %v18469_v62 = vand.u32 4294901760, %v18460_v61  ;;  %20659 = vst [vmem:[#allocation115_spill] sm:$0xff] %v18577_v63 }
 0x796   :  { %13207 = vmatmul.mubr.f32.gmra.mxu1 %v17978_v36  ;;  %v18457_v36 = vand.u32 4294901760, %v18450_v27 }
 0x797   :  { %13209 = vmatprep.mubr.f32.mxu1 %v18011_v19  ;;  %20632 = vst [vmem:[#allocation81_spill] sm:$0xff] %v18469_v62  ;;  %v8767_v29 = vsub.f32 %v18460_v61, %v18469_v62 }
 0x798   :  { %20630 = vst [vmem:[#allocation42_spill] sm:$0xff] %v18457_v36  ;;  %v8760_v19 = vsub.f32 %v18450_v27, %v18457_v36 }
 0x799   :  { %v8768_v60 = vand.u32 4294901760, %v8767_v29 }
 0x79a   :  { %13210 = vmatmul.mubr.f32.gmra.mxu1 %v17995_v45  ;;  %v18462_v45 = vand.u32 4294901760, %v8505_v52  ;;  %v8761_v8 = vand.u32 4294901760, %v8760_v19  ;;  %v8494_v19 = vld [vmem:[#allocation5 + $0x10] sm:$0xff] }
 0x79b   :  { %v18593_v32 = vand.u32 4294901760, %v8494_v19 }
 0x79c   :  { %v18472_v38 = vsub.f32 %v8505_v52, %v18462_v45  ;;  %13216 = vmatprep.subr.mxu0 %v18462_v45  ;;  %13268 = vmatprep.subr.mxu1 %v8761_v8  ;;  %v18579_v52 = vand.u32 4294901760, %v8495_v26 }
 0x79d   :  { %13217 = vmatpush3.msra.mxu0 %v18462_v45  ;;  %13269 = vmatpush3.msra.mxu1 %v8761_v8  ;;  %v18588_v8 = vand.u32 4294901760, %v18577_v63  ;;  %20663 = vst [vmem:[#allocation99_spill] sm:$0xff] %v18593_v32  ;;  %v18603_v46 = vsub.f32 %v8494_v19, %v18593_v32 }
 0x79e   :  { %20633 = vst [vmem:[#allocation67_spill] sm:$0xff] %v18472_v38  ;;  %v18481_v47 = vand.u32 4294901760, %v18472_v38  ;;  %13218 = vmatprep.subr.mxu0 %v18474_v11  ;;  %13270 = vmatprep.subr.mxu1 %v8768_v60  ;;  %20660 = vst [vmem:[#allocation74_spill] sm:$0xff] %v18579_v52  ;;  %v18591_v29 = vsub.f32 %v8495_v26, %v18579_v52 }
 0x79f   :  { %13219 = vmatpush3.msra.mxu0 %v18474_v11  ;;  %13271 = vmatpush3.msra.mxu1 %v8768_v60  ;;  %20661 = vst [vmem:[#allocation58_spill] sm:$0xff] %v18588_v8  ;;  %v8824_v60 = vand.u32 4294901760, %v8823_v59  ;;  %20665 = vst [vmem:[#allocation47_spill] sm:$0xff] %v18603_v46 }
 0x7a0   :  { %20634 = vst [vmem:[#allocation116_spill] sm:$0xff] %v18481_v47  ;;  %v8774_v21 = vsub.f32 %v18472_v38, %v18481_v47  ;;  %13220 = vmatprep.subr.mxu0 %v18487_v23  ;;  %20662 = vst [vmem:[#allocation16_spill] sm:$0xff] %v18591_v29  ;;  %v18600_v28 = vand.u32 4294901760, %v18591_v29 }
 0x7a1   :  { %13221 = vmatpush3.msra.mxu0 %v18487_v23 }
 0x7a2   :  { %v8775_v22 = vand.u32 4294901760, %v8774_v21  ;;  %13222 = vmatprep.subr.mxu0 %v18495_v55  ;;  %v8493_v21 = vld [vmem:[#allocation5 + $0x8] sm:$0xff]  ;;  %20664 = vst [vmem:[#allocation100_spill] sm:$0xff] %v18600_v28  ;;  %v8844_v42 = vsub.f32 %v18591_v29, %v18600_v28 }
 0x7a3   :  { %13223 = vmatpush3.msra.mxu0 %v18495_v55 }
 0x7a4   :  { %13272 = vmatprep.subr.mxu1 %v8775_v22  ;;  %13224 = vmatprep.subr.mxu0 %v18506_v24  ;;  %v8845_v54 = vand.u32 4294901760, %v8844_v42 }
 0x7a5   :  { %13273 = vmatpush3.msra.mxu1 %v8775_v22  ;;  %13225 = vmatpush3.msra.mxu0 %v18506_v24  ;;  %v8837_v22 = vsub.f32 %v18577_v63, %v18588_v8 }
 0x7a6   :  { %13274 = vmatprep.subr.mxu1 %v8782_v16  ;;  %13226 = vmatprep.subr.mxu0 %v18519_v41 }
 0x7a7   :  { %13275 = vmatpush3.msra.mxu1 %v8782_v16  ;;  %13227 = vmatpush3.msra.mxu0 %v18519_v41  ;;  %v18606_v16 = vand.u32 4294901760, %v8493_v21  ;;  %v8838_v39 = vand.u32 4294901760, %v8837_v22 }
 0x7a8   :  { %13276 = vmatprep.subr.mxu1 %v8789_v50  ;;  %13228 = vmatprep.subr.mxu0 %v18533_v20 }
 0x7a9   :  { %13277 = vmatpush3.msra.mxu1 %v8789_v50  ;;  %13229 = vmatpush3.msra.mxu0 %v18533_v20  ;;  %20666 = vst [vmem:[#allocation61_spill] sm:$0xff] %v18606_v16  ;;  %v18612_v50 = vand.u32 4294901760, %v18603_v46 }
 0x7aa   :  { %13278 = vmatprep.subr.mxu1 %v8796_v48  ;;  %13230 = vmatprep.subr.mxu0 %v18546_v30 }
 0x7ab   :  { %13279 = vmatpush3.msra.mxu1 %v8796_v48  ;;  %13231 = vmatpush3.msra.mxu0 %v18546_v30  ;;  %20667 = vst [vmem:[#allocation27_spill] sm:$0xff] %v18612_v50  ;;  %v18618_v48 = vsub.f32 %v8493_v21, %v18606_v16  ;;  %v8851_v1 = vsub.f32 %v18603_v46, %v18612_v50 }
 0x7ac   :  { %13280 = vmatprep.subr.mxu1 %v8803_v9  ;;  %13232 = vmatprep.subr.mxu0 %v18554_v37 }
 0x7ad   :  { %13281 = vmatpush3.msra.mxu1 %v8803_v9  ;;  %13233 = vmatpush3.msra.mxu0 %v18554_v37  ;;  %20669 = vst [vmem:[#allocation106_spill] sm:$0xff] %v18618_v48  ;;  %v18624_v9 = vsub.f32 %v8492_v15, %v18614_v35  ;;  %v18628_v18 = vand.u32 4294901760, %v18618_v48  ;;  %v8852_v53 = vand.u32 4294901760, %v8851_v1 }
 0x7ae   :  { %13282 = vmatprep.subr.mxu1 %v8810_v0  ;;  %13234 = vmatprep.subr.mxu0 %v18566_v6 }
 0x7af   :  { %13283 = vmatpush3.msra.mxu1 %v8810_v0  ;;  %13235 = vmatpush3.msra.mxu0 %v18566_v6  ;;  %20670 = vst [vmem:[#allocation57_spill] sm:$0xff] %v18624_v9  ;;  %20671 = vst [vmem:[#allocation39_spill] sm:$0xff] %v18628_v18  ;;  %v18632_v0 = vand.u32 4294901760, %v18624_v9  ;;  %v8858_v10 = vsub.f32 %v18618_v48, %v18628_v18 }
 0x7b0   :  { %13284 = vmatprep.subr.mxu1 %v8817_v58  ;;  %13236 = vmatprep.subr.mxu0 %v18579_v52 }
 0x7b1   :  { %13285 = vmatpush3.msra.mxu1 %v8817_v58  ;;  %13237 = vmatpush3.msra.mxu0 %v18579_v52  ;;  %20672 = vst [vmem:[#allocation94_spill] sm:$0xff] %v18632_v0  ;;  %v8865_v26 = vsub.f32 %v18624_v9, %v18632_v0  ;;  %v8859_v58 = vand.u32 4294901760, %v8858_v10 }
 0x7b2   :  { %13286 = vmatprep.subr.mxu1 %v8824_v60  ;;  %13238 = vmatprep.subr.mxu0 %v18593_v32 }
 0x7b3   :  { %13287 = vmatpush3.msra.mxu1 %v8824_v60  ;;  %13239 = vmatpush3.msra.mxu0 %v18593_v32  ;;  %v8866_v59 = vand.u32 4294901760, %v8865_v26 }
 0x7b4   :  { %13288 = vmatprep.subr.mxu1 %v8831_v17  ;;  %13240 = vmatprep.subr.mxu0 %v18606_v16 }
 0x7b5   :  { %13289 = vmatpush3.msra.mxu1 %v8831_v17  ;;  %13241 = vmatpush3.msra.mxu0 %v18606_v16 }
 0x7b6   :  { %13290 = vmatprep.subr.mxu1 %v8838_v39  ;;  %13242 = vmatprep.subr.mxu0 %v18614_v35 }
 0x7b7   :  { %13291 = vmatpush3.msra.mxu1 %v8838_v39  ;;  %13243 = vmatpush3.msra.mxu0 %v18614_v35 }
 0x7b8   :  { %13292 = vmatprep.subr.mxu1 %v8845_v54  ;;  %13324 = vmatprep.subr.mxu0 %v18450_v27 }
 0x7b9   :  { %13293 = vmatpush3.msra.mxu1 %v8845_v54 }
 0x7ba   :  { %13294 = vmatprep.subr.mxu1 %v8852_v53 }
 0x7bb   :  { %13295 = vmatpush3.msra.mxu1 %v8852_v53 }
 0x7bc   :  { %13296 = vmatprep.subr.mxu1 %v8859_v58 }
 0x7bd   :  { %13297 = vmatpush3.msra.mxu1 %v8859_v58 }
 0x7be   :  { %13298 = vmatprep.subr.mxu1 %v8866_v59 }
 0x7bf   :  { %13299 = vmatpush3.msra.mxu1 %v8866_v59 }
 0x7c0   :  { %13380 = vmatprep.subr.mxu1 %v18447_v14 }
 0x7d7   :  { %v18641_v19 = vpop.f32.mrf.mxu0 }
 0x7d9   :  { %v18643_v57 = vpop.f32.mrf.mxu0 }
 0x7dc   :  { %v18645_v60 = vpop.f32.mrf.mxu0 }
 0x7de   :  { %v18647_v21 = vpop.f32.mrf.mxu0 }
 0x7e1   :  { %v18649_v17 = vpop.f32.mrf.mxu0  ;;  %v18651_v22 = vpop.f32.mrf.mxu1 }
 0x7e2   :  { %v7601_v24 = vadd.f32 %v18651_v22, %v18641_v19 }
 0x7e3   :  { %v18653_v15 = vpop.f32.mrf.mxu0  ;;  %v18655_v39 = vpop.f32.mrf.mxu1 }
 0x7e7   :  { %v18657_v42 = vpop.f32.mrf.mxu0  ;;  %v18659_v54 = vpop.f32.mrf.mxu1 }
 0x7e9   :  { %v18661_v1 = vpop.f32.mrf.mxu0  ;;  %v18663_v53 = vpop.f32.mrf.mxu1 }
 0x7ea   :  { %v7607_v19 = vadd.f32 %v18663_v53, %v18647_v21 }
 0x7ed   :  { %v12922_v10 = vpop.f32.mrf.mxu0  ;;  %v18665_v26 = vpop.f32.mrf.mxu1 }
 0x7ef   :  { %v18667_v58 = vpop.f32.mrf.mxu0  ;;  %v18669_v59 = vpop.f32.mrf.mxu1 }
 0x7f3   :  { %v12925_v0 = vpop.f32.mrf.mxu0  ;;  %v18671_v18 = vpop.f32.mrf.mxu1 }
 0x7f5   :  { %v18673_v50 = vpop.f32.mrf.mxu0  ;;  %v18675_v28 = vpop.f32.mrf.mxu1 }
 0x7f9   :  { %v12928_v8 = vpop.f32.mrf.mxu0  ;;  %v12978_v43 = vpop.f32.mrf.mxu1 }
 0x7fa   :  { %v18677_v2 = vadd.f32 %v12978_v43, %v12922_v10 }
 0x7fb   :  { %v7413_v33 = vpop.f32.mrf.mxu0  ;;  %v18679_v56 = vpop.f32.mrf.mxu1 }
 0x7ff   :  { %v12931_v4 = vpop.f32.mrf.mxu0  ;;  %v12981_v3 = vpop.f32.mrf.mxu1 }
 0x800   :  { %v18681_v51 = vadd.f32 %v12981_v3, %v12925_v0 }
 0x801   :  { %v7433_v5 = vpop.f32.mrf.mxu0  ;;  %v18683_v47 = vpop.f32.mrf.mxu1 }
 0x805   :  { %v12984_v62 = vpop.f32.mrf.mxu1  ;;  %v13022_v36 = vpop.f32.mrf.mxu0 }
 0x806   :  { %v18685_v9 = vadd.f32 %v12984_v62, %v12928_v8  ;;  %v7796_v55 = vadd.f32 %v13022_v36, %v7601_v24  ;;  %v7625_v36 = vadd.f32 %v18665_v26, %v18649_v17 }
 0x807   :  { %v7666_v48 = vpop.f32.mrf.mxu1  ;;  %v7788_v46 = vpop.f32.mrf.mxu0 }
 0x808   :  { %20673 = vst [vmem:[#allocation122_spill] sm:$0xff] %v18685_v9  ;;  %v18687_v29 = vadd.f32 %v7666_v48, %v7413_v33 }
 0x80a   :  { %20674 = vst [vmem:[#allocation103_spill] sm:$0xff] %v18687_v29 }
 0x80b   :  { %v12987_v43 = vpop.f32.mrf.mxu1  ;;  %v13025_v10 = vpop.f32.mrf.mxu0 }
 0x80c   :  { %v18689_v35 = vadd.f32 %v12987_v43, %v12931_v4 }
 0x80d   :  { %v7678_v63 = vpop.f32.mrf.mxu1  ;;  %v7802_v16 = vpop.f32.mrf.mxu0 }
 0x80e   :  { %20675 = vst [vmem:[#allocation124_spill] sm:$0xff] %v18689_v35  ;;  %v18691_v7 = vadd.f32 %v7678_v63, %v7433_v5 }
 0x810   :  { %20676 = vst [vmem:[#allocation105_spill] sm:$0xff] %v18691_v7 }
 0x811   :  { %v13028_v3 = vpop.f32.mrf.mxu0  ;;  %v13078_v0 = vpop.f32.mrf.mxu1 }
 0x812   :  { %v7991_v61 = vadd.f32 %v13078_v0, %v7796_v55  ;;  %v7824_v55 = vadd.f32 %v13028_v3, %v7625_v36 }
 0x813   :  { %v18693_v32 = vpop.f32.mrf.mxu0  ;;  %v7982_v12 = vpop.f32.mrf.mxu1 }
 0x817   :  { %v18695_v52 = vpop.f32.mrf.mxu0  ;;  %v13081_v62 = vpop.f32.mrf.mxu1 }
 0x819   :  { %v18697_v8 = vpop.f32.mrf.mxu0  ;;  %v7998_v33 = vpop.f32.mrf.mxu1 }
 0x81d   :  { %v18699_v48 = vpop.f32.mrf.mxu0  ;;  %v13084_v40 = vpop.f32.mrf.mxu1 }
 0x81f   :  { %v18701_v4 = vpop.f32.mrf.mxu0  ;;  %v18703_v43 = vpop.f32.mrf.mxu1 }
 0x823   :  { %v18705_v5 = vpop.f32.mrf.mxu0  ;;  %v18707_v63 = vpop.f32.mrf.mxu1 }
 0x825   :  { %v18709_v6 = vpop.f32.mrf.mxu0  ;;  %v18711_v44 = vpop.f32.mrf.mxu1 }
 0x829   :  { %v18713_v37 = vpop.f32.mrf.mxu0  ;;  %v18715_v13 = vpop.f32.mrf.mxu1 }
 0x82a   :  { %20677 = vst [vmem:[#allocation125_spill] sm:$0xff] %v18713_v37 }
 0x82b   :  { %v18717_v30 = vpop.f32.mrf.mxu0  ;;  %v18719_v31 = vpop.f32.mrf.mxu1 }
 0x82c   :  { %20678 = vst [vmem:[#allocation56_spill] sm:$0xff] %v18717_v30  ;;  %v7595_v30 = vadd.f32 %v18655_v39, %v18643_v57  ;;  %v7803_v57 = vadd.f32 %v7802_v16, %v7607_v19 }
 0x82e   :  { %v7789_v9 = vadd.f32 %v7788_v46, %v7595_v30 }
 0x82f   :  { %v18721_v20 = vpop.f32.mrf.mxu0  ;;  %v18723_v35 = vpop.f32.mrf.mxu1 }
 0x830   :  { %20679 = vst [vmem:[#allocation126_spill] sm:$0xff] %v18721_v20 }
 0x831   :  { %v18725_v34 = vpop.f32.mrf.mxu0  ;;  %v18727_v7 = vpop.f32.mrf.mxu1 }
 0x832   :  { %20680 = vst [vmem:[#allocation71_spill] sm:$0xff] %v18725_v34  ;;  %20681 = vst [vmem:[#allocation87_spill] sm:$0xff] %v18727_v7  ;;  %v7613_v34 = vadd.f32 %v18659_v54, %v18645_v60  ;;  %v7999_v54 = vadd.f32 %v7998_v33, %v7803_v57 }
 0x834   :  { %v7810_v22 = vadd.f32 %v13025_v10, %v7613_v34 }
 0x835   :  { %v18729_v41 = vpop.f32.mrf.mxu1  ;;  %v13134_v49 = vpop.f32.mrf.mxu0 }
 0x836   :  { %20682 = vst [vmem:[#allocation98_spill] sm:$0xff] %v18729_v41  ;;  %v8228_v27 = vadd.f32 %v13134_v49, %v7991_v61  ;;  %v8007_v39 = vadd.f32 %v13081_v62, %v7810_v22  ;;  %v7619_v61 = vadd.f32 %v18669_v59, %v18653_v15  ;;  %v7637_v49 = vadd.f32 %v18671_v18, %v18657_v42 }
 0x837   :  { %v18733_v38 = vpop.f32.mrf.mxu1  ;;  %v8221_v29 = vpop.f32.mrf.mxu0 }
 0x838   :  { %20683 = vst [vmem:[#allocation30_spill] sm:$0xff] %v18733_v38  ;;  %v7983_v38 = vadd.f32 %v7982_v12, %v7789_v9  ;;  %v8023_v12 = vadd.f32 %v13084_v40, %v7824_v55  ;;  %v7817_v17 = vadd.f32 %v18693_v32, %v7619_v61  ;;  %v7838_v15 = vadd.f32 %v18695_v52, %v7637_v49 }
 0x839   :  { %v13137_v20 = vpop.f32.mrf.mxu0  ;;  %v7655_v32 = vadd.f32 %v18683_v47, %v18673_v50  ;;  %v7852_v47 = vadd.f32 %v18699_v48, %v18677_v2 }
 0x83a   :  { %v18737_v37 = vpop.f32.mrf.mxu1  ;;  %v8240_v0 = vadd.f32 %v13137_v20, %v8007_v39  ;;  %v8015_v52 = vadd.f32 %v18703_v43, %v7817_v17  ;;  %v8039_v10 = vadd.f32 %v18707_v63, %v7838_v15 }
 0x83b   :  { %20684 = vst [vmem:[#allocation19_spill] sm:$0xff] %v18737_v37  ;;  %v8233_v41 = vpop.f32.mrf.mxu0  ;;  %v8222_v37 = vadd.f32 %v8221_v29, %v7983_v38 }
 0x83c   :  { %v18741_v7 = vpop.f32.mrf.mxu1  ;;  %v8234_v9 = vadd.f32 %v8233_v41, %v7999_v54  ;;  %v8055_v54 = vadd.f32 %v18715_v13, %v7852_v47  ;;  %v20691_v47 = vld [vmem:[#allocation125_spill] sm:$0xff] }
 0x83d   :  { %20685 = vst [vmem:[#allocation82_spill] sm:$0xff] %v18741_v7  ;;  %v13140_v23 = vpop.f32.mrf.mxu0 }
 0x83e   :  { %v13190_v24 = vpop.f32.mrf.mxu1  ;;  %v8252_v53 = vadd.f32 %v13140_v23, %v8023_v12 }
 0x83f   :  { %v8405_v60 = vadd.f32 %v13190_v24, %v8228_v27  ;;  %v8245_v30 = vpop.f32.mrf.mxu0 }
 0x840   :  { %v8398_v46 = vpop.f32.mrf.mxu1 }
 0x841   :  { %v18747_v7 = vand.u32 4294901760, %v8405_v60  ;;  %v8399_v21 = vadd.f32 %v8398_v46, %v8222_v37  ;;  %v13143_v34 = vpop.f32.mrf.mxu0  ;;  %v7631_v37 = vadd.f32 %v18675_v28, %v18661_v1  ;;  %v7643_v28 = vadd.f32 %v18679_v56, %v18667_v58 }
 0x842   :  { %v13193_v16 = vpop.f32.mrf.mxu1  ;;  %v8246_v58 = vadd.f32 %v8245_v30, %v8015_v52  ;;  %v8264_v19 = vadd.f32 %v13143_v34, %v8039_v10 }
 0x843   :  { %v18754_v27 = vsub.f32 %v8405_v60, %v18747_v7  ;;  %v18756_v38 = vand.u32 4294901760, %v8399_v21  ;;  %v8417_v29 = vadd.f32 %v13193_v16, %v8240_v0  ;;  %v8257_v20 = vpop.f32.mrf.mxu0  ;;  %v7831_v23 = vadd.f32 %v18697_v8, %v7631_v37 }
 0x844   :  { %v8410_v26 = vpop.f32.mrf.mxu1  ;;  %v7845_v2 = vadd.f32 %v18701_v4, %v7643_v28  ;;  %v7866_v60 = vadd.f32 %v18705_v5, %v18681_v51  ;;  %v7859_v37 = vadd.f32 %v18709_v6, %v7655_v32  ;;  %v20687_v28 = vld [vmem:[#allocation109_spill] sm:$0xff]  ;;  %v20688_v6 = vld [vmem:[#allocation87_spill] sm:$0xff] }
 0x845   :  { %v8608_v40 = vand.u32 4294901760, %v18754_v27  ;;  %v18764_v41 = vsub.f32 %v8399_v21, %v18756_v38  ;;  %v18766_v18 = vand.u32 4294901760, %v8417_v29  ;;  %v8411_v42 = vadd.f32 %v8410_v26, %v8234_v9  ;;  %13300 = vmatprep.mubr.f32.mxu1 %v18756_v38  ;;  %v13146_v59 = vpop.f32.mrf.mxu0 }
 0x846   :  { %v13196_v1 = vpop.f32.mrf.mxu1  ;;  %13301 = vmatmul.mubr.f32.vlgmr.msra.gmra.mxu1 %v18747_v7  ;;  %v8031_v50 = vadd.f32 %v18711_v44, %v7831_v23  ;;  %v8047_v51 = vadd.f32 %v18719_v31, %v7845_v2  ;;  %v8276_v16 = vadd.f32 %v13146_v59, %v8055_v54  ;;  %v8071_v17 = vadd.f32 %v18723_v35, %v7866_v60  ;;  %v20686_v59 = vld [vmem:[#allocation118_spill] sm:$0xff] }
 0x847   :  { %v18778_v3 = vsub.f32 %v8417_v29, %v18766_v18  ;;  %v18780_v62 = vand.u32 4294901760, %v8411_v42  ;;  %v8429_v33 = vadd.f32 %v13196_v1, %v8252_v53  ;;  %13381 = vmatpush3.msra.mxu1 %v18447_v14  ;;  %v8269_v56 = vpop.f32.mrf.mxu0  ;;  %v8598_v43 = vand.u32 4294901760, %v18764_v41 }
 0x848   :  { %v8422_v8 = vpop.f32.mrf.mxu1  ;;  %13382 = vmatprep.subr.mxu1 %v18452_v25  ;;  %v8609_v63 = vsub.f32 %v18754_v27, %v8608_v40  ;;  %v8258_v30 = vadd.f32 %v8257_v20, %v8031_v50  ;;  %v8270_v15 = vadd.f32 %v8269_v56, %v8047_v51  ;;  %v8063_v32 = vadd.f32 %v20688_v6, %v7859_v37  ;;  %v20690_v56 = vld [vmem:[#allocation122_spill] sm:$0xff] }
 0x849   :  { %v18792_v22 = vsub.f32 %v8411_v42, %v18780_v62  ;;  %v18794_v36 = vand.u32 4294901760, %v8429_v33  ;;  %13303 = vmatprep.mubr.f32.mxu1 %v18780_v62  ;;  %13383 = vmatpush3.msra.mxu1 %v18452_v25  ;;  %v13149_v44 = vpop.f32.mrf.mxu0  ;;  %v8628_v48 = vand.u32 4294901760, %v18778_v3  ;;  %v8423_v24 = vadd.f32 %v8422_v8, %v8246_v58 }
 0x84a   :  { %v13199_v57 = vpop.f32.mrf.mxu1  ;;  %13304 = vmatmul.mubr.f32.gmra.mxu1 %v18766_v18  ;;  %13384 = vmatprep.subr.mxu1 %v18462_v45  ;;  %v8599_v39 = vsub.f32 %v18764_v41, %v8598_v43  ;;  %v8610_v5 = vand.u32 4294901760, %v8609_v63  ;;  %v7880_v50 = vadd.f32 %v20691_v47, %v20690_v56  ;;  %v20692_v63 = vld [vmem:[#allocation25_spill] sm:$0xff]  ;;  %v20700_v47 = vld [vmem:[#allocation36_spill] sm:$0xff] }
 0x84b   :  { %v8441_v55 = vadd.f32 %v13199_v57, %v8264_v19  ;;  %13385 = vmatpush3.msra.mxu1 %v18462_v45  ;;  %v8281_v4 = vpop.f32.mrf.mxu0  ;;  %v8618_v46 = vand.u32 4294901760, %v18792_v22  ;;  %v18811_v0 = vsub.f32 %v8429_v33, %v18794_v36  ;;  %v18813_v21 = vand.u32 4294901760, %v8423_v24  ;;  %v20689_v33 = vld [vmem:[#allocation51_spill] sm:$0xff] }
 0x84c   :  { %v8434_v34 = vpop.f32.mrf.mxu1  ;;  %13386 = vmatprep.subr.mxu1 %v18474_v11  ;;  %v8600_v61 = vand.u32 4294901760, %v8599_v39  ;;  %v8629_v13 = vsub.f32 %v18778_v3, %v8628_v48  ;;  %v20693_v57 = vld [vmem:[#allocation103_spill] sm:$0xff]  ;;  %v20694_v39 = vld [vmem:[#allocation56_spill] sm:$0xff]  ;;  %v8282_v54 = vadd.f32 %v8281_v4, %v8063_v32  ;;  %v20695_v4 = vld [vmem:[#allocation30_spill] sm:$0xff] }
 0x84d   :  { %v8435_v49 = vadd.f32 %v8434_v34, %v8258_v30  ;;  %13387 = vmatpush3.msra.mxu1 %v18474_v11  ;;  %v8619_v12 = vsub.f32 %v18792_v22, %v8618_v46  ;;  %v18825_v9 = vsub.f32 %v8423_v24, %v18813_v21  ;;  %v18827_v29 = vand.u32 4294901760, %v8441_v55  ;;  %13306 = vmatprep.mubr.f32.mxu1 %v18813_v21  ;;  %v18830_v31 = vpop.f32.mrf.mxu0 }
 0x84e   :  { %13244 = vmatprep.mubr.f32.mxu0 %v8600_v61  ;;  %v13202_v20 = vpop.f32.mrf.mxu1  ;;  %13307 = vmatmul.mubr.f32.gmra.mxu1 %v18794_v36  ;;  %v8648_v26 = vand.u32 4294901760, %v18811_v0  ;;  %v8630_v2 = vand.u32 4294901760, %v8629_v13  ;;  %v7873_v60 = vadd.f32 %v20694_v39, %v20693_v57  ;;  %v8288_v30 = vadd.f32 %v13149_v44, %v8071_v17  ;;  %v20696_v13 = vld [vmem:[#allocation67_spill] sm:$0xff]  ;;  %v20701_v57 = vld [vmem:[#allocation105_spill] sm:$0xff] }
 0x84f   :  { %v18834_v53 = vand.u32 4294901760, %v8435_v49  ;;  %13245 = vmatmul.mubr.f32.vlgmr.msra.gmra.mxu0 %v8610_v5  ;;  %v8453_v42 = vadd.f32 %v13202_v20, %v8276_v16  ;;  %13388 = vmatprep.subr.mxu1 %v20686_v59  ;;  %v8620_v52 = vand.u32 4294901760, %v8619_v12  ;;  %v8638_v1 = vand.u32 4294901760, %v18825_v9  ;;  %v8293_v8 = vpop.f32.mrf.mxu0  ;;  %v20702_v39 = vld [vmem:[#allocation71_spill] sm:$0xff] }
 0x850   :  { %13325 = vmatpush3.msra.mxu0 %v20687_v28  ;;  %v8446_v23 = vpop.f32.mrf.mxu1  ;;  %13389 = vmatpush3.msra.mxu1 %v20686_v59  ;;  %v18850_v58 = vsub.f32 %v8441_v55, %v18827_v29  ;;  %v8649_v55 = vsub.f32 %v18811_v0, %v8648_v26 }
 0x851   :  { %v18843_v35 = vsub.f32 %v8435_v49, %v18834_v53  ;;  %v8447_v10 = vadd.f32 %v8446_v23, %v8270_v15  ;;  %13326 = vmatprep.subr.mxu0 %v20689_v33  ;;  %13390 = vmatprep.subr.mxu1 %v20692_v63  ;;  %v8639_v24 = vsub.f32 %v18825_v9, %v8638_v1  ;;  %v18865_v61 = vand.u32 4294901760, %v8453_v42  ;;  %v13155_v37 = vpop.f32.mrf.mxu0  ;;  %v20697_v15 = vld [vmem:[#allocation31_spill] sm:$0xff] }
 0x852   :  { %13247 = vmatprep.mubr.f32.mxu0 %v8620_v52  ;;  %v13205_v19 = vpop.f32.mrf.mxu1  ;;  %13309 = vmatprep.mubr.f32.mxu1 %v18834_v53  ;;  %v8079_v49 = vadd.f32 %v20695_v4, %v7873_v60  ;;  %v8668_v20 = vand.u32 4294901760, %v18850_v58  ;;  %v20698_v52 = vld [vmem:[#allocation98_spill] sm:$0xff] }
 0x853   :  { %v18858_v34 = vand.u32 4294901760, %v8447_v10  ;;  %13327 = vmatpush3.msra.mxu0 %v20689_v33  ;;  %13391 = vmatpush3.msra.mxu1 %v20692_v63  ;;  %v8640_v5 = vand.u32 4294901760, %v8639_v24  ;;  %v8658_v44 = vand.u32 4294901760, %v18843_v35  ;;  %v8465_v17 = vadd.f32 %v13205_v19, %v8288_v30  ;;  %v20699_v33 = vld [vmem:[#allocation75_spill] sm:$0xff] }
 0x854   :  { %13248 = vmatmul.mubr.f32.gmra.mxu0 %v8630_v2  ;;  %v8458_v51 = vpop.f32.mrf.mxu1  ;;  %13310 = vmatmul.mubr.f32.gmra.mxu1 %v18827_v29  ;;  %v8087_v6 = vadd.f32 %v20698_v52, %v7880_v50  ;;  %v8294_v32 = vadd.f32 %v8293_v8, %v8079_v49  ;;  %v18887_v56 = vsub.f32 %v8453_v42, %v18865_v61  ;;  %v8650_v19 = vand.u32 4294901760, %v8649_v55  ;;  %v20704_v49 = vld [vmem:[#allocation92_spill] sm:$0xff]  ;;  %v20706_v52 = vld [vmem:[#allocation126_spill] sm:$0xff] }
 0x855   :  { %v18871_v12 = vsub.f32 %v8447_v10, %v18858_v34  ;;  %13328 = vmatprep.subr.mxu0 %v20696_v13  ;;  %v8459_v16 = vadd.f32 %v8458_v51, %v8282_v54  ;;  %13392 = vmatprep.subr.mxu1 %v20697_v15  ;;  %v8659_v23 = vsub.f32 %v18843_v35, %v8658_v44  ;;  %v18899_v30 = vand.u32 4294901760, %v8465_v17  ;;  %v8305_v54 = vpop.f32.mrf.mxu0 }
 0x856   :  { %13329 = vmatpush3.msra.mxu0 %v20696_v13  ;;  %v13208_v28 = vpop.f32.mrf.mxu1  ;;  %13393 = vmatpush3.msra.mxu1 %v20697_v15  ;;  %v7887_v50 = vadd.f32 %v20702_v39, %v20701_v57  ;;  %v8300_v8 = vadd.f32 %v18830_v31, %v8087_v6  ;;  %v8669_v42 = vsub.f32 %v18850_v58, %v8668_v20  ;;  %v20705_v13 = vld [vmem:[#allocation124_spill] sm:$0xff]  ;;  %v20708_v39 = vld [vmem:[#allocation93_spill] sm:$0xff] }
 0x857   :  { %v18883_v10 = vand.u32 4294901760, %v8459_v16  ;;  %13330 = vmatprep.subr.mxu0 %v20699_v33  ;;  %13394 = vmatprep.subr.mxu1 %v20700_v47  ;;  %v19821_v24 = vand.u32 4294901760, %v18871_v12  ;;  %v8660_v51 = vand.u32 4294901760, %v8659_v23  ;;  %v7894_v6 = vadd.f32 %v20706_v52, %v20705_v13 }
 0x858   :  { %13250 = vmatprep.mubr.f32.mxu0 %v8640_v5  ;;  %v8470_v2 = vpop.f32.mrf.mxu1  ;;  %13312 = vmatprep.mubr.f32.mxu1 %v18858_v34  ;;  %v20703_v5 = vld [vmem:[#allocation82_spill] sm:$0xff] }
 0x859   :  { %13331 = vmatpush3.msra.mxu0 %v20699_v33  ;;  %v8471_v60 = vadd.f32 %v8470_v2, %v8294_v32  ;;  %v18902_v55 = vsub.f32 %v8459_v16, %v18883_v10  ;;  %13395 = vmatpush3.msra.mxu1 %v20700_v47  ;;  %v8095_v4 = vadd.f32 %v20703_v5, %v7887_v50  ;;  %v19820_v32 = vand.u32 4294901760, %v18887_v56  ;;  %v20707_v2 = vld [vmem:[#allocation33_spill] sm:$0xff]  ;;  %v20709_v50 = vld [vmem:[#allocation19_spill] sm:$0xff] }
 0x85a   :  { %13251 = vmatmul.mubr.f32.gmra.mxu0 %v8650_v19  ;;  %v13211_v31 = vpop.f32.mrf.mxu1  ;;  %13313 = vmatmul.mubr.f32.gmra.mxu1 %v18865_v61  ;;  %v8477_v33 = vadd.f32 %v13208_v28, %v8300_v8  ;;  %v8679_v23 = vsub.f32 %v18871_v12, %v19821_v24  ;;  %v8103_v5 = vadd.f32 %v20709_v50, %v7894_v6  ;;  %v20710_v8 = vld [vmem:[#allocation24_spill] sm:$0xff] }
 0x85b   :  { %13332 = vmatprep.subr.mxu0 %v20704_v49  ;;  %13396 = vmatprep.subr.mxu1 %v20707_v2  ;;  %v8306_v19 = vadd.f32 %v8305_v54, %v8095_v4  ;;  %v18917_v57 = vand.u32 4294901760, %v8471_v60  ;;  %v18922_v28 = vsub.f32 %v8465_v17, %v18899_v30  ;;  %v19818_v13 = vand.u32 4294901760, %v18902_v55 }
 0x85c   :  { %13333 = vmatpush3.msra.mxu0 %v20704_v49  ;;  %v8482_v16 = vpop.f32.mrf.mxu1  ;;  %13397 = vmatpush3.msra.mxu1 %v20707_v2  ;;  %v8670_v49 = vand.u32 4294901760, %v8669_v42  ;;  %v8689_v4 = vsub.f32 %v18887_v56, %v19820_v32  ;;  %v8312_v52 = vadd.f32 %v13155_v37, %v8103_v5  ;;  %v18931_v6 = vand.u32 4294901760, %v8477_v33  ;;  %v20714_v5 = vld [vmem:[#allocation13_spill] sm:$0xff] }
 0x85d   :  { %13334 = vmatprep.subr.mxu0 %v20708_v39  ;;  %13398 = vmatprep.subr.mxu1 %v20710_v8  ;;  %v8483_v54 = vadd.f32 %v8482_v16, %v8306_v19  ;;  %v8680_v17 = vand.u32 4294901760, %v8679_v23  ;;  %v18935_v42 = vsub.f32 %v8471_v60, %v18917_v57  ;;  %v19819_v16 = vand.u32 4294901760, %v18922_v28  ;;  %v20713_v60 = vld [vmem:[#allocation44_spill] sm:$0xff] }
 0x85e   :  { %13253 = vmatprep.mubr.f32.mxu0 %v8660_v51  ;;  %13315 = vmatprep.mubr.f32.mxu1 %v18883_v10  ;;  %v20711_v51 = vld [vmem:[#allocation34_spill] sm:$0xff]  ;;  %v8489_v19 = vadd.f32 %v13211_v31, %v8312_v52  ;;  %v8699_v37 = vsub.f32 %v18902_v55, %v19818_v13  ;;  %v18950_v50 = vsub.f32 %v8477_v33, %v18931_v6  ;;  %v8690_v31 = vand.u32 4294901760, %v8689_v4 }
 0x85f   :  { %13335 = vmatpush3.msra.mxu0 %v20708_v39  ;;  %13399 = vmatpush3.msra.mxu1 %v20710_v8  ;;  %v20712_v39 = vld [vmem:[#allocation22_spill] sm:$0xff]  ;;  %v18946_v23 = vand.u32 4294901760, %v8483_v54  ;;  %v8709_v52 = vsub.f32 %v18922_v28, %v19819_v16  ;;  %v20717_v16 = vld [vmem:[#allocation23_spill] sm:$0xff] }
 0x860   :  { %13254 = vmatmul.mubr.f32.gmra.mxu0 %v8670_v49  ;;  %13316 = vmatmul.mubr.f32.gmra.mxu1 %v18899_v30  ;;  %v19822_v49 = vand.u32 4294901760, %v18935_v42  ;;  %v8700_v33 = vand.u32 4294901760, %v8699_v37  ;;  %v20715_v4 = vld [vmem:[#allocation18_spill] sm:$0xff] }
 0x861   :  { %13336 = vmatprep.subr.mxu0 %v20711_v51  ;;  %13400 = vmatprep.subr.mxu1 %v20712_v39  ;;  %v18963_v13 = vsub.f32 %v8483_v54, %v18946_v23  ;;  %v8710_v32 = vand.u32 4294901760, %v8709_v52 }
 0x862   :  { %13337 = vmatpush3.msra.mxu0 %v20711_v51  ;;  %13401 = vmatpush3.msra.mxu1 %v20712_v39  ;;  %v18959_v51 = vand.u32 4294901760, %v8489_v19  ;;  %v8719_v37 = vsub.f32 %v18935_v42, %v19822_v49 }
 0x863   :  { %13338 = vmatprep.subr.mxu0 %v20713_v60  ;;  %13402 = vmatprep.subr.mxu1 %v20714_v5 }
 0x864   :  { %13256 = vmatprep.mubr.f32.mxu0 %v8680_v17  ;;  %13318 = vmatprep.mubr.f32.mxu1 %v18917_v57  ;;  %v19823_v17 = vand.u32 4294901760, %v18950_v50  ;;  %v18976_v54 = vsub.f32 %v8489_v19, %v18959_v51  ;;  %v20719_v19 = vld [vmem:[#allocation86_spill] sm:$0xff]  ;;  %v8720_v49 = vand.u32 4294901760, %v8719_v37 }
 0x865   :  { %13339 = vmatpush3.msra.mxu0 %v20713_v60  ;;  %13403 = vmatpush3.msra.mxu1 %v20714_v5  ;;  %v20716_v60 = vld [vmem:[#allocation74_spill] sm:$0xff] }
 0x866   :  { %13257 = vmatmul.mubr.f32.gmra.mxu0 %v8690_v31  ;;  %13319 = vmatmul.mubr.f32.gmra.mxu1 %v18931_v6  ;;  %v20718_v31 = vld [vmem:[#allocation99_spill] sm:$0xff]  ;;  %v8729_v24 = vsub.f32 %v18950_v50, %v19823_v17  ;;  %v8748_v52 = vand.u32 4294901760, %v18976_v54  ;;  %v20722_v17 = vld [vmem:[#allocation114_spill] sm:$0xff] }
 0x867   :  { %13340 = vmatprep.subr.mxu0 %v20715_v4  ;;  %13404 = vmatprep.subr.mxu1 %v20716_v60 }
 0x868   :  { %13341 = vmatpush3.msra.mxu0 %v20715_v4  ;;  %13405 = vmatpush3.msra.mxu1 %v20716_v60  ;;  %v19824_v4 = vand.u32 4294901760, %v18963_v13  ;;  %v8730_v37 = vand.u32 4294901760, %v8729_v24  ;;  %v20724_v24 = vld [vmem:[#allocation47_spill] sm:$0xff] }
 0x869   :  { %13342 = vmatprep.subr.mxu0 %v20717_v16  ;;  %13406 = vmatprep.subr.mxu1 %v20718_v31 }
 0x86a   :  { %13259 = vmatprep.mubr.f32.mxu0 %v8700_v33  ;;  %13321 = vmatprep.mubr.f32.mxu1 %v18946_v23  ;;  %v20720_v33 = vld [vmem:[#allocation61_spill] sm:$0xff] }
 0x86b   :  { %13343 = vmatpush3.msra.mxu0 %v20717_v16  ;;  %13407 = vmatpush3.msra.mxu1 %v20718_v31  ;;  %v20721_v16 = vld [vmem:[#allocation115_spill] sm:$0xff] }
 0x86c   :  { %13260 = vmatmul.mubr.f32.gmra.mxu0 %v8710_v32  ;;  %13322 = vmatmul.mubr.f32.gmra.mxu1 %v18959_v51  ;;  %v8739_v32 = vsub.f32 %v18963_v13, %v19824_v4 }
 0x86d   :  { %13344 = vmatprep.subr.mxu0 %v20719_v19  ;;  %13408 = vmatprep.subr.mxu1 %v20720_v33 }
 0x86e   :  { %13345 = vmatpush3.msra.mxu0 %v20719_v19  ;;  %13409 = vmatpush3.msra.mxu1 %v20720_v33  ;;  %v8749_v19 = vsub.f32 %v18976_v54, %v8748_v52  ;;  %v8740_v4 = vand.u32 4294901760, %v8739_v32 }
 0x86f   :  { %13412 = vmatprep.mubr.f32.mxu1 %v8598_v43  ;;  %13346 = vmatprep.subr.mxu0 %v20721_v16  ;;  %v20723_v43 = vld [vmem:[#allocation16_spill] sm:$0xff] }
 0x870   :  { %13410 = vmatprep.subr.mxu1 %v20722_v17  ;;  %13262 = vmatprep.mubr.f32.mxu0 %v8720_v49  ;;  %v8750_v49 = vand.u32 4294901760, %v8749_v19 }
 0x871   :  { %13347 = vmatpush3.msra.mxu0 %v20721_v16  ;;  %13411 = vmatpush3.msra.mxu1 %v20722_v17 }
 0x872   :  { %13263 = vmatmul.mubr.f32.gmra.mxu0 %v8730_v37  ;;  %13348 = vmatprep.subr.mxu0 %v20723_v43 }
 0x873   :  { %13413 = vmatmul.mubr.f32.vlgmr.msra.gmra.mxu1 %v8608_v40  ;;  %13492 = vmatprep.subr.mxu1 %v18447_v14  ;;  %v20725_v40 = vld [vmem:[#allocation106_spill] sm:$0xff] }
 0x874   :  { %13349 = vmatpush3.msra.mxu0 %v20723_v43  ;;  %13415 = vmatprep.mubr.f32.mxu1 %v8618_v46  ;;  %v20735_v46 = vld [vmem:[#allocation88_spill] sm:$0xff] }
 0x875   :  { %13493 = vmatpush3.msra.mxu1 %v18447_v14  ;;  %13350 = vmatprep.subr.mxu0 %v20724_v24  ;;  %v20726_v14 = vld [vmem:[#allocation57_spill] sm:$0xff] }
 0x876   :  { %13494 = vmatprep.subr.mxu1 %v18452_v25  ;;  %13265 = vmatprep.mubr.f32.mxu0 %v8740_v4 }
 0x877   :  { %13351 = vmatpush3.msra.mxu0 %v20724_v24  ;;  %13495 = vmatpush3.msra.mxu1 %v18452_v25  ;;  %v20727_v25 = vld [vmem:[#allocation42_spill] sm:$0xff] }
 0x878   :  { %13266 = vmatmul.mubr.f32.gmra.mxu0 %v8750_v49  ;;  %13352 = vmatprep.subr.mxu0 %v20725_v40 }
 0x879   :  { %13416 = vmatmul.mubr.f32.gmra.mxu1 %v8628_v48  ;;  %13496 = vmatprep.subr.mxu1 %v18462_v45  ;;  %v20734_v48 = vand.u32 4294901760, %v18902_v55 }
 0x87a   :  { %13353 = vmatpush3.msra.mxu0 %v20725_v40  ;;  %13356 = vmatprep.mubr.f32.mxu0 %v18764_v41  ;;  %v20731_v41 = vld [vmem:[#allocation77_spill] sm:$0xff] }
 0x87b   :  { %13418 = vmatprep.mubr.f32.mxu1 %v8638_v1  ;;  %13497 = vmatpush3.msra.mxu1 %v18462_v45  ;;  %v20728_v45 = vld [vmem:[#allocation81_spill] sm:$0xff]  ;;  %v20740_v1 = vand.u32 4294901760, %v18950_v50 }
 0x87c   :  { %13354 = vmatprep.subr.mxu0 %v20726_v14  ;;  %13498 = vmatprep.subr.mxu1 %v18474_v11 }
 0x87d   :  { %13355 = vmatpush3.msra.mxu0 %v20726_v14  ;;  %13499 = vmatpush3.msra.mxu1 %v18474_v11  ;;  %v20729_v11 = vld [vmem:[#allocation116_spill] sm:$0xff] }
 0x87e   :  { %13357 = vmatmul.mubr.f32.vlgmr.msra.gmra.mxu0 %v18754_v27  ;;  %13419 = vmatmul.mubr.f32.gmra.mxu1 %v8648_v26  ;;  %v20730_v27 = vand.u32 4294901760, %v18871_v12  ;;  %v20738_v26 = vand.u32 4294901760, %v18935_v42 }
 0x87f   :  { %13436 = vmatprep.subr.mxu0 %v20727_v25  ;;  %13500 = vmatprep.subr.mxu1 %v20686_v59 }
 0x880   :  { %13359 = vmatprep.mubr.f32.mxu0 %v18792_v22  ;;  %13421 = vmatprep.mubr.f32.mxu1 %v8658_v44  ;;  %v20733_v22 = vld [vmem:[#allocation54_spill] sm:$0xff]  ;;  %v20744_v44 = vld [vmem:[#allocation49_spill] sm:$0xff] }
 0x881   :  { %13437 = vmatpush3.msra.mxu0 %v20727_v25  ;;  %13501 = vmatpush3.msra.mxu1 %v20686_v59  ;;  %v20739_v59 = vld [vmem:[#allocation17_spill] sm:$0xff] }
 0x882   :  { %13438 = vmatprep.subr.mxu0 %v20728_v45  ;;  %13502 = vmatprep.subr.mxu1 %v20692_v63 }
 0x883   :  { %13439 = vmatpush3.msra.mxu0 %v20728_v45  ;;  %13503 = vmatpush3.msra.mxu1 %v20692_v63  ;;  %v20743_v63 = vld [vmem:[#allocation96_spill] sm:$0xff] }
 0x884   :  { %13360 = vmatmul.mubr.f32.gmra.mxu0 %v18778_v3  ;;  %13422 = vmatmul.mubr.f32.gmra.mxu1 %v8668_v20  ;;  %v20732_v3 = vand.u32 4294901760, %v18887_v56  ;;  %v20746_v20 = vld [vmem:[#allocation100_spill] sm:$0xff] }
 0x885   :  { %13440 = vmatprep.subr.mxu0 %v20729_v11  ;;  %13504 = vmatprep.subr.mxu1 %v20697_v15 }
 0x886   :  { %13362 = vmatprep.mubr.f32.mxu0 %v18825_v9  ;;  %13424 = vmatprep.mubr.f32.mxu1 %v20730_v27  ;;  %v20737_v9 = vld [vmem:[#allocation80_spill] sm:$0xff] }
 0x887   :  { %13441 = vmatpush3.msra.mxu0 %v20729_v11  ;;  %13505 = vmatpush3.msra.mxu1 %v20697_v15  ;;  %v20747_v15 = vld [vmem:[#allocation27_spill] sm:$0xff] }
 0x888   :  { %13442 = vmatprep.subr.mxu0 %v20731_v41  ;;  %13506 = vmatprep.subr.mxu1 %v20700_v47 }
 0x889   :  { %13443 = vmatpush3.msra.mxu0 %v20731_v41  ;;  %13507 = vmatpush3.msra.mxu1 %v20700_v47  ;;  %v20749_v47 = vld [vmem:[#allocation94_spill] sm:$0xff] }
 0x88a   :  { %13363 = vmatmul.mubr.f32.gmra.mxu0 %v18811_v0  ;;  %13425 = vmatmul.mubr.f32.gmra.mxu1 %v20732_v3  ;;  %v20736_v0 = vand.u32 4294901760, %v18922_v28 }
 0x88b   :  { %13444 = vmatprep.subr.mxu0 %v20733_v22  ;;  %13508 = vmatprep.subr.mxu1 %v20707_v2 }
 0x88c   :  { %13365 = vmatprep.mubr.f32.mxu0 %v18843_v35  ;;  %13427 = vmatprep.mubr.f32.mxu1 %v20734_v48  ;;  %v20741_v35 = vld [vmem:[#allocation62_spill] sm:$0xff] }
 0x88d   :  { %13445 = vmatpush3.msra.mxu0 %v20733_v22  ;;  %13509 = vmatpush3.msra.mxu1 %v20707_v2 }
 0x88e   :  { %13446 = vmatprep.subr.mxu0 %v20735_v46  ;;  %13510 = vmatprep.subr.mxu1 %v20710_v8 }
 0x88f   :  { %13447 = vmatpush3.msra.mxu0 %v20735_v46  ;;  %13511 = vmatpush3.msra.mxu1 %v20710_v8 }
 0x890   :  { %13366 = vmatmul.mubr.f32.gmra.mxu0 %v18850_v58  ;;  %13428 = vmatmul.mubr.f32.gmra.mxu1 %v20736_v0  ;;  %v20742_v58 = vand.u32 4294901760, %v18963_v13 }
 0x891   :  { %13448 = vmatprep.subr.mxu0 %v20737_v9  ;;  %13512 = vmatprep.subr.mxu1 %v20712_v39 }
 0x892   :  { %13368 = vmatprep.mubr.f32.mxu0 %v18871_v12  ;;  %13430 = vmatprep.mubr.f32.mxu1 %v20738_v26  ;;  %v20745_v12 = vld [vmem:[#allocation58_spill] sm:$0xff] }
 0x893   :  { %13449 = vmatpush3.msra.mxu0 %v20737_v9  ;;  %13513 = vmatpush3.msra.mxu1 %v20712_v39 }
 0x894   :  { %13450 = vmatprep.subr.mxu0 %v20739_v59  ;;  %13514 = vmatprep.subr.mxu1 %v20714_v5 }
 0x895   :  { %13451 = vmatpush3.msra.mxu0 %v20739_v59  ;;  %13515 = vmatpush3.msra.mxu1 %v20714_v5 }
 0x896   :  { %13369 = vmatmul.mubr.f32.gmra.mxu0 %v18887_v56  ;;  %13431 = vmatmul.mubr.f32.gmra.mxu1 %v20740_v1  ;;  %v20748_v56 = vld [vmem:[#allocation39_spill] sm:$0xff] }
 0x897   :  { %13452 = vmatprep.subr.mxu0 %v20741_v35  ;;  %13516 = vmatprep.subr.mxu1 %v20716_v60 }
 0x898   :  { %13371 = vmatprep.mubr.f32.mxu0 %v18902_v55  ;;  %13433 = vmatprep.mubr.f32.mxu1 %v20742_v58 }
 0x899   :  { %13453 = vmatpush3.msra.mxu0 %v20741_v35  ;;  %13517 = vmatpush3.msra.mxu1 %v20716_v60 }
 0x89a   :  { %13454 = vmatprep.subr.mxu0 %v20743_v63  ;;  %13518 = vmatprep.subr.mxu1 %v20718_v31 }
 0x89b   :  { %13455 = vmatpush3.msra.mxu0 %v20743_v63  ;;  %13519 = vmatpush3.msra.mxu1 %v20718_v31 }
 0x89c   :  { %13372 = vmatmul.mubr.f32.gmra.mxu0 %v18922_v28  ;;  %13434 = vmatmul.mubr.f32.gmra.mxu1 %v8748_v52 }
 0x89d   :  { %13456 = vmatprep.subr.mxu0 %v20744_v44  ;;  %13520 = vmatprep.subr.mxu1 %v20720_v33 }
 0x89e   :  { %13374 = vmatprep.mubr.f32.mxu0 %v18935_v42  ;;  %13457 = vmatpush3.msra.mxu0 %v20744_v44  ;;  %v19247_v44 = vld [vmem:[%s19336_s2] ss:$0 sm:$0xff]  ;;  %s13657_s2 = smov [#allocation7]  }
 0x89f   :  { %13521 = vmatpush3.msra.mxu1 %v20720_v33  ;;  %13524 = vmatprep.mubr.f32.mxu1 %v18756_v38  ;;  %s9822_s24 = sshll.u32 %s13657_s2, 4  ;;  %s9823_s24 = int_to_ptr.vmem [resolvable:$true] %s9822_s24 }
 0x8a0   :  { %13458 = vmatprep.subr.mxu0 %v20745_v12  ;;  %13522 = vmatprep.subr.mxu1 %v20722_v17  ;;  %s13626_s25 = scalar_lea.vmem %s9823_s24, 2048  ;;  %p13631_p11 = scmp.lt.s32.totalorder %s9823_s24, %s9823_s24 }
 0x8a1   :  { %13459 = vmatpush3.msra.mxu0 %v20745_v12  ;;  %13523 = vmatpush3.msra.mxu1 %v20722_v17  ;;  %p13627_p10 = scmp.ne.s32.totalorder %s9823_s24, %s13626_s25  ;;  %p13632_p12 = scmp.lt.s32.totalorder %s13626_s25, %s13626_s25 }
 0x8a2   :  { %13375 = vmatmul.mubr.f32.gmra.mxu0 %v18950_v50  ;;  %13460 = vmatprep.subr.mxu0 %v20746_v20 }
 0x8a3   :  { %13525 = vmatmul.mubr.f32.vlgmr.msra.gmra.mxu1 %v18747_v7  ;;  %13377 = vmatprep.mubr.f32.mxu0 %v18963_v13  ;;  %p13633_p13 = por %p13632_p12, %p13631_p11 }
 0x8a4   :  { %13461 = vmatpush3.msra.mxu0 %v20746_v20  ;;  %13527 = vmatprep.mubr.f32.mxu1 %v18780_v62 }
 0x8a5   :  { %13462 = vmatprep.subr.mxu0 %v20747_v15  ;;  %p13634_p0 = pnand %p13633_p13, %p13627_p10 }
 0x8a6   :  { %13463 = vmatpush3.msra.mxu0 %v20747_v15 }
 0x8a7   :  { %13378 = vmatmul.mubr.f32.gmra.mxu0 %v18976_v54  ;;  %13464 = vmatprep.subr.mxu0 %v20748_v56 }
 0x8a8   :  { %13528 = vmatmul.mubr.f32.gmra.mxu1 %v18766_v18  ;;  %13465 = vmatpush3.msra.mxu0 %v20748_v56 }
 0x8a9   :  { %13468 = vmatprep.mubr.f32.mxu0 %v18756_v38  ;;  %13530 = vmatprep.mubr.f32.mxu1 %v18813_v21 }
 0x8aa   :  { %13466 = vmatprep.subr.mxu0 %v20749_v47 }
 0x8ab   :  { %13467 = vmatpush3.msra.mxu0 %v20749_v47 }
 0x8ac   :  { %13469 = vmatmul.mubr.f32.vlgmr.msra.gmra.mxu0 %v18747_v7  ;;  %13531 = vmatmul.mubr.f32.gmra.mxu1 %v18794_v36 }
 0x8ad   :  { %13471 = vmatprep.mubr.f32.mxu0 %v18780_v62  ;;  %13533 = vmatprep.mubr.f32.mxu1 %v18834_v53 }
 0x8b0   :  { %13472 = vmatmul.mubr.f32.gmra.mxu0 %v18766_v18  ;;  %13534 = vmatmul.mubr.f32.gmra.mxu1 %v18827_v29 }
 0x8b1   :  { %13474 = vmatprep.mubr.f32.mxu0 %v18813_v21  ;;  %13536 = vmatprep.mubr.f32.mxu1 %v18858_v34 }
 0x8b4   :  { %13475 = vmatmul.mubr.f32.gmra.mxu0 %v18794_v36  ;;  %13537 = vmatmul.mubr.f32.gmra.mxu1 %v18865_v61 }
 0x8b5   :  { %13477 = vmatprep.mubr.f32.mxu0 %v18834_v53  ;;  %13539 = vmatprep.mubr.f32.mxu1 %v18883_v10 }
 0x8b8   :  { %13478 = vmatmul.mubr.f32.gmra.mxu0 %v18827_v29  ;;  %13540 = vmatmul.mubr.f32.gmra.mxu1 %v18899_v30 }
 0x8b9   :  { %13480 = vmatprep.mubr.f32.mxu0 %v18858_v34  ;;  %13542 = vmatprep.mubr.f32.mxu1 %v18917_v57 }
 0x8bc   :  { %13481 = vmatmul.mubr.f32.gmra.mxu0 %v18865_v61  ;;  %13543 = vmatmul.mubr.f32.gmra.mxu1 %v18931_v6 }
 0x8bd   :  { %13483 = vmatprep.mubr.f32.mxu0 %v18883_v10  ;;  %13545 = vmatprep.mubr.f32.mxu1 %v18946_v23 }
 0x8c0   :  { %13484 = vmatmul.mubr.f32.gmra.mxu0 %v18899_v30  ;;  %13546 = vmatmul.mubr.f32.gmra.mxu1 %v18959_v51 }
 0x8c1   :  { %13486 = vmatprep.mubr.f32.mxu0 %v18917_v57 }
 0x8c4   :  { %13487 = vmatmul.mubr.f32.gmra.mxu0 %v18931_v6 }
 0x8c5   :  { %13489 = vmatprep.mubr.f32.mxu0 %v18946_v23 }
 0x8c8   :  { %13490 = vmatmul.mubr.f32.gmra.mxu0 %v18959_v51 }
 0x906   :  { %v19154_v7 = vpop.f32.mrf.mxu1 }
 0x908   :  { %v19156_v38 = vpop.f32.mrf.mxu1 }
 0x90a   :  { %v19158_v18 = vpop.f32.mrf.mxu1 }
 0x90c   :  { %v19160_v62 = vpop.f32.mrf.mxu1 }
 0x90e   :  { %v19162_v21 = vpop.f32.mrf.mxu1 }
 0x90f   :  { %v13246_v36 = vpop.f32.mrf.mxu0 }
 0x910   :  { %v19164_v53 = vpop.f32.mrf.mxu1  ;;  %v8613_v15 = vadd.f32 %v13246_v36, %v19247_v44 }
 0x911   :  { %v8602_v29 = vpop.f32.mrf.mxu0 }
 0x912   :  { %v8603_v47 = vadd.f32 %v19247_v44, %v8602_v29 }
 0x914   :  { %v13249_v34 = vpop.f32.mrf.mxu0  ;;  %v19166_v61 = vpop.f32.mrf.mxu1 }
 0x916   :  { %v8622_v10 = vpop.f32.mrf.mxu0  ;;  %v19168_v30 = vpop.f32.mrf.mxu1 }
 0x91a   :  { %v13252_v55 = vpop.f32.mrf.mxu0  ;;  %v19170_v2 = vpop.f32.mrf.mxu1 }
 0x91c   :  { %v19172_v57 = vpop.f32.mrf.mxu0  ;;  %v19174_v28 = vpop.f32.mrf.mxu1 }
 0x920   :  { %v19176_v8 = vpop.f32.mrf.mxu0  ;;  %v19178_v13 = vpop.f32.mrf.mxu1 }
 0x922   :  { %v19180_v6 = vpop.f32.mrf.mxu0  ;;  %v19182_v42 = vpop.f32.mrf.mxu1 }
 0x926   :  { %v19184_v39 = vpop.f32.mrf.mxu0  ;;  %v19186_v23 = vpop.f32.mrf.mxu1 }
 0x928   :  { %v19188_v50 = vpop.f32.mrf.mxu0  ;;  %v19190_v5 = vpop.f32.mrf.mxu1 }
 0x929   :  { %20750 = vst [vmem:[#allocation78_spill] sm:$0xff] %v19190_v5  ;;  %v8904_v5 = vadd.f32 %v19156_v38, %v8603_v47  ;;  %v8673_v38 = vadd.f32 %v19176_v8, %v19247_v44  ;;  %v8693_v8 = vadd.f32 %v19184_v39, %v19247_v44 }
 0x92c   :  { %v19192_v51 = vpop.f32.mrf.mxu0  ;;  %v19194_v17 = vpop.f32.mrf.mxu1 }
 0x92d   :  { %20751 = vst [vmem:[#allocation83_spill] sm:$0xff] %v19194_v17  ;;  %v8623_v17 = vadd.f32 %v19247_v44, %v8622_v10 }
 0x92e   :  { %v19196_v60 = vpop.f32.mrf.mxu0  ;;  %v19198_v54 = vpop.f32.mrf.mxu1 }
 0x92f   :  { %20752 = vst [vmem:[#allocation28_spill] sm:$0xff] %v19198_v54  ;;  %v8910_v54 = vadd.f32 %v19154_v7, %v8613_v15  ;;  %v8916_v10 = vadd.f32 %v19160_v62, %v8623_v17 }
 0x932   :  { %v19200_v31 = vpop.f32.mrf.mxu0 }
 0x933   :  { %v13414_v4 = vpop.f32.mrf.mxu1 }
 0x934   :  { %v19202_v52 = vpop.f32.mrf.mxu0 }
 0x935   :  { %v9291_v33 = vpop.f32.mrf.mxu1 }
 0x938   :  { %v19204_v32 = vpop.f32.mrf.mxu0 }
 0x939   :  { %v19206_v16 = vpop.f32.mrf.mxu1 }
 0x93a   :  { %v19208_v37 = vpop.f32.mrf.mxu0 }
 0x93b   :  { %20753 = vst [vmem:[#allocation90_spill] sm:$0xff] %v19208_v37  ;;  %v19210_v19 = vpop.f32.mrf.mxu1 }
 0x93e   :  { %v13358_v43 = vpop.f32.mrf.mxu0  ;;  %v19212_v24 = vpop.f32.mrf.mxu1 }
 0x940   :  { %v9097_v49 = vpop.f32.mrf.mxu0  ;;  %v19214_v40 = vpop.f32.mrf.mxu1 }
 0x941   :  { %v9098_v37 = vadd.f32 %v9097_v49, %v8904_v5  ;;  %v8663_v49 = vadd.f32 %v19247_v44, %v19180_v6 }
 0x944   :  { %v13361_v14 = vpop.f32.mrf.mxu0  ;;  %v19216_v25 = vpop.f32.mrf.mxu1 }
 0x946   :  { %v9111_v45 = vpop.f32.mrf.mxu0  ;;  %v19218_v11 = vpop.f32.mrf.mxu1 }
 0x94a   :  { %v13364_v27 = vpop.f32.mrf.mxu0  ;;  %v19220_v41 = vpop.f32.mrf.mxu1 }
 0x94c   :  { %v9125_v3 = vpop.f32.mrf.mxu0  ;;  %v19222_v22 = vpop.f32.mrf.mxu1 }
 0x94d   :  { %20754 = vst [vmem:[#allocation29_spill] sm:$0xff] %v19222_v22 }
 0x950   :  { %v19224_v48 = vpop.f32.mrf.mxu0  ;;  %v19226_v46 = vpop.f32.mrf.mxu1 }
 0x951   :  { %20755 = vst [vmem:[#allocation85_spill] sm:$0xff] %v19226_v46  ;;  %v9105_v46 = vadd.f32 %v13358_v43, %v8910_v54 }
 0x952   :  { %v19228_v0 = vpop.f32.mrf.mxu0  ;;  %v19230_v9 = vpop.f32.mrf.mxu1 }
 0x953   :  { %20756 = vst [vmem:[#allocation26_spill] sm:$0xff] %v19230_v9  ;;  %v9300_v54 = vadd.f32 %v13414_v4, %v9105_v46 }
 0x956   :  { %v19232_v26 = vpop.f32.mrf.mxu0  ;;  %v19234_v59 = vpop.f32.mrf.mxu1 }
 0x957   :  { %20757 = vst [vmem:[#allocation66_spill] sm:$0xff] %v19234_v59 }
 0x958   :  { %v19236_v1 = vpop.f32.mrf.mxu0  ;;  %v19238_v35 = vpop.f32.mrf.mxu1 }
 0x959   :  { %20758 = vst [vmem:[#allocation40_spill] sm:$0xff] %v19238_v35 }
 0x95c   :  { %v19240_v58 = vpop.f32.mrf.mxu0  ;;  %v19242_v63 = vpop.f32.mrf.mxu1 }
 0x95d   :  { %20759 = vst [vmem:[#allocation112_spill] sm:$0xff] %v19242_v63  ;;  %v8633_v63 = vadd.f32 %v13249_v34, %v19247_v44  ;;  %v8643_v34 = vadd.f32 %v19247_v44, %v19172_v57 }
 0x95e   :  { %v19249_v12 = vpop.f32.mrf.mxu0  ;;  %v19251_v20 = vpop.f32.mrf.mxu1 }
 0x95f   :  { %20760 = vst [vmem:[#allocation84_spill] sm:$0xff] %v19251_v20  ;;  %v8922_v29 = vadd.f32 %v19158_v18, %v8633_v63  ;;  %v9292_v18 = vadd.f32 %v9291_v33, %v9098_v37  ;;  %v8928_v57 = vadd.f32 %v19164_v53, %v8643_v34 }
 0x961   :  { %v9119_v15 = vadd.f32 %v13361_v14, %v8922_v29  ;;  %v9126_v33 = vadd.f32 %v9125_v3, %v8928_v57  ;;  %v8713_v3 = vadd.f32 %v19192_v51, %v19247_v44 }
 0x962   :  { %v19254_v56 = vpop.f32.mrf.mxu0 }
 0x963   :  { %20761 = vst [vmem:[#allocation117_spill] sm:$0xff] %v19254_v56  ;;  %v13526_v35 = vpop.f32.mrf.mxu1  ;;  %v8653_v56 = vadd.f32 %v13252_v55, %v19247_v44  ;;  %v9316_v4 = vadd.f32 %v19206_v16, %v9119_v15 }
 0x964   :  { %v19257_v59 = vpop.f32.mrf.mxu0 }
 0x965   :  { %v9707_v9 = vpop.f32.mrf.mxu1  ;;  %v8934_v55 = vadd.f32 %v19162_v21, %v8653_v56 }
 0x967   :  { %v19263_v20 = vpop.f32.mrf.mxu0  ;;  %v9133_v29 = vadd.f32 %v13364_v27, %v8934_v55  ;;  %v8683_v27 = vadd.f32 %v19247_v44, %v19188_v50 }
 0x968   :  { %20762 = vst [vmem:[#allocation102_spill] sm:$0xff] %v19263_v20  ;;  %v13529_v36 = vpop.f32.mrf.mxu1  ;;  %v9112_v20 = vadd.f32 %v9111_v45, %v8916_v10  ;;  %v8946_v45 = vadd.f32 %v19166_v61, %v8673_v38 }
 0x969   :  { %v19267_v22 = vpop.f32.mrf.mxu0  ;;  %v9332_v15 = vadd.f32 %v19212_v24, %v9133_v29 }
 0x96a   :  { %v9719_v7 = vpop.f32.mrf.mxu1  ;;  %v9308_v53 = vadd.f32 %v19210_v19, %v9112_v20  ;;  %v9147_v34 = vadd.f32 %v19224_v48, %v8946_v45  ;;  %v8703_v48 = vadd.f32 %v19247_v44, %v19196_v60  ;;  %v20765_v45 = vld [vmem:[#allocation78_spill] sm:$0xff] }
 0x96c   :  { %v13470_v43 = vpop.f32.mrf.mxu0  ;;  %v13532_v47 = vpop.f32.mrf.mxu1  ;;  %v9348_v55 = vadd.f32 %v19216_v25, %v9147_v34 }
 0x96d   :  { %v9537_v5 = vadd.f32 %v13470_v43, %v9300_v54  ;;  %v9324_v54 = vadd.f32 %v19214_v40, %v9126_v33 }
 0x96e   :  { %v9530_v63 = vpop.f32.mrf.mxu0  ;;  %v9731_v14 = vpop.f32.mrf.mxu1 }
 0x96f   :  { %v9714_v62 = vadd.f32 %v13526_v35, %v9537_v5  ;;  %v9531_v17 = vadd.f32 %v9530_v63, %v9292_v18  ;;  %v8940_v35 = vadd.f32 %v19168_v30, %v8663_v49 }
 0x970   :  { %v13473_v21 = vpop.f32.mrf.mxu0  ;;  %v13535_v46 = vpop.f32.mrf.mxu1 }
 0x971   :  { %9802 = vst [vmem:[#allocation7 + $0x8] sm:$0xff] %v9714_v62  ;;  %v9708_v37 = vadd.f32 %v9707_v9, %v9531_v17  ;;  %v9549_v6 = vadd.f32 %v13473_v21, %v9316_v4  ;;  %v8958_v9 = vadd.f32 %v19170_v2, %v8693_v8  ;;  %v9140_v50 = vadd.f32 %v19228_v0, %v8940_v35  ;;  %v20763_v17 = vld [vmem:[#allocation29_spill] sm:$0xff] }
 0x972   :  { %v9542_v56 = vpop.f32.mrf.mxu0  ;;  %v9743_v16 = vpop.f32.mrf.mxu1  ;;  %v8733_v0 = vadd.f32 %v19200_v31, %v19247_v44 }
 0x973   :  { %9801 = vst [vmem:[#allocation7] sm:$0xff] %v9708_v37  ;;  %v9726_v39 = vadd.f32 %v13529_v36, %v9549_v6  ;;  %v9543_v61 = vadd.f32 %v9542_v56, %v9308_v53  ;;  %v8952_v36 = vadd.f32 %v19174_v28, %v8683_v27  ;;  %v9161_v51 = vadd.f32 %v19232_v26, %v8958_v9  ;;  %v20767_v37 = vld [vmem:[#allocation85_spill] sm:$0xff]  ;;  %v20768_v53 = vld [vmem:[#allocation83_spill] sm:$0xff]  ;;  %v20771_v9 = vld [vmem:[#allocation102_spill] sm:$0xff] }
 0x974   :  { %v13476_v19 = vpop.f32.mrf.mxu0  ;;  %v13538_v20 = vpop.f32.mrf.mxu1  ;;  %v9340_v49 = vadd.f32 %v19218_v11, %v9140_v50  ;;  %v8723_v26 = vadd.f32 %v19247_v44, %v19202_v52 }
 0x975   :  { %9804 = vst [vmem:[#allocation7 + $0x18] sm:$0xff] %v9726_v39  ;;  %v9720_v30 = vadd.f32 %v9719_v7, %v9543_v61  ;;  %v9561_v10 = vadd.f32 %v13476_v19, %v9332_v15  ;;  %v8970_v7 = vadd.f32 %v19178_v13, %v8713_v3  ;;  %v9154_v60 = vadd.f32 %v19236_v1, %v8952_v36  ;;  %v20770_v61 = vld [vmem:[#allocation28_spill] sm:$0xff] }
 0x976   :  { %v9554_v24 = vpop.f32.mrf.mxu0  ;;  %v9755_v38 = vpop.f32.mrf.mxu1  ;;  %v9364_v63 = vadd.f32 %v19220_v41, %v9161_v51  ;;  %v8753_v1 = vadd.f32 %v19204_v32, %v19247_v44  ;;  %v8976_v21 = vadd.f32 %v20765_v45, %v8723_v26 }
 0x977   :  { %9803 = vst [vmem:[#allocation7 + $0x10] sm:$0xff] %v9720_v30  ;;  %v9738_v2 = vadd.f32 %v13532_v47, %v9561_v10  ;;  %v9555_v43 = vadd.f32 %v9554_v24, %v9324_v54  ;;  %v8964_v47 = vadd.f32 %v19182_v42, %v8703_v48  ;;  %v9175_v57 = vadd.f32 %v19240_v58, %v8970_v7  ;;  %v20764_v58 = vld [vmem:[#allocation90_spill] sm:$0xff] }
 0x978   :  { %v13479_v40 = vpop.f32.mrf.mxu0  ;;  %v13541_v5 = vpop.f32.mrf.mxu1  ;;  %v9356_v4 = vadd.f32 %v20763_v17, %v9154_v60  ;;  %v8743_v8 = vadd.f32 %v19247_v44, %v20764_v58  ;;  %v9182_v56 = vadd.f32 %v19257_v59, %v8976_v21  ;;  %v20769_v44 = vld [vmem:[#allocation26_spill] sm:$0xff] }
 0x979   :  { %9806 = vst [vmem:[#allocation7 + $0x28] sm:$0xff] %v9738_v2  ;;  %v9732_v28 = vadd.f32 %v9731_v14, %v9555_v43  ;;  %v9573_v18 = vadd.f32 %v13479_v40, %v9348_v55  ;;  %v8982_v14 = vadd.f32 %v19186_v23, %v8733_v0  ;;  %v9168_v62 = vadd.f32 %v19249_v12, %v8964_v47  ;;  %v20772_v30 = vld [vmem:[#allocation66_spill] sm:$0xff]  ;;  %v20774_v0 = vld [vmem:[#allocation112_spill] sm:$0xff] }
 0x97a   :  { %v9566_v25 = vpop.f32.mrf.mxu0  ;;  %v9767_v29 = vpop.f32.mrf.mxu1  ;;  %v9380_v6 = vadd.f32 %v20767_v37, %v9175_v57  ;;  %v8994_v12 = vadd.f32 %v20768_v53, %v8753_v1  ;;  %v8988_v15 = vadd.f32 %v20770_v61, %v8743_v8 }
 0x97b   :  { %9805 = vst [vmem:[#allocation7 + $0x20] sm:$0xff] %v9732_v28  ;;  %v9750_v31 = vadd.f32 %v13535_v46, %v9573_v18  ;;  %v9567_v13 = vadd.f32 %v9566_v25, %v9340_v49  ;;  %v20766_v46 = vld [vmem:[#allocation117_spill] sm:$0xff]  ;;  %v9372_v39 = vadd.f32 %v20769_v44, %v9168_v62  ;;  %v20775_v18 = vld [vmem:[#allocation84_spill] sm:$0xff] }
 0x97c   :  { %v13482_v11 = vpop.f32.mrf.mxu0  ;;  %v9189_v33 = vadd.f32 %v20766_v46, %v8982_v14  ;;  %v13544_v27 = vpop.f32.mrf.mxu1  ;;  %v9203_v19 = vadd.f32 %v20771_v9, %v8994_v12  ;;  %v9196_v36 = vadd.f32 %v19267_v22, %v8988_v15 }
 0x97d   :  { %9808 = vst [vmem:[#allocation7 + $0x38] sm:$0xff] %v9750_v31  ;;  %v9744_v52 = vadd.f32 %v9743_v16, %v9567_v13  ;;  %v9585_v42 = vadd.f32 %v13482_v11, %v9364_v63 }
 0x97e   :  { %v9578_v41 = vpop.f32.mrf.mxu0  ;;  %v9396_v10 = vadd.f32 %v20772_v30, %v9189_v33  ;;  %v9779_v54 = vpop.f32.mrf.mxu1  ;;  %v9412_v7 = vadd.f32 %v20774_v0, %v9203_v19  ;;  %v9404_v49 = vadd.f32 %v20775_v18, %v9196_v36 }
 0x97f   :  { %9807 = vst [vmem:[#allocation7 + $0x30] sm:$0xff] %v9744_v52  ;;  %v9762_v32 = vadd.f32 %v13538_v20, %v9585_v42  ;;  %v9579_v23 = vadd.f32 %v9578_v41, %v9356_v4 }
 0x980   :  { %v13485_v35 = vpop.f32.mrf.mxu0  ;;  %v13547_v40 = vpop.f32.mrf.mxu1 }
 0x981   :  { %9810 = vst [vmem:[#allocation7 + $0x48] sm:$0xff] %v9762_v32  ;;  %v9756_v16 = vadd.f32 %v9755_v38, %v9579_v23  ;;  %v9597_v34 = vadd.f32 %v13485_v35, %v9380_v6  ;;  %v20773_v38 = vld [vmem:[#allocation40_spill] sm:$0xff] }
 0x982   :  { %v9590_v3 = vpop.f32.mrf.mxu0  ;;  %v9388_v51 = vadd.f32 %v20773_v38, %v9182_v56  ;;  %v9791_v25 = vpop.f32.mrf.mxu1 }
 0x983   :  { %9809 = vst [vmem:[#allocation7 + $0x40] sm:$0xff] %v9756_v16  ;;  %v9774_v20 = vadd.f32 %v13541_v5, %v9597_v34  ;;  %v9591_v50 = vadd.f32 %v9590_v3, %v9372_v39 }
 0x984   :  { %v13488_v48 = vpop.f32.mrf.mxu0 }
 0x985   :  { %9812 = vst [vmem:[#allocation7 + $0x58] sm:$0xff] %v9774_v20  ;;  %v9768_v59 = vadd.f32 %v9767_v29, %v9591_v50  ;;  %v9609_v24 = vadd.f32 %v13488_v48, %v9396_v10 }
 0x986   :  { %v9602_v2 = vpop.f32.mrf.mxu0 }
 0x987   :  { %9811 = vst [vmem:[#allocation7 + $0x50] sm:$0xff] %v9768_v59  ;;  %v9786_v43 = vadd.f32 %v13544_v27, %v9609_v24  ;;  %v9603_v55 = vadd.f32 %v9602_v2, %v9388_v51 }
 0x988   :  { %v13491_v5 = vpop.f32.mrf.mxu0 }
 0x989   :  { %9814 = vst [vmem:[#allocation7 + $0x68] sm:$0xff] %v9786_v43  ;;  %v9780_v60 = vadd.f32 %v9779_v54, %v9603_v55  ;;  %v9621_v28 = vadd.f32 %v13491_v5, %v9412_v7 }
 0x98a   :  { %v9614_v26 = vpop.f32.mrf.mxu0 }
 0x98b   :  { %9813 = vst [vmem:[#allocation7 + $0x60] sm:$0xff] %v9780_v60  ;;  %v9798_v22 = vadd.f32 %v13547_v40, %v9621_v28  ;;  %v9615_v47 = vadd.f32 %v9614_v26, %v9404_v49 }
 0x98d   :  { %9816 = vst [vmem:[#allocation7 + $0x78] sm:$0xff] %v9798_v22  ;;  %v9792_v57 = vadd.f32 %v9791_v25, %v9615_v47 }
 0x98f   :  { %9815 = vst [vmem:[#allocation7 + $0x70] sm:$0xff] %v9792_v57 }
 0x990   :  { %13637 = shalt.err (!%p13634_p0)
}
 0x991   :  { %9828 = dma.vmem_to_hbm [thread:$0]  %s9823_s24, 2048, %s19337_s3, [#allocation4], %s13653_s15, %s13653_s15, %s13654_s16  }
 0x992   :  { %13650 = dma.done.wait [#allocation4], 2048  }
 0x993   :  { %13651 = vsyncadd [#allocation4], 4294965248 }
 0x994   :  { %9832 = vsyncpa [#allocation3], 1 }
 0x995   :  { %9833 = vsyncpa [#allocation6], 1 }
 0x996   :  { %9834 = vsyncpa [#allocation4], 1 }

</bundles_post_ra>
